<compile_context>
chip_gen: v7x
topology: tpu7x:2x2x1
jax: 0.10.0
libtpu: 0.0.40
codegen_flags: <defaults>
</compile_context>

<pallas_src>
import jax
import jax.numpy as jnp
from jax.experimental import pallas as pl
from jax.experimental.pallas import tpu as pltpu

LANES = 128
VMEM_LIMIT = 48 * 1024 * 1024   # well under v7x's 64 MiB physical VMEM


def _round_up(n, m):
    return ((n + m - 1) // m) * m


def _choose_batch_tile(B):
    """Images per grid step (NB) and padded batch.  NB is a multiple of 8 (so
    every block's second-minor dim is 8-aligned) or equals the whole batch."""
    if B < 16:
        return B, B
    nb = min(64, _round_up((B + 1) // 2, 8))   # >=2 grid steps for megacore
    return nb, _round_up(B, nb)


# ----------------------------- Pallas kernels ------------------------------


def _make_conv_pool_kernel(k, rh):
    """Fused Conv(k x k, 'same') + bias + ReLU + MaxPool(2,2), one batch tile.

    xe_ref, xo_ref : [NB*Hp2, Wp*C] bf16 -- even / odd padded input rows
    w_ref          : [2k, Wp*C, OW*OC] bf16 -- banded weights, index dw*k+kh
    b_ref          : [1, OW*OC] f32
    o_ref          : [NB*Hp2, OW*OC] bf16 -- first `rh` rows written; per image
                     rows i < OH are the valid pooled rows.
    """

    def kernel(xe_ref, xo_ref, w_ref, b_ref, o_ref):
        x_refs = (xe_ref, xo_ref)
        res = None
        for dh in (0, 1):                 # row parity of the 2x2 pool window
            for dw in (0, 1):             # col parity (baked into the weights)
                acc = None
                for kh in range(k):
                    m = dh + kh           # padded-row shift = 2*(m//2)+(m%2)
                    lhs = x_refs[m % 2][pl.ds(m // 2, rh), :]
                    part = jnp.dot(lhs, w_ref[dw * k + kh],
                                   preferred_element_type=jnp.float32)
                    acc = part if acc is None else acc + part
                res = acc if res is None else jnp.maximum(res, acc)
        res = jnp.maximum(res + b_ref[...], 0.0)        # bias + ReLU epilogue
        o_ref[pl.ds(0, rh), :] = res.astype(o_ref.dtype)

    return kernel


def _fc_fused_kernel(x_ref, w1_ref, b1_ref, w2_ref, b2_ref, o_ref):
    # fc1 -> ReLU -> fc2; hidden activation never leaves VMEM/vregs.
    h = jnp.dot(x_ref[...], w1_ref[...], preferred_element_type=jnp.float32)
    h = jnp.maximum(h + b1_ref[...], 0.0).astype(w2_ref.dtype)
    o = jnp.dot(h, w2_ref[...], preferred_element_type=jnp.float32)
    o_ref[...] = o + b2_ref[...]


# ------------------------------ stage wrappers ------------------------------


def _split_rows_even_odd(xp):
    """[B, Hp, Wp, C] (Hp even) -> two [B*Hp//2, Wp*C] planes (even/odd rows)."""
    B, Hp, Wp, C = xp.shape
    xe = xp[:, 0::2].reshape(B * (Hp // 2), Wp * C)
    xo = xp[:, 1::2].reshape(B * (Hp // 2), Wp * C)
    return xe, xo


def _repad_for_next(out, B, Hp2, OH, OW, OC, pad, extra_bottom=0):
    """Pooled kernel output [B*Hp2, OW*OC] -> next stage's padded NHWC input."""
    y = out.reshape(B, Hp2, OW, OC)[:, :OH]
    return jnp.pad(y, ((0, 0), (pad, pad + extra_bottom), (pad, pad), (0, 0)))


def conv_pool_stage(xe, xo, wb, bias, *, NB, Hp2, k):
    """One fused conv+ReLU+pool stage over all batch tiles."""
    rows, wpc = xe.shape
    owoc = wb.shape[-1]
    nbh2 = NB * Hp2
    assert rows % nbh2 == 0
    grid = rows // nbh2
    rh = nbh2 - k // 2                     # rows actually computed per tile
    kernel = _make_conv_pool_kernel(k, rh)
    return pl.pallas_call(
        kernel,
        out_shape=jax.ShapeDtypeStruct((rows, owoc), jnp.bfloat16),
        grid=(grid,),
        in_specs=[
            pl.BlockSpec((nbh2, wpc), lambda i: (i, 0)),
            pl.BlockSpec((nbh2, wpc), lambda i: (i, 0)),
            pl.BlockSpec(wb.shape, lambda i: (0, 0, 0)),
            pl.BlockSpec((1, owoc), lambda i: (0, 0)),
        ],
        out_specs=pl.BlockSpec((nbh2, owoc), lambda i: (i, 0)),
        compiler_params=pltpu.CompilerParams(
            dimension_semantics=("parallel",),
            vmem_limit_bytes=VMEM_LIMIT),
    )(xe, xo, wb, bias)


def fc_head(x, w1, b1, w2, b2, num_classes):
    """relu(x @ w1 + b1) @ w2 + b2, fused in one kernel. x: [B, 576] bf16."""
    B, D = x.shape
    TB = min(256, _round_up(B, 16))
    Bp = _round_up(B, TB)
    if Bp != B:
        x = jnp.pad(x, ((0, Bp - B), (0, 0)))
    out = pl.pallas_call(
        _fc_fused_kernel,
        out_shape=jax.ShapeDtypeStruct((Bp, LANES), jnp.float32),
        grid=(Bp // TB,),
        in_specs=[
            pl.BlockSpec((TB, D), lambda i: (i, 0)),
            pl.BlockSpec((D, LANES), lambda i: (0, 0)),
            pl.BlockSpec((1, LANES), lambda i: (0, 0)),
            pl.BlockSpec((LANES, LANES), lambda i: (0, 0)),
            pl.BlockSpec((1, LANES), lambda i: (0, 0)),
        ],
        out_specs=pl.BlockSpec((TB, LANES), lambda i: (i, 0)),
        compiler_params=pltpu.CompilerParams(
            dimension_semantics=("parallel",),
            vmem_limit_bytes=VMEM_LIMIT),
    )(x, w1, b1, w2, b2)
    return out[:, :num_classes]


# ------------------------------- parameters ---------------------------------


def init_params(num_classes, key):
    """Deterministic parameter init (PyTorch shapes)."""
    ks = jax.random.split(key, 10)

    def uni(k, shape, fan_in):
        bound = 1.0 / jnp.sqrt(fan_in)
        return jax.random.uniform(k, shape, jnp.float32, -bound, bound)

    return {
        "conv1_w": uni(ks[0], (32, 1, 5, 5), 1 * 5 * 5),
        "conv1_b": uni(ks[1], (32,), 1 * 5 * 5),
        "conv2_w": uni(ks[2], (64, 32, 3, 3), 32 * 3 * 3),
        "conv2_b": uni(ks[3], (64,), 32 * 3 * 3),
        "conv3_w": uni(ks[4], (64, 64, 3, 3), 64 * 3 * 3),
        "conv3_b": uni(ks[5], (64,), 64 * 3 * 3),
        "fc1_w": uni(ks[6], (128, 64 * 3 * 3), 64 * 3 * 3),
        "fc1_b": uni(ks[7], (128,), 64 * 3 * 3),
        "fc2_w": uni(ks[8], (num_classes, 128), 128),
        "fc2_b": uni(ks[9], (num_classes,), 128),
    }


def _band_weights(w, b, Wp, OW):
    """Build the banded (Toeplitz) weight banks and the lane-tiled bias.

    w: [OC, C, k, k], b: [OC].
    Returns wb [2k, Wp*C, OW*OC] bf16 (index dw*k + kh) and bias [1, OW*OC] f32
    where wb[dw*k+kh][(2j+dw+kw)*C + c, j*OC + oc] = w[oc, c, kh, kw].
    """
    OC, C, k, _ = w.shape
    wt = jnp.transpose(w, (2, 3, 1, 0))                  # [kh, kw, C, OC]
    jj = jnp.arange(OW)
    ww = jnp.arange(Wp)
    kk = jnp.arange(k)
    banks = []
    for dw in (0, 1):
        sel = (ww[None, :, None] ==
               (2 * jj[None, None, :] + dw + kk[:, None, None]))
        sel = sel.astype(jnp.float32)                    # [kw, Wp, OW]
        wb = jnp.einsum("xwj,kxco->kwcjo", sel, wt)      # [kh, Wp, C, OW, OC]
        banks.append(wb.reshape(k, Wp * C, OW * OC))
    wb_all = jnp.concatenate(banks, axis=0).astype(jnp.bfloat16)
    bias = jnp.tile(b, OW).reshape(1, OW * OC).astype(jnp.float32)
    return wb_all, bias


def prepare_params(params):
    """One-time weight prep: banded conv weights, permuted/padded FC weights."""
    c1w, c1b = _band_weights(params["conv1_w"], params["conv1_b"], Wp=32, OW=14)
    c2w, c2b = _band_weights(params["conv2_w"], params["conv2_b"], Wp=16, OW=7)
    c3w, c3b = _band_weights(params["conv3_w"], params["conv3_b"], Wp=9, OW=3)

    # fc1: torch flattens in (c, h, w) order; our features are (h, w, c).
    w1t = params["fc1_w"].T                               # [576(chw), 128]
    w1t = w1t.reshape(64, 3, 3, 128).transpose(1, 2, 0, 3).reshape(576, 128)
    f1w = w1t.astype(jnp.bfloat16)
    f1b = params["fc1_b"].reshape(1, LANES).astype(jnp.float32)

    nc = params["fc2_w"].shape[0]
    assert nc <= LANES
    f2w = jnp.pad(params["fc2_w"].T, ((0, 0), (0, LANES - nc)))
    f2w = f2w.astype(jnp.bfloat16)
    f2b = jnp.pad(params["fc2_b"], (0, LANES - nc)).reshape(1, LANES)
    f2b = f2b.astype(jnp.float32)

    return {"c1w": c1w, "c1b": c1b, "c2w": c2w, "c2b": c2b,
            "c3w": c3w, "c3b": c3b,
            "f1w": f1w, "f1b": f1b, "f2w": f2w, "f2b": f2b}


# ------------------------------- the forward ---------------------------------


def classifier_cnn3_forward(prep, x, *, num_classes):
    # x: [B, 1, 28, 28] NCHW (28x28 so the flatten yields 64*3*3 = 576).
    B = x.shape[0]
    NB, B_pad = _choose_batch_tile(B)

    # bf16 BEFORE any glue; C=1 so NCHW -> NHWC is a free reshape.
    a = x.astype(jnp.bfloat16).reshape(B, 28, 28, 1)
    if B_pad != B:
        a = jnp.pad(a, ((0, B_pad - B), (0, 0), (0, 0), (0, 0)))

    # conv1: 28x28x1 -> 14x14x32   (k=5, pad=2 -> Hp=32, Wp=32)
    xp = jnp.pad(a, ((0, 0), (2, 2), (2, 2), (0, 0)))
    xe, xo = _split_rows_even_odd(xp)
    o1 = conv_pool_stage(xe, xo, prep["c1w"], prep["c1b"], NB=NB, Hp2=16, k=5)

    # conv2: 14x14x32 -> 7x7x64    (k=3, pad=1 -> Hp=16, Wp=16)
    xp = _repad_for_next(o1, B_pad, 16, 14, 14, 32, pad=1)
    xe, xo = _split_rows_even_odd(xp)
    o2 = conv_pool_stage(xe, xo, prep["c2w"], prep["c2b"], NB=NB, Hp2=8, k=3)

    # conv3: 7x7x64 -> 3x3x64      (k=3, pad=1, +1 extra bottom row -> Hp=10)
    xp = _repad_for_next(o2, B_pad, 8, 7, 7, 64, pad=1, extra_bottom=1)
    xe, xo = _split_rows_even_odd(xp)
    o3 = conv_pool_stage(xe, xo, prep["c3w"], prep["c3b"], NB=NB, Hp2=5, k=3)

    # flatten in (h, w, c) order; fc1 weights were pre-permuted to match.
    feat = o3.reshape(B_pad, 5, 3, 64)[:, :3].reshape(B_pad, 3 * 3 * 64)
    logits = fc_head(feat, prep["f1w"], prep["f1b"], prep["f2w"], prep["f2b"],
                     num_classes)
    return logits[:B]


if __name__ == "__main__":
    num_classes = 10
    key = jax.random.PRNGKey(0)
    k_param, k_x = jax.random.split(key)
    params = init_params(num_classes, k_param)
    prep = prepare_params(params)
    x = jax.random.normal(k_x, (2, 1, 28, 28), dtype=jnp.float32)

    fwd = jax.jit(classifier_cnn3_forward, static_argnames="num_classes")
    out = fwd(prep, x, num_classes=num_classes)
    out = jax.block_until_ready(out)
    assert out.shape == (2, num_classes), out.shape
    assert out.dtype == jnp.float32
    print("KERNEL_OK")
</pallas_src>

<mosaic_0001>
module attributes {stable_mosaic.version = 11 : i64} {
  func.func @kernel(%arg0: i32, %arg1: memref<32x32xbf16, #tpu.memory_space<vmem>>, %arg2: memref<32x32xbf16, #tpu.memory_space<vmem>>, %arg3: memref<10x32x448xbf16, #tpu.memory_space<vmem>>, %arg4: memref<1x448xf32, #tpu.memory_space<vmem>>, %arg5: memref<32x448xbf16, #tpu.memory_space<vmem>>) attributes {dimension_semantics = [#tpu.dimension_semantics<parallel>], iteration_bounds = array<i64: 1>, scalar_prefetch = 0 : i64, scratch_operands = 0 : i64, tpu.core_type = #tpu.core_type<tc>, window_params = [{transform_indices = @transform_0, window_bounds = array<i64: 32, 32>}, {transform_indices = @transform_1, window_bounds = array<i64: 32, 32>}, {pipeline_mode = #tpu.pipeline_mode<synchronous>, transform_indices = @transform_2, window_bounds = array<i64: 10, 32, 448>}, {pipeline_mode = #tpu.pipeline_mode<synchronous>, transform_indices = @transform_3, window_bounds = array<i64: 1, 448>}, {transform_indices = @transform_4, window_bounds = array<i64: 32, 448>}]} {
    %c0 = arith.constant 0 : index
    %c0_0 = arith.constant 0 : index
    %0 = vector.load %arg1[%c0, %c0_0] : memref<32x32xbf16, #tpu.memory_space<vmem>>, vector<30x32xbf16>
    %c0_1 = arith.constant 0 : index
    %c0_2 = arith.constant 0 : index
    %c0_3 = arith.constant 0 : index
    %1 = vector.load %arg3[%c0_1, %c0_2, %c0_3] : memref<10x32x448xbf16, #tpu.memory_space<vmem>>, vector<1x32x448xbf16>
    %2 = vector.shape_cast %1 : vector<1x32x448xbf16> to vector<32x448xbf16>
    %cst = arith.constant dense<0.000000e+00> : vector<30x448xf32>
    %3 = tpu.matmul %0, %2, %cst {dimension_numbers = #tpu.dot_dimension_numbers<[1], [0], [0], [1], [0, 0, 1, 1], [], []>} : vector<30x32xbf16>, vector<32x448xbf16>, vector<30x448xf32> -> vector<30x448xf32>
    %c0_4 = arith.constant 0 : index
    %c0_5 = arith.constant 0 : index
    %4 = vector.load %arg2[%c0_4, %c0_5] : memref<32x32xbf16, #tpu.memory_space<vmem>>, vector<30x32xbf16>
    %c1 = arith.constant 1 : index
    %c0_6 = arith.constant 0 : index
    %c0_7 = arith.constant 0 : index
    %5 = vector.load %arg3[%c1, %c0_6, %c0_7] : memref<10x32x448xbf16, #tpu.memory_space<vmem>>, vector<1x32x448xbf16>
    %6 = vector.shape_cast %5 : vector<1x32x448xbf16> to vector<32x448xbf16>
    %cst_8 = arith.constant dense<0.000000e+00> : vector<30x448xf32>
    %7 = tpu.matmul %4, %6, %cst_8 {dimension_numbers = #tpu.dot_dimension_numbers<[1], [0], [0], [1], [0, 0, 1, 1], [], []>} : vector<30x32xbf16>, vector<32x448xbf16>, vector<30x448xf32> -> vector<30x448xf32>
    %8 = arith.addf %3, %7 : vector<30x448xf32>
    %c1_9 = arith.constant 1 : index
    %c0_10 = arith.constant 0 : index
    %9 = vector.load %arg1[%c1_9, %c0_10] : memref<32x32xbf16, #tpu.memory_space<vmem>>, vector<30x32xbf16>
    %c2 = arith.constant 2 : index
    %c0_11 = arith.constant 0 : index
    %c0_12 = arith.constant 0 : index
    %10 = vector.load %arg3[%c2, %c0_11, %c0_12] : memref<10x32x448xbf16, #tpu.memory_space<vmem>>, vector<1x32x448xbf16>
    %11 = vector.shape_cast %10 : vector<1x32x448xbf16> to vector<32x448xbf16>
    %cst_13 = arith.constant dense<0.000000e+00> : vector<30x448xf32>
    %12 = tpu.matmul %9, %11, %cst_13 {dimension_numbers = #tpu.dot_dimension_numbers<[1], [0], [0], [1], [0, 0, 1, 1], [], []>} : vector<30x32xbf16>, vector<32x448xbf16>, vector<30x448xf32> -> vector<30x448xf32>
    %13 = arith.addf %8, %12 : vector<30x448xf32>
    %c1_14 = arith.constant 1 : index
    %c0_15 = arith.constant 0 : index
    %14 = vector.load %arg2[%c1_14, %c0_15] : memref<32x32xbf16, #tpu.memory_space<vmem>>, vector<30x32xbf16>
    %c3 = arith.constant 3 : index
    %c0_16 = arith.constant 0 : index
    %c0_17 = arith.constant 0 : index
    %15 = vector.load %arg3[%c3, %c0_16, %c0_17] : memref<10x32x448xbf16, #tpu.memory_space<vmem>>, vector<1x32x448xbf16>
    %16 = vector.shape_cast %15 : vector<1x32x448xbf16> to vector<32x448xbf16>
    %cst_18 = arith.constant dense<0.000000e+00> : vector<30x448xf32>
    %17 = tpu.matmul %14, %16, %cst_18 {dimension_numbers = #tpu.dot_dimension_numbers<[1], [0], [0], [1], [0, 0, 1, 1], [], []>} : vector<30x32xbf16>, vector<32x448xbf16>, vector<30x448xf32> -> vector<30x448xf32>
    %18 = arith.addf %13, %17 : vector<30x448xf32>
    %c2_19 = arith.constant 2 : index
    %c0_20 = arith.constant 0 : index
    %19 = vector.load %arg1[%c2_19, %c0_20] : memref<32x32xbf16, #tpu.memory_space<vmem>>, vector<30x32xbf16>
    %c4 = arith.constant 4 : index
    %c0_21 = arith.constant 0 : index
    %c0_22 = arith.constant 0 : index
    %20 = vector.load %arg3[%c4, %c0_21, %c0_22] : memref<10x32x448xbf16, #tpu.memory_space<vmem>>, vector<1x32x448xbf16>
    %21 = vector.shape_cast %20 : vector<1x32x448xbf16> to vector<32x448xbf16>
    %cst_23 = arith.constant dense<0.000000e+00> : vector<30x448xf32>
    %22 = tpu.matmul %19, %21, %cst_23 {dimension_numbers = #tpu.dot_dimension_numbers<[1], [0], [0], [1], [0, 0, 1, 1], [], []>} : vector<30x32xbf16>, vector<32x448xbf16>, vector<30x448xf32> -> vector<30x448xf32>
    %23 = arith.addf %18, %22 : vector<30x448xf32>
    %c0_24 = arith.constant 0 : index
    %c0_25 = arith.constant 0 : index
    %24 = vector.load %arg1[%c0_24, %c0_25] : memref<32x32xbf16, #tpu.memory_space<vmem>>, vector<30x32xbf16>
    %c5 = arith.constant 5 : index
    %c0_26 = arith.constant 0 : index
    %c0_27 = arith.constant 0 : index
    %25 = vector.load %arg3[%c5, %c0_26, %c0_27] : memref<10x32x448xbf16, #tpu.memory_space<vmem>>, vector<1x32x448xbf16>
    %26 = vector.shape_cast %25 : vector<1x32x448xbf16> to vector<32x448xbf16>
    %cst_28 = arith.constant dense<0.000000e+00> : vector<30x448xf32>
    %27 = tpu.matmul %24, %26, %cst_28 {dimension_numbers = #tpu.dot_dimension_numbers<[1], [0], [0], [1], [0, 0, 1, 1], [], []>} : vector<30x32xbf16>, vector<32x448xbf16>, vector<30x448xf32> -> vector<30x448xf32>
    %c0_29 = arith.constant 0 : index
    %c0_30 = arith.constant 0 : index
    %28 = vector.load %arg2[%c0_29, %c0_30] : memref<32x32xbf16, #tpu.memory_space<vmem>>, vector<30x32xbf16>
    %c6 = arith.constant 6 : index
    %c0_31 = arith.constant 0 : index
    %c0_32 = arith.constant 0 : index
    %29 = vector.load %arg3[%c6, %c0_31, %c0_32] : memref<10x32x448xbf16, #tpu.memory_space<vmem>>, vector<1x32x448xbf16>
    %30 = vector.shape_cast %29 : vector<1x32x448xbf16> to vector<32x448xbf16>
    %cst_33 = arith.constant dense<0.000000e+00> : vector<30x448xf32>
    %31 = tpu.matmul %28, %30, %cst_33 {dimension_numbers = #tpu.dot_dimension_numbers<[1], [0], [0], [1], [0, 0, 1, 1], [], []>} : vector<30x32xbf16>, vector<32x448xbf16>, vector<30x448xf32> -> vector<30x448xf32>
    %32 = arith.addf %27, %31 : vector<30x448xf32>
    %c1_34 = arith.constant 1 : index
    %c0_35 = arith.constant 0 : index
    %33 = vector.load %arg1[%c1_34, %c0_35] : memref<32x32xbf16, #tpu.memory_space<vmem>>, vector<30x32xbf16>
    %c7 = arith.constant 7 : index
    %c0_36 = arith.constant 0 : index
    %c0_37 = arith.constant 0 : index
    %34 = vector.load %arg3[%c7, %c0_36, %c0_37] : memref<10x32x448xbf16, #tpu.memory_space<vmem>>, vector<1x32x448xbf16>
    %35 = vector.shape_cast %34 : vector<1x32x448xbf16> to vector<32x448xbf16>
    %cst_38 = arith.constant dense<0.000000e+00> : vector<30x448xf32>
    %36 = tpu.matmul %33, %35, %cst_38 {dimension_numbers = #tpu.dot_dimension_numbers<[1], [0], [0], [1], [0, 0, 1, 1], [], []>} : vector<30x32xbf16>, vector<32x448xbf16>, vector<30x448xf32> -> vector<30x448xf32>
    %37 = arith.addf %32, %36 : vector<30x448xf32>
    %c1_39 = arith.constant 1 : index
    %c0_40 = arith.constant 0 : index
    %38 = vector.load %arg2[%c1_39, %c0_40] : memref<32x32xbf16, #tpu.memory_space<vmem>>, vector<30x32xbf16>
    %c8 = arith.constant 8 : index
    %c0_41 = arith.constant 0 : index
    %c0_42 = arith.constant 0 : index
    %39 = vector.load %arg3[%c8, %c0_41, %c0_42] : memref<10x32x448xbf16, #tpu.memory_space<vmem>>, vector<1x32x448xbf16>
    %40 = vector.shape_cast %39 : vector<1x32x448xbf16> to vector<32x448xbf16>
    %cst_43 = arith.constant dense<0.000000e+00> : vector<30x448xf32>
    %41 = tpu.matmul %38, %40, %cst_43 {dimension_numbers = #tpu.dot_dimension_numbers<[1], [0], [0], [1], [0, 0, 1, 1], [], []>} : vector<30x32xbf16>, vector<32x448xbf16>, vector<30x448xf32> -> vector<30x448xf32>
    %42 = arith.addf %37, %41 : vector<30x448xf32>
    %c2_44 = arith.constant 2 : index
    %c0_45 = arith.constant 0 : index
    %43 = vector.load %arg1[%c2_44, %c0_45] : memref<32x32xbf16, #tpu.memory_space<vmem>>, vector<30x32xbf16>
    %c9 = arith.constant 9 : index
    %c0_46 = arith.constant 0 : index
    %c0_47 = arith.constant 0 : index
    %44 = vector.load %arg3[%c9, %c0_46, %c0_47] : memref<10x32x448xbf16, #tpu.memory_space<vmem>>, vector<1x32x448xbf16>
    %45 = vector.shape_cast %44 : vector<1x32x448xbf16> to vector<32x448xbf16>
    %cst_48 = arith.constant dense<0.000000e+00> : vector<30x448xf32>
    %46 = tpu.matmul %43, %45, %cst_48 {dimension_numbers = #tpu.dot_dimension_numbers<[1], [0], [0], [1], [0, 0, 1, 1], [], []>} : vector<30x32xbf16>, vector<32x448xbf16>, vector<30x448xf32> -> vector<30x448xf32>
    %47 = arith.addf %42, %46 : vector<30x448xf32>
    %48 = arith.maximumf %23, %47 : vector<30x448xf32>
    %c0_49 = arith.constant 0 : index
    %c0_50 = arith.constant 0 : index
    %49 = vector.load %arg2[%c0_49, %c0_50] : memref<32x32xbf16, #tpu.memory_space<vmem>>, vector<30x32xbf16>
    %c0_51 = arith.constant 0 : index
    %c0_52 = arith.constant 0 : index
    %c0_53 = arith.constant 0 : index
    %50 = vector.load %arg3[%c0_51, %c0_52, %c0_53] : memref<10x32x448xbf16, #tpu.memory_space<vmem>>, vector<1x32x448xbf16>
    %51 = vector.shape_cast %50 : vector<1x32x448xbf16> to vector<32x448xbf16>
    %cst_54 = arith.constant dense<0.000000e+00> : vector<30x448xf32>
    %52 = tpu.matmul %49, %51, %cst_54 {dimension_numbers = #tpu.dot_dimension_numbers<[1], [0], [0], [1], [0, 0, 1, 1], [], []>} : vector<30x32xbf16>, vector<32x448xbf16>, vector<30x448xf32> -> vector<30x448xf32>
    %c1_55 = arith.constant 1 : index
    %c0_56 = arith.constant 0 : index
    %53 = vector.load %arg1[%c1_55, %c0_56] : memref<32x32xbf16, #tpu.memory_space<vmem>>, vector<30x32xbf16>
    %c1_57 = arith.constant 1 : index
    %c0_58 = arith.constant 0 : index
    %c0_59 = arith.constant 0 : index
    %54 = vector.load %arg3[%c1_57, %c0_58, %c0_59] : memref<10x32x448xbf16, #tpu.memory_space<vmem>>, vector<1x32x448xbf16>
    %55 = vector.shape_cast %54 : vector<1x32x448xbf16> to vector<32x448xbf16>
    %cst_60 = arith.constant dense<0.000000e+00> : vector<30x448xf32>
    %56 = tpu.matmul %53, %55, %cst_60 {dimension_numbers = #tpu.dot_dimension_numbers<[1], [0], [0], [1], [0, 0, 1, 1], [], []>} : vector<30x32xbf16>, vector<32x448xbf16>, vector<30x448xf32> -> vector<30x448xf32>
    %57 = arith.addf %52, %56 : vector<30x448xf32>
    %c1_61 = arith.constant 1 : index
    %c0_62 = arith.constant 0 : index
    %58 = vector.load %arg2[%c1_61, %c0_62] : memref<32x32xbf16, #tpu.memory_space<vmem>>, vector<30x32xbf16>
    %c2_63 = arith.constant 2 : index
    %c0_64 = arith.constant 0 : index
    %c0_65 = arith.constant 0 : index
    %59 = vector.load %arg3[%c2_63, %c0_64, %c0_65] : memref<10x32x448xbf16, #tpu.memory_space<vmem>>, vector<1x32x448xbf16>
    %60 = vector.shape_cast %59 : vector<1x32x448xbf16> to vector<32x448xbf16>
    %cst_66 = arith.constant dense<0.000000e+00> : vector<30x448xf32>
    %61 = tpu.matmul %58, %60, %cst_66 {dimension_numbers = #tpu.dot_dimension_numbers<[1], [0], [0], [1], [0, 0, 1, 1], [], []>} : vector<30x32xbf16>, vector<32x448xbf16>, vector<30x448xf32> -> vector<30x448xf32>
    %62 = arith.addf %57, %61 : vector<30x448xf32>
    %c2_67 = arith.constant 2 : index
    %c0_68 = arith.constant 0 : index
    %63 = vector.load %arg1[%c2_67, %c0_68] : memref<32x32xbf16, #tpu.memory_space<vmem>>, vector<30x32xbf16>
    %c3_69 = arith.constant 3 : index
    %c0_70 = arith.constant 0 : index
    %c0_71 = arith.constant 0 : index
    %64 = vector.load %arg3[%c3_69, %c0_70, %c0_71] : memref<10x32x448xbf16, #tpu.memory_space<vmem>>, vector<1x32x448xbf16>
    %65 = vector.shape_cast %64 : vector<1x32x448xbf16> to vector<32x448xbf16>
    %cst_72 = arith.constant dense<0.000000e+00> : vector<30x448xf32>
    %66 = tpu.matmul %63, %65, %cst_72 {dimension_numbers = #tpu.dot_dimension_numbers<[1], [0], [0], [1], [0, 0, 1, 1], [], []>} : vector<30x32xbf16>, vector<32x448xbf16>, vector<30x448xf32> -> vector<30x448xf32>
    %67 = arith.addf %62, %66 : vector<30x448xf32>
    %c2_73 = arith.constant 2 : index
    %c0_74 = arith.constant 0 : index
    %68 = vector.load %arg2[%c2_73, %c0_74] : memref<32x32xbf16, #tpu.memory_space<vmem>>, vector<30x32xbf16>
    %c4_75 = arith.constant 4 : index
    %c0_76 = arith.constant 0 : index
    %c0_77 = arith.constant 0 : index
    %69 = vector.load %arg3[%c4_75, %c0_76, %c0_77] : memref<10x32x448xbf16, #tpu.memory_space<vmem>>, vector<1x32x448xbf16>
    %70 = vector.shape_cast %69 : vector<1x32x448xbf16> to vector<32x448xbf16>
    %cst_78 = arith.constant dense<0.000000e+00> : vector<30x448xf32>
    %71 = tpu.matmul %68, %70, %cst_78 {dimension_numbers = #tpu.dot_dimension_numbers<[1], [0], [0], [1], [0, 0, 1, 1], [], []>} : vector<30x32xbf16>, vector<32x448xbf16>, vector<30x448xf32> -> vector<30x448xf32>
    %72 = arith.addf %67, %71 : vector<30x448xf32>
    %73 = arith.maximumf %48, %72 : vector<30x448xf32>
    %c0_79 = arith.constant 0 : index
    %c0_80 = arith.constant 0 : index
    %74 = vector.load %arg2[%c0_79, %c0_80] : memref<32x32xbf16, #tpu.memory_space<vmem>>, vector<30x32xbf16>
    %c5_81 = arith.constant 5 : index
    %c0_82 = arith.constant 0 : index
    %c0_83 = arith.constant 0 : index
    %75 = vector.load %arg3[%c5_81, %c0_82, %c0_83] : memref<10x32x448xbf16, #tpu.memory_space<vmem>>, vector<1x32x448xbf16>
    %76 = vector.shape_cast %75 : vector<1x32x448xbf16> to vector<32x448xbf16>
    %cst_84 = arith.constant dense<0.000000e+00> : vector<30x448xf32>
    %77 = tpu.matmul %74, %76, %cst_84 {dimension_numbers = #tpu.dot_dimension_numbers<[1], [0], [0], [1], [0, 0, 1, 1], [], []>} : vector<30x32xbf16>, vector<32x448xbf16>, vector<30x448xf32> -> vector<30x448xf32>
    %c1_85 = arith.constant 1 : index
    %c0_86 = arith.constant 0 : index
    %78 = vector.load %arg1[%c1_85, %c0_86] : memref<32x32xbf16, #tpu.memory_space<vmem>>, vector<30x32xbf16>
    %c6_87 = arith.constant 6 : index
    %c0_88 = arith.constant 0 : index
    %c0_89 = arith.constant 0 : index
    %79 = vector.load %arg3[%c6_87, %c0_88, %c0_89] : memref<10x32x448xbf16, #tpu.memory_space<vmem>>, vector<1x32x448xbf16>
    %80 = vector.shape_cast %79 : vector<1x32x448xbf16> to vector<32x448xbf16>
    %cst_90 = arith.constant dense<0.000000e+00> : vector<30x448xf32>
    %81 = tpu.matmul %78, %80, %cst_90 {dimension_numbers = #tpu.dot_dimension_numbers<[1], [0], [0], [1], [0, 0, 1, 1], [], []>} : vector<30x32xbf16>, vector<32x448xbf16>, vector<30x448xf32> -> vector<30x448xf32>
    %82 = arith.addf %77, %81 : vector<30x448xf32>
    %c1_91 = arith.constant 1 : index
    %c0_92 = arith.constant 0 : index
    %83 = vector.load %arg2[%c1_91, %c0_92] : memref<32x32xbf16, #tpu.memory_space<vmem>>, vector<30x32xbf16>
    %c7_93 = arith.constant 7 : index
    %c0_94 = arith.constant 0 : index
    %c0_95 = arith.constant 0 : index
    %84 = vector.load %arg3[%c7_93, %c0_94, %c0_95] : memref<10x32x448xbf16, #tpu.memory_space<vmem>>, vector<1x32x448xbf16>
    %85 = vector.shape_cast %84 : vector<1x32x448xbf16> to vector<32x448xbf16>
    %cst_96 = arith.constant dense<0.000000e+00> : vector<30x448xf32>
    %86 = tpu.matmul %83, %85, %cst_96 {dimension_numbers = #tpu.dot_dimension_numbers<[1], [0], [0], [1], [0, 0, 1, 1], [], []>} : vector<30x32xbf16>, vector<32x448xbf16>, vector<30x448xf32> -> vector<30x448xf32>
    %87 = arith.addf %82, %86 : vector<30x448xf32>
    %c2_97 = arith.constant 2 : index
    %c0_98 = arith.constant 0 : index
    %88 = vector.load %arg1[%c2_97, %c0_98] : memref<32x32xbf16, #tpu.memory_space<vmem>>, vector<30x32xbf16>
    %c8_99 = arith.constant 8 : index
    %c0_100 = arith.constant 0 : index
    %c0_101 = arith.constant 0 : index
    %89 = vector.load %arg3[%c8_99, %c0_100, %c0_101] : memref<10x32x448xbf16, #tpu.memory_space<vmem>>, vector<1x32x448xbf16>
    %90 = vector.shape_cast %89 : vector<1x32x448xbf16> to vector<32x448xbf16>
    %cst_102 = arith.constant dense<0.000000e+00> : vector<30x448xf32>
    %91 = tpu.matmul %88, %90, %cst_102 {dimension_numbers = #tpu.dot_dimension_numbers<[1], [0], [0], [1], [0, 0, 1, 1], [], []>} : vector<30x32xbf16>, vector<32x448xbf16>, vector<30x448xf32> -> vector<30x448xf32>
    %92 = arith.addf %87, %91 : vector<30x448xf32>
    %c2_103 = arith.constant 2 : index
    %c0_104 = arith.constant 0 : index
    %93 = vector.load %arg2[%c2_103, %c0_104] : memref<32x32xbf16, #tpu.memory_space<vmem>>, vector<30x32xbf16>
    %c9_105 = arith.constant 9 : index
    %c0_106 = arith.constant 0 : index
    %c0_107 = arith.constant 0 : index
    %94 = vector.load %arg3[%c9_105, %c0_106, %c0_107] : memref<10x32x448xbf16, #tpu.memory_space<vmem>>, vector<1x32x448xbf16>
    %95 = vector.shape_cast %94 : vector<1x32x448xbf16> to vector<32x448xbf16>
    %cst_108 = arith.constant dense<0.000000e+00> : vector<30x448xf32>
    %96 = tpu.matmul %93, %95, %cst_108 {dimension_numbers = #tpu.dot_dimension_numbers<[1], [0], [0], [1], [0, 0, 1, 1], [], []>} : vector<30x32xbf16>, vector<32x448xbf16>, vector<30x448xf32> -> vector<30x448xf32>
    %97 = arith.addf %92, %96 : vector<30x448xf32>
    %98 = arith.maximumf %73, %97 : vector<30x448xf32>
    %c0_109 = arith.constant 0 : index
    %c0_110 = arith.constant 0 : index
    %99 = vector.load %arg4[%c0_109, %c0_110] : memref<1x448xf32, #tpu.memory_space<vmem>>, vector<1x448xf32>
    %100 = vector.broadcast %99 : vector<1x448xf32> to vector<30x448xf32>
    %101 = arith.addf %98, %100 : vector<30x448xf32>
    %cst_111 = arith.constant 0.000000e+00 : f32
    %102 = vector.broadcast %cst_111 : f32 to vector<30x448xf32>
    %103 = arith.maximumf %101, %102 : vector<30x448xf32>
    %104 = arith.truncf %103 : vector<30x448xf32> to vector<30x448xbf16>
    %c0_112 = arith.constant 0 : index
    %c0_113 = arith.constant 0 : index
    %105 = vector.load %arg5[%c0_112, %c0_113] : memref<32x448xbf16, #tpu.memory_space<vmem>>, vector<30x448xbf16>
    tpu.vector_store %arg5[%c0_112, %c0_113], %104 {strides = array<i32>} : memref<32x448xbf16, #tpu.memory_space<vmem>>, vector<30x448xbf16>,
    return
  }
  func.func @transform_0(%arg0: i32) -> (i32, i32) {
    %c0_i32 = arith.constant 0 : i32
    %c0_i32_0 = arith.constant 0 : i32
    return %arg0, %c0_i32 : i32, i32
  }
  func.func @transform_1(%arg0: i32) -> (i32, i32) {
    %c0_i32 = arith.constant 0 : i32
    %c0_i32_0 = arith.constant 0 : i32
    return %arg0, %c0_i32 : i32, i32
  }
  func.func @transform_2(%arg0: i32) -> (i32, i32, i32) {
    %c0_i32 = arith.constant 0 : i32
    %c0_i32_0 = arith.constant 0 : i32
    %c0_i32_1 = arith.constant 0 : i32
    %c0_i32_2 = arith.constant 0 : i32
    return %c0_i32, %c0_i32_0, %c0_i32_1 : i32, i32, i32
  }
  func.func @transform_3(%arg0: i32) -> (i32, i32) {
    %c0_i32 = arith.constant 0 : i32
    %c0_i32_0 = arith.constant 0 : i32
    %c0_i32_1 = arith.constant 0 : i32
    return %c0_i32, %c0_i32_0 : i32, i32
  }
  func.func @transform_4(%arg0: i32) -> (i32, i32) {
    %c0_i32 = arith.constant 0 : i32
    %c0_i32_0 = arith.constant 0 : i32
    return %arg0, %c0_i32 : i32, i32
  }
}

module attributes {stable_mosaic.version = 11 : i64} {
  func.func @kernel(%arg0: i32, %arg1: memref<16x512xbf16, #tpu.memory_space<vmem>>, %arg2: memref<16x512xbf16, #tpu.memory_space<vmem>>, %arg3: memref<6x512x448xbf16, #tpu.memory_space<vmem>>, %arg4: memref<1x448xf32, #tpu.memory_space<vmem>>, %arg5: memref<16x448xbf16, #tpu.memory_space<vmem>>) attributes {dimension_semantics = [#tpu.dimension_semantics<parallel>], iteration_bounds = array<i64: 1>, scalar_prefetch = 0 : i64, scratch_operands = 0 : i64, tpu.core_type = #tpu.core_type<tc>, window_params = [{transform_indices = @transform_0, window_bounds = array<i64: 16, 512>}, {transform_indices = @transform_1, window_bounds = array<i64: 16, 512>}, {pipeline_mode = #tpu.pipeline_mode<synchronous>, transform_indices = @transform_2, window_bounds = array<i64: 6, 512, 448>}, {pipeline_mode = #tpu.pipeline_mode<synchronous>, transform_indices = @transform_3, window_bounds = array<i64: 1, 448>}, {transform_indices = @transform_4, window_bounds = array<i64: 16, 448>}]} {
    %c0 = arith.constant 0 : index
    %c0_0 = arith.constant 0 : index
    %0 = vector.load %arg1[%c0, %c0_0] : memref<16x512xbf16, #tpu.memory_space<vmem>>, vector<15x512xbf16>
    %c0_1 = arith.constant 0 : index
    %c0_2 = arith.constant 0 : index
    %c0_3 = arith.constant 0 : index
    %1 = vector.load %arg3[%c0_1, %c0_2, %c0_3] : memref<6x512x448xbf16, #tpu.memory_space<vmem>>, vector<1x512x448xbf16>
    %2 = vector.shape_cast %1 : vector<1x512x448xbf16> to vector<512x448xbf16>
    %cst = arith.constant dense<0.000000e+00> : vector<15x448xf32>
    %3 = tpu.matmul %0, %2, %cst {dimension_numbers = #tpu.dot_dimension_numbers<[1], [0], [0], [1], [0, 0, 1, 1], [], []>} : vector<15x512xbf16>, vector<512x448xbf16>, vector<15x448xf32> -> vector<15x448xf32>
    %c0_4 = arith.constant 0 : index
    %c0_5 = arith.constant 0 : index
    %4 = vector.load %arg2[%c0_4, %c0_5] : memref<16x512xbf16, #tpu.memory_space<vmem>>, vector<15x512xbf16>
    %c1 = arith.constant 1 : index
    %c0_6 = arith.constant 0 : index
    %c0_7 = arith.constant 0 : index
    %5 = vector.load %arg3[%c1, %c0_6, %c0_7] : memref<6x512x448xbf16, #tpu.memory_space<vmem>>, vector<1x512x448xbf16>
    %6 = vector.shape_cast %5 : vector<1x512x448xbf16> to vector<512x448xbf16>
    %cst_8 = arith.constant dense<0.000000e+00> : vector<15x448xf32>
    %7 = tpu.matmul %4, %6, %cst_8 {dimension_numbers = #tpu.dot_dimension_numbers<[1], [0], [0], [1], [0, 0, 1, 1], [], []>} : vector<15x512xbf16>, vector<512x448xbf16>, vector<15x448xf32> -> vector<15x448xf32>
    %8 = arith.addf %3, %7 : vector<15x448xf32>
    %c1_9 = arith.constant 1 : index
    %c0_10 = arith.constant 0 : index
    %9 = vector.load %arg1[%c1_9, %c0_10] : memref<16x512xbf16, #tpu.memory_space<vmem>>, vector<15x512xbf16>
    %c2 = arith.constant 2 : index
    %c0_11 = arith.constant 0 : index
    %c0_12 = arith.constant 0 : index
    %10 = vector.load %arg3[%c2, %c0_11, %c0_12] : memref<6x512x448xbf16, #tpu.memory_space<vmem>>, vector<1x512x448xbf16>
    %11 = vector.shape_cast %10 : vector<1x512x448xbf16> to vector<512x448xbf16>
    %cst_13 = arith.constant dense<0.000000e+00> : vector<15x448xf32>
    %12 = tpu.matmul %9, %11, %cst_13 {dimension_numbers = #tpu.dot_dimension_numbers<[1], [0], [0], [1], [0, 0, 1, 1], [], []>} : vector<15x512xbf16>, vector<512x448xbf16>, vector<15x448xf32> -> vector<15x448xf32>
    %13 = arith.addf %8, %12 : vector<15x448xf32>
    %c0_14 = arith.constant 0 : index
    %c0_15 = arith.constant 0 : index
    %14 = vector.load %arg1[%c0_14, %c0_15] : memref<16x512xbf16, #tpu.memory_space<vmem>>, vector<15x512xbf16>
    %c3 = arith.constant 3 : index
    %c0_16 = arith.constant 0 : index
    %c0_17 = arith.constant 0 : index
    %15 = vector.load %arg3[%c3, %c0_16, %c0_17] : memref<6x512x448xbf16, #tpu.memory_space<vmem>>, vector<1x512x448xbf16>
    %16 = vector.shape_cast %15 : vector<1x512x448xbf16> to vector<512x448xbf16>
    %cst_18 = arith.constant dense<0.000000e+00> : vector<15x448xf32>
    %17 = tpu.matmul %14, %16, %cst_18 {dimension_numbers = #tpu.dot_dimension_numbers<[1], [0], [0], [1], [0, 0, 1, 1], [], []>} : vector<15x512xbf16>, vector<512x448xbf16>, vector<15x448xf32> -> vector<15x448xf32>
    %c0_19 = arith.constant 0 : index
    %c0_20 = arith.constant 0 : index
    %18 = vector.load %arg2[%c0_19, %c0_20] : memref<16x512xbf16, #tpu.memory_space<vmem>>, vector<15x512xbf16>
    %c4 = arith.constant 4 : index
    %c0_21 = arith.constant 0 : index
    %c0_22 = arith.constant 0 : index
    %19 = vector.load %arg3[%c4, %c0_21, %c0_22] : memref<6x512x448xbf16, #tpu.memory_space<vmem>>, vector<1x512x448xbf16>
    %20 = vector.shape_cast %19 : vector<1x512x448xbf16> to vector<512x448xbf16>
    %cst_23 = arith.constant dense<0.000000e+00> : vector<15x448xf32>
    %21 = tpu.matmul %18, %20, %cst_23 {dimension_numbers = #tpu.dot_dimension_numbers<[1], [0], [0], [1], [0, 0, 1, 1], [], []>} : vector<15x512xbf16>, vector<512x448xbf16>, vector<15x448xf32> -> vector<15x448xf32>
    %22 = arith.addf %17, %21 : vector<15x448xf32>
    %c1_24 = arith.constant 1 : index
    %c0_25 = arith.constant 0 : index
    %23 = vector.load %arg1[%c1_24, %c0_25] : memref<16x512xbf16, #tpu.memory_space<vmem>>, vector<15x512xbf16>
    %c5 = arith.constant 5 : index
    %c0_26 = arith.constant 0 : index
    %c0_27 = arith.constant 0 : index
    %24 = vector.load %arg3[%c5, %c0_26, %c0_27] : memref<6x512x448xbf16, #tpu.memory_space<vmem>>, vector<1x512x448xbf16>
    %25 = vector.shape_cast %24 : vector<1x512x448xbf16> to vector<512x448xbf16>
    %cst_28 = arith.constant dense<0.000000e+00> : vector<15x448xf32>
    %26 = tpu.matmul %23, %25, %cst_28 {dimension_numbers = #tpu.dot_dimension_numbers<[1], [0], [0], [1], [0, 0, 1, 1], [], []>} : vector<15x512xbf16>, vector<512x448xbf16>, vector<15x448xf32> -> vector<15x448xf32>
    %27 = arith.addf %22, %26 : vector<15x448xf32>
    %28 = arith.maximumf %13, %27 : vector<15x448xf32>
    %c0_29 = arith.constant 0 : index
    %c0_30 = arith.constant 0 : index
    %29 = vector.load %arg2[%c0_29, %c0_30] : memref<16x512xbf16, #tpu.memory_space<vmem>>, vector<15x512xbf16>
    %c0_31 = arith.constant 0 : index
    %c0_32 = arith.constant 0 : index
    %c0_33 = arith.constant 0 : index
    %30 = vector.load %arg3[%c0_31, %c0_32, %c0_33] : memref<6x512x448xbf16, #tpu.memory_space<vmem>>, vector<1x512x448xbf16>
    %31 = vector.shape_cast %30 : vector<1x512x448xbf16> to vector<512x448xbf16>
    %cst_34 = arith.constant dense<0.000000e+00> : vector<15x448xf32>
    %32 = tpu.matmul %29, %31, %cst_34 {dimension_numbers = #tpu.dot_dimension_numbers<[1], [0], [0], [1], [0, 0, 1, 1], [], []>} : vector<15x512xbf16>, vector<512x448xbf16>, vector<15x448xf32> -> vector<15x448xf32>
    %c1_35 = arith.constant 1 : index
    %c0_36 = arith.constant 0 : index
    %33 = vector.load %arg1[%c1_35, %c0_36] : memref<16x512xbf16, #tpu.memory_space<vmem>>, vector<15x512xbf16>
    %c1_37 = arith.constant 1 : index
    %c0_38 = arith.constant 0 : index
    %c0_39 = arith.constant 0 : index
    %34 = vector.load %arg3[%c1_37, %c0_38, %c0_39] : memref<6x512x448xbf16, #tpu.memory_space<vmem>>, vector<1x512x448xbf16>
    %35 = vector.shape_cast %34 : vector<1x512x448xbf16> to vector<512x448xbf16>
    %cst_40 = arith.constant dense<0.000000e+00> : vector<15x448xf32>
    %36 = tpu.matmul %33, %35, %cst_40 {dimension_numbers = #tpu.dot_dimension_numbers<[1], [0], [0], [1], [0, 0, 1, 1], [], []>} : vector<15x512xbf16>, vector<512x448xbf16>, vector<15x448xf32> -> vector<15x448xf32>
    %37 = arith.addf %32, %36 : vector<15x448xf32>
    %c1_41 = arith.constant 1 : index
    %c0_42 = arith.constant 0 : index
    %38 = vector.load %arg2[%c1_41, %c0_42] : memref<16x512xbf16, #tpu.memory_space<vmem>>, vector<15x512xbf16>
    %c2_43 = arith.constant 2 : index
    %c0_44 = arith.constant 0 : index
    %c0_45 = arith.constant 0 : index
    %39 = vector.load %arg3[%c2_43, %c0_44, %c0_45] : memref<6x512x448xbf16, #tpu.memory_space<vmem>>, vector<1x512x448xbf16>
    %40 = vector.shape_cast %39 : vector<1x512x448xbf16> to vector<512x448xbf16>
    %cst_46 = arith.constant dense<0.000000e+00> : vector<15x448xf32>
    %41 = tpu.matmul %38, %40, %cst_46 {dimension_numbers = #tpu.dot_dimension_numbers<[1], [0], [0], [1], [0, 0, 1, 1], [], []>} : vector<15x512xbf16>, vector<512x448xbf16>, vector<15x448xf32> -> vector<15x448xf32>
    %42 = arith.addf %37, %41 : vector<15x448xf32>
    %43 = arith.maximumf %28, %42 : vector<15x448xf32>
    %c0_47 = arith.constant 0 : index
    %c0_48 = arith.constant 0 : index
    %44 = vector.load %arg2[%c0_47, %c0_48] : memref<16x512xbf16, #tpu.memory_space<vmem>>, vector<15x512xbf16>
    %c3_49 = arith.constant 3 : index
    %c0_50 = arith.constant 0 : index
    %c0_51 = arith.constant 0 : index
    %45 = vector.load %arg3[%c3_49, %c0_50, %c0_51] : memref<6x512x448xbf16, #tpu.memory_space<vmem>>, vector<1x512x448xbf16>
    %46 = vector.shape_cast %45 : vector<1x512x448xbf16> to vector<512x448xbf16>
    %cst_52 = arith.constant dense<0.000000e+00> : vector<15x448xf32>
    %47 = tpu.matmul %44, %46, %cst_52 {dimension_numbers = #tpu.dot_dimension_numbers<[1], [0], [0], [1], [0, 0, 1, 1], [], []>} : vector<15x512xbf16>, vector<512x448xbf16>, vector<15x448xf32> -> vector<15x448xf32>
    %c1_53 = arith.constant 1 : index
    %c0_54 = arith.constant 0 : index
    %48 = vector.load %arg1[%c1_53, %c0_54] : memref<16x512xbf16, #tpu.memory_space<vmem>>, vector<15x512xbf16>
    %c4_55 = arith.constant 4 : index
    %c0_56 = arith.constant 0 : index
    %c0_57 = arith.constant 0 : index
    %49 = vector.load %arg3[%c4_55, %c0_56, %c0_57] : memref<6x512x448xbf16, #tpu.memory_space<vmem>>, vector<1x512x448xbf16>
    %50 = vector.shape_cast %49 : vector<1x512x448xbf16> to vector<512x448xbf16>
    %cst_58 = arith.constant dense<0.000000e+00> : vector<15x448xf32>
    %51 = tpu.matmul %48, %50, %cst_58 {dimension_numbers = #tpu.dot_dimension_numbers<[1], [0], [0], [1], [0, 0, 1, 1], [], []>} : vector<15x512xbf16>, vector<512x448xbf16>, vector<15x448xf32> -> vector<15x448xf32>
    %52 = arith.addf %47, %51 : vector<15x448xf32>
    %c1_59 = arith.constant 1 : index
    %c0_60 = arith.constant 0 : index
    %53 = vector.load %arg2[%c1_59, %c0_60] : memref<16x512xbf16, #tpu.memory_space<vmem>>, vector<15x512xbf16>
    %c5_61 = arith.constant 5 : index
    %c0_62 = arith.constant 0 : index
    %c0_63 = arith.constant 0 : index
    %54 = vector.load %arg3[%c5_61, %c0_62, %c0_63] : memref<6x512x448xbf16, #tpu.memory_space<vmem>>, vector<1x512x448xbf16>
    %55 = vector.shape_cast %54 : vector<1x512x448xbf16> to vector<512x448xbf16>
    %cst_64 = arith.constant dense<0.000000e+00> : vector<15x448xf32>
    %56 = tpu.matmul %53, %55, %cst_64 {dimension_numbers = #tpu.dot_dimension_numbers<[1], [0], [0], [1], [0, 0, 1, 1], [], []>} : vector<15x512xbf16>, vector<512x448xbf16>, vector<15x448xf32> -> vector<15x448xf32>
    %57 = arith.addf %52, %56 : vector<15x448xf32>
    %58 = arith.maximumf %43, %57 : vector<15x448xf32>
    %c0_65 = arith.constant 0 : index
    %c0_66 = arith.constant 0 : index
    %59 = vector.load %arg4[%c0_65, %c0_66] : memref<1x448xf32, #tpu.memory_space<vmem>>, vector<1x448xf32>
    %60 = vector.broadcast %59 : vector<1x448xf32> to vector<15x448xf32>
    %61 = arith.addf %58, %60 : vector<15x448xf32>
    %cst_67 = arith.constant 0.000000e+00 : f32
    %62 = vector.broadcast %cst_67 : f32 to vector<15x448xf32>
    %63 = arith.maximumf %61, %62 : vector<15x448xf32>
    %64 = arith.truncf %63 : vector<15x448xf32> to vector<15x448xbf16>
    %c0_68 = arith.constant 0 : index
    %c0_69 = arith.constant 0 : index
    %65 = vector.load %arg5[%c0_68, %c0_69] : memref<16x448xbf16, #tpu.memory_space<vmem>>, vector<15x448xbf16>
    tpu.vector_store %arg5[%c0_68, %c0_69], %64 {strides = array<i32>} : memref<16x448xbf16, #tpu.memory_space<vmem>>, vector<15x448xbf16>,
    return
  }
  func.func @transform_0(%arg0: i32) -> (i32, i32) {
    %c0_i32 = arith.constant 0 : i32
    %c0_i32_0 = arith.constant 0 : i32
    return %arg0, %c0_i32 : i32, i32
  }
  func.func @transform_1(%arg0: i32) -> (i32, i32) {
    %c0_i32 = arith.constant 0 : i32
    %c0_i32_0 = arith.constant 0 : i32
    return %arg0, %c0_i32 : i32, i32
  }
  func.func @transform_2(%arg0: i32) -> (i32, i32, i32) {
    %c0_i32 = arith.constant 0 : i32
    %c0_i32_0 = arith.constant 0 : i32
    %c0_i32_1 = arith.constant 0 : i32
    %c0_i32_2 = arith.constant 0 : i32
    return %c0_i32, %c0_i32_0, %c0_i32_1 : i32, i32, i32
  }
  func.func @transform_3(%arg0: i32) -> (i32, i32) {
    %c0_i32 = arith.constant 0 : i32
    %c0_i32_0 = arith.constant 0 : i32
    %c0_i32_1 = arith.constant 0 : i32
    return %c0_i32, %c0_i32_0 : i32, i32
  }
  func.func @transform_4(%arg0: i32) -> (i32, i32) {
    %c0_i32 = arith.constant 0 : i32
    %c0_i32_0 = arith.constant 0 : i32
    return %arg0, %c0_i32 : i32, i32
  }
}

module attributes {stable_mosaic.version = 11 : i64} {
  func.func @kernel(%arg0: i32, %arg1: memref<10x576xbf16, #tpu.memory_space<vmem>>, %arg2: memref<10x576xbf16, #tpu.memory_space<vmem>>, %arg3: memref<6x576x192xbf16, #tpu.memory_space<vmem>>, %arg4: memref<1x192xf32, #tpu.memory_space<vmem>>, %arg5: memref<10x192xbf16, #tpu.memory_space<vmem>>) attributes {dimension_semantics = [#tpu.dimension_semantics<parallel>], iteration_bounds = array<i64: 1>, scalar_prefetch = 0 : i64, scratch_operands = 0 : i64, tpu.core_type = #tpu.core_type<tc>, window_params = [{transform_indices = @transform_0, window_bounds = array<i64: 10, 576>}, {transform_indices = @transform_1, window_bounds = array<i64: 10, 576>}, {pipeline_mode = #tpu.pipeline_mode<synchronous>, transform_indices = @transform_2, window_bounds = array<i64: 6, 576, 192>}, {pipeline_mode = #tpu.pipeline_mode<synchronous>, transform_indices = @transform_3, window_bounds = array<i64: 1, 192>}, {transform_indices = @transform_4, window_bounds = array<i64: 10, 192>}]} {
    %c0 = arith.constant 0 : index
    %c0_0 = arith.constant 0 : index
    %0 = vector.load %arg1[%c0, %c0_0] : memref<10x576xbf16, #tpu.memory_space<vmem>>, vector<9x576xbf16>
    %c0_1 = arith.constant 0 : index
    %c0_2 = arith.constant 0 : index
    %c0_3 = arith.constant 0 : index
    %1 = vector.load %arg3[%c0_1, %c0_2, %c0_3] : memref<6x576x192xbf16, #tpu.memory_space<vmem>>, vector<1x576x192xbf16>
    %2 = vector.shape_cast %1 : vector<1x576x192xbf16> to vector<576x192xbf16>
    %cst = arith.constant dense<0.000000e+00> : vector<9x192xf32>
    %3 = tpu.matmul %0, %2, %cst {dimension_numbers = #tpu.dot_dimension_numbers<[1], [0], [0], [1], [0, 0, 1, 1], [], []>} : vector<9x576xbf16>, vector<576x192xbf16>, vector<9x192xf32> -> vector<9x192xf32>
    %c0_4 = arith.constant 0 : index
    %c0_5 = arith.constant 0 : index
    %4 = vector.load %arg2[%c0_4, %c0_5] : memref<10x576xbf16, #tpu.memory_space<vmem>>, vector<9x576xbf16>
    %c1 = arith.constant 1 : index
    %c0_6 = arith.constant 0 : index
    %c0_7 = arith.constant 0 : index
    %5 = vector.load %arg3[%c1, %c0_6, %c0_7] : memref<6x576x192xbf16, #tpu.memory_space<vmem>>, vector<1x576x192xbf16>
    %6 = vector.shape_cast %5 : vector<1x576x192xbf16> to vector<576x192xbf16>
    %cst_8 = arith.constant dense<0.000000e+00> : vector<9x192xf32>
    %7 = tpu.matmul %4, %6, %cst_8 {dimension_numbers = #tpu.dot_dimension_numbers<[1], [0], [0], [1], [0, 0, 1, 1], [], []>} : vector<9x576xbf16>, vector<576x192xbf16>, vector<9x192xf32> -> vector<9x192xf32>
    %8 = arith.addf %3, %7 : vector<9x192xf32>
    %c1_9 = arith.constant 1 : index
    %c0_10 = arith.constant 0 : index
    %9 = vector.load %arg1[%c1_9, %c0_10] : memref<10x576xbf16, #tpu.memory_space<vmem>>, vector<9x576xbf16>
    %c2 = arith.constant 2 : index
    %c0_11 = arith.constant 0 : index
    %c0_12 = arith.constant 0 : index
    %10 = vector.load %arg3[%c2, %c0_11, %c0_12] : memref<6x576x192xbf16, #tpu.memory_space<vmem>>, vector<1x576x192xbf16>
    %11 = vector.shape_cast %10 : vector<1x576x192xbf16> to vector<576x192xbf16>
    %cst_13 = arith.constant dense<0.000000e+00> : vector<9x192xf32>
    %12 = tpu.matmul %9, %11, %cst_13 {dimension_numbers = #tpu.dot_dimension_numbers<[1], [0], [0], [1], [0, 0, 1, 1], [], []>} : vector<9x576xbf16>, vector<576x192xbf16>, vector<9x192xf32> -> vector<9x192xf32>
    %13 = arith.addf %8, %12 : vector<9x192xf32>
    %c0_14 = arith.constant 0 : index
    %c0_15 = arith.constant 0 : index
    %14 = vector.load %arg1[%c0_14, %c0_15] : memref<10x576xbf16, #tpu.memory_space<vmem>>, vector<9x576xbf16>
    %c3 = arith.constant 3 : index
    %c0_16 = arith.constant 0 : index
    %c0_17 = arith.constant 0 : index
    %15 = vector.load %arg3[%c3, %c0_16, %c0_17] : memref<6x576x192xbf16, #tpu.memory_space<vmem>>, vector<1x576x192xbf16>
    %16 = vector.shape_cast %15 : vector<1x576x192xbf16> to vector<576x192xbf16>
    %cst_18 = arith.constant dense<0.000000e+00> : vector<9x192xf32>
    %17 = tpu.matmul %14, %16, %cst_18 {dimension_numbers = #tpu.dot_dimension_numbers<[1], [0], [0], [1], [0, 0, 1, 1], [], []>} : vector<9x576xbf16>, vector<576x192xbf16>, vector<9x192xf32> -> vector<9x192xf32>
    %c0_19 = arith.constant 0 : index
    %c0_20 = arith.constant 0 : index
    %18 = vector.load %arg2[%c0_19, %c0_20] : memref<10x576xbf16, #tpu.memory_space<vmem>>, vector<9x576xbf16>
    %c4 = arith.constant 4 : index
    %c0_21 = arith.constant 0 : index
    %c0_22 = arith.constant 0 : index
    %19 = vector.load %arg3[%c4, %c0_21, %c0_22] : memref<6x576x192xbf16, #tpu.memory_space<vmem>>, vector<1x576x192xbf16>
    %20 = vector.shape_cast %19 : vector<1x576x192xbf16> to vector<576x192xbf16>
    %cst_23 = arith.constant dense<0.000000e+00> : vector<9x192xf32>
    %21 = tpu.matmul %18, %20, %cst_23 {dimension_numbers = #tpu.dot_dimension_numbers<[1], [0], [0], [1], [0, 0, 1, 1], [], []>} : vector<9x576xbf16>, vector<576x192xbf16>, vector<9x192xf32> -> vector<9x192xf32>
    %22 = arith.addf %17, %21 : vector<9x192xf32>
    %c1_24 = arith.constant 1 : index
    %c0_25 = arith.constant 0 : index
    %23 = vector.load %arg1[%c1_24, %c0_25] : memref<10x576xbf16, #tpu.memory_space<vmem>>, vector<9x576xbf16>
    %c5 = arith.constant 5 : index
    %c0_26 = arith.constant 0 : index
    %c0_27 = arith.constant 0 : index
    %24 = vector.load %arg3[%c5, %c0_26, %c0_27] : memref<6x576x192xbf16, #tpu.memory_space<vmem>>, vector<1x576x192xbf16>
    %25 = vector.shape_cast %24 : vector<1x576x192xbf16> to vector<576x192xbf16>
    %cst_28 = arith.constant dense<0.000000e+00> : vector<9x192xf32>
    %26 = tpu.matmul %23, %25, %cst_28 {dimension_numbers = #tpu.dot_dimension_numbers<[1], [0], [0], [1], [0, 0, 1, 1], [], []>} : vector<9x576xbf16>, vector<576x192xbf16>, vector<9x192xf32> -> vector<9x192xf32>
    %27 = arith.addf %22, %26 : vector<9x192xf32>
    %28 = arith.maximumf %13, %27 : vector<9x192xf32>
    %c0_29 = arith.constant 0 : index
    %c0_30 = arith.constant 0 : index
    %29 = vector.load %arg2[%c0_29, %c0_30] : memref<10x576xbf16, #tpu.memory_space<vmem>>, vector<9x576xbf16>
    %c0_31 = arith.constant 0 : index
    %c0_32 = arith.constant 0 : index
    %c0_33 = arith.constant 0 : index
    %30 = vector.load %arg3[%c0_31, %c0_32, %c0_33] : memref<6x576x192xbf16, #tpu.memory_space<vmem>>, vector<1x576x192xbf16>
    %31 = vector.shape_cast %30 : vector<1x576x192xbf16> to vector<576x192xbf16>
    %cst_34 = arith.constant dense<0.000000e+00> : vector<9x192xf32>
    %32 = tpu.matmul %29, %31, %cst_34 {dimension_numbers = #tpu.dot_dimension_numbers<[1], [0], [0], [1], [0, 0, 1, 1], [], []>} : vector<9x576xbf16>, vector<576x192xbf16>, vector<9x192xf32> -> vector<9x192xf32>
    %c1_35 = arith.constant 1 : index
    %c0_36 = arith.constant 0 : index
    %33 = vector.load %arg1[%c1_35, %c0_36] : memref<10x576xbf16, #tpu.memory_space<vmem>>, vector<9x576xbf16>
    %c1_37 = arith.constant 1 : index
    %c0_38 = arith.constant 0 : index
    %c0_39 = arith.constant 0 : index
    %34 = vector.load %arg3[%c1_37, %c0_38, %c0_39] : memref<6x576x192xbf16, #tpu.memory_space<vmem>>, vector<1x576x192xbf16>
    %35 = vector.shape_cast %34 : vector<1x576x192xbf16> to vector<576x192xbf16>
    %cst_40 = arith.constant dense<0.000000e+00> : vector<9x192xf32>
    %36 = tpu.matmul %33, %35, %cst_40 {dimension_numbers = #tpu.dot_dimension_numbers<[1], [0], [0], [1], [0, 0, 1, 1], [], []>} : vector<9x576xbf16>, vector<576x192xbf16>, vector<9x192xf32> -> vector<9x192xf32>
    %37 = arith.addf %32, %36 : vector<9x192xf32>
    %c1_41 = arith.constant 1 : index
    %c0_42 = arith.constant 0 : index
    %38 = vector.load %arg2[%c1_41, %c0_42] : memref<10x576xbf16, #tpu.memory_space<vmem>>, vector<9x576xbf16>
    %c2_43 = arith.constant 2 : index
    %c0_44 = arith.constant 0 : index
    %c0_45 = arith.constant 0 : index
    %39 = vector.load %arg3[%c2_43, %c0_44, %c0_45] : memref<6x576x192xbf16, #tpu.memory_space<vmem>>, vector<1x576x192xbf16>
    %40 = vector.shape_cast %39 : vector<1x576x192xbf16> to vector<576x192xbf16>
    %cst_46 = arith.constant dense<0.000000e+00> : vector<9x192xf32>
    %41 = tpu.matmul %38, %40, %cst_46 {dimension_numbers = #tpu.dot_dimension_numbers<[1], [0], [0], [1], [0, 0, 1, 1], [], []>} : vector<9x576xbf16>, vector<576x192xbf16>, vector<9x192xf32> -> vector<9x192xf32>
    %42 = arith.addf %37, %41 : vector<9x192xf32>
    %43 = arith.maximumf %28, %42 : vector<9x192xf32>
    %c0_47 = arith.constant 0 : index
    %c0_48 = arith.constant 0 : index
    %44 = vector.load %arg2[%c0_47, %c0_48] : memref<10x576xbf16, #tpu.memory_space<vmem>>, vector<9x576xbf16>
    %c3_49 = arith.constant 3 : index
    %c0_50 = arith.constant 0 : index
    %c0_51 = arith.constant 0 : index
    %45 = vector.load %arg3[%c3_49, %c0_50, %c0_51] : memref<6x576x192xbf16, #tpu.memory_space<vmem>>, vector<1x576x192xbf16>
    %46 = vector.shape_cast %45 : vector<1x576x192xbf16> to vector<576x192xbf16>
    %cst_52 = arith.constant dense<0.000000e+00> : vector<9x192xf32>
    %47 = tpu.matmul %44, %46, %cst_52 {dimension_numbers = #tpu.dot_dimension_numbers<[1], [0], [0], [1], [0, 0, 1, 1], [], []>} : vector<9x576xbf16>, vector<576x192xbf16>, vector<9x192xf32> -> vector<9x192xf32>
    %c1_53 = arith.constant 1 : index
    %c0_54 = arith.constant 0 : index
    %48 = vector.load %arg1[%c1_53, %c0_54] : memref<10x576xbf16, #tpu.memory_space<vmem>>, vector<9x576xbf16>
    %c4_55 = arith.constant 4 : index
    %c0_56 = arith.constant 0 : index
    %c0_57 = arith.constant 0 : index
    %49 = vector.load %arg3[%c4_55, %c0_56, %c0_57] : memref<6x576x192xbf16, #tpu.memory_space<vmem>>, vector<1x576x192xbf16>
    %50 = vector.shape_cast %49 : vector<1x576x192xbf16> to vector<576x192xbf16>
    %cst_58 = arith.constant dense<0.000000e+00> : vector<9x192xf32>
    %51 = tpu.matmul %48, %50, %cst_58 {dimension_numbers = #tpu.dot_dimension_numbers<[1], [0], [0], [1], [0, 0, 1, 1], [], []>} : vector<9x576xbf16>, vector<576x192xbf16>, vector<9x192xf32> -> vector<9x192xf32>
    %52 = arith.addf %47, %51 : vector<9x192xf32>
    %c1_59 = arith.constant 1 : index
    %c0_60 = arith.constant 0 : index
    %53 = vector.load %arg2[%c1_59, %c0_60] : memref<10x576xbf16, #tpu.memory_space<vmem>>, vector<9x576xbf16>
    %c5_61 = arith.constant 5 : index
    %c0_62 = arith.constant 0 : index
    %c0_63 = arith.constant 0 : index
    %54 = vector.load %arg3[%c5_61, %c0_62, %c0_63] : memref<6x576x192xbf16, #tpu.memory_space<vmem>>, vector<1x576x192xbf16>
    %55 = vector.shape_cast %54 : vector<1x576x192xbf16> to vector<576x192xbf16>
    %cst_64 = arith.constant dense<0.000000e+00> : vector<9x192xf32>
    %56 = tpu.matmul %53, %55, %cst_64 {dimension_numbers = #tpu.dot_dimension_numbers<[1], [0], [0], [1], [0, 0, 1, 1], [], []>} : vector<9x576xbf16>, vector<576x192xbf16>, vector<9x192xf32> -> vector<9x192xf32>
    %57 = arith.addf %52, %56 : vector<9x192xf32>
    %58 = arith.maximumf %43, %57 : vector<9x192xf32>
    %c0_65 = arith.constant 0 : index
    %c0_66 = arith.constant 0 : index
    %59 = vector.load %arg4[%c0_65, %c0_66] : memref<1x192xf32, #tpu.memory_space<vmem>>, vector<1x192xf32>
    %60 = vector.broadcast %59 : vector<1x192xf32> to vector<9x192xf32>
    %61 = arith.addf %58, %60 : vector<9x192xf32>
    %cst_67 = arith.constant 0.000000e+00 : f32
    %62 = vector.broadcast %cst_67 : f32 to vector<9x192xf32>
    %63 = arith.maximumf %61, %62 : vector<9x192xf32>
    %64 = arith.truncf %63 : vector<9x192xf32> to vector<9x192xbf16>
    %c0_68 = arith.constant 0 : index
    %c0_69 = arith.constant 0 : index
    %65 = vector.load %arg5[%c0_68, %c0_69] : memref<10x192xbf16, #tpu.memory_space<vmem>>, vector<9x192xbf16>
    tpu.vector_store %arg5[%c0_68, %c0_69], %64 {strides = array<i32>} : memref<10x192xbf16, #tpu.memory_space<vmem>>, vector<9x192xbf16>,
    return
  }
  func.func @transform_0(%arg0: i32) -> (i32, i32) {
    %c0_i32 = arith.constant 0 : i32
    %c0_i32_0 = arith.constant 0 : i32
    return %arg0, %c0_i32 : i32, i32
  }
  func.func @transform_1(%arg0: i32) -> (i32, i32) {
    %c0_i32 = arith.constant 0 : i32
    %c0_i32_0 = arith.constant 0 : i32
    return %arg0, %c0_i32 : i32, i32
  }
  func.func @transform_2(%arg0: i32) -> (i32, i32, i32) {
    %c0_i32 = arith.constant 0 : i32
    %c0_i32_0 = arith.constant 0 : i32
    %c0_i32_1 = arith.constant 0 : i32
    %c0_i32_2 = arith.constant 0 : i32
    return %c0_i32, %c0_i32_0, %c0_i32_1 : i32, i32, i32
  }
  func.func @transform_3(%arg0: i32) -> (i32, i32) {
    %c0_i32 = arith.constant 0 : i32
    %c0_i32_0 = arith.constant 0 : i32
    %c0_i32_1 = arith.constant 0 : i32
    return %c0_i32, %c0_i32_0 : i32, i32
  }
  func.func @transform_4(%arg0: i32) -> (i32, i32) {
    %c0_i32 = arith.constant 0 : i32
    %c0_i32_0 = arith.constant 0 : i32
    return %arg0, %c0_i32 : i32, i32
  }
}

module attributes {stable_mosaic.version = 11 : i64} {
  func.func @_fc_fused_kernel(%arg0: i32, %arg1: memref<16x576xbf16, #tpu.memory_space<vmem>>, %arg2: memref<576x128xbf16, #tpu.memory_space<vmem>>, %arg3: memref<1x128xf32, #tpu.memory_space<vmem>>, %arg4: memref<128x128xbf16, #tpu.memory_space<vmem>>, %arg5: memref<1x128xf32, #tpu.memory_space<vmem>>, %arg6: memref<16x128xf32, #tpu.memory_space<vmem>>) attributes {dimension_semantics = [#tpu.dimension_semantics<parallel>], iteration_bounds = array<i64: 1>, scalar_prefetch = 0 : i64, scratch_operands = 0 : i64, tpu.core_type = #tpu.core_type<tc>, window_params = [{transform_indices = @transform_0, window_bounds = array<i64: 16, 576>}, {pipeline_mode = #tpu.pipeline_mode<synchronous>, transform_indices = @transform_1, window_bounds = array<i64: 576, 128>}, {pipeline_mode = #tpu.pipeline_mode<synchronous>, transform_indices = @transform_2, window_bounds = array<i64: 1, 128>}, {pipeline_mode = #tpu.pipeline_mode<synchronous>, transform_indices = @transform_3, window_bounds = array<i64: 128, 128>}, {pipeline_mode = #tpu.pipeline_mode<synchronous>, transform_indices = @transform_4, window_bounds = array<i64: 1, 128>}, {transform_indices = @transform_5, window_bounds = array<i64: 16, 128>}]} {
    %c0 = arith.constant 0 : index
    %c0_0 = arith.constant 0 : index
    %0 = vector.load %arg1[%c0, %c0_0] : memref<16x576xbf16, #tpu.memory_space<vmem>>, vector<16x576xbf16>
    %c0_1 = arith.constant 0 : index
    %c0_2 = arith.constant 0 : index
    %1 = vector.load %arg2[%c0_1, %c0_2] : memref<576x128xbf16, #tpu.memory_space<vmem>>, vector<576x128xbf16>
    %cst = arith.constant dense<0.000000e+00> : vector<16x128xf32>
    %2 = tpu.matmul %0, %1, %cst {dimension_numbers = #tpu.dot_dimension_numbers<[1], [0], [0], [1], [0, 0, 1, 1], [], []>} : vector<16x576xbf16>, vector<576x128xbf16>, vector<16x128xf32> -> vector<16x128xf32>
    %c0_3 = arith.constant 0 : index
    %c0_4 = arith.constant 0 : index
    %3 = vector.load %arg3[%c0_3, %c0_4] : memref<1x128xf32, #tpu.memory_space<vmem>>, vector<1x128xf32>
    %4 = vector.broadcast %3 : vector<1x128xf32> to vector<16x128xf32>
    %5 = arith.addf %2, %4 : vector<16x128xf32>
    %cst_5 = arith.constant 0.000000e+00 : f32
    %6 = vector.broadcast %cst_5 : f32 to vector<16x128xf32>
    %7 = arith.maximumf %5, %6 : vector<16x128xf32>
    %8 = arith.truncf %7 : vector<16x128xf32> to vector<16x128xbf16>
    %c0_6 = arith.constant 0 : index
    %c0_7 = arith.constant 0 : index
    %9 = vector.load %arg4[%c0_6, %c0_7] : memref<128x128xbf16, #tpu.memory_space<vmem>>, vector<128x128xbf16>
    %cst_8 = arith.constant dense<0.000000e+00> : vector<16x128xf32>
    %10 = tpu.matmul %8, %9, %cst_8 {dimension_numbers = #tpu.dot_dimension_numbers<[1], [0], [0], [1], [0, 0, 1, 1], [], []>} : vector<16x128xbf16>, vector<128x128xbf16>, vector<16x128xf32> -> vector<16x128xf32>
    %c0_9 = arith.constant 0 : index
    %c0_10 = arith.constant 0 : index
    %11 = vector.load %arg5[%c0_9, %c0_10] : memref<1x128xf32, #tpu.memory_space<vmem>>, vector<1x128xf32>
    %12 = vector.broadcast %11 : vector<1x128xf32> to vector<16x128xf32>
    %13 = arith.addf %10, %12 : vector<16x128xf32>
    %c0_11 = arith.constant 0 : index
    %c0_12 = arith.constant 0 : index
    %14 = vector.load %arg6[%c0_11, %c0_12] : memref<16x128xf32, #tpu.memory_space<vmem>>, vector<16x128xf32>
    tpu.vector_store %arg6[%c0_11, %c0_12], %13 {strides = array<i32>} : memref<16x128xf32, #tpu.memory_space<vmem>>, vector<16x128xf32>,
    return
  }
  func.func @transform_0(%arg0: i32) -> (i32, i32) {
    %c0_i32 = arith.constant 0 : i32
    %c0_i32_0 = arith.constant 0 : i32
    return %arg0, %c0_i32 : i32, i32
  }
  func.func @transform_1(%arg0: i32) -> (i32, i32) {
    %c0_i32 = arith.constant 0 : i32
    %c0_i32_0 = arith.constant 0 : i32
    %c0_i32_1 = arith.constant 0 : i32
    return %c0_i32, %c0_i32_0 : i32, i32
  }
  func.func @transform_2(%arg0: i32) -> (i32, i32) {
    %c0_i32 = arith.constant 0 : i32
    %c0_i32_0 = arith.constant 0 : i32
    %c0_i32_1 = arith.constant 0 : i32
    return %c0_i32, %c0_i32_0 : i32, i32
  }
  func.func @transform_3(%arg0: i32) -> (i32, i32) {
    %c0_i32 = arith.constant 0 : i32
    %c0_i32_0 = arith.constant 0 : i32
    %c0_i32_1 = arith.constant 0 : i32
    return %c0_i32, %c0_i32_0 : i32, i32
  }
  func.func @transform_4(%arg0: i32) -> (i32, i32) {
    %c0_i32 = arith.constant 0 : i32
    %c0_i32_0 = arith.constant 0 : i32
    %c0_i32_1 = arith.constant 0 : i32
    return %c0_i32, %c0_i32_0 : i32, i32
  }
  func.func @transform_5(%arg0: i32) -> (i32, i32) {
    %c0_i32 = arith.constant 0 : i32
    %c0_i32_0 = arith.constant 0 : i32
    return %arg0, %c0_i32 : i32, i32
  }
}

</mosaic_0001>

<bundles_post_ra>
// kernel: classifier_cnn3_forward.4
= control target key start
LH: loop header
LB: loop body
LE: loop exit
PB: predicated region body
PF: predicated region fallthrough
CT: control target
= control target key end

     0   :  { %9 = vsyncpa [#allocation3], 0  ;;  %s4593_s0 = inlined_call_operand.vmem [shape: bf16[32,32], index: 0, kind: input, shape index: {}]   ;;  %s4594_s1 = inlined_call_operand.vmem [shape: bf16[32,32], index: 1, kind: input, shape index: {}]   ;;  %s4595_s2 = inlined_call_operand.hbm [shape: bf16[10,32,448], index: 2, kind: input, shape index: {}]   ;;  %s4596_s3 = inlined_call_operand.hbm [shape: f32[1,448], index: 3, kind: input, shape index: {}]   ;;  %s4597_s4 = inlined_call_operand.vmem [shape: bf16[32,448], index: 4, kind: output, shape index: {}]  }
   0x1   :  { %10 = vsyncpa [#allocation5], 0  ;;  %s3753_s15 = smov [#allocation2]   ;;  %s3705_s19 = scalar_lea.hbm %s4595_s2, 10240 }
   0x2   :  { %s20_s16 = sshll.u32 %s3753_s15, 4  ;;  %p3706_p0 = scmp.ne.s32.totalorder %s4595_s2, %s3705_s19  ;;  %s21_s16 = int_to_ptr.vmem [resolvable:$true] %s20_s16 }
   0x3   :  { %p3709_p1 = scmp.lt.u32.totalorder %s3705_s19, %s4595_s2 }
   0x5   :  { %p3711_p2 = pnand %p3709_p1, %p3706_p0 }
   0x7   :  { %3714 = shalt.err (!%p3711_p2)
}
   0x8   :  { %s3715_s24 = scalar_lea.vmem %s21_s16, 10240  ;;  %p3720_p4 = scmp.lt.s32.totalorder %s21_s16, %s21_s16 }
   0x9   :  { %p3716_p3 = scmp.ne.s32.totalorder %s21_s16, %s3715_s24  ;;  %p3721_p5 = scmp.lt.s32.totalorder %s3715_s24, %s3715_s24 }
   0xb   :  { %p3722_p6 = por %p3721_p5, %p3720_p4 }
   0xd   :  { %p3723_p7 = pnand %p3722_p6, %p3716_p3 }
   0xf   :  { %3726 = shalt.err (!%p3723_p7)
}
  0x10   :  { %s3754_s25 = smov 256   ;;  %s3755_s26 = smov 16  }
  0x11   :  { %26 = dma.hbm_to_vmem [thread:$0]  %s4595_s2, 10240, %s21_s16, [#allocation3], %s3754_s25, %s3754_s25, %s3755_s26  }
  0x12   :  { %s3756_s29 = smov [#allocation4]   ;;  %s3727_s7 = scalar_lea.hbm %s4596_s3, 64 }
  0x13   :  { %s33_s30 = sshll.u32 %s3756_s29, 4  ;;  %p3728_p8 = scmp.ne.s32.totalorder %s4596_s3, %s3727_s7  ;;  %s34_s30 = int_to_ptr.vmem [resolvable:$true] %s33_s30 }
  0x14   :  { %p3731_p9 = scmp.lt.u32.totalorder %s3727_s7, %s4596_s3 }
  0x16   :  { %p3733_p10 = pnand %p3731_p9, %p3728_p8 }
  0x18   :  { %3736 = shalt.err (!%p3733_p10)
}
  0x19   :  { %s3737_s12 = scalar_lea.vmem %s34_s30, 64  ;;  %p3742_p12 = scmp.lt.s32.totalorder %s34_s30, %s34_s30 }
  0x1a   :  { %p3738_p11 = scmp.ne.s32.totalorder %s34_s30, %s3737_s12  ;;  %p3743_p13 = scmp.lt.s32.totalorder %s3737_s12, %s3737_s12 }
  0x1c   :  { %p3744_p0 = por %p3743_p13, %p3742_p12 }
  0x1e   :  { %p3745_p1 = pnand %p3744_p0, %p3738_p11 }
  0x20   :  { %3748 = shalt.err (!%p3745_p1)
}
  0x21   :  { %36 = dma.hbm_to_vmem [thread:$0]  %s4596_s3, 64, %s34_s30, [#allocation5]  }
  0x22   :  { %3749 = dma.done.wait [#allocation3], 10240  }
  0x23   :  { %3750 = vsyncadd [#allocation3], 4294957056 }
  0x24   :  { %3751 = dma.done.wait [#allocation5], 64  }
  0x25   :  { %3752 = vsyncadd [#allocation5], 4294967232  ;;  %v4602_v0 = vmov 0   ;;  %v3809_v1 = vld [vmem:[#allocation2 + $0x44] ss:$16 sps:$4 sm:$0xff]   ;;  %vm119_vm0 = vcmask 261120  }
  0x26   :  { %158 = vmatprep.mubr.bf16.mxu0 %v4602_v0  ;;  %211 = vmatprep.mubr.bf16.mxu1 %v4602_v0  ;;  %v3811_v2 = vld [vmem:[#allocation2 + $0x4c] ss:$16 sps:$4 sm:$0xff]   ;;  %v3814_v3 = vld [vmem:[#allocation2 + $0x40] ss:$16 sps:$4 sm:$0xff]   ;;  %v3816_v4 = vld [vmem:[#allocation2 + $0x48] ss:$16 sps:$4 sm:$0xff]  }
  0x27   :  { %126 = vmatprep.subr.bf16.mxu0 %v3809_v1  ;;  %179 = vmatprep.subr.bf16.mxu1 %v3811_v2  ;;  %v3819_v5 = vld [vmem:[#allocation2 + $0x64] ss:$16 sps:$4 sm:$0xff]   ;;  %v3823_v6 = vld [vmem:[#allocation2 + $0x6c] ss:$16 sps:$4 sm:$0xff]   ;;  %v3825_v7 = vld [vmem:[#allocation2 + $0x60] ss:$16 sps:$4 sm:$0xff]  }
  0x28   :  { %127 = vmatpush1.bf16.msra.mxu0 %v3814_v3  ;;  %180 = vmatpush1.bf16.msra.mxu1 %v3816_v4  ;;  %v3828_v8 = vld [vmem:[#allocation2 + $0x68] ss:$16 sps:$4 sm:$0xff]   ;;  %v56_v9 = vld [vmem:[%s4594_s1] sm:$0xf]  ;;  %v3836_v10 = vld [vmem:[%s4594_s1 + $0x4] sm:$0xf] }
  0x29   :  { %128 = vmatprep.subr.bf16.mxu0 %v3819_v5  ;;  %181 = vmatprep.subr.bf16.mxu1 %v3823_v6  ;;  %v3840_v11 = vcombine.low %v56_v9, %v3836_v10  ;;  %v3842_v12 = vld [vmem:[#allocation2 + $0x4] ss:$16 sps:$4 sm:$0xff]   ;;  %v3846_v13 = vld [vmem:[#allocation2] ss:$16 sps:$4 sm:$0xff]   ;;  %v3848_v14 = vld [vmem:[#allocation2 + $0x8] ss:$16 sps:$4 sm:$0xff]  }
  0x2a   :  { %v3850_v15 = vld [vmem:[#allocation2 + $0xc] ss:$16 sps:$4 sm:$0xff]   ;;  %v3854_v16 = vld [vmem:[#allocation2 + $0x24] ss:$16 sps:$4 sm:$0xff]   ;;  %v3863_v17 = vld [vmem:[%s4594_s1 + $0x8] sm:$0xf] }
  0x2b   :  { %v3865_v18 = vld [vmem:[#allocation2 + $0x2c] ss:$16 sps:$4 sm:$0xff]   ;;  %v3872_v20 = vld [vmem:[#allocation2 + $0x20] ss:$16 sps:$4 sm:$0xff]   ;;  %v3874_v21 = vld [vmem:[#allocation2 + $0x28] ss:$16 sps:$4 sm:$0xff]  }
  0x2c   :  { %129 = vmatpush1.bf16.msra.mxu0 %v3825_v7  ;;  %182 = vmatpush1.bf16.msra.mxu1 %v3828_v8  ;;  %v59_v19 = vld [vmem:[%s4594_s1 + $0xc] sm:$0x7]  ;;  %v3880_v22 = vld [vmem:[#allocation2 + $0x84] ss:$16 sps:$4 sm:$0xff]   ;;  %v44_v25 = vld [vmem:[%s4593_s0] sm:$0xf] }
  0x2d   :  { %288 = vmatprep.subr.bf16.mxu0 %v3842_v12  ;;  %341 = vmatprep.subr.bf16.mxu1 %v3850_v15  ;;  %v3883_v23 = vcombine.low %v3863_v17, %v59_v19  ;;  %v3885_v24 = vld [vmem:[#allocation2 + $0x8c] ss:$16 sps:$4 sm:$0xff]   ;;  %v3903_v26 = vld [vmem:[%s4593_s0 + $0x4] sm:$0xf]  ;;  %v3908_v28 = vld [vmem:[#allocation2 + $0x80] ss:$16 sps:$4 sm:$0xff]  }
  0x2e   :  { %v3906_v27 = vcombine.low %v44_v25, %v3903_v26  ;;  %v3910_v29 = vld [vmem:[#allocation2 + $0x88] ss:$16 sps:$4 sm:$0xff]   ;;  %v394_v31 = vld [vmem:[%s4593_s0 + $0xc] sm:$0xf]  ;;  %v3921_v33 = vld [vmem:[#allocation2 + $0xa4] ss:$16 sps:$4 sm:$0xff]  }
  0x2f   :  { %3142 = vmatmul.mubr.msk.bf16.vlgmr.msra.gmra.mrb[0].mxu0 %vm119_vm0, %v3840_v11  ;;  %3144 = vmatmul.mubr.msk.bf16.vlgmr.msra.gmra.mrb[0].mxu1 %vm119_vm0, %v3840_v11  ;;  %v46_v30 = vld [vmem:[%s4593_s0 + $0x8] sm:$0xf]  ;;  %v47_v32 = vld [vmem:[%s4593_s0 + $0xc] sm:$0x7]  ;;  %v3929_v35 = vld [vmem:[#allocation2 + $0xa0] ss:$16 sps:$4 sm:$0xff]  }
  0x30   :  { %289 = vmatpush1.bf16.msra.mxu0 %v3846_v13  ;;  %342 = vmatpush1.bf16.msra.mxu1 %v3848_v14  ;;  %v3923_v34 = vld [vmem:[#allocation2 + $0xac] ss:$16 sps:$4 sm:$0xff]   ;;  %v3933_v36 = vcombine.low %v46_v30, %v394_v31  ;;  %v3935_v37 = vld [vmem:[#allocation2 + $0xa8] ss:$16 sps:$4 sm:$0xff]   ;;  %v410_v38 = vshll.u32 %v3906_v27, 16  ;;  %v3946_v41 = vcombine.low %v46_v30, %v47_v32  ;;  %v408_v43 = vshrl.u32 %v3906_v27, 16 }
  0x31   :  { %168 = vmatprep.mubr.bf16.mxu0 %v4602_v0  ;;  %221 = vmatprep.mubr.bf16.mxu1 %v4602_v0  ;;  %v3940_v39 = vld [vmem:[#allocation2 + $0xc4] ss:$16 sps:$4 sm:$0xff]   ;;  %v3942_v40 = vld [vmem:[#allocation2 + $0xcc] ss:$16 sps:$4 sm:$0xff]   ;;  %vm407_vm1 = vsmask.f32 7424 }
  0x32   :  { %290 = vmatprep.subr.bf16.mxu0 %v3854_v16  ;;  %343 = vmatprep.subr.bf16.mxu1 %v3865_v18  ;;  %v415_v42 = vshll.u32 %v3933_v36, 16  ;;  %v412_v44 = vrot.slane %v410_v38, 1  ;;  %v3960_v47 = vld [vmem:[#allocation2 + $0xc0] ss:$16 sps:$4 sm:$0xff]   ;;  %v3965_v49 = vld [vmem:[#allocation2 + $0xc8] ss:$16 sps:$4 sm:$0xff]  }
  0x33   :  { %v590_v50 = vld [vmem:[%s4594_s1 + $0xc] sm:$0xf]  ;;  %v3970_v51 = vld [vmem:[#allocation2 + $0xe4] ss:$16 sps:$4 sm:$0xff]   ;;  %v419_v53 = vshrl.u32 %v3933_v36, 16  ;;  %v605_v57 = vshll.u32 %v3840_v11, 16 }
  0x34   :  { %291 = vmatpush1.bf16.msra.mxu0 %v3872_v20  ;;  %344 = vmatpush1.bf16.msra.mxu1 %v3874_v21  ;;  %v417_v45 = vrot.slane %v415_v42, 1  ;;  %v413_v46 = vor.u32 %v412_v44, %v408_v43  ;;  %v3972_v52 = vld [vmem:[#allocation2 + $0xec] ss:$16 sps:$4 sm:$0xff]   ;;  %v3979_v54 = vld [vmem:[#allocation2 + $0xe0] ss:$16 sps:$4 sm:$0xff]   ;;  %v3986_v56 = vcombine.low %v3863_v17, %v590_v50  ;;  %v603_v61 = vshrl.u32 %v3840_v11, 16 }
  0x35   :  { %468 = vmatprep.subr.bf16.mxu0 %v3880_v22  ;;  %521 = vmatprep.subr.bf16.mxu1 %v3885_v24  ;;  %v3983_v55 = vld [vmem:[#allocation2 + $0xe8] ss:$16 sps:$4 sm:$0xff]   ;;  %v3991_v58 = vld [vmem:[#allocation2 + $0x104] ss:$16 sps:$4 sm:$0xff]   ;;  %v3993_v59 = vld [vmem:[#allocation2 + $0x10c] ss:$16 sps:$4 sm:$0xff]  }
  0x36   :  { %v3963_v48 = vsel %vm407_vm1, %v413_v46, %v417_v45  ;;  %v3997_v60 = vor.u32 %v419_v53, %v417_v45  ;;  %v607_v62 = vrot.slane %v605_v57, 1  ;;  %v610_v63 = vshll.u32 %v3986_v56, 16  ;;  %v4011_v19 = vld [vmem:[#allocation2 + $0x100] ss:$16 sps:$4 sm:$0xff]   ;;  %v4016_v30 = vld [vmem:[#allocation2 + $0x108] ss:$16 sps:$4 sm:$0xff]  }
  0x37   :  { %3143 = vmatmul.mubr.msk.bf16.gmra.mrb[4].mxu0 %vm119_vm0, %v3883_v23  ;;  %3145 = vmatmul.mubr.msk.bf16.gmra.mrb[4].mxu1 %vm119_vm0, %v3883_v23  ;;  %v4018_v31 = vld [vmem:[#allocation2 + $0x124] ss:$16 sps:$4 sm:$0xff]   ;;  %v4020_v32 = vld [vmem:[#allocation2 + $0x12c] ss:$16 sps:$4 sm:$0xff]   ;;  %v614_v38 = vshrl.u32 %v3986_v56, 16  ;;  %v4056_v57 = vrot.slane %v3933_v36, 1 }
  0x38   :  { %320 = vmatprep.mubr.bf16.mxu0 %v4602_v0  ;;  %373 = vmatprep.mubr.bf16.mxu1 %v4602_v0  ;;  %v608_v9 = vor.u32 %v607_v62, %v603_v61  ;;  %v612_v17 = vrot.slane %v610_v63, 1  ;;  %v4029_v42 = vld [vmem:[#allocation2 + $0x120] ss:$16 sps:$4 sm:$0xff]   ;;  %v4031_v43 = vld [vmem:[#allocation2 + $0x128] ss:$16 sps:$4 sm:$0xff]   ;;  %vm798_vm2 = vcmask 1046528  }
  0x39   :  { %v785_v44 = vld [vmem:[%s4593_s0] sm:$0xe]  ;;  %v4038_v45 = vld [vmem:[#allocation2 + $0x184] ss:$16 sps:$4 sm:$0xff]   ;;  %v4040_v46 = vld [vmem:[#allocation2 + $0x18c] ss:$16 sps:$4 sm:$0xff]  }
  0x3a   :  { %v4014_v25 = vsel %vm407_vm1, %v608_v9, %v612_v17  ;;  %v4044_v50 = vor.u32 %v614_v38, %v612_v17  ;;  %v3186_v53 = vcombine.low %v785_v44, %v3903_v26  ;;  %v4064_v62 = vld [vmem:[#allocation2 + $0x180] ss:$16 sps:$4 sm:$0xff]   ;;  %v4066_v63 = vld [vmem:[#allocation2 + $0x188] ss:$16 sps:$4 sm:$0xff]   ;;  %v4068_v9 = vld [vmem:[#allocation2 + $0x1a4] ss:$16 sps:$4 sm:$0xff]  }
  0x3b   :  { %4627 = vst [vmem:[#allocation8_spill] sm:$0xff] %v4066_v63  ;;  %4628 = vst [vmem:[#allocation9_spill] sm:$0xff] %v4068_v9  ;;  %v4070_v17 = vld [vmem:[#allocation2 + $0x1ac] ss:$16 sps:$4 sm:$0xff]   ;;  %v4078_v36 = vld [vmem:[#allocation2 + $0x1a0] ss:$16 sps:$4 sm:$0xff]  }
  0x3c   :  { %v799_v26 = vrot.slane %v3186_v53, 1  ;;  %4629 = vst [vmem:[#allocation10_spill] sm:$0xff] %v4070_v17  ;;  %4630 = vst [vmem:[#allocation11_spill] sm:$0xff] %v4078_v36  ;;  %v4080_v38 = vld [vmem:[#allocation2 + $0x1a8] ss:$16 sps:$4 sm:$0xff]   ;;  %vm3113_vm3 = vcmask 1043456  }
  0x3d   :  { %4631 = vst [vmem:[#allocation12_spill] sm:$0xff] %v4080_v38  ;;  %v4084_v44 = vld [vmem:[#allocation2 + $0x144] ss:$16 sps:$4 sm:$0xff]   ;;  %v4086_v53 = vld [vmem:[#allocation2 + $0x14c] ss:$16 sps:$4 sm:$0xff]   ;;  %vm3114_vm4 = vcmask 523268  }
  0x3e   :  { %v4062_v61 = vsel %vm798_vm2, %v799_v26, %v4056_v57  ;;  %4632 = vst [vmem:[#allocation13_spill] sm:$0xff] %v4084_v44  ;;  %4633 = vst [vmem:[#allocation14_spill] sm:$0xff] %v4086_v53  ;;  %v4100_v26 = vld [vmem:[#allocation2 + $0x140] ss:$16 sps:$4 sm:$0xff]   ;;  %vm3122_vm6 = vcmask 1042432   ;;  %vm3123_vm7 = vcmask 522244  }
  0x3f   :  { %3156 = vmatmul.mubr.msk.bf16.vlgmr.msra.gmra.mrb[0].mxu0 %vm119_vm0, %v3906_v27  ;;  %3158 = vmatmul.mubr.msk.bf16.vlgmr.msra.gmra.mrb[0].mxu1 %vm119_vm0, %v3906_v27  ;;  %4634 = vst [vmem:[#allocation15_spill] sm:$0xff] %v4100_v26  ;;  %vm4541_vm5 = vmor %vm3114_vm4, %vm3113_vm3 }
  0x40   :  { %469 = vmatpush1.bf16.msra.mxu0 %v3908_v28  ;;  %522 = vmatpush1.bf16.msra.mxu1 %v3910_v29  ;;  %vm3124_vm8 = vmor %vm3123_vm7, %vm3122_vm6 }
  0x41   :  { %330 = vmatprep.mubr.bf16.mxu0 %v4602_v0  ;;  %383 = vmatprep.mubr.bf16.mxu1 %v4602_v0 }
  0x42   :  { %470 = vmatprep.subr.bf16.mxu0 %v3921_v33  ;;  %523 = vmatprep.subr.bf16.mxu1 %v3923_v34 }
  0x44   :  { %471 = vmatpush1.bf16.msra.mxu0 %v3929_v35  ;;  %524 = vmatpush1.bf16.msra.mxu1 %v3935_v37 }
  0x45   :  { %663 = vmatprep.subr.bf16.mxu0 %v3940_v39  ;;  %716 = vmatprep.subr.bf16.mxu1 %v3942_v40 }
  0x47   :  { %3157 = vmatmul.mubr.msk.bf16.gmra.mrb[4].mxu0 %vm119_vm0, %v3946_v41  ;;  %3159 = vmatmul.mubr.msk.bf16.gmra.mrb[4].mxu1 %vm119_vm0, %v3946_v41 }
  0x48   :  { %500 = vmatprep.mubr.bf16.mxu0 %v4602_v0  ;;  %553 = vmatprep.mubr.bf16.mxu1 %v4602_v0 }
  0x4f   :  { %3169 = vmatmul.mubr.msk.bf16.vlgmr.msra.gmra.mrb[0].mxu0 %vm119_vm0, %v3963_v48  ;;  %3171 = vmatmul.mubr.msk.bf16.vlgmr.msra.gmra.mrb[0].mxu1 %vm119_vm0, %v3963_v48 }
  0x50   :  { %664 = vmatpush1.bf16.msra.mxu0 %v3960_v47  ;;  %717 = vmatpush1.bf16.msra.mxu1 %v3965_v49 }
  0x51   :  { %510 = vmatprep.mubr.bf16.mxu0 %v4602_v0  ;;  %563 = vmatprep.mubr.bf16.mxu1 %v4602_v0 }
  0x52   :  { %665 = vmatprep.subr.bf16.mxu0 %v3970_v51  ;;  %718 = vmatprep.subr.bf16.mxu1 %v3972_v52 }
  0x54   :  { %666 = vmatpush1.bf16.msra.mxu0 %v3979_v54  ;;  %719 = vmatpush1.bf16.msra.mxu1 %v3983_v55 }
  0x55   :  { %848 = vmatprep.subr.bf16.mxu0 %v3991_v58  ;;  %901 = vmatprep.subr.bf16.mxu1 %v3993_v59 }
  0x57   :  { %3170 = vmatmul.mubr.msk.bf16.gmra.mrb[4].mxu0 %vm119_vm0, %v3997_v60  ;;  %3172 = vmatmul.mubr.msk.bf16.gmra.mrb[4].mxu1 %vm119_vm0, %v3997_v60 }
  0x58   :  { %695 = vmatprep.mubr.bf16.mxu0 %v4602_v0  ;;  %748 = vmatprep.mubr.bf16.mxu1 %v4602_v0 }
  0x5f   :  { %3182 = vmatmul.mubr.msk.bf16.vlgmr.msra.gmra.mrb[0].mxu0 %vm119_vm0, %v4014_v25  ;;  %3184 = vmatmul.mubr.msk.bf16.vlgmr.msra.gmra.mrb[0].mxu1 %vm119_vm0, %v4014_v25 }
  0x60   :  { %849 = vmatpush1.bf16.msra.mxu0 %v4011_v19  ;;  %902 = vmatpush1.bf16.msra.mxu1 %v4016_v30 }
  0x61   :  { %705 = vmatprep.mubr.bf16.mxu0 %v4602_v0  ;;  %758 = vmatprep.mubr.bf16.mxu1 %v4602_v0 }
  0x62   :  { %850 = vmatprep.subr.bf16.mxu0 %v4018_v31  ;;  %903 = vmatprep.subr.bf16.mxu1 %v4020_v32 }
  0x64   :  { %851 = vmatpush1.bf16.msra.mxu0 %v4029_v42  ;;  %904 = vmatpush1.bf16.msra.mxu1 %v4031_v43 }
  0x65   :  { %1028 = vmatprep.subr.bf16.mxu0 %v4038_v45  ;;  %1081 = vmatprep.subr.bf16.mxu1 %v4040_v46 }
  0x67   :  { %3183 = vmatmul.mubr.msk.bf16.gmra.mrb[4].mxu0 %vm119_vm0, %v4044_v50  ;;  %3185 = vmatmul.mubr.msk.bf16.gmra.mrb[4].mxu1 %vm119_vm0, %v4044_v50 }
  0x68   :  { %880 = vmatprep.mubr.bf16.mxu0 %v4602_v0  ;;  %933 = vmatprep.mubr.bf16.mxu1 %v4602_v0 }
  0x6f   :  { %3195 = vmatmul.mubr.msk.bf16.vlgmr.msra.gmra.mrb[0].mxu0 %vm119_vm0, %v4062_v61  ;;  %3197 = vmatmul.mubr.msk.bf16.vlgmr.msra.gmra.mrb[0].mxu1 %vm119_vm0, %v4062_v61 }
  0x70   :  { %1029 = vmatpush1.bf16.msra.mxu0 %v4064_v62  ;;  %1082 = vmatpush1.bf16.msra.mxu1 %v4066_v63  ;;  %v4122_v63 = vld [vmem:[#allocation2 + $0x1cc] ss:$16 sps:$4 sm:$0xff]  }
  0x71   :  { %890 = vmatprep.mubr.bf16.mxu0 %v4602_v0  ;;  %943 = vmatprep.mubr.bf16.mxu1 %v4602_v0  ;;  %4642 = vst [vmem:[#allocation22_spill] sm:$0xff] %v4122_v63 }
  0x72   :  { %1030 = vmatprep.subr.bf16.mxu0 %v4068_v9  ;;  %1083 = vmatprep.subr.bf16.mxu1 %v4070_v17  ;;  %v4102_v17 = vld [vmem:[#allocation2 + $0x148] ss:$16 sps:$4 sm:$0xff]   ;;  %v4120_v9 = vld [vmem:[#allocation2 + $0x1c4] ss:$16 sps:$4 sm:$0xff]  }
  0x73   :  { %4635 = vst [vmem:[#allocation16_spill] sm:$0xff] %v4102_v17  ;;  %4641 = vst [vmem:[#allocation21_spill] sm:$0xff] %v4120_v9 }
  0x74   :  { %1031 = vmatpush1.bf16.msra.mxu0 %v4078_v36  ;;  %1084 = vmatpush1.bf16.msra.mxu1 %v4080_v38  ;;  %v4104_v36 = vld [vmem:[#allocation2 + $0x164] ss:$16 sps:$4 sm:$0xff]   ;;  %v4106_v38 = vld [vmem:[#allocation2 + $0x16c] ss:$16 sps:$4 sm:$0xff]  }
  0x75   :  { %1174 = vmatprep.subr.bf16.mxu0 %v4084_v44  ;;  %1227 = vmatprep.subr.bf16.mxu1 %v4086_v53  ;;  %4636 = vst [vmem:[#allocation17_spill] sm:$0xff] %v4104_v36  ;;  %4637 = vst [vmem:[#allocation18_spill] sm:$0xff] %v4106_v38  ;;  %v4114_v53 = vld [vmem:[#allocation2 + $0x160] ss:$16 sps:$4 sm:$0xff]   ;;  %v4640_v44 = vmov 0  }
  0x76   :  { %4638 = vst [vmem:[#allocation19_spill] sm:$0xff] %v4114_v53 }
  0x77   :  { %3196 = vmatmul.mubr.msk.bf16.gmra.mrb[4].mxu0 %vm119_vm0, %v4056_v57  ;;  %3198 = vmatmul.mubr.msk.bf16.gmra.mrb[4].mxu1 %vm119_vm0, %v4056_v57 }
  0x78   :  { %1060 = vmatprep.mubr.bf16.mxu0 %v4602_v0  ;;  %1113 = vmatprep.mubr.bf16.mxu1 %v4602_v0  ;;  %v4116_v0 = vld [vmem:[#allocation2 + $0x168] ss:$16 sps:$4 sm:$0xff]  }
  0x79   :  { %4639 = vst [vmem:[#allocation20_spill] sm:$0xff] %v4116_v0 }
  0x7f   :  { %3207 = vmatmul.mubr.msk.bf16.vlgmr.msra.gmra.mrb[8].mxu0 %vm119_vm0, %v3840_v11  ;;  %3209 = vmatmul.mubr.msk.bf16.vlgmr.msra.gmra.mrb[8].mxu1 %vm119_vm0, %v3840_v11 }
  0x80   :  { %1175 = vmatpush1.bf16.msra.mxu0 %v4100_v26  ;;  %1228 = vmatpush1.bf16.msra.mxu1 %v4102_v17  ;;  %v4156_v17 = vld [vmem:[#allocation2 + $0x204] ss:$16 sps:$4 sm:$0xff]   ;;  %v4158_v26 = vld [vmem:[#allocation2 + $0x20c] ss:$16 sps:$4 sm:$0xff]  }
  0x81   :  { %1070 = vmatprep.mubr.bf16.mxu0 %v4640_v44  ;;  %1123 = vmatprep.mubr.bf16.mxu1 %v4640_v44  ;;  %4647 = vst [vmem:[#allocation27_spill] sm:$0xff] %v4156_v17  ;;  %4648 = vst [vmem:[#allocation28_spill] sm:$0xff] %v4158_v26 }
  0x82   :  { %1176 = vmatprep.subr.bf16.mxu0 %v4104_v36  ;;  %1229 = vmatprep.subr.bf16.mxu1 %v4106_v38  ;;  %v4136_v36 = vld [vmem:[#allocation2 + $0x1c0] ss:$16 sps:$4 sm:$0xff]   ;;  %v4138_v38 = vld [vmem:[#allocation2 + $0x1c8] ss:$16 sps:$4 sm:$0xff]  }
  0x84   :  { %1177 = vmatpush1.bf16.msra.mxu0 %v4114_v53  ;;  %1230 = vmatpush1.bf16.msra.mxu1 %v4116_v0  ;;  %v4140_v53 = vld [vmem:[#allocation2 + $0x1e4] ss:$16 sps:$4 sm:$0xff]   ;;  %v4142_v0 = vld [vmem:[#allocation2 + $0x1ec] ss:$16 sps:$4 sm:$0xff]  }
  0x85   :  { %1329 = vmatprep.subr.bf16.mxu0 %v4120_v9  ;;  %1382 = vmatprep.subr.bf16.mxu1 %v4122_v63  ;;  %4643 = vst [vmem:[#allocation23_spill] sm:$0xff] %v4140_v53  ;;  %4644 = vst [vmem:[#allocation24_spill] sm:$0xff] %v4142_v0  ;;  %v4150_v63 = vld [vmem:[#allocation2 + $0x1e0] ss:$16 sps:$4 sm:$0xff]   ;;  %v4152_v9 = vld [vmem:[#allocation2 + $0x1e8] ss:$16 sps:$4 sm:$0xff]  }
  0x86   :  { %4645 = vst [vmem:[#allocation25_spill] sm:$0xff] %v4150_v63  ;;  %4646 = vst [vmem:[#allocation26_spill] sm:$0xff] %v4152_v9 }
  0x87   :  { %3208 = vmatmul.mubr.msk.bf16.gmra.mrb[12].mxu0 %vm119_vm0, %v3883_v23  ;;  %3210 = vmatmul.mubr.msk.bf16.gmra.mrb[12].mxu1 %vm119_vm0, %v3883_v23 }
  0x88   :  { %1206 = vmatprep.mubr.bf16.mxu0 %v4640_v44  ;;  %1259 = vmatprep.mubr.bf16.mxu1 %v4640_v44 }
  0x8f   :  { %3219 = vmatmul.mubr.msk.bf16.vlgmr.msra.gmra.mrb[8].mxu0 %vm119_vm0, %v3906_v27  ;;  %3221 = vmatmul.mubr.msk.bf16.vlgmr.msra.gmra.mrb[8].mxu1 %vm119_vm0, %v3906_v27  ;;  %v4172_v27 = vld [vmem:[#allocation2 + $0x200] ss:$16 sps:$4 sm:$0xff]  }
  0x90   :  { %1330 = vmatpush1.bf16.msra.mxu0 %v4136_v36  ;;  %1383 = vmatpush1.bf16.msra.mxu1 %v4138_v38 }
  0x91   :  { %1216 = vmatprep.mubr.bf16.mxu0 %v4640_v44  ;;  %1269 = vmatprep.mubr.bf16.mxu1 %v4640_v44 }
  0x92   :  { %1331 = vmatprep.subr.bf16.mxu0 %v4140_v53  ;;  %1384 = vmatprep.subr.bf16.mxu1 %v4142_v0  ;;  %v4174_v0 = vld [vmem:[#allocation2 + $0x208] ss:$16 sps:$4 sm:$0xff]   ;;  %v4194_v53 = vld [vmem:[#allocation2 + $0x24c] ss:$16 sps:$4 sm:$0xff]  }
  0x93   :  { %4654 = vst [vmem:[#allocation34_spill] sm:$0xff] %v4194_v53 }
  0x94   :  { %1332 = vmatpush1.bf16.msra.mxu0 %v4150_v63  ;;  %1385 = vmatpush1.bf16.msra.mxu1 %v4152_v9  ;;  %v4176_v63 = vld [vmem:[#allocation2 + $0x224] ss:$16 sps:$4 sm:$0xff]   ;;  %v4178_v9 = vld [vmem:[#allocation2 + $0x22c] ss:$16 sps:$4 sm:$0xff]  }
  0x95   :  { %1500 = vmatprep.subr.bf16.mxu0 %v4156_v17  ;;  %1553 = vmatprep.subr.bf16.mxu1 %v4158_v26  ;;  %4649 = vst [vmem:[#allocation29_spill] sm:$0xff] %v4176_v63  ;;  %4650 = vst [vmem:[#allocation30_spill] sm:$0xff] %v4178_v9  ;;  %v4188_v26 = vld [vmem:[#allocation2 + $0x228] ss:$16 sps:$4 sm:$0xff]   ;;  %v4192_v17 = vld [vmem:[#allocation2 + $0x244] ss:$16 sps:$4 sm:$0xff]  }
  0x96   :  { %4652 = vst [vmem:[#allocation32_spill] sm:$0xff] %v4188_v26  ;;  %4653 = vst [vmem:[#allocation33_spill] sm:$0xff] %v4192_v17 }
  0x97   :  { %3220 = vmatmul.mubr.msk.bf16.gmra.mrb[12].mxu0 %vm119_vm0, %v3946_v41  ;;  %3222 = vmatmul.mubr.msk.bf16.gmra.mrb[12].mxu1 %vm119_vm0, %v3946_v41  ;;  %v4186_v41 = vld [vmem:[#allocation2 + $0x220] ss:$16 sps:$4 sm:$0xff]  }
  0x98   :  { %1361 = vmatprep.mubr.bf16.mxu0 %v4640_v44  ;;  %1414 = vmatprep.mubr.bf16.mxu1 %v4640_v44  ;;  %4651 = vst [vmem:[#allocation31_spill] sm:$0xff] %v4186_v41 }
  0x9f   :  { %3231 = vmatmul.mubr.msk.bf16.vlgmr.msra.gmra.mrb[8].mxu0 %vm119_vm0, %v3963_v48  ;;  %3233 = vmatmul.mubr.msk.bf16.vlgmr.msra.gmra.mrb[8].mxu1 %vm119_vm0, %v3963_v48 }
  0xa0   :  { %1501 = vmatpush1.bf16.msra.mxu0 %v4172_v27  ;;  %1554 = vmatpush1.bf16.msra.mxu1 %v4174_v0 }
  0xa1   :  { %1371 = vmatprep.mubr.bf16.mxu0 %v4640_v44  ;;  %1424 = vmatprep.mubr.bf16.mxu1 %v4640_v44 }
  0xa2   :  { %1502 = vmatprep.subr.bf16.mxu0 %v4176_v63  ;;  %1555 = vmatprep.subr.bf16.mxu1 %v4178_v9  ;;  %v4208_v63 = vld [vmem:[#allocation2 + $0x240] ss:$16 sps:$4 sm:$0xff]   ;;  %v4210_v9 = vld [vmem:[#allocation2 + $0x248] ss:$16 sps:$4 sm:$0xff]  }
  0xa4   :  { %1503 = vmatpush1.bf16.msra.mxu0 %v4186_v41  ;;  %1556 = vmatpush1.bf16.msra.mxu1 %v4188_v26  ;;  %v4212_v41 = vld [vmem:[#allocation2 + $0x264] ss:$16 sps:$4 sm:$0xff]   ;;  %v4214_v26 = vld [vmem:[#allocation2 + $0x26c] ss:$16 sps:$4 sm:$0xff]  }
  0xa5   :  { %1671 = vmatprep.subr.bf16.mxu0 %v4192_v17  ;;  %1724 = vmatprep.subr.bf16.mxu1 %v4194_v53  ;;  %v4222_v53 = vld [vmem:[#allocation2 + $0x260] ss:$16 sps:$4 sm:$0xff]   ;;  %v4224_v17 = vld [vmem:[#allocation2 + $0x268] ss:$16 sps:$4 sm:$0xff]  }
  0xa7   :  { %3232 = vmatmul.mubr.msk.bf16.gmra.mrb[12].mxu0 %vm119_vm0, %v3997_v60  ;;  %3234 = vmatmul.mubr.msk.bf16.gmra.mrb[12].mxu1 %vm119_vm0, %v3997_v60 }
  0xa8   :  { %1532 = vmatprep.mubr.bf16.mxu0 %v4640_v44  ;;  %1585 = vmatprep.mubr.bf16.mxu1 %v4640_v44 }
  0xaf   :  { %3243 = vmatmul.mubr.msk.bf16.vlgmr.msra.gmra.mrb[8].mxu0 %vm119_vm0, %v4014_v25  ;;  %3245 = vmatmul.mubr.msk.bf16.vlgmr.msra.gmra.mrb[8].mxu1 %vm119_vm0, %v4014_v25 }
  0xb0   :  { %1672 = vmatpush1.bf16.msra.mxu0 %v4208_v63  ;;  %1725 = vmatpush1.bf16.msra.mxu1 %v4210_v9 }
  0xb1   :  { %1542 = vmatprep.mubr.bf16.mxu0 %v4640_v44  ;;  %1595 = vmatprep.mubr.bf16.mxu1 %v4640_v44 }
  0xb2   :  { %1673 = vmatprep.subr.bf16.mxu0 %v4212_v41  ;;  %1726 = vmatprep.subr.bf16.mxu1 %v4214_v26 }
  0xb4   :  { %1674 = vmatpush1.bf16.msra.mxu0 %v4222_v53  ;;  %1727 = vmatpush1.bf16.msra.mxu1 %v4224_v17 }
  0xb5   :  { %1809 = vmatprep.subr.bf16.mxu0 %v3809_v1  ;;  %1862 = vmatprep.subr.bf16.mxu1 %v3811_v2  ;;  %v2265_v1 = vld [vmem:[%s4594_s1] sm:$0xe] }
  0xb6   :  { %v3275_v2 = vcombine.low %v2265_v1, %v3836_v10  ;;  %v4658_v10 = vld [vmem:[#allocation11_spill] sm:$0xff] }
  0xb7   :  { %3244 = vmatmul.mubr.msk.bf16.gmra.mrb[12].mxu0 %vm119_vm0, %v4044_v50  ;;  %3246 = vmatmul.mubr.msk.bf16.gmra.mrb[12].mxu1 %vm119_vm0, %v4044_v50 }
  0xb8   :  { %1703 = vmatprep.mubr.bf16.mxu0 %v4640_v44  ;;  %1756 = vmatprep.mubr.bf16.mxu1 %v4640_v44 }
  0xbf   :  { %3255 = vmatmul.mubr.msk.bf16.vlgmr.msra.gmra.mrb[8].mxu0 %vm119_vm0, %v4062_v61  ;;  %3257 = vmatmul.mubr.msk.bf16.vlgmr.msra.gmra.mrb[8].mxu1 %vm119_vm0, %v4062_v61 }
  0xc0   :  { %1810 = vmatpush1.bf16.msra.mxu0 %v3814_v3  ;;  %1863 = vmatpush1.bf16.msra.mxu1 %v3816_v4  ;;  %v2269_v3 = vrot.slane %v3275_v2, 1  ;;  %v4345_v4 = vrot.slane %v3986_v56, 1 }
  0xc1   :  { %1713 = vmatprep.mubr.bf16.mxu0 %v4640_v44  ;;  %1766 = vmatprep.mubr.bf16.mxu1 %v4640_v44 }
  0xc2   :  { %1811 = vmatprep.subr.bf16.mxu0 %v3819_v5  ;;  %1864 = vmatprep.subr.bf16.mxu1 %v3823_v6  ;;  %v4349_v5 = vsel %vm798_vm2, %v2269_v3, %v4345_v4  ;;  %v4655_v6 = vld [vmem:[#allocation8_spill] sm:$0xff] }
  0xc4   :  { %1812 = vmatpush1.bf16.msra.mxu0 %v3825_v7  ;;  %1865 = vmatpush1.bf16.msra.mxu1 %v3828_v8  ;;  %v4656_v7 = vld [vmem:[#allocation9_spill] sm:$0xff]  ;;  %v4657_v8 = vld [vmem:[#allocation10_spill] sm:$0xff] }
  0xc5   :  { %1915 = vmatprep.subr.bf16.mxu0 %v3842_v12  ;;  %1968 = vmatprep.subr.bf16.mxu1 %v3850_v15  ;;  %v4659_v12 = vld [vmem:[#allocation12_spill] sm:$0xff]  ;;  %v4662_v15 = vld [vmem:[#allocation15_spill] sm:$0xff] }
  0xc7   :  { %3256 = vmatmul.mubr.msk.bf16.gmra.mrb[12].mxu0 %vm119_vm0, %v4056_v57  ;;  %3258 = vmatmul.mubr.msk.bf16.gmra.mrb[12].mxu1 %vm119_vm0, %v4056_v57 }
  0xc8   :  { %1841 = vmatprep.mubr.bf16.mxu0 %v4640_v44  ;;  %1894 = vmatprep.mubr.bf16.mxu1 %v4640_v44 }
  0xcf   :  { %3259 = vmatmul.mubr.msk.bf16.vlgmr.msra.gmra.mrb[16].mxu0 %vm119_vm0, %v3963_v48  ;;  %3261 = vmatmul.mubr.msk.bf16.vlgmr.msra.gmra.mrb[16].mxu1 %vm119_vm0, %v3963_v48 }
  0xd0   :  { %1916 = vmatpush1.bf16.msra.mxu0 %v3846_v13  ;;  %1969 = vmatpush1.bf16.msra.mxu1 %v3848_v14  ;;  %v4660_v13 = vld [vmem:[#allocation13_spill] sm:$0xff]  ;;  %v4661_v14 = vld [vmem:[#allocation14_spill] sm:$0xff] }
  0xd1   :  { %1851 = vmatprep.mubr.bf16.mxu0 %v4640_v44  ;;  %1904 = vmatprep.mubr.bf16.mxu1 %v4640_v44 }
  0xd2   :  { %1917 = vmatprep.subr.bf16.mxu0 %v3854_v16  ;;  %1970 = vmatprep.subr.bf16.mxu1 %v3865_v18  ;;  %v4663_v16 = vld [vmem:[#allocation16_spill] sm:$0xff]  ;;  %v4664_v18 = vld [vmem:[#allocation17_spill] sm:$0xff] }
  0xd4   :  { %1918 = vmatpush1.bf16.msra.mxu0 %v3872_v20  ;;  %1971 = vmatpush1.bf16.msra.mxu1 %v3874_v21  ;;  %v4665_v20 = vld [vmem:[#allocation18_spill] sm:$0xff]  ;;  %v4666_v21 = vld [vmem:[#allocation19_spill] sm:$0xff] }
  0xd5   :  { %2021 = vmatprep.subr.bf16.mxu0 %v3880_v22  ;;  %2074 = vmatprep.subr.bf16.mxu1 %v3885_v24  ;;  %v4667_v22 = vld [vmem:[#allocation20_spill] sm:$0xff]  ;;  %v4668_v24 = vld [vmem:[#allocation21_spill] sm:$0xff] }
  0xd7   :  { %3260 = vmatmul.mubr.msk.bf16.gmra.mrb[20].mxu0 %vm119_vm0, %v3997_v60  ;;  %3262 = vmatmul.mubr.msk.bf16.gmra.mrb[20].mxu1 %vm119_vm0, %v3997_v60 }
  0xd8   :  { %1947 = vmatprep.mubr.bf16.mxu0 %v4640_v44  ;;  %2000 = vmatprep.mubr.bf16.mxu1 %v4640_v44 }
  0xdf   :  { %3263 = vmatmul.mubr.msk.bf16.vlgmr.msra.gmra.mrb[16].mxu0 %vm119_vm0, %v3840_v11  ;;  %3265 = vmatmul.mubr.msk.bf16.vlgmr.msra.gmra.mrb[16].mxu1 %vm119_vm0, %v3840_v11 }
  0xe0   :  { %2022 = vmatpush1.bf16.msra.mxu0 %v3908_v28  ;;  %2075 = vmatpush1.bf16.msra.mxu1 %v3910_v29  ;;  %v4669_v28 = vld [vmem:[#allocation22_spill] sm:$0xff]  ;;  %v4670_v29 = vld [vmem:[#allocation23_spill] sm:$0xff] }
  0xe1   :  { %1957 = vmatprep.mubr.bf16.mxu0 %v4640_v44  ;;  %2010 = vmatprep.mubr.bf16.mxu1 %v4640_v44 }
  0xe2   :  { %2023 = vmatprep.subr.bf16.mxu0 %v3921_v33  ;;  %2076 = vmatprep.subr.bf16.mxu1 %v3923_v34  ;;  %v4671_v33 = vld [vmem:[#allocation24_spill] sm:$0xff]  ;;  %v4672_v34 = vld [vmem:[#allocation25_spill] sm:$0xff] }
  0xe4   :  { %2024 = vmatpush1.bf16.msra.mxu0 %v3929_v35  ;;  %2077 = vmatpush1.bf16.msra.mxu1 %v3935_v37  ;;  %v4673_v35 = vld [vmem:[#allocation26_spill] sm:$0xff]  ;;  %v4674_v37 = vld [vmem:[#allocation27_spill] sm:$0xff] }
  0xe5   :  { %2143 = vmatprep.subr.bf16.mxu0 %v3940_v39  ;;  %2196 = vmatprep.subr.bf16.mxu1 %v3942_v40  ;;  %v4675_v39 = vld [vmem:[#allocation28_spill] sm:$0xff]  ;;  %v4676_v40 = vld [vmem:[#allocation29_spill] sm:$0xff] }
  0xe7   :  { %3264 = vmatmul.mubr.msk.bf16.gmra.mrb[20].mxu0 %vm119_vm0, %v3883_v23  ;;  %3266 = vmatmul.mubr.msk.bf16.gmra.mrb[20].mxu1 %vm119_vm0, %v3883_v23 }
  0xe8   :  { %2053 = vmatprep.mubr.bf16.mxu0 %v4640_v44  ;;  %2106 = vmatprep.mubr.bf16.mxu1 %v4640_v44 }
  0xef   :  { %3267 = vmatmul.mubr.msk.bf16.vlgmr.msra.gmra.mrb[16].mxu0 %vm119_vm0, %v4014_v25  ;;  %3269 = vmatmul.mubr.msk.bf16.vlgmr.msra.gmra.mrb[16].mxu1 %vm119_vm0, %v4014_v25 }
  0xf0   :  { %2144 = vmatpush1.bf16.msra.mxu0 %v3960_v47  ;;  %2197 = vmatpush1.bf16.msra.mxu1 %v3965_v49  ;;  %v4677_v47 = vld [vmem:[#allocation30_spill] sm:$0xff] }
  0xf1   :  { %2063 = vmatprep.mubr.bf16.mxu0 %v4640_v44  ;;  %2116 = vmatprep.mubr.bf16.mxu1 %v4640_v44 }
  0xf2   :  { %2145 = vmatprep.subr.bf16.mxu0 %v3970_v51  ;;  %2198 = vmatprep.subr.bf16.mxu1 %v3972_v52 }
  0xf4   :  { %2146 = vmatpush1.bf16.msra.mxu0 %v3979_v54  ;;  %2199 = vmatpush1.bf16.msra.mxu1 %v3983_v55  ;;  %v4679_v54 = vld [vmem:[#allocation32_spill] sm:$0xff] }
  0xf5   :  { %2278 = vmatprep.subr.bf16.mxu0 %v3991_v58  ;;  %2331 = vmatprep.subr.bf16.mxu1 %v3993_v59  ;;  %v4680_v58 = vld [vmem:[#allocation33_spill] sm:$0xff]  ;;  %v4681_v59 = vld [vmem:[#allocation34_spill] sm:$0xff] }
  0xf7   :  { %3268 = vmatmul.mubr.msk.bf16.gmra.mrb[20].mxu0 %vm119_vm0, %v4044_v50  ;;  %3270 = vmatmul.mubr.msk.bf16.gmra.mrb[20].mxu1 %vm119_vm0, %v4044_v50 }
  0xf8   :  { %2175 = vmatprep.mubr.bf16.mxu0 %v4640_v44  ;;  %2228 = vmatprep.mubr.bf16.mxu1 %v4640_v44 }
  0xff   :  { %3271 = vmatmul.mubr.msk.bf16.vlgmr.msra.gmra.mrb[16].mxu0 %vm119_vm0, %v4062_v61  ;;  %3273 = vmatmul.mubr.msk.bf16.vlgmr.msra.gmra.mrb[16].mxu1 %vm119_vm0, %v4062_v61 }
 0x100   :  { %2279 = vmatpush1.bf16.msra.mxu0 %v4011_v19  ;;  %2332 = vmatpush1.bf16.msra.mxu1 %v4016_v30 }
 0x101   :  { %2185 = vmatprep.mubr.bf16.mxu0 %v4640_v44  ;;  %2238 = vmatprep.mubr.bf16.mxu1 %v4640_v44 }
 0x102   :  { %2280 = vmatprep.subr.bf16.mxu0 %v4018_v31  ;;  %2333 = vmatprep.subr.bf16.mxu1 %v4020_v32 }
 0x104   :  { %2281 = vmatpush1.bf16.msra.mxu0 %v4029_v42  ;;  %2334 = vmatpush1.bf16.msra.mxu1 %v4031_v43 }
 0x105   :  { %2416 = vmatprep.subr.bf16.mxu0 %v4038_v45  ;;  %2469 = vmatprep.subr.bf16.mxu1 %v4040_v46 }
 0x107   :  { %3272 = vmatmul.mubr.msk.bf16.gmra.mrb[20].mxu0 %vm119_vm0, %v4056_v57  ;;  %3274 = vmatmul.mubr.msk.bf16.gmra.mrb[20].mxu1 %vm119_vm0, %v4056_v57 }
 0x108   :  { %2310 = vmatprep.mubr.bf16.mxu0 %v4640_v44  ;;  %2363 = vmatprep.mubr.bf16.mxu1 %v4640_v44 }
 0x10f   :  { %3276 = vmatmul.mubr.msk.bf16.vlgmr.msra.gmra.mrb[16].mxu0 %vm119_vm0, %v4349_v5  ;;  %3278 = vmatmul.mubr.msk.bf16.vlgmr.msra.gmra.mrb[16].mxu1 %vm119_vm0, %v4349_v5 }
 0x110   :  { %2417 = vmatpush1.bf16.msra.mxu0 %v4064_v62  ;;  %2470 = vmatpush1.bf16.msra.mxu1 %v4655_v6 }
 0x111   :  { %2320 = vmatprep.mubr.bf16.mxu0 %v4640_v44  ;;  %2373 = vmatprep.mubr.bf16.mxu1 %v4640_v44 }
 0x112   :  { %2418 = vmatprep.subr.bf16.mxu0 %v4656_v7  ;;  %2471 = vmatprep.subr.bf16.mxu1 %v4657_v8 }
 0x114   :  { %2419 = vmatpush1.bf16.msra.mxu0 %v4658_v10  ;;  %2472 = vmatpush1.bf16.msra.mxu1 %v4659_v12 }
 0x115   :  { %2522 = vmatprep.subr.bf16.mxu0 %v4660_v13  ;;  %2575 = vmatprep.subr.bf16.mxu1 %v4661_v14 }
 0x117   :  { %3277 = vmatmul.mubr.msk.bf16.gmra.mrb[20].mxu0 %vm119_vm0, %v4345_v4  ;;  %3279 = vmatmul.mubr.msk.bf16.gmra.mrb[20].mxu1 %vm119_vm0, %v4345_v4 }
 0x118   :  { %2448 = vmatprep.mubr.bf16.mxu0 %v4640_v44  ;;  %2501 = vmatprep.mubr.bf16.mxu1 %v4640_v44 }
 0x11f   :  { %3280 = vmatmul.mubr.msk.bf16.vlgmr.msra.gmra.mrb[24].mxu0 %vm119_vm0, %v3963_v48  ;;  %3282 = vmatmul.mubr.msk.bf16.vlgmr.msra.gmra.mrb[24].mxu1 %vm119_vm0, %v3963_v48 }
 0x120   :  { %2523 = vmatpush1.bf16.msra.mxu0 %v4662_v15  ;;  %2576 = vmatpush1.bf16.msra.mxu1 %v4663_v16 }
 0x121   :  { %2458 = vmatprep.mubr.bf16.mxu0 %v4640_v44  ;;  %2511 = vmatprep.mubr.bf16.mxu1 %v4640_v44 }
 0x122   :  { %2524 = vmatprep.subr.bf16.mxu0 %v4664_v18  ;;  %2577 = vmatprep.subr.bf16.mxu1 %v4665_v20 }
 0x124   :  { %2525 = vmatpush1.bf16.msra.mxu0 %v4666_v21  ;;  %2578 = vmatpush1.bf16.msra.mxu1 %v4667_v22 }
 0x125   :  { %2628 = vmatprep.subr.bf16.mxu0 %v4668_v24  ;;  %2681 = vmatprep.subr.bf16.mxu1 %v4669_v28 }
 0x127   :  { %3281 = vmatmul.mubr.msk.bf16.gmra.mrb[28].mxu0 %vm119_vm0, %v3997_v60  ;;  %3283 = vmatmul.mubr.msk.bf16.gmra.mrb[28].mxu1 %vm119_vm0, %v3997_v60 }
 0x128   :  { %2554 = vmatprep.mubr.bf16.mxu0 %v4640_v44  ;;  %2607 = vmatprep.mubr.bf16.mxu1 %v4640_v44 }
 0x12f   :  { %3284 = vmatmul.mubr.msk.bf16.vlgmr.msra.gmra.mrb[24].mxu0 %vm119_vm0, %v3840_v11  ;;  %3286 = vmatmul.mubr.msk.bf16.vlgmr.msra.gmra.mrb[24].mxu1 %vm119_vm0, %v3840_v11 }
 0x130   :  { %2629 = vmatpush1.bf16.msra.mxu0 %v4136_v36  ;;  %2682 = vmatpush1.bf16.msra.mxu1 %v4138_v38 }
 0x131   :  { %2564 = vmatprep.mubr.bf16.mxu0 %v4640_v44  ;;  %2617 = vmatprep.mubr.bf16.mxu1 %v4640_v44 }
 0x132   :  { %2630 = vmatprep.subr.bf16.mxu0 %v4670_v29  ;;  %2683 = vmatprep.subr.bf16.mxu1 %v4671_v33 }
 0x134   :  { %2631 = vmatpush1.bf16.msra.mxu0 %v4672_v34  ;;  %2684 = vmatpush1.bf16.msra.mxu1 %v4673_v35 }
 0x135   :  { %2750 = vmatprep.subr.bf16.mxu0 %v4674_v37  ;;  %2803 = vmatprep.subr.bf16.mxu1 %v4675_v39 }
 0x137   :  { %3285 = vmatmul.mubr.msk.bf16.gmra.mrb[28].mxu0 %vm119_vm0, %v3883_v23  ;;  %3287 = vmatmul.mubr.msk.bf16.gmra.mrb[28].mxu1 %vm119_vm0, %v3883_v23 }
 0x138   :  { %2660 = vmatprep.mubr.bf16.mxu0 %v4640_v44  ;;  %2713 = vmatprep.mubr.bf16.mxu1 %v4640_v44 }
 0x13f   :  { %3288 = vmatmul.mubr.msk.bf16.vlgmr.msra.gmra.mrb[24].mxu0 %vm119_vm0, %v4014_v25  ;;  %3290 = vmatmul.mubr.msk.bf16.vlgmr.msra.gmra.mrb[24].mxu1 %vm119_vm0, %v4014_v25 }
 0x140   :  { %2751 = vmatpush1.bf16.msra.mxu0 %v4172_v27  ;;  %2804 = vmatpush1.bf16.msra.mxu1 %v4174_v0  ;;  %v4678_v0 = vld [vmem:[#allocation31_spill] sm:$0xff] }
 0x141   :  { %2670 = vmatprep.mubr.bf16.mxu0 %v4640_v44  ;;  %2723 = vmatprep.mubr.bf16.mxu1 %v4640_v44 }
 0x142   :  { %v4419_v11 = vpop.f32.mrb[0].mxu0  ;;  %v4421_v23 = vpop.f32.mrb[0].mxu1  ;;  %2752 = vmatprep.subr.bf16.mxu0 %v4676_v40  ;;  %2805 = vmatprep.subr.bf16.mxu1 %v4677_v47 }
 0x143   :  { %v4425_v48 = vpop.f32.mrb[1].mxu0  ;;  %v4427_v49 = vpop.f32.mrb[1].mxu1 }
 0x144   :  { %v4429_v51 = vpop.f32.mrb[2].mxu0  ;;  %v4431_v52 = vpop.f32.mrb[2].mxu1  ;;  %2753 = vmatpush1.bf16.msra.mxu0 %v4678_v0  ;;  %2806 = vmatpush1.bf16.msra.mxu1 %v4679_v54 }
 0x145   :  { %v4435_v55 = vpop.f32.mrb[3].mxu0  ;;  %v4437_v56 = vpop.f32.mrb[3].mxu1  ;;  %2872 = vmatprep.subr.bf16.mxu0 %v4680_v58  ;;  %2925 = vmatprep.subr.bf16.mxu1 %v4681_v59 }
 0x147   :  { %3289 = vmatmul.mubr.msk.bf16.gmra.mrb[28].mxu0 %vm119_vm0, %v4044_v50  ;;  %3291 = vmatmul.mubr.msk.bf16.gmra.mrb[28].mxu1 %vm119_vm0, %v4044_v50 }
 0x148   :  { %2782 = vmatprep.mubr.bf16.mxu0 %v4640_v44  ;;  %2835 = vmatprep.mubr.bf16.mxu1 %v4640_v44 }
 0x14a   :  { %v4447_v60 = vpop.f32.mrb[4].mxu0  ;;  %v4449_v19 = vpop.f32.mrb[4].mxu1 }
 0x14b   :  { %v4451_v25 = vpop.f32.mrb[5].mxu0  ;;  %v4453_v30 = vpop.f32.mrb[5].mxu1 }
 0x14c   :  { %v4455_v31 = vpop.f32.mrb[6].mxu0  ;;  %v4457_v32 = vpop.f32.mrb[6].mxu1 }
 0x14d   :  { %v4459_v42 = vpop.f32.mrb[7].mxu0  ;;  %v4461_v43 = vpop.f32.mrb[7].mxu1 }
 0x14f   :  { %3292 = vmatmul.mubr.msk.bf16.vlgmr.msra.gmra.mrb[24].mxu0 %vm119_vm0, %v4062_v61  ;;  %3294 = vmatmul.mubr.msk.bf16.vlgmr.msra.gmra.mrb[24].mxu1 %vm119_vm0, %v4062_v61 }
 0x150   :  { %2873 = vmatpush1.bf16.msra.mxu0 %v4208_v63  ;;  %2926 = vmatpush1.bf16.msra.mxu1 %v4210_v9 }
 0x151   :  { %2792 = vmatprep.mubr.bf16.mxu0 %v4640_v44  ;;  %2845 = vmatprep.mubr.bf16.mxu1 %v4640_v44 }
 0x152   :  { %2874 = vmatprep.subr.bf16.mxu0 %v4212_v41  ;;  %2927 = vmatprep.subr.bf16.mxu1 %v4214_v26 }
 0x154   :  { %2875 = vmatpush1.bf16.msra.mxu0 %v4222_v53  ;;  %2928 = vmatpush1.bf16.msra.mxu1 %v4224_v17 }
 0x157   :  { %3293 = vmatmul.mubr.msk.bf16.gmra.mrb[28].mxu0 %vm119_vm0, %v4056_v57  ;;  %3295 = vmatmul.mubr.msk.bf16.gmra.mrb[28].mxu1 %vm119_vm0, %v4056_v57 }
 0x158   :  { %2904 = vmatprep.mubr.bf16.mxu0 %v4640_v44  ;;  %2957 = vmatprep.mubr.bf16.mxu1 %v4640_v44 }
 0x15f   :  { %3296 = vmatmul.mubr.msk.bf16.vlgmr.msra.gmra.mrb[24].mxu0 %vm119_vm0, %v4349_v5  ;;  %3298 = vmatmul.mubr.msk.bf16.vlgmr.msra.gmra.mrb[24].mxu1 %vm119_vm0, %v4349_v5 }
 0x160   :  { %2914 = vmatprep.mubr.bf16.mxu0 %v4640_v44  ;;  %2967 = vmatprep.mubr.bf16.mxu1 %v4640_v44 }
 0x167   :  { %3297 = vmatmul.mubr.msk.bf16.gmra.mrb[28].mxu0 %vm119_vm0, %v4345_v4  ;;  %3299 = vmatmul.mubr.msk.bf16.gmra.mrb[28].mxu1 %vm119_vm0, %v4345_v4 }
 0x192   :  { %v1705_v45 = vpop.f32.mrb[8].mxu0  ;;  %v1758_v46 = vpop.f32.mrb[8].mxu1 }
 0x193   :  { %v1793_v50 = vmax.f32 %v4419_v11, %v1705_v45  ;;  %v1795_v57 = vmax.f32 %v4421_v23, %v1758_v46  ;;  %v1707_v61 = vpop.f32.mrb[9].mxu0  ;;  %v1760_v62 = vpop.f32.mrb[9].mxu1  ;;  %v3012_v45 = vlaneseq }
 0x194   :  { %v1794_v63 = vmax.f32 %v4425_v48, %v1707_v61  ;;  %v1796_v9 = vmax.f32 %v4427_v49, %v1760_v62  ;;  %v1709_v17 = vpop.f32.mrb[10].mxu0  ;;  %v1762_v36 = vpop.f32.mrb[10].mxu1  ;;  %v3010_v61 = vld [vmem:[#allocation4] sm:$0xf] }
 0x195   :  { %v1797_v38 = vmax.f32 %v4429_v51, %v1709_v17  ;;  %v1799_v44 = vmax.f32 %v4431_v52, %v1762_v36  ;;  %v1711_v53 = vpop.f32.mrb[11].mxu0  ;;  %v1764_v26 = vpop.f32.mrb[11].mxu1  ;;  %v3013_v46 = vshrl.u32 %v3012_v45, 7 }
 0x196   :  { %v1798_v27 = vmax.f32 %v4435_v55, %v1711_v53  ;;  %v1800_v41 = vmax.f32 %v4437_v56, %v1764_v26 }
 0x197   :  { %v3018_v62 = vsub.s32 1, %v3013_v46 }
 0x19a   :  { %v1715_v1 = vpop.f32.mrb[12].mxu0  ;;  %v1768_v2 = vpop.f32.mrb[12].mxu1 }
 0x19b   :  { %v1801_v3 = vmax.f32 %v4447_v60, %v1715_v1  ;;  %v1803_v4 = vmax.f32 %v4449_v19, %v1768_v2  ;;  %v1717_v5 = vpop.f32.mrb[13].mxu0  ;;  %v1770_v6 = vpop.f32.mrb[13].mxu1 }
 0x19c   :  { %v1802_v7 = vmax.f32 %v4451_v25, %v1717_v5  ;;  %v1804_v8 = vmax.f32 %v4453_v30, %v1770_v6  ;;  %v1719_v10 = vpop.f32.mrb[14].mxu0  ;;  %v1772_v12 = vpop.f32.mrb[14].mxu1 }
 0x19d   :  { %v1805_v13 = vmax.f32 %v4455_v31, %v1719_v10  ;;  %v1807_v14 = vmax.f32 %v4457_v32, %v1772_v12  ;;  %v1721_v15 = vpop.f32.mrb[15].mxu0  ;;  %v1774_v16 = vpop.f32.mrb[15].mxu1 }
 0x19e   :  { %v1806_v18 = vmax.f32 %v4459_v42, %v1721_v15  ;;  %v1808_v20 = vmax.f32 %v4461_v43, %v1774_v16 }
 0x1e2   :  { %v2312_v21 = vpop.f32.mrb[16].mxu0  ;;  %v2365_v22 = vpop.f32.mrb[16].mxu1 }
 0x1e3   :  { %v2400_v24 = vmax.f32 %v1793_v50, %v2312_v21  ;;  %v2402_v28 = vmax.f32 %v1795_v57, %v2365_v22  ;;  %v2314_v29 = vpop.f32.mrb[17].mxu0  ;;  %v2367_v33 = vpop.f32.mrb[17].mxu1  ;;  %v3014_v50 = vsub.s32 0, %v3013_v46  ;;  %v3022_v57 = vsub.s32 2, %v3013_v46 }
 0x1e4   :  { %v2401_v34 = vmax.f32 %v1794_v63, %v2314_v29  ;;  %v2403_v35 = vmax.f32 %v1796_v9, %v2367_v33  ;;  %v2316_v37 = vpop.f32.mrb[18].mxu0  ;;  %v2369_v39 = vpop.f32.mrb[18].mxu1  ;;  %v3026_v63 = vsub.s32 3, %v3013_v46 }
 0x1e5   :  { %v2404_v11 = vmax.f32 %v1797_v38, %v2316_v37  ;;  %v2406_v23 = vmax.f32 %v1799_v44, %v2369_v39  ;;  %v2318_v40 = vpop.f32.mrb[19].mxu0  ;;  %v2371_v47 = vpop.f32.mrb[19].mxu1  ;;  %v4523_v9 = vrot.slane %v3010_v61, %v3014_v50  ;;  %v4525_v17 = vrot.slane %v3010_v61, %v3022_v57 }
 0x1e6   :  { %v2405_v48 = vmax.f32 %v1798_v27, %v2318_v40  ;;  %v2407_v49 = vmax.f32 %v1800_v41, %v2371_v47  ;;  %v4527_v44 = vrot.slane %v3010_v61, %v3018_v62  ;;  %v4529_v53 = vrot.slane %v3010_v61, %v3026_v63 }
 0x1ea   :  { %v2322_v51 = vpop.f32.mrb[20].mxu0  ;;  %v2375_v52 = vpop.f32.mrb[20].mxu1 }
 0x1eb   :  { %v4507_v0 = vmax.f32 %v1801_v3, %v2322_v51  ;;  %v4509_v54 = vmax.f32 %v1803_v4, %v2375_v52  ;;  %v2324_v55 = vpop.f32.mrb[21].mxu0  ;;  %v2377_v56 = vpop.f32.mrb[21].mxu1 }
 0x1ec   :  { %v4511_v58 = vmax.f32 %v1802_v7, %v2324_v55  ;;  %v4513_v59 = vmax.f32 %v1804_v8, %v2377_v56  ;;  %v2326_v60 = vpop.f32.mrb[22].mxu0  ;;  %v2379_v19 = vpop.f32.mrb[22].mxu1 }
 0x1ed   :  { %v4515_v25 = vmax.f32 %v1805_v13, %v2326_v60  ;;  %v4517_v30 = vmax.f32 %v1807_v14, %v2379_v19  ;;  %v2328_v31 = vpop.f32.mrb[23].mxu0  ;;  %v2381_v32 = vpop.f32.mrb[23].mxu1 }
 0x1ee   :  { %v4519_v42 = vmax.f32 %v1806_v18, %v2328_v31  ;;  %v4521_v43 = vmax.f32 %v1808_v20, %v2381_v32 }
 0x232   :  { %v2906_v36 = vpop.f32.mrb[24].mxu0  ;;  %v2959_v38 = vpop.f32.mrb[24].mxu1 }
 0x233   :  { %v2994_v26 = vmax.f32 %v2400_v24, %v2906_v36  ;;  %v2996_v27 = vmax.f32 %v2402_v28, %v2959_v38  ;;  %v2908_v41 = vpop.f32.mrb[25].mxu0  ;;  %v2961_v1 = vpop.f32.mrb[25].mxu1 }
 0x234   :  { %v2995_v2 = vmax.f32 %v2401_v34, %v2908_v41  ;;  %v2997_v3 = vmax.f32 %v2403_v35, %v2961_v1  ;;  %v2910_v4 = vpop.f32.mrb[26].mxu0  ;;  %v2963_v5 = vpop.f32.mrb[26].mxu1 }
 0x235   :  { %v3032_v6 = vadd.f32 %v4523_v9, %v2994_v26  ;;  %v3034_v7 = vadd.f32 %v4525_v17, %v2996_v27  ;;  %v2998_v8 = vmax.f32 %v2404_v11, %v2910_v4  ;;  %v3000_v10 = vmax.f32 %v2406_v23, %v2963_v5  ;;  %v2912_v12 = vpop.f32.mrb[27].mxu0  ;;  %v2965_v13 = vpop.f32.mrb[27].mxu1 }
 0x236   :  { %v3033_v14 = vadd.f32 %v4527_v44, %v2995_v2  ;;  %v3035_v15 = vadd.f32 %v4529_v53, %v2997_v3  ;;  %v2999_v16 = vmax.f32 %v2405_v48, %v2912_v12  ;;  %v3001_v18 = vmax.f32 %v2407_v49, %v2965_v13 }
 0x237   :  { %v3048_v20 = vmax.f32 %v3032_v6, 0.0  ;;  %v3050_v21 = vmax.f32 %v3034_v7, 0.0  ;;  %v3036_v22 = vadd.f32 %v4523_v9, %v2998_v8  ;;  %v3038_v24 = vadd.f32 %v4525_v17, %v3000_v10 }
 0x238   :  { %v3049_v28 = vmax.f32 %v3033_v14, 0.0  ;;  %v3051_v29 = vmax.f32 %v3035_v15, 0.0  ;;  %v3037_v33 = vadd.f32 %v4527_v44, %v2999_v16  ;;  %v3039_v34 = vadd.f32 %v4529_v53, %v3001_v18 }
 0x239   :  { %v3052_v37 = vmax.f32 %v3036_v22, 0.0  ;;  %v3054_v39 = vmax.f32 %v3038_v24, 0.0 }
 0x23a   :  { %v3308_v11 = vpack.c.bf16 %v3049_v28, %v3048_v20  ;;  %v3309_v23 = vpack.c.bf16 %v3051_v29, %v3050_v21  ;;  %v3053_v40 = vmax.f32 %v3037_v33, 0.0  ;;  %v3055_v47 = vmax.f32 %v3039_v34, 0.0  ;;  %v2916_v48 = vpop.f32.mrb[28].mxu0  ;;  %v2969_v49 = vpop.f32.mrb[28].mxu1 }
 0x23b   :  { %v3002_v51 = vmax.f32 %v4507_v0, %v2916_v48  ;;  %v3004_v52 = vmax.f32 %v4509_v54, %v2969_v49  ;;  %v2918_v55 = vpop.f32.mrb[29].mxu0  ;;  %v2971_v56 = vpop.f32.mrb[29].mxu1 }
 0x23c   :  { %3112 = vst [vmem:[%s4597_s4] sm:$0xff] %v3308_v11  ;;  %3116 = vst.msk [vmem:[%s4597_s4 + $0x8] sm:$0xff] %vm4541_vm5, %v3309_v23  ;;  %v3310_v60 = vpack.c.bf16 %v3053_v40, %v3052_v37  ;;  %v3311_v19 = vpack.c.bf16 %v3055_v47, %v3054_v39  ;;  %v3003_v0 = vmax.f32 %v4511_v58, %v2918_v55  ;;  %v2920_v31 = vpop.f32.mrb[30].mxu0  ;;  %v2973_v32 = vpop.f32.mrb[30].mxu1 }
 0x23d   :  { %v3005_v54 = vmax.f32 %v4513_v59, %v2971_v56  ;;  %v3040_v45 = vadd.f32 %v4523_v9, %v3002_v51  ;;  %v3042_v46 = vadd.f32 %v4525_v17, %v3004_v52  ;;  %v3006_v50 = vmax.f32 %v4515_v25, %v2920_v31  ;;  %v2922_v61 = vpop.f32.mrb[31].mxu0  ;;  %v2975_v62 = vpop.f32.mrb[31].mxu1 }
 0x23e   :  { %v3008_v57 = vmax.f32 %v4517_v30, %v2973_v32  ;;  %3117 = vst [vmem:[%s4597_s4 + $0x10] sm:$0xff] %v3310_v60  ;;  %3118 = vst.msk [vmem:[%s4597_s4 + $0x18] sm:$0xff] %vm4541_vm5, %v3311_v19  ;;  %v3041_v58 = vadd.f32 %v4527_v44, %v3003_v0  ;;  %v3007_v25 = vmax.f32 %v4519_v42, %v2922_v61 }
 0x23f   :  { %v3043_v59 = vadd.f32 %v4529_v53, %v3005_v54  ;;  %v3009_v30 = vmax.f32 %v4521_v43, %v2975_v62  ;;  %v3056_v63 = vmax.f32 %v3040_v45, 0.0  ;;  %v3058_v36 = vmax.f32 %v3042_v46, 0.0 }
 0x240   :  { %v3044_v38 = vadd.f32 %v4523_v9, %v3006_v50  ;;  %v3046_v26 = vadd.f32 %v4525_v17, %v3008_v57  ;;  %v3057_v27 = vmax.f32 %v3041_v58, 0.0  ;;  %v3045_v1 = vadd.f32 %v4527_v44, %v3007_v25 }
 0x241   :  { %v3059_v41 = vmax.f32 %v3043_v59, 0.0  ;;  %v3047_v2 = vadd.f32 %v4529_v53, %v3009_v30 }
 0x242   :  { %v3060_v3 = vmax.f32 %v3044_v38, 0.0  ;;  %v3062_v4 = vmax.f32 %v3046_v26, 0.0  ;;  %v3312_v5 = vpack.c.bf16 %v3057_v27, %v3056_v63  ;;  %v3061_v7 = vmax.f32 %v3045_v1, 0.0 }
 0x243   :  { %v3313_v6 = vpack.c.bf16 %v3059_v41, %v3058_v36  ;;  %v3063_v42 = vmax.f32 %v3047_v2, 0.0 }
 0x244   :  { %3119 = vst [vmem:[%s4597_s4 + $0x20] sm:$0xff] %v3312_v5  ;;  %v3314_v43 = vpack.c.bf16 %v3061_v7, %v3060_v3 }
 0x245   :  { %3120 = vst.msk [vmem:[%s4597_s4 + $0x28] sm:$0xff] %vm4541_vm5, %v3313_v6  ;;  %v3315_v9 = vpack.c.bf16 %v3063_v42, %v3062_v4 }
 0x246   :  { %3121 = vst [vmem:[%s4597_s4 + $0x30] sm:$0x77] %v3314_v43 }
 0x247   :  { %3125 = vst.msk [vmem:[%s4597_s4 + $0x38] sm:$0x77] %vm3124_vm8, %v3315_v9 }
 0x248   :  { %3130 = vsyncpa [#allocation3], 1 }
 0x249   :  { %3131 = vsyncpa [#allocation5], 1 }

// kernel: classifier_cnn3_forward.7
= control target key start
LH: loop header
LB: loop body
LE: loop exit
PB: predicated region body
PF: predicated region fallthrough
CT: control target
= control target key end

     0   :  { %v790_v33 = vmov 0.0   ;;  %vm791_vm0 = vmmov 0   ;;  %vm347_vm1 = vcmask 523264   ;;  %s981_s1 = inlined_call_operand.vmem [shape: bf16[576,128], index: 1, kind: input, shape index: {}]   ;;  %s982_s0 = inlined_call_operand.vmem [shape: bf16[16,576], index: 0, kind: input, shape index: {}]   ;;  %s983_s3 = inlined_call_operand.vmem [shape: bf16[128,128], index: 3, kind: input, shape index: {}]   ;;  %s984_s2 = inlined_call_operand.vmem [shape: f32[1,128], index: 2, kind: input, shape index: {}]   ;;  %s985_s4 = inlined_call_operand.vmem [shape: f32[1,128], index: 4, kind: input, shape index: {}]   ;;  %s986_s5 = inlined_call_operand.vmem [shape: f32[16,128], index: 5, kind: output, shape index: {}]  }
   0x1   :  { %v739_v0 = vld [vmem:[%s981_s1 + $0x40] sm:$0xff]   ;;  %v743_v4 = vld [vmem:[%s981_s1 + $0x48] sm:$0xff]   ;;  %v747_v8 = vld [vmem:[%s981_s1 + $0x50] sm:$0xff]  }
   0x2   :  { %v740_v1 = vld [vmem:[%s981_s1] sm:$0xff]   ;;  %647 = vmatprep.subr.bf16.mxu0 %v739_v0  ;;  %v744_v5 = vld [vmem:[%s981_s1 + $0x8] sm:$0xff]   ;;  %v748_v9 = vld [vmem:[%s981_s1 + $0x10] sm:$0xff]  }
   0x3   :  { %v741_v2 = vld [vmem:[%s981_s1 + $0xc0] sm:$0xff]   ;;  %648 = vmatpush3.bf16.msra.mxu0 %v740_v1  ;;  %v745_v6 = vld [vmem:[%s981_s1 + $0xc8] sm:$0xff]   ;;  %v749_v10 = vld [vmem:[%s981_s1 + $0xd0] sm:$0xff]  }
   0x4   :  { %v742_v3 = vld [vmem:[%s981_s1 + $0x80] sm:$0xff]   ;;  %669 = vmatprep.subr.bf16.mxu1 %v741_v2  ;;  %649 = vmatprep.subr.bf16.mxu0 %v743_v4  ;;  %v746_v7 = vld [vmem:[%s981_s1 + $0x88] sm:$0xff]   ;;  %v750_v11 = vld [vmem:[%s981_s1 + $0x90] sm:$0xff]  }
   0x5   :  { %670 = vmatpush3.bf16.msra.mxu1 %v742_v3  ;;  %v751_v12 = vld [vmem:[%s981_s1 + $0x58] sm:$0xff]   ;;  %v755_v16 = vld [vmem:[%s981_s1 + $0x60] sm:$0xff]   ;;  %v759_v20 = vld [vmem:[%s981_s1 + $0x68] sm:$0xff]  }
   0x6   :  { %671 = vmatprep.subr.bf16.mxu1 %v745_v6  ;;  %v752_v13 = vld [vmem:[%s981_s1 + $0x18] sm:$0xff]   ;;  %v756_v17 = vld [vmem:[%s981_s1 + $0x20] sm:$0xff]   ;;  %v760_v21 = vld [vmem:[%s981_s1 + $0x28] sm:$0xff]  }
   0x7   :  { %650 = vmatpush3.bf16.msra.mxu0 %v744_v5  ;;  %v753_v14 = vld [vmem:[%s981_s1 + $0xd8] sm:$0xff]   ;;  %v757_v18 = vld [vmem:[%s981_s1 + $0xe0] sm:$0xff]   ;;  %v761_v22 = vld [vmem:[%s981_s1 + $0xe8] sm:$0xff]  }
   0x8   :  { %651 = vmatprep.subr.bf16.mxu0 %v747_v8  ;;  %v754_v15 = vld [vmem:[%s981_s1 + $0x98] sm:$0xff]   ;;  %v758_v19 = vld [vmem:[%s981_s1 + $0xa0] sm:$0xff]   ;;  %v762_v23 = vld [vmem:[%s981_s1 + $0xa8] sm:$0xff]  }
   0x9   :  { %672 = vmatpush3.bf16.msra.mxu1 %v746_v7  ;;  %v763_v24 = vld [vmem:[%s981_s1 + $0x70] sm:$0xff]   ;;  %v767_v28 = vld [vmem:[%s981_s1 + $0x78] sm:$0xff]   ;;  %v776_v36 = vld [vmem:[%s982_s0 + $0xc] ss:$20 sps:$4 sm:$0xff]  }
   0xa   :  { %673 = vmatprep.subr.bf16.mxu1 %v749_v10  ;;  %v764_v25 = vld [vmem:[%s981_s1 + $0x30] sm:$0xff]   ;;  %v768_v29 = vld [vmem:[%s981_s1 + $0x38] sm:$0xff]   ;;  %v777_v37 = vld [vmem:[%s981_s1 + $0x100] sm:$0xff]   ;;  %424 = vmatprep.mubr.bf16.mxu1 %v776_v36 }
   0xb   :  { %652 = vmatpush3.bf16.msra.mxu0 %v748_v9  ;;  %v765_v26 = vld [vmem:[%s981_s1 + $0xf0] sm:$0xff]   ;;  %v769_v30 = vld [vmem:[%s981_s1 + $0xf8] sm:$0xff]   ;;  %v778_v38 = vld [vmem:[%s981_s1 + $0x108] sm:$0xff]  }
   0xc   :  { %653 = vmatprep.subr.bf16.mxu0 %v751_v12  ;;  %v766_v27 = vld [vmem:[%s981_s1 + $0xb0] sm:$0xff]   ;;  %v772_v32 = vld [vmem:[%s982_s0 + $0x4] ss:$20 sps:$4 sm:$0xff]   ;;  %v774_v35 = vld [vmem:[%s982_s0 + $0x8] ss:$20 sps:$4 sm:$0xff]  }
   0xd   :  { %674 = vmatpush3.bf16.msra.mxu1 %v750_v11  ;;  %v770_v31 = vld [vmem:[%s982_s0] ss:$20 sps:$4 sm:$0xff]   ;;  %v773_v34 = vld [vmem:[%s981_s1 + $0xb8] sm:$0xff]   ;;  %383 = vmatprep.mubr.bf16.mxu0 %v772_v32  ;;  %v783_v41 = vld [vmem:[%s983_s3 + $0x8] sm:$0xff]  }
   0xe   :  { %675 = vmatprep.subr.bf16.mxu1 %v753_v14  ;;  %v779_v39 = vld [vmem:[%s981_s1 + $0x110] sm:$0xff]   ;;  %v782_v40 = vld [vmem:[%s983_s3] sm:$0xff]   ;;  %v780_v42 = vld [vmem:[%s981_s1 + $0x118] sm:$0xff]  }
   0xf   :  { %654 = vmatpush3.bf16.msra.mxu0 %v752_v13  ;;  %v781_v43 = vld [vmem:[%s982_s0 + $0x10] ss:$20 sps:$4 sm:$0xff]   ;;  %v785_v45 = vld [vmem:[%s983_s3 + $0x18] sm:$0xff]   ;;  %v787_v47 = vld [vmem:[%s983_s3 + $0x28] sm:$0xff]  }
  0x10   :  { %655 = vmatprep.subr.bf16.mxu0 %v755_v16  ;;  %v784_v44 = vld [vmem:[%s983_s3 + $0x10] sm:$0xff]   ;;  %v786_v46 = vld [vmem:[%s983_s3 + $0x20] sm:$0xff]   ;;  %v789_v49 = vld [vmem:[%s983_s3 + $0x38] sm:$0xff]  }
  0x11   :  { %676 = vmatpush3.bf16.msra.mxu1 %v754_v15  ;;  %v788_v48 = vld [vmem:[%s983_s3 + $0x30] sm:$0xff]   ;;  %v595_v51 = vld [vmem:[%s984_s2] ss:$0 sm:$0xff] }
  0x12   :  { %677 = vmatprep.subr.bf16.mxu1 %v757_v18  ;;  %v638_v12 = vld [vmem:[%s985_s4] ss:$0 sm:$0xff] }
  0x13   :  { %656 = vmatpush3.bf16.msra.mxu0 %v756_v17 }
  0x14   :  { %657 = vmatprep.subr.bf16.mxu0 %v759_v20 }
  0x15   :  { %678 = vmatpush3.bf16.msra.mxu1 %v758_v19 }
  0x16   :  { %679 = vmatprep.subr.bf16.mxu1 %v761_v22 }
  0x17   :  { %658 = vmatpush3.bf16.msra.mxu0 %v760_v21 }
  0x18   :  { %659 = vmatprep.subr.bf16.mxu0 %v763_v24 }
  0x19   :  { %680 = vmatpush3.bf16.msra.mxu1 %v762_v23 }
  0x1a   :  { %681 = vmatprep.subr.bf16.mxu1 %v765_v26 }
  0x1b   :  { %660 = vmatpush3.bf16.msra.mxu0 %v764_v25 }
  0x1c   :  { %661 = vmatprep.subr.bf16.mxu0 %v767_v28 }
  0x1d   :  { %682 = vmatpush3.bf16.msra.mxu1 %v766_v27 }
  0x1e   :  { %683 = vmatprep.subr.bf16.mxu1 %v769_v30 }
  0x1f   :  { %662 = vmatpush3.bf16.msra.mxu0 %v768_v29 }
  0x20   :  { %705 = vmatprep.subr.bf16.mxu0 %v790_v33 }
  0x21   :  { %684 = vmatpush3.bf16.msra.mxu1 %v773_v34 }
  0x22   :  { %384 = vmatmul.mubr.bf16.vlgmr.msra.gmra.mrb[0].mxu0 %v770_v31  ;;  %717 = vmatprep.subr.bf16.mxu1 %v790_v33 }
  0x23   :  { %713 = vmatprep.mubr.msk.bf16.mxu0 %vm791_vm0, %v790_v33  ;;  %706 = vmatpush3.bf16.msra.mxu0 %v777_v37 }
  0x24   :  { %425 = vmatmul.mubr.bf16.vlgmr.msra.gmra.mrb[0].mxu1 %v774_v35  ;;  %707 = vmatprep.subr.bf16.mxu0 %v790_v33 }
  0x25   :  { %733 = vmatprep.mubr.msk.bf16.mxu1 %vm791_vm0, %v790_v33  ;;  %718 = vmatpush3.bf16.msra.mxu1 %v782_v40 }
  0x26   :  { %719 = vmatprep.subr.bf16.mxu1 %v790_v33 }
  0x27   :  { %708 = vmatpush3.bf16.msra.mxu0 %v778_v38 }
  0x28   :  { %709 = vmatprep.subr.bf16.mxu0 %v790_v33 }
  0x29   :  { %720 = vmatpush3.bf16.msra.mxu1 %v783_v41 }
  0x2a   :  { %721 = vmatprep.subr.bf16.mxu1 %v790_v33 }
  0x2b   :  { %710 = vmatpush3.bf16.msra.mxu0 %v779_v39 }
  0x2c   :  { %711 = vmatprep.subr.bf16.mxu0 %v790_v33 }
  0x2d   :  { %722 = vmatpush3.bf16.msra.mxu1 %v784_v44 }
  0x2e   :  { %723 = vmatprep.subr.bf16.mxu1 %v790_v33 }
  0x2f   :  { %712 = vmatpush3.bf16.msra.mxu0 %v780_v42 }
  0x31   :  { %724 = vmatpush3.bf16.msra.mxu1 %v785_v45 }
  0x32   :  { %714 = vmatmul.mubr.msk.bf16.vlgmr.msra.gmra.mrb[4].mxu0 %vm347_vm1, %v781_v43  ;;  %725 = vmatprep.subr.bf16.mxu1 %v790_v33 }
  0x35   :  { %726 = vmatpush3.bf16.msra.mxu1 %v786_v46 }
  0x36   :  { %727 = vmatprep.subr.bf16.mxu1 %v790_v33 }
  0x39   :  { %728 = vmatpush3.bf16.msra.mxu1 %v787_v47 }
  0x3a   :  { %729 = vmatprep.subr.bf16.mxu1 %v790_v33 }
  0x3d   :  { %730 = vmatpush3.bf16.msra.mxu1 %v788_v48 }
  0x3e   :  { %731 = vmatprep.subr.bf16.mxu1 %v790_v33 }
  0x41   :  { %732 = vmatpush3.bf16.msra.mxu1 %v789_v49 }
  0xf5   :  { %v663_v50 = vpop.f32.mrb[0].mxu0 }
  0xf6   :  { %v664_v52 = vpop.f32.mrb[1].mxu0 }
  0xf7   :  { %v665_v53 = vadd.f32 %v664_v52, %v663_v50  ;;  %v666_v54 = vpop.f32.mrb[2].mxu0  ;;  %v685_v55 = vpop.f32.mrb[0].mxu1 }
  0xf8   :  { %v667_v56 = vpop.f32.mrb[3].mxu0  ;;  %v686_v59 = vpop.f32.mrb[1].mxu1 }
  0xf9   :  { %v386_v57 = vadd.f32 %v665_v53, %v595_v51  ;;  %v668_v58 = vadd.f32 %v667_v56, %v666_v54  ;;  %v687_v60 = vadd.f32 %v686_v59, %v685_v55  ;;  %v688_v61 = vpop.f32.mrb[2].mxu1 }
  0xfa   :  { %v689_v63 = vpop.f32.mrb[3].mxu1 }
  0xfb   :  { %v389_v62 = vadd.f32 %v668_v58, %v595_v51  ;;  %v690_v0 = vadd.f32 %v689_v63, %v688_v61  ;;  %v427_v1 = vadd.f32 %v687_v60, %v386_v57 }
  0xfd   :  { %v430_v2 = vadd.f32 %v690_v0, %v389_v62 }
 0x105   :  { %v467_v3 = vpop.f32.mrb[4].mxu0 }
 0x106   :  { %v468_v4 = vadd.f32 %v467_v3, %v427_v1  ;;  %v715_v5 = vpop.f32.mrb[5].mxu0 }
 0x107   :  { %v470_v6 = vpop.f32.mrb[6].mxu0 }
 0x108   :  { %v471_v7 = vadd.f32 %v470_v6, %v430_v2  ;;  %v716_v8 = vpop.f32.mrb[7].mxu0  ;;  %v474_v9 = vmax.f32 %v468_v4, 0.0 }
 0x10a   :  { %v475_v10 = vmax.f32 %v471_v7, 0.0 }
 0x10c   :  { %v476_v11 = vpack.c.bf16 %v475_v10, %v474_v9 }
 0x10e   :  { %734 = vmatmul.mubr.bf16.vlgmr.msra.gmra.mrb[4].mxu1 %v476_v11 }
 0x1e1   :  { %v582_v13 = vpop.f32.mrb[4].mxu1 }
 0x1e2   :  { %v583_v14 = vadd.f32 %v638_v12, %v582_v13  ;;  %v735_v15 = vpop.f32.mrb[5].mxu1 }
 0x1e3   :  { %v585_v16 = vpop.f32.mrb[6].mxu1 }
 0x1e4   :  { %589 = vst [vmem:[%s986_s5] sm:$0xff] %v583_v14  ;;  %v586_v17 = vadd.f32 %v638_v12, %v585_v16  ;;  %v736_v18 = vpop.f32.mrb[7].mxu1 }
 0x1e6   :  { %590 = vst [vmem:[%s986_s5 + $0x8] sm:$0xff] %v586_v17 }

// kernel: classifier_cnn3_forward.5
= control target key start
LH: loop header
LB: loop body
LE: loop exit
PB: predicated region body
PF: predicated region fallthrough
CT: control target
= control target key end

     0   :  { %vm6925_vm0 = vcmask 1043456   ;;  %vm6926_vm1 = vcmask 523268   ;;  %vm6930_vm2 = vsmask.f32 3328  ;;  %vm6932_vm3 = vcmask 1047556   ;;  %s15435_s2 = inlined_call_operand.vmem [shape: bf16[6,512,448], index: 2, kind: input, shape index: {}]   ;;  %s15436_s1 = inlined_call_operand.vmem [shape: bf16[16,512], index: 1, kind: input, shape index: {}]   ;;  %s15437_s0 = inlined_call_operand.vmem [shape: bf16[16,512], index: 0, kind: input, shape index: {}]   ;;  %s15438_s3 = inlined_call_operand.vmem [shape: f32[1,448], index: 3, kind: input, shape index: {}]   ;;  %s15439_s4 = inlined_call_operand.vmem [shape: bf16[16,448], index: 4, kind: output, shape index: {}]  }
   0x1   :  { %v8533_v0 = vld [vmem:[%s15435_s2 + $0x404] ss:$16 sps:$4 sm:$0xff]   ;;  %v8535_v1 = vld [vmem:[%s15435_s2 + $0x40c] ss:$16 sps:$4 sm:$0xff]   ;;  %v8537_v2 = vld [vmem:[%s15435_s2 + $0x400] ss:$16 sps:$4 sm:$0xff]  }
   0x2   :  { %942 = vmatprep.subr.bf16.mxu0 %v8533_v0  ;;  %v8538_v3 = vld [vmem:[%s15435_s2 + $0x408] ss:$16 sps:$4 sm:$0xff]   ;;  %1028 = vmatprep.subr.bf16.mxu1 %v8535_v1  ;;  %v8539_v4 = vld [vmem:[%s15435_s2 + $0x424] ss:$16 sps:$4 sm:$0xff]   ;;  %v8541_v5 = vld [vmem:[%s15435_s2 + $0x42c] ss:$16 sps:$4 sm:$0xff]  }
   0x3   :  { %943 = vmatpush1.bf16.msra.mxu0 %v8537_v2  ;;  %1029 = vmatpush1.bf16.msra.mxu1 %v8538_v3  ;;  %v8543_v6 = vld [vmem:[%s15435_s2 + $0x420] ss:$16 sps:$4 sm:$0xff]   ;;  %v8544_v7 = vld [vmem:[%s15435_s2 + $0x428] ss:$16 sps:$4 sm:$0xff]   ;;  %v8545_v8 = vld [vmem:[%s15435_s2 + $0x444] ss:$16 sps:$4 sm:$0xff]  }
   0x4   :  { %944 = vmatprep.subr.bf16.mxu0 %v8539_v4  ;;  %1030 = vmatprep.subr.bf16.mxu1 %v8541_v5  ;;  %v8547_v9 = vld [vmem:[%s15435_s2 + $0x44c] ss:$16 sps:$4 sm:$0xff]   ;;  %v8549_v10 = vld [vmem:[%s15435_s2 + $0x440] ss:$16 sps:$4 sm:$0xff]   ;;  %v8550_v11 = vld [vmem:[%s15435_s2 + $0x448] ss:$16 sps:$4 sm:$0xff]  }
   0x5   :  { %v8551_v12 = vld [vmem:[%s15435_s2 + $0x464] ss:$16 sps:$4 sm:$0xff]   ;;  %v8553_v13 = vld [vmem:[%s15435_s2 + $0x46c] ss:$16 sps:$4 sm:$0xff]   ;;  %v8555_v14 = vld [vmem:[%s15435_s2 + $0x460] ss:$16 sps:$4 sm:$0xff]  }
   0x6   :  { %v8556_v15 = vld [vmem:[%s15435_s2 + $0x468] ss:$16 sps:$4 sm:$0xff]   ;;  %v8557_v16 = vld [vmem:[%s15435_s2 + $0x484] ss:$16 sps:$4 sm:$0xff]   ;;  %v8559_v17 = vld [vmem:[%s15435_s2 + $0x48c] ss:$16 sps:$4 sm:$0xff]  }
   0x7   :  { %945 = vmatpush1.bf16.msra.mxu0 %v8543_v6  ;;  %1031 = vmatpush1.bf16.msra.mxu1 %v8544_v7  ;;  %v8561_v18 = vld [vmem:[%s15435_s2 + $0x480] ss:$16 sps:$4 sm:$0xff]   ;;  %v8562_v19 = vld [vmem:[%s15435_s2 + $0x488] ss:$16 sps:$4 sm:$0xff]   ;;  %v8563_v20 = vld [vmem:[%s15435_s2 + $0x4a4] ss:$16 sps:$4 sm:$0xff]  }
   0x8   :  { %946 = vmatprep.subr.bf16.mxu0 %v8545_v8  ;;  %1032 = vmatprep.subr.bf16.mxu1 %v8547_v9  ;;  %v8565_v21 = vld [vmem:[%s15435_s2 + $0x4ac] ss:$16 sps:$4 sm:$0xff]   ;;  %v8567_v22 = vld [vmem:[%s15435_s2 + $0x4a0] ss:$16 sps:$4 sm:$0xff]   ;;  %v8568_v23 = vld [vmem:[%s15435_s2 + $0x4a8] ss:$16 sps:$4 sm:$0xff]  }
   0x9   :  { %v8569_v24 = vld [vmem:[%s15435_s2 + $0x4c4] ss:$16 sps:$4 sm:$0xff]   ;;  %v8571_v25 = vld [vmem:[%s15435_s2 + $0x4cc] ss:$16 sps:$4 sm:$0xff]   ;;  %v8573_v26 = vld [vmem:[%s15435_s2 + $0x4c0] ss:$16 sps:$4 sm:$0xff]  }
   0xa   :  { %v8574_v27 = vld [vmem:[%s15435_s2 + $0x4c8] ss:$16 sps:$4 sm:$0xff]   ;;  %v8575_v28 = vld [vmem:[%s15435_s2 + $0x4e4] ss:$16 sps:$4 sm:$0xff]   ;;  %v8577_v29 = vld [vmem:[%s15435_s2 + $0x4ec] ss:$16 sps:$4 sm:$0xff]  }
   0xb   :  { %947 = vmatpush1.bf16.msra.mxu0 %v8549_v10  ;;  %1033 = vmatpush1.bf16.msra.mxu1 %v8550_v11  ;;  %v8579_v30 = vld [vmem:[%s15435_s2 + $0x4e0] ss:$16 sps:$4 sm:$0xff]   ;;  %v8580_v31 = vld [vmem:[%s15435_s2 + $0x4e8] ss:$16 sps:$4 sm:$0xff]   ;;  %v8581_v32 = vld [vmem:[%s15435_s2 + $0x504] ss:$16 sps:$4 sm:$0xff]  }
   0xc   :  { %948 = vmatprep.subr.bf16.mxu0 %v8551_v12  ;;  %1034 = vmatprep.subr.bf16.mxu1 %v8553_v13  ;;  %v8583_v33 = vld [vmem:[%s15435_s2 + $0x50c] ss:$16 sps:$4 sm:$0xff]   ;;  %v8585_v34 = vld [vmem:[%s15435_s2 + $0x500] ss:$16 sps:$4 sm:$0xff]   ;;  %v8586_v35 = vld [vmem:[%s15435_s2 + $0x508] ss:$16 sps:$4 sm:$0xff]  }
   0xd   :  { %v8587_v36 = vld [vmem:[%s15435_s2 + $0x524] ss:$16 sps:$4 sm:$0xff]   ;;  %v8589_v37 = vld [vmem:[%s15435_s2 + $0x52c] ss:$16 sps:$4 sm:$0xff]   ;;  %v8591_v38 = vld [vmem:[%s15435_s2 + $0x520] ss:$16 sps:$4 sm:$0xff]  }
   0xe   :  { %v8592_v39 = vld [vmem:[%s15435_s2 + $0x528] ss:$16 sps:$4 sm:$0xff]   ;;  %v8593_v40 = vld [vmem:[%s15435_s2 + $0x544] ss:$16 sps:$4 sm:$0xff]   ;;  %v8595_v41 = vld [vmem:[%s15435_s2 + $0x54c] ss:$16 sps:$4 sm:$0xff]  }
   0xf   :  { %949 = vmatpush1.bf16.msra.mxu0 %v8555_v14  ;;  %1035 = vmatpush1.bf16.msra.mxu1 %v8556_v15  ;;  %v8597_v42 = vld [vmem:[%s15435_s2 + $0x540] ss:$16 sps:$4 sm:$0xff]   ;;  %v8598_v43 = vld [vmem:[%s15435_s2 + $0x548] ss:$16 sps:$4 sm:$0xff]   ;;  %v8599_v44 = vld [vmem:[%s15435_s2 + $0x564] ss:$16 sps:$4 sm:$0xff]  }
  0x10   :  { %950 = vmatprep.subr.bf16.mxu0 %v8557_v16  ;;  %1036 = vmatprep.subr.bf16.mxu1 %v8559_v17  ;;  %v8601_v45 = vld [vmem:[%s15435_s2 + $0x56c] ss:$16 sps:$4 sm:$0xff]   ;;  %v8603_v46 = vld [vmem:[%s15435_s2 + $0x560] ss:$16 sps:$4 sm:$0xff]   ;;  %v8629_v47 = vld [vmem:[%s15436_s1 + $0x4] ss:$16 sps:$4 sm:$0xff]  }
  0x11   :  { %v8604_v48 = vld [vmem:[%s15435_s2 + $0x568] ss:$16 sps:$4 sm:$0xff]   ;;  %v8605_v49 = vld [vmem:[%s15435_s2 + $0x584] ss:$16 sps:$4 sm:$0xff]   ;;  %v8607_v50 = vld [vmem:[%s15435_s2 + $0x58c] ss:$16 sps:$4 sm:$0xff]   ;;  %974 = vmatprep.mubr.bf16.mxu0 %v8629_v47  ;;  %1060 = vmatprep.mubr.bf16.mxu1 %v8629_v47 }
  0x12   :  { %v8609_v51 = vld [vmem:[%s15435_s2 + $0x580] ss:$16 sps:$4 sm:$0xff]   ;;  %v8610_v52 = vld [vmem:[%s15435_s2 + $0x588] ss:$16 sps:$4 sm:$0xff]   ;;  %v8611_v53 = vld [vmem:[%s15435_s2 + $0x5a4] ss:$16 sps:$4 sm:$0xff]  }
  0x13   :  { %951 = vmatpush1.bf16.msra.mxu0 %v8561_v18  ;;  %1037 = vmatpush1.bf16.msra.mxu1 %v8562_v19  ;;  %v8613_v54 = vld [vmem:[%s15435_s2 + $0x5ac] ss:$16 sps:$4 sm:$0xff]   ;;  %v8615_v55 = vld [vmem:[%s15435_s2 + $0x5a0] ss:$16 sps:$4 sm:$0xff]   ;;  %v8616_v56 = vld [vmem:[%s15435_s2 + $0x5a8] ss:$16 sps:$4 sm:$0xff]  }
  0x14   :  { %952 = vmatprep.subr.bf16.mxu0 %v8563_v20  ;;  %1038 = vmatprep.subr.bf16.mxu1 %v8565_v21  ;;  %v8617_v57 = vld [vmem:[%s15435_s2 + $0x5c4] ss:$16 sps:$4 sm:$0xff]   ;;  %v8619_v58 = vld [vmem:[%s15435_s2 + $0x5cc] ss:$16 sps:$4 sm:$0xff]   ;;  %v8621_v59 = vld [vmem:[%s15435_s2 + $0x5c0] ss:$16 sps:$4 sm:$0xff]  }
  0x15   :  { %v8622_v60 = vld [vmem:[%s15435_s2 + $0x5c8] ss:$16 sps:$4 sm:$0xff]   ;;  %v8623_v61 = vld [vmem:[%s15435_s2 + $0x5e4] ss:$16 sps:$4 sm:$0xff]   ;;  %v8625_v62 = vld [vmem:[%s15435_s2 + $0x5ec] ss:$16 sps:$4 sm:$0xff]  }
  0x16   :  { %v8627_v63 = vld [vmem:[%s15435_s2 + $0x5e0] ss:$16 sps:$4 sm:$0xff]   ;;  %v8628_v0 = vld [vmem:[%s15435_s2 + $0x5e8] ss:$16 sps:$4 sm:$0xff]   ;;  %v8633_v1 = vld [vmem:[%s15435_s2 + $0x604] ss:$16 sps:$4 sm:$0xff]  }
  0x17   :  { %953 = vmatpush1.bf16.msra.mxu0 %v8567_v22  ;;  %1039 = vmatpush1.bf16.msra.mxu1 %v8568_v23  ;;  %v8636_v2 = vld [vmem:[%s15435_s2 + $0x60c] ss:$16 sps:$4 sm:$0xff]   ;;  %v8631_v3 = vld [vmem:[%s15435_s2 + $0x600] ss:$16 sps:$4 sm:$0xff]   ;;  %v8634_v4 = vld [vmem:[%s15435_s2 + $0x608] ss:$16 sps:$4 sm:$0xff]  }
  0x18   :  { %954 = vmatprep.subr.bf16.mxu0 %v8569_v24  ;;  %1040 = vmatprep.subr.bf16.mxu1 %v8571_v25  ;;  %v8637_v5 = vld [vmem:[%s15436_s1] ss:$16 sps:$4 sm:$0xff]   ;;  %v8640_v6 = vld [vmem:[%s15435_s2 + $0x624] ss:$16 sps:$4 sm:$0xff]   ;;  %v8643_v7 = vld [vmem:[%s15435_s2 + $0x62c] ss:$16 sps:$4 sm:$0xff]  }
  0x19   :  { %v8638_v8 = vld [vmem:[%s15435_s2 + $0x620] ss:$16 sps:$4 sm:$0xff]   ;;  %v8641_v9 = vld [vmem:[%s15435_s2 + $0x628] ss:$16 sps:$4 sm:$0xff]   ;;  %v8646_v10 = vld [vmem:[%s15435_s2 + $0x644] ss:$16 sps:$4 sm:$0xff]  }
  0x1a   :  { %v8649_v11 = vld [vmem:[%s15435_s2 + $0x64c] ss:$16 sps:$4 sm:$0xff]   ;;  %v8644_v12 = vld [vmem:[%s15435_s2 + $0x640] ss:$16 sps:$4 sm:$0xff]   ;;  %v8647_v13 = vld [vmem:[%s15435_s2 + $0x648] ss:$16 sps:$4 sm:$0xff]  }
  0x1b   :  { %955 = vmatpush1.bf16.msra.mxu0 %v8573_v26  ;;  %1041 = vmatpush1.bf16.msra.mxu1 %v8574_v27  ;;  %v8652_v14 = vld [vmem:[%s15435_s2 + $0x664] ss:$16 sps:$4 sm:$0xff]   ;;  %v8655_v15 = vld [vmem:[%s15435_s2 + $0x66c] ss:$16 sps:$4 sm:$0xff]   ;;  %v8650_v16 = vld [vmem:[%s15435_s2 + $0x660] ss:$16 sps:$4 sm:$0xff]  }
  0x1c   :  { %956 = vmatprep.subr.bf16.mxu0 %v8575_v28  ;;  %1042 = vmatprep.subr.bf16.mxu1 %v8577_v29  ;;  %v8653_v17 = vld [vmem:[%s15435_s2 + $0x668] ss:$16 sps:$4 sm:$0xff]   ;;  %v8658_v18 = vld [vmem:[%s15435_s2 + $0x684] ss:$16 sps:$4 sm:$0xff]   ;;  %v8661_v19 = vld [vmem:[%s15435_s2 + $0x68c] ss:$16 sps:$4 sm:$0xff]  }
  0x1d   :  { %v8656_v20 = vld [vmem:[%s15435_s2 + $0x680] ss:$16 sps:$4 sm:$0xff]   ;;  %v8659_v21 = vld [vmem:[%s15435_s2 + $0x688] ss:$16 sps:$4 sm:$0xff]   ;;  %v8664_v22 = vld [vmem:[%s15435_s2 + $0x6a4] ss:$16 sps:$4 sm:$0xff]  }
  0x1e   :  { %v8667_v23 = vld [vmem:[%s15435_s2 + $0x6ac] ss:$16 sps:$4 sm:$0xff]   ;;  %v8662_v24 = vld [vmem:[%s15435_s2 + $0x6a0] ss:$16 sps:$4 sm:$0xff]   ;;  %v8665_v25 = vld [vmem:[%s15435_s2 + $0x6a8] ss:$16 sps:$4 sm:$0xff]  }
  0x1f   :  { %957 = vmatpush1.bf16.msra.mxu0 %v8579_v30  ;;  %1043 = vmatpush1.bf16.msra.mxu1 %v8580_v31  ;;  %v8670_v26 = vld [vmem:[%s15435_s2 + $0x6c4] ss:$16 sps:$4 sm:$0xff]   ;;  %v8673_v27 = vld [vmem:[%s15435_s2 + $0x6cc] ss:$16 sps:$4 sm:$0xff]   ;;  %v8668_v28 = vld [vmem:[%s15435_s2 + $0x6c0] ss:$16 sps:$4 sm:$0xff]  }
  0x20   :  { %958 = vmatprep.subr.bf16.mxu0 %v8581_v32  ;;  %1044 = vmatprep.subr.bf16.mxu1 %v8583_v33  ;;  %v8728_v29 = vld [vmem:[%s15436_s1 + $0xc] ss:$16 sps:$4 sm:$0xff]   ;;  %v8671_v30 = vld [vmem:[%s15435_s2 + $0x6c8] ss:$16 sps:$4 sm:$0xff]   ;;  %v8676_v31 = vld [vmem:[%s15435_s2 + $0x6e4] ss:$16 sps:$4 sm:$0xff]  }
  0x21   :  { %v8679_v32 = vld [vmem:[%s15435_s2 + $0x6ec] ss:$16 sps:$4 sm:$0xff]   ;;  %v8674_v33 = vld [vmem:[%s15435_s2 + $0x6e0] ss:$16 sps:$4 sm:$0xff]   ;;  %v8700_v47 = vld [vmem:[%s15435_s2 + $0x764] ss:$16 sps:$4 sm:$0xff]  }
  0x22   :  { %vm6933_vm4 = vsmask.f32 7424  ;;  %vm15390_vm5 = vmand %vm6925_vm0, %vm6930_vm2 }
  0x23   :  { %959 = vmatpush1.bf16.msra.mxu0 %v8585_v34  ;;  %1045 = vmatpush1.bf16.msra.mxu1 %v8586_v35  ;;  %v8677_v34 = vld [vmem:[%s15435_s2 + $0x6e8] ss:$16 sps:$4 sm:$0xff]   ;;  %v8682_v35 = vld [vmem:[%s15435_s2 + $0x704] ss:$16 sps:$4 sm:$0xff]   ;;  %vm15397_vm6 = vmand %vm6932_vm3, %vm6933_vm4 }
  0x24   :  { %960 = vmatprep.subr.bf16.mxu0 %v8587_v36  ;;  %1046 = vmatprep.subr.bf16.mxu1 %v8589_v37  ;;  %v8685_v36 = vld [vmem:[%s15435_s2 + $0x70c] ss:$16 sps:$4 sm:$0xff]   ;;  %v8680_v37 = vld [vmem:[%s15435_s2 + $0x700] ss:$16 sps:$4 sm:$0xff]   ;;  %vm15403_vm7 = vmand %vm6926_vm1, %vm6933_vm4 }
  0x25   :  { %vm6927_vm8 = vmor %vm6926_vm1, %vm6925_vm0 }
  0x26   :  { %vm6935_vm9 = vmor %vm15397_vm6, %vm15390_vm5 }
  0x27   :  { %961 = vmatpush1.bf16.msra.mxu0 %v8591_v38  ;;  %1047 = vmatpush1.bf16.msra.mxu1 %v8592_v39  ;;  %v8683_v38 = vld [vmem:[%s15435_s2 + $0x708] ss:$16 sps:$4 sm:$0xff]   ;;  %v8688_v39 = vld [vmem:[%s15435_s2 + $0x724] ss:$16 sps:$4 sm:$0xff]   ;;  %vm6941_vm10 = vmor %vm15403_vm7, %vm15390_vm5 }
  0x28   :  { %962 = vmatprep.subr.bf16.mxu0 %v8593_v40  ;;  %1048 = vmatprep.subr.bf16.mxu1 %v8595_v41  ;;  %v8691_v40 = vld [vmem:[%s15435_s2 + $0x72c] ss:$16 sps:$4 sm:$0xff]   ;;  %v8686_v41 = vld [vmem:[%s15435_s2 + $0x720] ss:$16 sps:$4 sm:$0xff]  }
  0x2b   :  { %963 = vmatpush1.bf16.msra.mxu0 %v8597_v42  ;;  %1049 = vmatpush1.bf16.msra.mxu1 %v8598_v43  ;;  %v8689_v42 = vld [vmem:[%s15435_s2 + $0x728] ss:$16 sps:$4 sm:$0xff]   ;;  %v8694_v43 = vld [vmem:[%s15435_s2 + $0x744] ss:$16 sps:$4 sm:$0xff]  }
  0x2c   :  { %964 = vmatprep.subr.bf16.mxu0 %v8599_v44  ;;  %1050 = vmatprep.subr.bf16.mxu1 %v8601_v45  ;;  %v8697_v44 = vld [vmem:[%s15435_s2 + $0x74c] ss:$16 sps:$4 sm:$0xff]   ;;  %v8692_v45 = vld [vmem:[%s15435_s2 + $0x740] ss:$16 sps:$4 sm:$0xff]  }
  0x2f   :  { %965 = vmatpush1.bf16.msra.mxu0 %v8603_v46  ;;  %1051 = vmatpush1.bf16.msra.mxu1 %v8604_v48  ;;  %v8695_v46 = vld [vmem:[%s15435_s2 + $0x748] ss:$16 sps:$4 sm:$0xff]   ;;  %v8703_v48 = vld [vmem:[%s15435_s2 + $0x76c] ss:$16 sps:$4 sm:$0xff]  }
  0x30   :  { %966 = vmatprep.subr.bf16.mxu0 %v8605_v49  ;;  %1052 = vmatprep.subr.bf16.mxu1 %v8607_v50  ;;  %v8698_v49 = vld [vmem:[%s15435_s2 + $0x760] ss:$16 sps:$4 sm:$0xff]   ;;  %v8701_v50 = vld [vmem:[%s15435_s2 + $0x768] ss:$16 sps:$4 sm:$0xff]  }
  0x33   :  { %967 = vmatpush1.bf16.msra.mxu0 %v8609_v51  ;;  %1053 = vmatpush1.bf16.msra.mxu1 %v8610_v52  ;;  %v8706_v51 = vld [vmem:[%s15435_s2 + $0x784] ss:$16 sps:$4 sm:$0xff]   ;;  %v8709_v52 = vld [vmem:[%s15435_s2 + $0x78c] ss:$16 sps:$4 sm:$0xff]  }
  0x34   :  { %968 = vmatprep.subr.bf16.mxu0 %v8611_v53  ;;  %1054 = vmatprep.subr.bf16.mxu1 %v8613_v54  ;;  %v8704_v53 = vld [vmem:[%s15435_s2 + $0x780] ss:$16 sps:$4 sm:$0xff]   ;;  %v8707_v54 = vld [vmem:[%s15435_s2 + $0x788] ss:$16 sps:$4 sm:$0xff]  }
  0x37   :  { %969 = vmatpush1.bf16.msra.mxu0 %v8615_v55  ;;  %1055 = vmatpush1.bf16.msra.mxu1 %v8616_v56  ;;  %v8712_v55 = vld [vmem:[%s15435_s2 + $0x7a4] ss:$16 sps:$4 sm:$0xff]   ;;  %v8715_v56 = vld [vmem:[%s15435_s2 + $0x7ac] ss:$16 sps:$4 sm:$0xff]  }
  0x38   :  { %970 = vmatprep.subr.bf16.mxu0 %v8617_v57  ;;  %1056 = vmatprep.subr.bf16.mxu1 %v8619_v58  ;;  %v8710_v57 = vld [vmem:[%s15435_s2 + $0x7a0] ss:$16 sps:$4 sm:$0xff]   ;;  %v8713_v58 = vld [vmem:[%s15435_s2 + $0x7a8] ss:$16 sps:$4 sm:$0xff]  }
  0x3b   :  { %971 = vmatpush1.bf16.msra.mxu0 %v8621_v59  ;;  %1057 = vmatpush1.bf16.msra.mxu1 %v8622_v60  ;;  %v8718_v59 = vld [vmem:[%s15435_s2 + $0x7c4] ss:$16 sps:$4 sm:$0xff]   ;;  %v8721_v60 = vld [vmem:[%s15435_s2 + $0x7cc] ss:$16 sps:$4 sm:$0xff]  }
  0x3c   :  { %972 = vmatprep.subr.bf16.mxu0 %v8623_v61  ;;  %1058 = vmatprep.subr.bf16.mxu1 %v8625_v62  ;;  %v8716_v61 = vld [vmem:[%s15435_s2 + $0x7c0] ss:$16 sps:$4 sm:$0xff]   ;;  %v8719_v62 = vld [vmem:[%s15435_s2 + $0x7c8] ss:$16 sps:$4 sm:$0xff]  }
  0x3f   :  { %973 = vmatpush1.bf16.msra.mxu0 %v8627_v63  ;;  %1059 = vmatpush1.bf16.msra.mxu1 %v8628_v0  ;;  %v8724_v63 = vld [vmem:[%s15435_s2 + $0x7e4] ss:$16 sps:$4 sm:$0xff]   ;;  %v8727_v0 = vld [vmem:[%s15435_s2 + $0x7ec] ss:$16 sps:$4 sm:$0xff]  }
  0x40   :  { %985 = vmatprep.subr.bf16.mxu0 %v8633_v1  ;;  %1071 = vmatprep.subr.bf16.mxu1 %v8636_v2  ;;  %v8722_v1 = vld [vmem:[%s15435_s2 + $0x7e0] ss:$16 sps:$4 sm:$0xff]   ;;  %v8725_v2 = vld [vmem:[%s15435_s2 + $0x7e8] ss:$16 sps:$4 sm:$0xff]  }
  0x42   :  { %975 = vmatmul.mubr.bf16.vlgmr.msra.gmra.mrb[0].mxu0 %v8637_v5  ;;  %1061 = vmatmul.mubr.bf16.vlgmr.msra.gmra.mrb[0].mxu1 %v8637_v5  ;;  %v8730_v5 = vld [vmem:[%s15435_s2] ss:$16 sps:$4 sm:$0xff]  }
  0x43   :  { %986 = vmatpush1.bf16.msra.mxu0 %v8631_v3  ;;  %1072 = vmatpush1.bf16.msra.mxu1 %v8634_v4  ;;  %v8732_v3 = vld [vmem:[%s15435_s2 + $0x4] ss:$16 sps:$4 sm:$0xff]   ;;  %v8735_v4 = vld [vmem:[%s15435_s2 + $0xc] ss:$16 sps:$4 sm:$0xff]  }
  0x44   :  { %987 = vmatprep.subr.bf16.mxu0 %v8640_v6  ;;  %1073 = vmatprep.subr.bf16.mxu1 %v8643_v7  ;;  %v8733_v6 = vld [vmem:[%s15435_s2 + $0x8] ss:$16 sps:$4 sm:$0xff]  }
  0x45   :  { %1017 = vmatprep.mubr.bf16.mxu0 %v8728_v29  ;;  %1103 = vmatprep.mubr.bf16.mxu1 %v8728_v29  ;;  %v8736_v7 = vld [vmem:[%s15436_s1 + $0x8] ss:$16 sps:$4 sm:$0xff]   ;;  %v8769_v29 = vld [vmem:[%s15435_s2 + $0xc4] ss:$16 sps:$4 sm:$0xff]  }
  0x47   :  { %988 = vmatpush1.bf16.msra.mxu0 %v8638_v8  ;;  %1074 = vmatpush1.bf16.msra.mxu1 %v8641_v9  ;;  %v8739_v8 = vld [vmem:[%s15435_s2 + $0x24] ss:$16 sps:$4 sm:$0xff]   ;;  %v8742_v9 = vld [vmem:[%s15435_s2 + $0x2c] ss:$16 sps:$4 sm:$0xff]  }
  0x48   :  { %989 = vmatprep.subr.bf16.mxu0 %v8646_v10  ;;  %1075 = vmatprep.subr.bf16.mxu1 %v8649_v11  ;;  %v8737_v10 = vld [vmem:[%s15435_s2 + $0x20] ss:$16 sps:$4 sm:$0xff]   ;;  %v10922_v11 = vld [vmem:[%s15437_s0 + $0x4] ss:$16 sps:$4 sm:$0xff]  }
  0x4b   :  { %990 = vmatpush1.bf16.msra.mxu0 %v8644_v12  ;;  %1076 = vmatpush1.bf16.msra.mxu1 %v8647_v13  ;;  %v8740_v12 = vld [vmem:[%s15435_s2 + $0x28] ss:$16 sps:$4 sm:$0xff]   ;;  %v8745_v13 = vld [vmem:[%s15435_s2 + $0x44] ss:$16 sps:$4 sm:$0xff]  }
  0x4c   :  { %991 = vmatprep.subr.bf16.mxu0 %v8652_v14  ;;  %1077 = vmatprep.subr.bf16.mxu1 %v8655_v15  ;;  %v8748_v14 = vld [vmem:[%s15435_s2 + $0x4c] ss:$16 sps:$4 sm:$0xff]   ;;  %v8743_v15 = vld [vmem:[%s15435_s2 + $0x40] ss:$16 sps:$4 sm:$0xff]  }
  0x4f   :  { %992 = vmatpush1.bf16.msra.mxu0 %v8650_v16  ;;  %1078 = vmatpush1.bf16.msra.mxu1 %v8653_v17  ;;  %v8746_v16 = vld [vmem:[%s15435_s2 + $0x48] ss:$16 sps:$4 sm:$0xff]   ;;  %v8751_v17 = vld [vmem:[%s15435_s2 + $0x64] ss:$16 sps:$4 sm:$0xff]  }
  0x50   :  { %993 = vmatprep.subr.bf16.mxu0 %v8658_v18  ;;  %1079 = vmatprep.subr.bf16.mxu1 %v8661_v19  ;;  %v8754_v18 = vld [vmem:[%s15435_s2 + $0x6c] ss:$16 sps:$4 sm:$0xff]   ;;  %v8749_v19 = vld [vmem:[%s15435_s2 + $0x60] ss:$16 sps:$4 sm:$0xff]  }
  0x53   :  { %994 = vmatpush1.bf16.msra.mxu0 %v8656_v20  ;;  %1080 = vmatpush1.bf16.msra.mxu1 %v8659_v21  ;;  %v8752_v20 = vld [vmem:[%s15435_s2 + $0x68] ss:$16 sps:$4 sm:$0xff]   ;;  %v8757_v21 = vld [vmem:[%s15435_s2 + $0x84] ss:$16 sps:$4 sm:$0xff]  }
  0x54   :  { %995 = vmatprep.subr.bf16.mxu0 %v8664_v22  ;;  %1081 = vmatprep.subr.bf16.mxu1 %v8667_v23  ;;  %v8760_v22 = vld [vmem:[%s15435_s2 + $0x8c] ss:$16 sps:$4 sm:$0xff]   ;;  %v8755_v23 = vld [vmem:[%s15435_s2 + $0x80] ss:$16 sps:$4 sm:$0xff]  }
  0x57   :  { %996 = vmatpush1.bf16.msra.mxu0 %v8662_v24  ;;  %1082 = vmatpush1.bf16.msra.mxu1 %v8665_v25  ;;  %v8758_v24 = vld [vmem:[%s15435_s2 + $0x88] ss:$16 sps:$4 sm:$0xff]   ;;  %v8763_v25 = vld [vmem:[%s15435_s2 + $0xa4] ss:$16 sps:$4 sm:$0xff]  }
  0x58   :  { %997 = vmatprep.subr.bf16.mxu0 %v8670_v26  ;;  %1083 = vmatprep.subr.bf16.mxu1 %v8673_v27  ;;  %v8766_v26 = vld [vmem:[%s15435_s2 + $0xac] ss:$16 sps:$4 sm:$0xff]   ;;  %v8761_v27 = vld [vmem:[%s15435_s2 + $0xa0] ss:$16 sps:$4 sm:$0xff]  }
  0x5b   :  { %998 = vmatpush1.bf16.msra.mxu0 %v8668_v28  ;;  %1084 = vmatpush1.bf16.msra.mxu1 %v8671_v30  ;;  %v8764_v28 = vld [vmem:[%s15435_s2 + $0xa8] ss:$16 sps:$4 sm:$0xff]   ;;  %v8772_v30 = vld [vmem:[%s15435_s2 + $0xcc] ss:$16 sps:$4 sm:$0xff]  }
  0x5c   :  { %999 = vmatprep.subr.bf16.mxu0 %v8676_v31  ;;  %1085 = vmatprep.subr.bf16.mxu1 %v8679_v32  ;;  %v8767_v31 = vld [vmem:[%s15435_s2 + $0xc0] ss:$16 sps:$4 sm:$0xff]   ;;  %v8770_v32 = vld [vmem:[%s15435_s2 + $0xc8] ss:$16 sps:$4 sm:$0xff]  }
  0x5f   :  { %1000 = vmatpush1.bf16.msra.mxu0 %v8674_v33  ;;  %1086 = vmatpush1.bf16.msra.mxu1 %v8677_v34  ;;  %v8775_v33 = vld [vmem:[%s15435_s2 + $0xe4] ss:$16 sps:$4 sm:$0xff]   ;;  %v8778_v34 = vld [vmem:[%s15435_s2 + $0xec] ss:$16 sps:$4 sm:$0xff]  }
  0x60   :  { %1001 = vmatprep.subr.bf16.mxu0 %v8682_v35  ;;  %1087 = vmatprep.subr.bf16.mxu1 %v8685_v36  ;;  %v8773_v35 = vld [vmem:[%s15435_s2 + $0xe0] ss:$16 sps:$4 sm:$0xff]   ;;  %v8776_v36 = vld [vmem:[%s15435_s2 + $0xe8] ss:$16 sps:$4 sm:$0xff]  }
  0x63   :  { %1002 = vmatpush1.bf16.msra.mxu0 %v8680_v37  ;;  %1088 = vmatpush1.bf16.msra.mxu1 %v8683_v38  ;;  %v8781_v37 = vld [vmem:[%s15435_s2 + $0x104] ss:$16 sps:$4 sm:$0xff]   ;;  %v8784_v38 = vld [vmem:[%s15435_s2 + $0x10c] ss:$16 sps:$4 sm:$0xff]  }
  0x64   :  { %1003 = vmatprep.subr.bf16.mxu0 %v8688_v39  ;;  %1089 = vmatprep.subr.bf16.mxu1 %v8691_v40  ;;  %v8779_v39 = vld [vmem:[%s15435_s2 + $0x100] ss:$16 sps:$4 sm:$0xff]   ;;  %v8782_v40 = vld [vmem:[%s15435_s2 + $0x108] ss:$16 sps:$4 sm:$0xff]  }
  0x67   :  { %1004 = vmatpush1.bf16.msra.mxu0 %v8686_v41  ;;  %1090 = vmatpush1.bf16.msra.mxu1 %v8689_v42  ;;  %v8787_v41 = vld [vmem:[%s15435_s2 + $0x124] ss:$16 sps:$4 sm:$0xff]   ;;  %v8790_v42 = vld [vmem:[%s15435_s2 + $0x12c] ss:$16 sps:$4 sm:$0xff]  }
  0x68   :  { %1005 = vmatprep.subr.bf16.mxu0 %v8694_v43  ;;  %1091 = vmatprep.subr.bf16.mxu1 %v8697_v44  ;;  %v8785_v43 = vld [vmem:[%s15435_s2 + $0x120] ss:$16 sps:$4 sm:$0xff]   ;;  %v8788_v44 = vld [vmem:[%s15435_s2 + $0x128] ss:$16 sps:$4 sm:$0xff]  }
  0x6b   :  { %1006 = vmatpush1.bf16.msra.mxu0 %v8692_v45  ;;  %1092 = vmatpush1.bf16.msra.mxu1 %v8695_v46  ;;  %v8793_v45 = vld [vmem:[%s15435_s2 + $0x144] ss:$16 sps:$4 sm:$0xff]   ;;  %v8796_v46 = vld [vmem:[%s15435_s2 + $0x14c] ss:$16 sps:$4 sm:$0xff]  }
  0x6c   :  { %1007 = vmatprep.subr.bf16.mxu0 %v8700_v47  ;;  %1093 = vmatprep.subr.bf16.mxu1 %v8703_v48  ;;  %v8791_v47 = vld [vmem:[%s15435_s2 + $0x140] ss:$16 sps:$4 sm:$0xff]   ;;  %v8794_v48 = vld [vmem:[%s15435_s2 + $0x148] ss:$16 sps:$4 sm:$0xff]  }
  0x6f   :  { %1008 = vmatpush1.bf16.msra.mxu0 %v8698_v49  ;;  %1094 = vmatpush1.bf16.msra.mxu1 %v8701_v50  ;;  %v8799_v49 = vld [vmem:[%s15435_s2 + $0x164] ss:$16 sps:$4 sm:$0xff]   ;;  %v8802_v50 = vld [vmem:[%s15435_s2 + $0x16c] ss:$16 sps:$4 sm:$0xff]  }
  0x70   :  { %1009 = vmatprep.subr.bf16.mxu0 %v8706_v51  ;;  %1095 = vmatprep.subr.bf16.mxu1 %v8709_v52  ;;  %v8797_v51 = vld [vmem:[%s15435_s2 + $0x160] ss:$16 sps:$4 sm:$0xff]   ;;  %v8800_v52 = vld [vmem:[%s15435_s2 + $0x168] ss:$16 sps:$4 sm:$0xff]  }
  0x73   :  { %1010 = vmatpush1.bf16.msra.mxu0 %v8704_v53  ;;  %1096 = vmatpush1.bf16.msra.mxu1 %v8707_v54  ;;  %v8805_v53 = vld [vmem:[%s15435_s2 + $0x184] ss:$16 sps:$4 sm:$0xff]   ;;  %v8808_v54 = vld [vmem:[%s15435_s2 + $0x18c] ss:$16 sps:$4 sm:$0xff]  }
  0x74   :  { %1011 = vmatprep.subr.bf16.mxu0 %v8712_v55  ;;  %1097 = vmatprep.subr.bf16.mxu1 %v8715_v56  ;;  %v8803_v55 = vld [vmem:[%s15435_s2 + $0x180] ss:$16 sps:$4 sm:$0xff]   ;;  %v8806_v56 = vld [vmem:[%s15435_s2 + $0x188] ss:$16 sps:$4 sm:$0xff]  }
  0x77   :  { %1012 = vmatpush1.bf16.msra.mxu0 %v8710_v57  ;;  %1098 = vmatpush1.bf16.msra.mxu1 %v8713_v58  ;;  %v8811_v57 = vld [vmem:[%s15435_s2 + $0x1a4] ss:$16 sps:$4 sm:$0xff]   ;;  %v8814_v58 = vld [vmem:[%s15435_s2 + $0x1ac] ss:$16 sps:$4 sm:$0xff]  }
  0x78   :  { %1013 = vmatprep.subr.bf16.mxu0 %v8718_v59  ;;  %1099 = vmatprep.subr.bf16.mxu1 %v8721_v60  ;;  %v8809_v59 = vld [vmem:[%s15435_s2 + $0x1a0] ss:$16 sps:$4 sm:$0xff]   ;;  %v8812_v60 = vld [vmem:[%s15435_s2 + $0x1a8] ss:$16 sps:$4 sm:$0xff]  }
  0x7b   :  { %1014 = vmatpush1.bf16.msra.mxu0 %v8716_v61  ;;  %1100 = vmatpush1.bf16.msra.mxu1 %v8719_v62  ;;  %v8817_v61 = vld [vmem:[%s15435_s2 + $0x1c4] ss:$16 sps:$4 sm:$0xff]   ;;  %v8820_v62 = vld [vmem:[%s15435_s2 + $0x1cc] ss:$16 sps:$4 sm:$0xff]  }
  0x7c   :  { %1015 = vmatprep.subr.bf16.mxu0 %v8724_v63  ;;  %1101 = vmatprep.subr.bf16.mxu1 %v8727_v0  ;;  %v8815_v63 = vld [vmem:[%s15435_s2 + $0x1c0] ss:$16 sps:$4 sm:$0xff]   ;;  %v8818_v0 = vld [vmem:[%s15435_s2 + $0x1c8] ss:$16 sps:$4 sm:$0xff]  }
  0x7f   :  { %1016 = vmatpush1.bf16.msra.mxu0 %v8722_v1  ;;  %1102 = vmatpush1.bf16.msra.mxu1 %v8725_v2  ;;  %v8823_v1 = vld [vmem:[%s15435_s2 + $0x1e4] ss:$16 sps:$4 sm:$0xff]   ;;  %v8826_v2 = vld [vmem:[%s15435_s2 + $0x1ec] ss:$16 sps:$4 sm:$0xff]  }
  0x80   :  { %1774 = vmatprep.subr.bf16.mxu0 %v8732_v3  ;;  %1860 = vmatprep.subr.bf16.mxu1 %v8735_v4  ;;  %v8821_v3 = vld [vmem:[%s15435_s2 + $0x1e0] ss:$16 sps:$4 sm:$0xff]   ;;  %v8824_v4 = vld [vmem:[%s15435_s2 + $0x1e8] ss:$16 sps:$4 sm:$0xff]  }
  0x82   :  { %1018 = vmatmul.mubr.bf16.vlgmr.msra.gmra.mrb[0].mxu0 %v8736_v7  ;;  %1104 = vmatmul.mubr.bf16.vlgmr.msra.gmra.mrb[0].mxu1 %v8736_v7  ;;  %v8829_v7 = vld [vmem:[%s15435_s2 + $0x200] ss:$16 sps:$4 sm:$0xff]  }
  0x83   :  { %1775 = vmatpush1.bf16.msra.mxu0 %v8730_v5  ;;  %1861 = vmatpush1.bf16.msra.mxu1 %v8733_v6  ;;  %v8831_v5 = vld [vmem:[%s15435_s2 + $0x204] ss:$16 sps:$4 sm:$0xff]   ;;  %v8834_v6 = vld [vmem:[%s15435_s2 + $0x20c] ss:$16 sps:$4 sm:$0xff]  }
  0x84   :  { %1776 = vmatprep.subr.bf16.mxu0 %v8739_v8  ;;  %1862 = vmatprep.subr.bf16.mxu1 %v8742_v9  ;;  %v8832_v8 = vld [vmem:[%s15435_s2 + $0x208] ss:$16 sps:$4 sm:$0xff]   ;;  %v11112_v9 = vld [vmem:[%s15437_s0] ss:$16 sps:$4 sm:$0xff]  }
  0x85   :  { %1806 = vmatprep.mubr.bf16.mxu0 %v10922_v11  ;;  %1892 = vmatprep.mubr.bf16.mxu1 %v10922_v11 }
  0x87   :  { %1777 = vmatpush1.bf16.msra.mxu0 %v8737_v10  ;;  %1863 = vmatpush1.bf16.msra.mxu1 %v8740_v12  ;;  %v8838_v10 = vld [vmem:[%s15435_s2 + $0x224] ss:$16 sps:$4 sm:$0xff]   ;;  %v8841_v12 = vld [vmem:[%s15435_s2 + $0x22c] ss:$16 sps:$4 sm:$0xff]  }
  0x88   :  { %1778 = vmatprep.subr.bf16.mxu0 %v8745_v13  ;;  %1864 = vmatprep.subr.bf16.mxu1 %v8748_v14  ;;  %v11123_v13 = vld [vmem:[%s15437_s0 + $0xc] ss:$16 sps:$4 sm:$0xff]   ;;  %v8836_v14 = vld [vmem:[%s15435_s2 + $0x220] ss:$16 sps:$4 sm:$0xff]  }
  0x8b   :  { %1779 = vmatpush1.bf16.msra.mxu0 %v8743_v15  ;;  %1865 = vmatpush1.bf16.msra.mxu1 %v8746_v16  ;;  %v8839_v15 = vld [vmem:[%s15435_s2 + $0x228] ss:$16 sps:$4 sm:$0xff]   ;;  %v8844_v16 = vld [vmem:[%s15435_s2 + $0x244] ss:$16 sps:$4 sm:$0xff]  }
  0x8c   :  { %1780 = vmatprep.subr.bf16.mxu0 %v8751_v17  ;;  %1866 = vmatprep.subr.bf16.mxu1 %v8754_v18  ;;  %v8847_v17 = vld [vmem:[%s15435_s2 + $0x24c] ss:$16 sps:$4 sm:$0xff]   ;;  %v8842_v18 = vld [vmem:[%s15435_s2 + $0x240] ss:$16 sps:$4 sm:$0xff]  }
  0x8f   :  { %1781 = vmatpush1.bf16.msra.mxu0 %v8749_v19  ;;  %1867 = vmatpush1.bf16.msra.mxu1 %v8752_v20  ;;  %v8845_v19 = vld [vmem:[%s15435_s2 + $0x248] ss:$16 sps:$4 sm:$0xff]   ;;  %v8850_v20 = vld [vmem:[%s15435_s2 + $0x264] ss:$16 sps:$4 sm:$0xff]  }
  0x90   :  { %1782 = vmatprep.subr.bf16.mxu0 %v8757_v21  ;;  %1868 = vmatprep.subr.bf16.mxu1 %v8760_v22  ;;  %v8853_v21 = vld [vmem:[%s15435_s2 + $0x26c] ss:$16 sps:$4 sm:$0xff]   ;;  %v8848_v22 = vld [vmem:[%s15435_s2 + $0x260] ss:$16 sps:$4 sm:$0xff]  }
  0x93   :  { %1783 = vmatpush1.bf16.msra.mxu0 %v8755_v23  ;;  %1869 = vmatpush1.bf16.msra.mxu1 %v8758_v24  ;;  %v8851_v23 = vld [vmem:[%s15435_s2 + $0x268] ss:$16 sps:$4 sm:$0xff]   ;;  %v8856_v24 = vld [vmem:[%s15435_s2 + $0x284] ss:$16 sps:$4 sm:$0xff]  }
  0x94   :  { %1784 = vmatprep.subr.bf16.mxu0 %v8763_v25  ;;  %1870 = vmatprep.subr.bf16.mxu1 %v8766_v26  ;;  %v8859_v25 = vld [vmem:[%s15435_s2 + $0x28c] ss:$16 sps:$4 sm:$0xff]   ;;  %v8854_v26 = vld [vmem:[%s15435_s2 + $0x280] ss:$16 sps:$4 sm:$0xff]  }
  0x97   :  { %1785 = vmatpush1.bf16.msra.mxu0 %v8761_v27  ;;  %1871 = vmatpush1.bf16.msra.mxu1 %v8764_v28  ;;  %v8857_v27 = vld [vmem:[%s15435_s2 + $0x288] ss:$16 sps:$4 sm:$0xff]   ;;  %v8862_v28 = vld [vmem:[%s15435_s2 + $0x2a4] ss:$16 sps:$4 sm:$0xff]  }
  0x98   :  { %1786 = vmatprep.subr.bf16.mxu0 %v8769_v29  ;;  %1872 = vmatprep.subr.bf16.mxu1 %v8772_v30  ;;  %v8865_v29 = vld [vmem:[%s15435_s2 + $0x2ac] ss:$16 sps:$4 sm:$0xff]   ;;  %v8860_v30 = vld [vmem:[%s15435_s2 + $0x2a0] ss:$16 sps:$4 sm:$0xff]  }
  0x9b   :  { %1787 = vmatpush1.bf16.msra.mxu0 %v8767_v31  ;;  %1873 = vmatpush1.bf16.msra.mxu1 %v8770_v32  ;;  %v8863_v31 = vld [vmem:[%s15435_s2 + $0x2a8] ss:$16 sps:$4 sm:$0xff]   ;;  %v8868_v32 = vld [vmem:[%s15435_s2 + $0x2c4] ss:$16 sps:$4 sm:$0xff]  }
  0x9c   :  { %1788 = vmatprep.subr.bf16.mxu0 %v8775_v33  ;;  %1874 = vmatprep.subr.bf16.mxu1 %v8778_v34  ;;  %v8871_v33 = vld [vmem:[%s15435_s2 + $0x2cc] ss:$16 sps:$4 sm:$0xff]   ;;  %v8866_v34 = vld [vmem:[%s15435_s2 + $0x2c0] ss:$16 sps:$4 sm:$0xff]  }
  0x9f   :  { %1789 = vmatpush1.bf16.msra.mxu0 %v8773_v35  ;;  %1875 = vmatpush1.bf16.msra.mxu1 %v8776_v36  ;;  %v8869_v35 = vld [vmem:[%s15435_s2 + $0x2c8] ss:$16 sps:$4 sm:$0xff]   ;;  %v8874_v36 = vld [vmem:[%s15435_s2 + $0x2e4] ss:$16 sps:$4 sm:$0xff]  }
  0xa0   :  { %1790 = vmatprep.subr.bf16.mxu0 %v8781_v37  ;;  %1876 = vmatprep.subr.bf16.mxu1 %v8784_v38  ;;  %v8877_v37 = vld [vmem:[%s15435_s2 + $0x2ec] ss:$16 sps:$4 sm:$0xff]   ;;  %v8872_v38 = vld [vmem:[%s15435_s2 + $0x2e0] ss:$16 sps:$4 sm:$0xff]  }
  0xa3   :  { %1791 = vmatpush1.bf16.msra.mxu0 %v8779_v39  ;;  %1877 = vmatpush1.bf16.msra.mxu1 %v8782_v40  ;;  %v8875_v39 = vld [vmem:[%s15435_s2 + $0x2e8] ss:$16 sps:$4 sm:$0xff]   ;;  %v8880_v40 = vld [vmem:[%s15435_s2 + $0x304] ss:$16 sps:$4 sm:$0xff]  }
  0xa4   :  { %1792 = vmatprep.subr.bf16.mxu0 %v8787_v41  ;;  %1878 = vmatprep.subr.bf16.mxu1 %v8790_v42  ;;  %v8883_v41 = vld [vmem:[%s15435_s2 + $0x30c] ss:$16 sps:$4 sm:$0xff]   ;;  %v8878_v42 = vld [vmem:[%s15435_s2 + $0x300] ss:$16 sps:$4 sm:$0xff]  }
  0xa7   :  { %1793 = vmatpush1.bf16.msra.mxu0 %v8785_v43  ;;  %1879 = vmatpush1.bf16.msra.mxu1 %v8788_v44  ;;  %v8881_v43 = vld [vmem:[%s15435_s2 + $0x308] ss:$16 sps:$4 sm:$0xff]   ;;  %v8886_v44 = vld [vmem:[%s15435_s2 + $0x324] ss:$16 sps:$4 sm:$0xff]  }
  0xa8   :  { %1794 = vmatprep.subr.bf16.mxu0 %v8793_v45  ;;  %1880 = vmatprep.subr.bf16.mxu1 %v8796_v46  ;;  %v8889_v45 = vld [vmem:[%s15435_s2 + $0x32c] ss:$16 sps:$4 sm:$0xff]   ;;  %v8884_v46 = vld [vmem:[%s15435_s2 + $0x320] ss:$16 sps:$4 sm:$0xff]  }
  0xab   :  { %1795 = vmatpush1.bf16.msra.mxu0 %v8791_v47  ;;  %1881 = vmatpush1.bf16.msra.mxu1 %v8794_v48  ;;  %v8887_v47 = vld [vmem:[%s15435_s2 + $0x328] ss:$16 sps:$4 sm:$0xff]   ;;  %v8892_v48 = vld [vmem:[%s15435_s2 + $0x344] ss:$16 sps:$4 sm:$0xff]  }
  0xac   :  { %1796 = vmatprep.subr.bf16.mxu0 %v8799_v49  ;;  %1882 = vmatprep.subr.bf16.mxu1 %v8802_v50  ;;  %v8895_v49 = vld [vmem:[%s15435_s2 + $0x34c] ss:$16 sps:$4 sm:$0xff]   ;;  %v8890_v50 = vld [vmem:[%s15435_s2 + $0x340] ss:$16 sps:$4 sm:$0xff]  }
  0xaf   :  { %1797 = vmatpush1.bf16.msra.mxu0 %v8797_v51  ;;  %1883 = vmatpush1.bf16.msra.mxu1 %v8800_v52  ;;  %v8893_v51 = vld [vmem:[%s15435_s2 + $0x348] ss:$16 sps:$4 sm:$0xff]   ;;  %v8898_v52 = vld [vmem:[%s15435_s2 + $0x364] ss:$16 sps:$4 sm:$0xff]  }
  0xb0   :  { %1798 = vmatprep.subr.bf16.mxu0 %v8805_v53  ;;  %1884 = vmatprep.subr.bf16.mxu1 %v8808_v54  ;;  %v8901_v53 = vld [vmem:[%s15435_s2 + $0x36c] ss:$16 sps:$4 sm:$0xff]   ;;  %v8896_v54 = vld [vmem:[%s15435_s2 + $0x360] ss:$16 sps:$4 sm:$0xff]  }
  0xb3   :  { %1799 = vmatpush1.bf16.msra.mxu0 %v8803_v55  ;;  %1885 = vmatpush1.bf16.msra.mxu1 %v8806_v56  ;;  %v8899_v55 = vld [vmem:[%s15435_s2 + $0x368] ss:$16 sps:$4 sm:$0xff]   ;;  %v8904_v56 = vld [vmem:[%s15435_s2 + $0x384] ss:$16 sps:$4 sm:$0xff]  }
  0xb4   :  { %1800 = vmatprep.subr.bf16.mxu0 %v8811_v57  ;;  %1886 = vmatprep.subr.bf16.mxu1 %v8814_v58  ;;  %v8907_v57 = vld [vmem:[%s15435_s2 + $0x38c] ss:$16 sps:$4 sm:$0xff]   ;;  %v8902_v58 = vld [vmem:[%s15435_s2 + $0x380] ss:$16 sps:$4 sm:$0xff]  }
  0xb7   :  { %1801 = vmatpush1.bf16.msra.mxu0 %v8809_v59  ;;  %1887 = vmatpush1.bf16.msra.mxu1 %v8812_v60  ;;  %v8905_v59 = vld [vmem:[%s15435_s2 + $0x388] ss:$16 sps:$4 sm:$0xff]   ;;  %v8910_v60 = vld [vmem:[%s15435_s2 + $0x3a4] ss:$16 sps:$4 sm:$0xff]  }
  0xb8   :  { %1802 = vmatprep.subr.bf16.mxu0 %v8817_v61  ;;  %1888 = vmatprep.subr.bf16.mxu1 %v8820_v62  ;;  %v8913_v61 = vld [vmem:[%s15435_s2 + $0x3ac] ss:$16 sps:$4 sm:$0xff]   ;;  %v8908_v62 = vld [vmem:[%s15435_s2 + $0x3a0] ss:$16 sps:$4 sm:$0xff]  }
  0xbb   :  { %1803 = vmatpush1.bf16.msra.mxu0 %v8815_v63  ;;  %1889 = vmatpush1.bf16.msra.mxu1 %v8818_v0  ;;  %v8911_v63 = vld [vmem:[%s15435_s2 + $0x3a8] ss:$16 sps:$4 sm:$0xff]   ;;  %v8916_v0 = vld [vmem:[%s15435_s2 + $0x3c4] ss:$16 sps:$4 sm:$0xff]  }
  0xbc   :  { %1804 = vmatprep.subr.bf16.mxu0 %v8823_v1  ;;  %1890 = vmatprep.subr.bf16.mxu1 %v8826_v2  ;;  %v8919_v1 = vld [vmem:[%s15435_s2 + $0x3cc] ss:$16 sps:$4 sm:$0xff]   ;;  %v8914_v2 = vld [vmem:[%s15435_s2 + $0x3c0] ss:$16 sps:$4 sm:$0xff]  }
  0xbf   :  { %1805 = vmatpush1.bf16.msra.mxu0 %v8821_v3  ;;  %1891 = vmatpush1.bf16.msra.mxu1 %v8824_v4  ;;  %v8917_v3 = vld [vmem:[%s15435_s2 + $0x3c8] ss:$16 sps:$4 sm:$0xff]   ;;  %v8922_v4 = vld [vmem:[%s15435_s2 + $0x3e4] ss:$16 sps:$4 sm:$0xff]  }
  0xc0   :  { %1817 = vmatprep.subr.bf16.mxu0 %v8831_v5  ;;  %1903 = vmatprep.subr.bf16.mxu1 %v8834_v6  ;;  %v8925_v5 = vld [vmem:[%s15435_s2 + $0x3ec] ss:$16 sps:$4 sm:$0xff]   ;;  %v2085_v6 = vshll.u32 %v10922_v11, 16 }
  0xc2   :  { %1807 = vmatmul.mubr.bf16.vlgmr.msra.gmra.mrb[0].mxu0 %v11112_v9  ;;  %1893 = vmatmul.mubr.bf16.vlgmr.msra.gmra.mrb[0].mxu1 %v11112_v9 }
  0xc3   :  { %1818 = vmatpush1.bf16.msra.mxu0 %v8829_v7  ;;  %1904 = vmatpush1.bf16.msra.mxu1 %v8832_v8  ;;  %v8920_v7 = vld [vmem:[%s15435_s2 + $0x3e0] ss:$16 sps:$4 sm:$0xff]   ;;  %v8923_v8 = vld [vmem:[%s15435_s2 + $0x3e8] ss:$16 sps:$4 sm:$0xff]  }
  0xc4   :  { %1819 = vmatprep.subr.bf16.mxu0 %v8838_v10  ;;  %1905 = vmatprep.subr.bf16.mxu1 %v8841_v12  ;;  %v8930_v10 = vld [vmem:[%s15435_s2 + $0x804] ss:$16 sps:$4 sm:$0xff]   ;;  %v8933_v12 = vld [vmem:[%s15435_s2 + $0x80c] ss:$16 sps:$4 sm:$0xff]  }
  0xc5   :  { %1849 = vmatprep.mubr.bf16.mxu0 %v11123_v13  ;;  %1935 = vmatprep.mubr.bf16.mxu1 %v11123_v13 }
  0xc7   :  { %1820 = vmatpush1.bf16.msra.mxu0 %v8836_v14  ;;  %1906 = vmatpush1.bf16.msra.mxu1 %v8839_v15  ;;  %v8928_v14 = vld [vmem:[%s15435_s2 + $0x800] ss:$16 sps:$4 sm:$0xff]   ;;  %v2083_v15 = vshrl.u32 %v10922_v11, 16  ;;  %v8940_v11 = vld [vmem:[%s15435_s2 + $0x82c] ss:$16 sps:$4 sm:$0xff]  }
  0xc8   :  { %1821 = vmatprep.subr.bf16.mxu0 %v8844_v16  ;;  %1907 = vmatprep.subr.bf16.mxu1 %v8847_v17  ;;  %v2087_v16 = vrot.slane %v2085_v6, 1  ;;  %v8931_v17 = vld [vmem:[%s15435_s2 + $0x808] ss:$16 sps:$4 sm:$0xff]  }
  0xc9   :  { %v9010_v6 = vld [vmem:[%s15435_s2 + $0x9a8] ss:$16 sps:$4 sm:$0xff]  }
  0xcb   :  { %1822 = vmatpush1.bf16.msra.mxu0 %v8842_v18  ;;  %1908 = vmatpush1.bf16.msra.mxu1 %v8845_v19  ;;  %v11320_v18 = vld [vmem:[%s15437_s0 + $0x8] ss:$16 sps:$4 sm:$0xff]   ;;  %v8937_v19 = vld [vmem:[%s15435_s2 + $0x824] ss:$16 sps:$4 sm:$0xff]  }
  0xcc   :  { %1823 = vmatprep.subr.bf16.mxu0 %v8850_v20  ;;  %1909 = vmatprep.subr.bf16.mxu1 %v8853_v21  ;;  %v11328_v20 = vor.u32 %v2087_v16, %v2083_v15  ;;  %v8935_v21 = vld [vmem:[%s15435_s2 + $0x820] ss:$16 sps:$4 sm:$0xff]   ;;  %v9021_v15 = vld [vmem:[%s15435_s2 + $0x9e4] ss:$16 sps:$4 sm:$0xff]   ;;  %v9024_v16 = vld [vmem:[%s15435_s2 + $0x9ec] ss:$16 sps:$4 sm:$0xff]  }
  0xcf   :  { %1824 = vmatpush1.bf16.msra.mxu0 %v8848_v22  ;;  %1910 = vmatpush1.bf16.msra.mxu1 %v8851_v23  ;;  %v8938_v22 = vld [vmem:[%s15435_s2 + $0x828] ss:$16 sps:$4 sm:$0xff]   ;;  %v8943_v23 = vld [vmem:[%s15435_s2 + $0x844] ss:$16 sps:$4 sm:$0xff]  }
  0xd0   :  { %1825 = vmatprep.subr.bf16.mxu0 %v8856_v24  ;;  %1911 = vmatprep.subr.bf16.mxu1 %v8859_v25  ;;  %v8946_v24 = vld [vmem:[%s15435_s2 + $0x84c] ss:$16 sps:$4 sm:$0xff]   ;;  %v8941_v25 = vld [vmem:[%s15435_s2 + $0x840] ss:$16 sps:$4 sm:$0xff]  }
  0xd3   :  { %1826 = vmatpush1.bf16.msra.mxu0 %v8854_v26  ;;  %1912 = vmatpush1.bf16.msra.mxu1 %v8857_v27  ;;  %v8944_v26 = vld [vmem:[%s15435_s2 + $0x848] ss:$16 sps:$4 sm:$0xff]   ;;  %v8949_v27 = vld [vmem:[%s15435_s2 + $0x864] ss:$16 sps:$4 sm:$0xff]  }
  0xd4   :  { %1827 = vmatprep.subr.bf16.mxu0 %v8862_v28  ;;  %1913 = vmatprep.subr.bf16.mxu1 %v8865_v29  ;;  %v8952_v28 = vld [vmem:[%s15435_s2 + $0x86c] ss:$16 sps:$4 sm:$0xff]   ;;  %v8947_v29 = vld [vmem:[%s15435_s2 + $0x860] ss:$16 sps:$4 sm:$0xff]  }
  0xd7   :  { %1828 = vmatpush1.bf16.msra.mxu0 %v8860_v30  ;;  %1914 = vmatpush1.bf16.msra.mxu1 %v8863_v31  ;;  %v8950_v30 = vld [vmem:[%s15435_s2 + $0x868] ss:$16 sps:$4 sm:$0xff]   ;;  %v8955_v31 = vld [vmem:[%s15435_s2 + $0x884] ss:$16 sps:$4 sm:$0xff]  }
  0xd8   :  { %1829 = vmatprep.subr.bf16.mxu0 %v8868_v32  ;;  %1915 = vmatprep.subr.bf16.mxu1 %v8871_v33  ;;  %v8958_v32 = vld [vmem:[%s15435_s2 + $0x88c] ss:$16 sps:$4 sm:$0xff]   ;;  %v8953_v33 = vld [vmem:[%s15435_s2 + $0x880] ss:$16 sps:$4 sm:$0xff]  }
  0xdb   :  { %1830 = vmatpush1.bf16.msra.mxu0 %v8866_v34  ;;  %1916 = vmatpush1.bf16.msra.mxu1 %v8869_v35  ;;  %v8956_v34 = vld [vmem:[%s15435_s2 + $0x888] ss:$16 sps:$4 sm:$0xff]   ;;  %v8961_v35 = vld [vmem:[%s15435_s2 + $0x8a4] ss:$16 sps:$4 sm:$0xff]  }
  0xdc   :  { %1831 = vmatprep.subr.bf16.mxu0 %v8874_v36  ;;  %1917 = vmatprep.subr.bf16.mxu1 %v8877_v37  ;;  %v8964_v36 = vld [vmem:[%s15435_s2 + $0x8ac] ss:$16 sps:$4 sm:$0xff]   ;;  %v8959_v37 = vld [vmem:[%s15435_s2 + $0x8a0] ss:$16 sps:$4 sm:$0xff]  }
  0xdf   :  { %1832 = vmatpush1.bf16.msra.mxu0 %v8872_v38  ;;  %1918 = vmatpush1.bf16.msra.mxu1 %v8875_v39  ;;  %v8962_v38 = vld [vmem:[%s15435_s2 + $0x8a8] ss:$16 sps:$4 sm:$0xff]   ;;  %v8967_v39 = vld [vmem:[%s15435_s2 + $0x8c4] ss:$16 sps:$4 sm:$0xff]  }
  0xe0   :  { %1833 = vmatprep.subr.bf16.mxu0 %v8880_v40  ;;  %1919 = vmatprep.subr.bf16.mxu1 %v8883_v41  ;;  %v8970_v40 = vld [vmem:[%s15435_s2 + $0x8cc] ss:$16 sps:$4 sm:$0xff]   ;;  %v8965_v41 = vld [vmem:[%s15435_s2 + $0x8c0] ss:$16 sps:$4 sm:$0xff]  }
  0xe3   :  { %1834 = vmatpush1.bf16.msra.mxu0 %v8878_v42  ;;  %1920 = vmatpush1.bf16.msra.mxu1 %v8881_v43  ;;  %v8968_v42 = vld [vmem:[%s15435_s2 + $0x8c8] ss:$16 sps:$4 sm:$0xff]   ;;  %v8973_v43 = vld [vmem:[%s15435_s2 + $0x8e4] ss:$16 sps:$4 sm:$0xff]  }
  0xe4   :  { %1835 = vmatprep.subr.bf16.mxu0 %v8886_v44  ;;  %1921 = vmatprep.subr.bf16.mxu1 %v8889_v45  ;;  %v8976_v44 = vld [vmem:[%s15435_s2 + $0x8ec] ss:$16 sps:$4 sm:$0xff]   ;;  %v8971_v45 = vld [vmem:[%s15435_s2 + $0x8e0] ss:$16 sps:$4 sm:$0xff]  }
  0xe7   :  { %1836 = vmatpush1.bf16.msra.mxu0 %v8884_v46  ;;  %1922 = vmatpush1.bf16.msra.mxu1 %v8887_v47  ;;  %v8974_v46 = vld [vmem:[%s15435_s2 + $0x8e8] ss:$16 sps:$4 sm:$0xff]   ;;  %v8979_v47 = vld [vmem:[%s15435_s2 + $0x904] ss:$16 sps:$4 sm:$0xff]  }
  0xe8   :  { %1837 = vmatprep.subr.bf16.mxu0 %v8892_v48  ;;  %1923 = vmatprep.subr.bf16.mxu1 %v8895_v49  ;;  %v8982_v48 = vld [vmem:[%s15435_s2 + $0x90c] ss:$16 sps:$4 sm:$0xff]   ;;  %v8977_v49 = vld [vmem:[%s15435_s2 + $0x900] ss:$16 sps:$4 sm:$0xff]  }
  0xeb   :  { %1838 = vmatpush1.bf16.msra.mxu0 %v8890_v50  ;;  %1924 = vmatpush1.bf16.msra.mxu1 %v8893_v51  ;;  %v8980_v50 = vld [vmem:[%s15435_s2 + $0x908] ss:$16 sps:$4 sm:$0xff]   ;;  %v8985_v51 = vld [vmem:[%s15435_s2 + $0x924] ss:$16 sps:$4 sm:$0xff]  }
  0xec   :  { %1839 = vmatprep.subr.bf16.mxu0 %v8898_v52  ;;  %1925 = vmatprep.subr.bf16.mxu1 %v8901_v53  ;;  %v8988_v52 = vld [vmem:[%s15435_s2 + $0x92c] ss:$16 sps:$4 sm:$0xff]   ;;  %v8983_v53 = vld [vmem:[%s15435_s2 + $0x920] ss:$16 sps:$4 sm:$0xff]  }
  0xef   :  { %1840 = vmatpush1.bf16.msra.mxu0 %v8896_v54  ;;  %1926 = vmatpush1.bf16.msra.mxu1 %v8899_v55  ;;  %v8986_v54 = vld [vmem:[%s15435_s2 + $0x928] ss:$16 sps:$4 sm:$0xff]   ;;  %v8991_v55 = vld [vmem:[%s15435_s2 + $0x944] ss:$16 sps:$4 sm:$0xff]  }
  0xf0   :  { %1841 = vmatprep.subr.bf16.mxu0 %v8904_v56  ;;  %1927 = vmatprep.subr.bf16.mxu1 %v8907_v57  ;;  %v8994_v56 = vld [vmem:[%s15435_s2 + $0x94c] ss:$16 sps:$4 sm:$0xff]   ;;  %v8989_v57 = vld [vmem:[%s15435_s2 + $0x940] ss:$16 sps:$4 sm:$0xff]  }
  0xf3   :  { %1842 = vmatpush1.bf16.msra.mxu0 %v8902_v58  ;;  %1928 = vmatpush1.bf16.msra.mxu1 %v8905_v59  ;;  %v8992_v58 = vld [vmem:[%s15435_s2 + $0x948] ss:$16 sps:$4 sm:$0xff]   ;;  %v8997_v59 = vld [vmem:[%s15435_s2 + $0x964] ss:$16 sps:$4 sm:$0xff]  }
  0xf4   :  { %1843 = vmatprep.subr.bf16.mxu0 %v8910_v60  ;;  %1929 = vmatprep.subr.bf16.mxu1 %v8913_v61  ;;  %v9000_v60 = vld [vmem:[%s15435_s2 + $0x96c] ss:$16 sps:$4 sm:$0xff]   ;;  %v8995_v61 = vld [vmem:[%s15435_s2 + $0x960] ss:$16 sps:$4 sm:$0xff]  }
  0xf7   :  { %1844 = vmatpush1.bf16.msra.mxu0 %v8908_v62  ;;  %1930 = vmatpush1.bf16.msra.mxu1 %v8911_v63  ;;  %v8998_v62 = vld [vmem:[%s15435_s2 + $0x968] ss:$16 sps:$4 sm:$0xff]   ;;  %v9003_v63 = vld [vmem:[%s15435_s2 + $0x984] ss:$16 sps:$4 sm:$0xff]  }
  0xf8   :  { %1845 = vmatprep.subr.bf16.mxu0 %v8916_v0  ;;  %1931 = vmatprep.subr.bf16.mxu1 %v8919_v1  ;;  %v9006_v0 = vld [vmem:[%s15435_s2 + $0x98c] ss:$16 sps:$4 sm:$0xff]   ;;  %v9001_v1 = vld [vmem:[%s15435_s2 + $0x980] ss:$16 sps:$4 sm:$0xff]  }
  0xfb   :  { %1846 = vmatpush1.bf16.msra.mxu0 %v8914_v2  ;;  %1932 = vmatpush1.bf16.msra.mxu1 %v8917_v3  ;;  %v9004_v2 = vld [vmem:[%s15435_s2 + $0x988] ss:$16 sps:$4 sm:$0xff]   ;;  %v9009_v3 = vld [vmem:[%s15435_s2 + $0x9a4] ss:$16 sps:$4 sm:$0xff]  }
  0xfc   :  { %1847 = vmatprep.subr.bf16.mxu0 %v8922_v4  ;;  %1933 = vmatprep.subr.bf16.mxu1 %v8925_v5  ;;  %v9012_v4 = vld [vmem:[%s15435_s2 + $0x9ac] ss:$16 sps:$4 sm:$0xff]   ;;  %v9007_v5 = vld [vmem:[%s15435_s2 + $0x9a0] ss:$16 sps:$4 sm:$0xff]  }
  0xff   :  { %1848 = vmatpush1.bf16.msra.mxu0 %v8920_v7  ;;  %1934 = vmatpush1.bf16.msra.mxu1 %v8923_v8  ;;  %v9015_v7 = vld [vmem:[%s15435_s2 + $0x9c4] ss:$16 sps:$4 sm:$0xff]   ;;  %v9018_v8 = vld [vmem:[%s15435_s2 + $0x9cc] ss:$16 sps:$4 sm:$0xff]  }
 0x100   :  { %2747 = vmatprep.subr.bf16.mxu0 %v8930_v10  ;;  %2833 = vmatprep.subr.bf16.mxu1 %v8933_v12  ;;  %v2078_v10 = vshll.u32 %v11112_v9, 16  ;;  %v9013_v12 = vld [vmem:[%s15435_s2 + $0x9c0] ss:$16 sps:$4 sm:$0xff]  }
 0x102   :  { %1850 = vmatmul.mubr.bf16.vlgmr.msra.gmra.mrb[0].mxu0 %v11320_v18  ;;  %1936 = vmatmul.mubr.bf16.vlgmr.msra.gmra.mrb[0].mxu1 %v11320_v18 }
 0x103   :  { %2748 = vmatpush1.bf16.msra.mxu0 %v8928_v14  ;;  %2834 = vmatpush1.bf16.msra.mxu1 %v8931_v17  ;;  %v9016_v14 = vld [vmem:[%s15435_s2 + $0x9c8] ss:$16 sps:$4 sm:$0xff]   ;;  %v2099_v17 = vshll.u32 %v11123_v13, 16 }
 0x104   :  { %2749 = vmatprep.subr.bf16.mxu0 %v8937_v19  ;;  %2835 = vmatprep.subr.bf16.mxu1 %v8940_v11  ;;  %v2076_v19 = vshrl.u32 %v11112_v9, 16  ;;  %v2080_v11 = vrot.slane %v2078_v10, 1  ;;  %v9030_v9 = vld [vmem:[%s15435_s2 + $0xa0c] ss:$16 sps:$4 sm:$0xff]   ;;  %v9099_v10 = vld [vmem:[%s15435_s2 + $0xb84] ss:$16 sps:$4 sm:$0xff]  }
 0x105   :  { %2779 = vmatprep.mubr.bf16.mxu0 %v11328_v20  ;;  %2865 = vmatprep.mubr.bf16.mxu1 %v11328_v20 }
 0x107   :  { %2750 = vmatpush1.bf16.msra.mxu0 %v8935_v21  ;;  %2836 = vmatpush1.bf16.msra.mxu1 %v8938_v22  ;;  %v9019_v21 = vld [vmem:[%s15435_s2 + $0x9e0] ss:$16 sps:$4 sm:$0xff]   ;;  %v9022_v22 = vld [vmem:[%s15435_s2 + $0x9e8] ss:$16 sps:$4 sm:$0xff]  }
 0x108   :  { %2751 = vmatprep.subr.bf16.mxu0 %v8943_v23  ;;  %2837 = vmatprep.subr.bf16.mxu1 %v8946_v24  ;;  %v9027_v23 = vld [vmem:[%s15435_s2 + $0xa04] ss:$16 sps:$4 sm:$0xff]   ;;  %v2097_v24 = vshrl.u32 %v11123_v13, 16  ;;  %v9036_v13 = vld [vmem:[%s15435_s2 + $0xa2c] ss:$16 sps:$4 sm:$0xff]  }
 0x10b   :  { %2752 = vmatpush1.bf16.msra.mxu0 %v8941_v25  ;;  %2838 = vmatpush1.bf16.msra.mxu1 %v8944_v26  ;;  %v2101_v25 = vrot.slane %v2099_v17, 1  ;;  %v11518_v26 = vor.u32 %v2080_v11, %v2076_v19  ;;  %v9108_v17 = vld [vmem:[%s15435_s2 + $0xbac] ss:$16 sps:$4 sm:$0xff]   ;;  %v9103_v19 = vld [vmem:[%s15435_s2 + $0xba0] ss:$16 sps:$4 sm:$0xff]  }
 0x10c   :  { %2753 = vmatprep.subr.bf16.mxu0 %v8949_v27  ;;  %2839 = vmatprep.subr.bf16.mxu1 %v8952_v28  ;;  %v9025_v27 = vld [vmem:[%s15435_s2 + $0xa00] ss:$16 sps:$4 sm:$0xff]   ;;  %v9028_v28 = vld [vmem:[%s15435_s2 + $0xa08] ss:$16 sps:$4 sm:$0xff]  }
 0x10d   :  { %v9106_v11 = vld [vmem:[%s15435_s2 + $0xba8] ss:$16 sps:$4 sm:$0xff]  }
 0x10f   :  { %2754 = vmatpush1.bf16.msra.mxu0 %v8947_v29  ;;  %2840 = vmatpush1.bf16.msra.mxu1 %v8950_v30  ;;  %v9033_v29 = vld [vmem:[%s15435_s2 + $0xa24] ss:$16 sps:$4 sm:$0xff]   ;;  %v11532_v30 = vor.u32 %v2101_v25, %v2097_v24  ;;  %v9112_v24 = vld [vmem:[%s15435_s2 + $0xbc8] ss:$16 sps:$4 sm:$0xff]  }
 0x110   :  { %2755 = vmatprep.subr.bf16.mxu0 %v8955_v31  ;;  %2841 = vmatprep.subr.bf16.mxu1 %v8958_v32  ;;  %v9031_v31 = vld [vmem:[%s15435_s2 + $0xa20] ss:$16 sps:$4 sm:$0xff]   ;;  %v9034_v32 = vld [vmem:[%s15435_s2 + $0xa28] ss:$16 sps:$4 sm:$0xff]   ;;  %v9117_v25 = vld [vmem:[%s15435_s2 + $0xbe4] ss:$16 sps:$4 sm:$0xff]  }
 0x113   :  { %2756 = vmatpush1.bf16.msra.mxu0 %v8953_v33  ;;  %2842 = vmatpush1.bf16.msra.mxu1 %v8956_v34  ;;  %v9039_v33 = vld [vmem:[%s15435_s2 + $0xa44] ss:$16 sps:$4 sm:$0xff]   ;;  %v9042_v34 = vld [vmem:[%s15435_s2 + $0xa4c] ss:$16 sps:$4 sm:$0xff]  }
 0x114   :  { %2757 = vmatprep.subr.bf16.mxu0 %v8961_v35  ;;  %2843 = vmatprep.subr.bf16.mxu1 %v8964_v36  ;;  %v9037_v35 = vld [vmem:[%s15435_s2 + $0xa40] ss:$16 sps:$4 sm:$0xff]   ;;  %v9040_v36 = vld [vmem:[%s15435_s2 + $0xa48] ss:$16 sps:$4 sm:$0xff]  }
 0x117   :  { %2758 = vmatpush1.bf16.msra.mxu0 %v8959_v37  ;;  %2844 = vmatpush1.bf16.msra.mxu1 %v8962_v38  ;;  %v9045_v37 = vld [vmem:[%s15435_s2 + $0xa64] ss:$16 sps:$4 sm:$0xff]   ;;  %v9048_v38 = vld [vmem:[%s15435_s2 + $0xa6c] ss:$16 sps:$4 sm:$0xff]  }
 0x118   :  { %2759 = vmatprep.subr.bf16.mxu0 %v8967_v39  ;;  %2845 = vmatprep.subr.bf16.mxu1 %v8970_v40  ;;  %v9043_v39 = vld [vmem:[%s15435_s2 + $0xa60] ss:$16 sps:$4 sm:$0xff]   ;;  %v9046_v40 = vld [vmem:[%s15435_s2 + $0xa68] ss:$16 sps:$4 sm:$0xff]  }
 0x11b   :  { %2760 = vmatpush1.bf16.msra.mxu0 %v8965_v41  ;;  %2846 = vmatpush1.bf16.msra.mxu1 %v8968_v42  ;;  %v9051_v41 = vld [vmem:[%s15435_s2 + $0xa84] ss:$16 sps:$4 sm:$0xff]   ;;  %v9054_v42 = vld [vmem:[%s15435_s2 + $0xa8c] ss:$16 sps:$4 sm:$0xff]  }
 0x11c   :  { %2761 = vmatprep.subr.bf16.mxu0 %v8973_v43  ;;  %2847 = vmatprep.subr.bf16.mxu1 %v8976_v44  ;;  %v9049_v43 = vld [vmem:[%s15435_s2 + $0xa80] ss:$16 sps:$4 sm:$0xff]   ;;  %v9052_v44 = vld [vmem:[%s15435_s2 + $0xa88] ss:$16 sps:$4 sm:$0xff]  }
 0x11f   :  { %2762 = vmatpush1.bf16.msra.mxu0 %v8971_v45  ;;  %2848 = vmatpush1.bf16.msra.mxu1 %v8974_v46  ;;  %v9057_v45 = vld [vmem:[%s15435_s2 + $0xaa4] ss:$16 sps:$4 sm:$0xff]   ;;  %v9060_v46 = vld [vmem:[%s15435_s2 + $0xaac] ss:$16 sps:$4 sm:$0xff]  }
 0x120   :  { %2763 = vmatprep.subr.bf16.mxu0 %v8979_v47  ;;  %2849 = vmatprep.subr.bf16.mxu1 %v8982_v48  ;;  %v9055_v47 = vld [vmem:[%s15435_s2 + $0xaa0] ss:$16 sps:$4 sm:$0xff]   ;;  %v9058_v48 = vld [vmem:[%s15435_s2 + $0xaa8] ss:$16 sps:$4 sm:$0xff]  }
 0x123   :  { %2764 = vmatpush1.bf16.msra.mxu0 %v8977_v49  ;;  %2850 = vmatpush1.bf16.msra.mxu1 %v8980_v50  ;;  %v9063_v49 = vld [vmem:[%s15435_s2 + $0xac4] ss:$16 sps:$4 sm:$0xff]   ;;  %v9066_v50 = vld [vmem:[%s15435_s2 + $0xacc] ss:$16 sps:$4 sm:$0xff]  }
 0x124   :  { %2765 = vmatprep.subr.bf16.mxu0 %v8985_v51  ;;  %2851 = vmatprep.subr.bf16.mxu1 %v8988_v52  ;;  %v9061_v51 = vld [vmem:[%s15435_s2 + $0xac0] ss:$16 sps:$4 sm:$0xff]   ;;  %v9064_v52 = vld [vmem:[%s15435_s2 + $0xac8] ss:$16 sps:$4 sm:$0xff]  }
 0x127   :  { %2766 = vmatpush1.bf16.msra.mxu0 %v8983_v53  ;;  %2852 = vmatpush1.bf16.msra.mxu1 %v8986_v54  ;;  %v9069_v53 = vld [vmem:[%s15435_s2 + $0xae4] ss:$16 sps:$4 sm:$0xff]   ;;  %v9072_v54 = vld [vmem:[%s15435_s2 + $0xaec] ss:$16 sps:$4 sm:$0xff]  }
 0x128   :  { %2767 = vmatprep.subr.bf16.mxu0 %v8991_v55  ;;  %2853 = vmatprep.subr.bf16.mxu1 %v8994_v56  ;;  %v9067_v55 = vld [vmem:[%s15435_s2 + $0xae0] ss:$16 sps:$4 sm:$0xff]   ;;  %v9070_v56 = vld [vmem:[%s15435_s2 + $0xae8] ss:$16 sps:$4 sm:$0xff]  }
 0x12b   :  { %2768 = vmatpush1.bf16.msra.mxu0 %v8989_v57  ;;  %2854 = vmatpush1.bf16.msra.mxu1 %v8992_v58  ;;  %v9075_v57 = vld [vmem:[%s15435_s2 + $0xb04] ss:$16 sps:$4 sm:$0xff]   ;;  %v9078_v58 = vld [vmem:[%s15435_s2 + $0xb0c] ss:$16 sps:$4 sm:$0xff]  }
 0x12c   :  { %2769 = vmatprep.subr.bf16.mxu0 %v8997_v59  ;;  %2855 = vmatprep.subr.bf16.mxu1 %v9000_v60  ;;  %v9073_v59 = vld [vmem:[%s15435_s2 + $0xb00] ss:$16 sps:$4 sm:$0xff]   ;;  %v9076_v60 = vld [vmem:[%s15435_s2 + $0xb08] ss:$16 sps:$4 sm:$0xff]  }
 0x12f   :  { %2770 = vmatpush1.bf16.msra.mxu0 %v8995_v61  ;;  %2856 = vmatpush1.bf16.msra.mxu1 %v8998_v62  ;;  %v9081_v61 = vld [vmem:[%s15435_s2 + $0xb24] ss:$16 sps:$4 sm:$0xff]   ;;  %v9084_v62 = vld [vmem:[%s15435_s2 + $0xb2c] ss:$16 sps:$4 sm:$0xff]  }
 0x130   :  { %2771 = vmatprep.subr.bf16.mxu0 %v9003_v63  ;;  %2857 = vmatprep.subr.bf16.mxu1 %v9006_v0  ;;  %v9079_v63 = vld [vmem:[%s15435_s2 + $0xb20] ss:$16 sps:$4 sm:$0xff]   ;;  %v9082_v0 = vld [vmem:[%s15435_s2 + $0xb28] ss:$16 sps:$4 sm:$0xff]  }
 0x133   :  { %2772 = vmatpush1.bf16.msra.mxu0 %v9001_v1  ;;  %2858 = vmatpush1.bf16.msra.mxu1 %v9004_v2  ;;  %v9087_v1 = vld [vmem:[%s15435_s2 + $0xb44] ss:$16 sps:$4 sm:$0xff]   ;;  %v9090_v2 = vld [vmem:[%s15435_s2 + $0xb4c] ss:$16 sps:$4 sm:$0xff]  }
 0x134   :  { %2773 = vmatprep.subr.bf16.mxu0 %v9009_v3  ;;  %2859 = vmatprep.subr.bf16.mxu1 %v9012_v4  ;;  %v9085_v3 = vld [vmem:[%s15435_s2 + $0xb40] ss:$16 sps:$4 sm:$0xff]   ;;  %v9088_v4 = vld [vmem:[%s15435_s2 + $0xb48] ss:$16 sps:$4 sm:$0xff]  }
 0x137   :  { %2774 = vmatpush1.bf16.msra.mxu0 %v9007_v5  ;;  %2860 = vmatpush1.bf16.msra.mxu1 %v9010_v6  ;;  %v9093_v5 = vld [vmem:[%s15435_s2 + $0xb64] ss:$16 sps:$4 sm:$0xff]   ;;  %v9096_v6 = vld [vmem:[%s15435_s2 + $0xb6c] ss:$16 sps:$4 sm:$0xff]  }
 0x138   :  { %2775 = vmatprep.subr.bf16.mxu0 %v9015_v7  ;;  %2861 = vmatprep.subr.bf16.mxu1 %v9018_v8  ;;  %v9091_v7 = vld [vmem:[%s15435_s2 + $0xb60] ss:$16 sps:$4 sm:$0xff]   ;;  %v9094_v8 = vld [vmem:[%s15435_s2 + $0xb68] ss:$16 sps:$4 sm:$0xff]  }
 0x13b   :  { %2776 = vmatpush1.bf16.msra.mxu0 %v9013_v12  ;;  %2862 = vmatpush1.bf16.msra.mxu1 %v9016_v14  ;;  %v9102_v12 = vld [vmem:[%s15435_s2 + $0xb8c] ss:$16 sps:$4 sm:$0xff]   ;;  %v9097_v14 = vld [vmem:[%s15435_s2 + $0xb80] ss:$16 sps:$4 sm:$0xff]  }
 0x13c   :  { %2777 = vmatprep.subr.bf16.mxu0 %v9021_v15  ;;  %2863 = vmatprep.subr.bf16.mxu1 %v9024_v16  ;;  %v9100_v15 = vld [vmem:[%s15435_s2 + $0xb88] ss:$16 sps:$4 sm:$0xff]   ;;  %v9105_v16 = vld [vmem:[%s15435_s2 + $0xba4] ss:$16 sps:$4 sm:$0xff]  }
 0x13f   :  { %2778 = vmatpush1.bf16.msra.mxu0 %v9019_v21  ;;  %2864 = vmatpush1.bf16.msra.mxu1 %v9022_v22  ;;  %v9111_v21 = vld [vmem:[%s15435_s2 + $0xbc4] ss:$16 sps:$4 sm:$0xff]   ;;  %v9114_v22 = vld [vmem:[%s15435_s2 + $0xbcc] ss:$16 sps:$4 sm:$0xff]  }
 0x140   :  { %2790 = vmatprep.subr.bf16.mxu0 %v9027_v23  ;;  %2876 = vmatprep.subr.bf16.mxu1 %v9030_v9  ;;  %v2092_v23 = vshll.u32 %v11320_v18, 16  ;;  %v9109_v9 = vld [vmem:[%s15435_s2 + $0xbc0] ss:$16 sps:$4 sm:$0xff]  }
 0x142   :  { %2780 = vmatmul.mubr.bf16.vlgmr.msra.gmra.mrb[0].mxu0 %v11518_v26  ;;  %2866 = vmatmul.mubr.bf16.vlgmr.msra.gmra.mrb[0].mxu1 %v11518_v26 }
 0x143   :  { %2791 = vmatpush1.bf16.msra.mxu0 %v9025_v27  ;;  %2877 = vmatpush1.bf16.msra.mxu1 %v9028_v28  ;;  %v9120_v27 = vld [vmem:[%s15435_s2 + $0xbec] ss:$16 sps:$4 sm:$0xff]   ;;  %v2090_v28 = vshrl.u32 %v11320_v18, 16 }
 0x144   :  { %2792 = vmatprep.subr.bf16.mxu0 %v9033_v29  ;;  %2878 = vmatprep.subr.bf16.mxu1 %v9036_v13  ;;  %v2094_v29 = vrot.slane %v2092_v23, 1  ;;  %v9115_v13 = vld [vmem:[%s15435_s2 + $0xbe0] ss:$16 sps:$4 sm:$0xff]   ;;  %v9126_v18 = vld [vmem:[%s15435_s2 + $0x100c] ss:$16 sps:$4 sm:$0xff]  }
 0x145   :  { %2822 = vmatprep.mubr.bf16.mxu0 %v11532_v30  ;;  %2908 = vmatprep.mubr.bf16.mxu1 %v11532_v30  ;;  %v9193_v23 = vld [vmem:[%s15435_s2 + $0x1180] ss:$16 sps:$4 sm:$0xff]  }
 0x147   :  { %2793 = vmatpush1.bf16.msra.mxu0 %v9031_v31  ;;  %2879 = vmatpush1.bf16.msra.mxu1 %v9034_v32  ;;  %v9118_v31 = vld [vmem:[%s15435_s2 + $0xbe8] ss:$16 sps:$4 sm:$0xff]   ;;  %v9123_v32 = vld [vmem:[%s15435_s2 + $0x1004] ss:$16 sps:$4 sm:$0xff]  }
 0x148   :  { %2794 = vmatprep.subr.bf16.mxu0 %v9039_v33  ;;  %2880 = vmatprep.subr.bf16.mxu1 %v9042_v34  ;;  %v11720_v33 = vor.u32 %v2094_v29, %v2090_v28  ;;  %v9121_v34 = vld [vmem:[%s15435_s2 + $0x1000] ss:$16 sps:$4 sm:$0xff]   ;;  %v9202_v28 = vld [vmem:[%s15435_s2 + $0x11a8] ss:$16 sps:$4 sm:$0xff]   ;;  %v9207_v29 = vld [vmem:[%s15435_s2 + $0x11c4] ss:$16 sps:$4 sm:$0xff]  }
 0x14b   :  { %2795 = vmatpush1.bf16.msra.mxu0 %v9037_v35  ;;  %2881 = vmatpush1.bf16.msra.mxu1 %v9040_v36  ;;  %v9124_v35 = vld [vmem:[%s15435_s2 + $0x1008] ss:$16 sps:$4 sm:$0xff]   ;;  %v9129_v36 = vld [vmem:[%s15435_s2 + $0x1024] ss:$16 sps:$4 sm:$0xff]  }
 0x14c   :  { %2796 = vmatprep.subr.bf16.mxu0 %v9045_v37  ;;  %2882 = vmatprep.subr.bf16.mxu1 %v9048_v38  ;;  %v9132_v37 = vld [vmem:[%s15435_s2 + $0x102c] ss:$16 sps:$4 sm:$0xff]   ;;  %v9127_v38 = vld [vmem:[%s15435_s2 + $0x1020] ss:$16 sps:$4 sm:$0xff]  }
 0x14f   :  { %2797 = vmatpush1.bf16.msra.mxu0 %v9043_v39  ;;  %2883 = vmatpush1.bf16.msra.mxu1 %v9046_v40  ;;  %v9130_v39 = vld [vmem:[%s15435_s2 + $0x1028] ss:$16 sps:$4 sm:$0xff]   ;;  %v9135_v40 = vld [vmem:[%s15435_s2 + $0x1044] ss:$16 sps:$4 sm:$0xff]  }
 0x150   :  { %2798 = vmatprep.subr.bf16.mxu0 %v9051_v41  ;;  %2884 = vmatprep.subr.bf16.mxu1 %v9054_v42  ;;  %v9138_v41 = vld [vmem:[%s15435_s2 + $0x104c] ss:$16 sps:$4 sm:$0xff]   ;;  %v9697_v42 = vld [vmem:[%s15436_s1 + $0x4] ss:$16 sps:$4 sm:$0xff]  }
 0x153   :  { %2799 = vmatpush1.bf16.msra.mxu0 %v9049_v43  ;;  %2885 = vmatpush1.bf16.msra.mxu1 %v9052_v44  ;;  %v9133_v43 = vld [vmem:[%s15435_s2 + $0x1040] ss:$16 sps:$4 sm:$0xff]   ;;  %v9136_v44 = vld [vmem:[%s15435_s2 + $0x1048] ss:$16 sps:$4 sm:$0xff]  }
 0x154   :  { %2800 = vmatprep.subr.bf16.mxu0 %v9057_v45  ;;  %2886 = vmatprep.subr.bf16.mxu1 %v9060_v46  ;;  %v9141_v45 = vld [vmem:[%s15435_s2 + $0x1064] ss:$16 sps:$4 sm:$0xff]   ;;  %v9144_v46 = vld [vmem:[%s15435_s2 + $0x106c] ss:$16 sps:$4 sm:$0xff]  }
 0x157   :  { %2801 = vmatpush1.bf16.msra.mxu0 %v9055_v47  ;;  %2887 = vmatpush1.bf16.msra.mxu1 %v9058_v48  ;;  %v9139_v47 = vld [vmem:[%s15435_s2 + $0x1060] ss:$16 sps:$4 sm:$0xff]   ;;  %v9142_v48 = vld [vmem:[%s15435_s2 + $0x1068] ss:$16 sps:$4 sm:$0xff]  }
 0x158   :  { %2802 = vmatprep.subr.bf16.mxu0 %v9063_v49  ;;  %2888 = vmatprep.subr.bf16.mxu1 %v9066_v50  ;;  %v9147_v49 = vld [vmem:[%s15435_s2 + $0x1084] ss:$16 sps:$4 sm:$0xff]   ;;  %v9150_v50 = vld [vmem:[%s15435_s2 + $0x108c] ss:$16 sps:$4 sm:$0xff]  }
 0x15b   :  { %2803 = vmatpush1.bf16.msra.mxu0 %v9061_v51  ;;  %2889 = vmatpush1.bf16.msra.mxu1 %v9064_v52  ;;  %v9145_v51 = vld [vmem:[%s15435_s2 + $0x1080] ss:$16 sps:$4 sm:$0xff]   ;;  %v9148_v52 = vld [vmem:[%s15435_s2 + $0x1088] ss:$16 sps:$4 sm:$0xff]  }
 0x15c   :  { %2804 = vmatprep.subr.bf16.mxu0 %v9069_v53  ;;  %2890 = vmatprep.subr.bf16.mxu1 %v9072_v54  ;;  %v9153_v53 = vld [vmem:[%s15435_s2 + $0x10a4] ss:$16 sps:$4 sm:$0xff]   ;;  %v9156_v54 = vld [vmem:[%s15435_s2 + $0x10ac] ss:$16 sps:$4 sm:$0xff]  }
 0x15f   :  { %2805 = vmatpush1.bf16.msra.mxu0 %v9067_v55  ;;  %2891 = vmatpush1.bf16.msra.mxu1 %v9070_v56  ;;  %v9151_v55 = vld [vmem:[%s15435_s2 + $0x10a0] ss:$16 sps:$4 sm:$0xff]   ;;  %v9154_v56 = vld [vmem:[%s15435_s2 + $0x10a8] ss:$16 sps:$4 sm:$0xff]  }
 0x160   :  { %2806 = vmatprep.subr.bf16.mxu0 %v9075_v57  ;;  %2892 = vmatprep.subr.bf16.mxu1 %v9078_v58  ;;  %v9159_v57 = vld [vmem:[%s15435_s2 + $0x10c4] ss:$16 sps:$4 sm:$0xff]   ;;  %v9162_v58 = vld [vmem:[%s15435_s2 + $0x10cc] ss:$16 sps:$4 sm:$0xff]  }
 0x163   :  { %2807 = vmatpush1.bf16.msra.mxu0 %v9073_v59  ;;  %2893 = vmatpush1.bf16.msra.mxu1 %v9076_v60  ;;  %v9157_v59 = vld [vmem:[%s15435_s2 + $0x10c0] ss:$16 sps:$4 sm:$0xff]   ;;  %v9160_v60 = vld [vmem:[%s15435_s2 + $0x10c8] ss:$16 sps:$4 sm:$0xff]  }
 0x164   :  { %2808 = vmatprep.subr.bf16.mxu0 %v9081_v61  ;;  %2894 = vmatprep.subr.bf16.mxu1 %v9084_v62  ;;  %v9165_v61 = vld [vmem:[%s15435_s2 + $0x10e4] ss:$16 sps:$4 sm:$0xff]   ;;  %v9168_v62 = vld [vmem:[%s15435_s2 + $0x10ec] ss:$16 sps:$4 sm:$0xff]  }
 0x167   :  { %2809 = vmatpush1.bf16.msra.mxu0 %v9079_v63  ;;  %2895 = vmatpush1.bf16.msra.mxu1 %v9082_v0  ;;  %v9163_v63 = vld [vmem:[%s15435_s2 + $0x10e0] ss:$16 sps:$4 sm:$0xff]   ;;  %v9166_v0 = vld [vmem:[%s15435_s2 + $0x10e8] ss:$16 sps:$4 sm:$0xff]  }
 0x168   :  { %2810 = vmatprep.subr.bf16.mxu0 %v9087_v1  ;;  %2896 = vmatprep.subr.bf16.mxu1 %v9090_v2  ;;  %v9171_v1 = vld [vmem:[%s15435_s2 + $0x1104] ss:$16 sps:$4 sm:$0xff]   ;;  %v9174_v2 = vld [vmem:[%s15435_s2 + $0x110c] ss:$16 sps:$4 sm:$0xff]  }
 0x16b   :  { %2811 = vmatpush1.bf16.msra.mxu0 %v9085_v3  ;;  %2897 = vmatpush1.bf16.msra.mxu1 %v9088_v4  ;;  %v9169_v3 = vld [vmem:[%s15435_s2 + $0x1100] ss:$16 sps:$4 sm:$0xff]   ;;  %v9172_v4 = vld [vmem:[%s15435_s2 + $0x1108] ss:$16 sps:$4 sm:$0xff]  }
 0x16c   :  { %2812 = vmatprep.subr.bf16.mxu0 %v9093_v5  ;;  %2898 = vmatprep.subr.bf16.mxu1 %v9096_v6  ;;  %v9177_v5 = vld [vmem:[%s15435_s2 + $0x1124] ss:$16 sps:$4 sm:$0xff]   ;;  %v9180_v6 = vld [vmem:[%s15435_s2 + $0x112c] ss:$16 sps:$4 sm:$0xff]  }
 0x16f   :  { %2813 = vmatpush1.bf16.msra.mxu0 %v9091_v7  ;;  %2899 = vmatpush1.bf16.msra.mxu1 %v9094_v8  ;;  %v9175_v7 = vld [vmem:[%s15435_s2 + $0x1120] ss:$16 sps:$4 sm:$0xff]   ;;  %v9178_v8 = vld [vmem:[%s15435_s2 + $0x1128] ss:$16 sps:$4 sm:$0xff]  }
 0x170   :  { %2814 = vmatprep.subr.bf16.mxu0 %v9099_v10  ;;  %2900 = vmatprep.subr.bf16.mxu1 %v9102_v12  ;;  %v9183_v10 = vld [vmem:[%s15435_s2 + $0x1144] ss:$16 sps:$4 sm:$0xff]   ;;  %v9186_v12 = vld [vmem:[%s15435_s2 + $0x114c] ss:$16 sps:$4 sm:$0xff]  }
 0x173   :  { %2815 = vmatpush1.bf16.msra.mxu0 %v9097_v14  ;;  %2901 = vmatpush1.bf16.msra.mxu1 %v9100_v15  ;;  %v9181_v14 = vld [vmem:[%s15435_s2 + $0x1140] ss:$16 sps:$4 sm:$0xff]   ;;  %v9184_v15 = vld [vmem:[%s15435_s2 + $0x1148] ss:$16 sps:$4 sm:$0xff]  }
 0x174   :  { %2816 = vmatprep.subr.bf16.mxu0 %v9105_v16  ;;  %2902 = vmatprep.subr.bf16.mxu1 %v9108_v17  ;;  %v9189_v16 = vld [vmem:[%s15435_s2 + $0x1164] ss:$16 sps:$4 sm:$0xff]   ;;  %v9192_v17 = vld [vmem:[%s15435_s2 + $0x116c] ss:$16 sps:$4 sm:$0xff]  }
 0x177   :  { %2817 = vmatpush1.bf16.msra.mxu0 %v9103_v19  ;;  %2903 = vmatpush1.bf16.msra.mxu1 %v9106_v11  ;;  %v9187_v19 = vld [vmem:[%s15435_s2 + $0x1160] ss:$16 sps:$4 sm:$0xff]   ;;  %v9190_v11 = vld [vmem:[%s15435_s2 + $0x1168] ss:$16 sps:$4 sm:$0xff]  }
 0x178   :  { %2818 = vmatprep.subr.bf16.mxu0 %v9111_v21  ;;  %2904 = vmatprep.subr.bf16.mxu1 %v9114_v22  ;;  %v9195_v21 = vld [vmem:[%s15435_s2 + $0x1184] ss:$16 sps:$4 sm:$0xff]   ;;  %v9198_v22 = vld [vmem:[%s15435_s2 + $0x118c] ss:$16 sps:$4 sm:$0xff]  }
 0x17b   :  { %2819 = vmatpush1.bf16.msra.mxu0 %v9109_v9  ;;  %2905 = vmatpush1.bf16.msra.mxu1 %v9112_v24  ;;  %v9196_v9 = vld [vmem:[%s15435_s2 + $0x1188] ss:$16 sps:$4 sm:$0xff]   ;;  %v9201_v24 = vld [vmem:[%s15435_s2 + $0x11a4] ss:$16 sps:$4 sm:$0xff]  }
 0x17c   :  { %2820 = vmatprep.subr.bf16.mxu0 %v9117_v25  ;;  %2906 = vmatprep.subr.bf16.mxu1 %v9120_v27  ;;  %v9204_v25 = vld [vmem:[%s15435_s2 + $0x11ac] ss:$16 sps:$4 sm:$0xff]   ;;  %v9199_v27 = vld [vmem:[%s15435_s2 + $0x11a0] ss:$16 sps:$4 sm:$0xff]  }
 0x17f   :  { %2821 = vmatpush1.bf16.msra.mxu0 %v9115_v13  ;;  %2907 = vmatpush1.bf16.msra.mxu1 %v9118_v31  ;;  %v9210_v13 = vld [vmem:[%s15435_s2 + $0x11cc] ss:$16 sps:$4 sm:$0xff]   ;;  %v9205_v31 = vld [vmem:[%s15435_s2 + $0x11c0] ss:$16 sps:$4 sm:$0xff]  }
 0x180   :  { %3825 = vmatprep.subr.bf16.mxu0 %v9123_v32  ;;  %3911 = vmatprep.subr.bf16.mxu1 %v9126_v18  ;;  %v9208_v32 = vld [vmem:[%s15435_s2 + $0x11c8] ss:$16 sps:$4 sm:$0xff]   ;;  %v9213_v18 = vld [vmem:[%s15435_s2 + $0x11e4] ss:$16 sps:$4 sm:$0xff]  }
 0x182   :  { %2823 = vmatmul.mubr.bf16.vlgmr.msra.gmra.mrb[0].mxu0 %v11720_v33  ;;  %2909 = vmatmul.mubr.bf16.vlgmr.msra.gmra.mrb[0].mxu1 %v11720_v33 }
 0x183   :  { %3826 = vmatpush1.bf16.msra.mxu0 %v9121_v34  ;;  %3912 = vmatpush1.bf16.msra.mxu1 %v9124_v35  ;;  %v9216_v34 = vld [vmem:[%s15435_s2 + $0x11ec] ss:$16 sps:$4 sm:$0xff]   ;;  %v9211_v35 = vld [vmem:[%s15435_s2 + $0x11e0] ss:$16 sps:$4 sm:$0xff]  }
 0x184   :  { %3827 = vmatprep.subr.bf16.mxu0 %v9129_v36  ;;  %3913 = vmatprep.subr.bf16.mxu1 %v9132_v37  ;;  %v9214_v36 = vld [vmem:[%s15435_s2 + $0x11e8] ss:$16 sps:$4 sm:$0xff]   ;;  %v9219_v37 = vld [vmem:[%s15435_s2 + $0x1204] ss:$16 sps:$4 sm:$0xff]  }
 0x185   :  { %3857 = vmatprep.mubr.bf16.mxu0 %v9697_v42  ;;  %3943 = vmatprep.mubr.bf16.mxu1 %v9697_v42  ;;  %v9228_v42 = vld [vmem:[%s15435_s2 + $0x122c] ss:$16 sps:$4 sm:$0xff]  }
 0x187   :  { %3828 = vmatpush1.bf16.msra.mxu0 %v9127_v38  ;;  %3914 = vmatpush1.bf16.msra.mxu1 %v9130_v39  ;;  %v9222_v38 = vld [vmem:[%s15435_s2 + $0x120c] ss:$16 sps:$4 sm:$0xff]   ;;  %v9217_v39 = vld [vmem:[%s15435_s2 + $0x1200] ss:$16 sps:$4 sm:$0xff]  }
 0x188   :  { %3829 = vmatprep.subr.bf16.mxu0 %v9135_v40  ;;  %3915 = vmatprep.subr.bf16.mxu1 %v9138_v41  ;;  %v9220_v40 = vld [vmem:[%s15435_s2 + $0x1208] ss:$16 sps:$4 sm:$0xff]   ;;  %v9225_v41 = vld [vmem:[%s15435_s2 + $0x1224] ss:$16 sps:$4 sm:$0xff]  }
 0x18b   :  { %3830 = vmatpush1.bf16.msra.mxu0 %v9133_v43  ;;  %3916 = vmatpush1.bf16.msra.mxu1 %v9136_v44  ;;  %v9698_v43 = vld [vmem:[%s15436_s1] ss:$16 sps:$4 sm:$0xff]  }
 0x18c   :  { %3831 = vmatprep.subr.bf16.mxu0 %v9141_v45  ;;  %3917 = vmatprep.subr.bf16.mxu1 %v9144_v46  ;;  %v9223_v44 = vld [vmem:[%s15435_s2 + $0x1220] ss:$16 sps:$4 sm:$0xff]   ;;  %v9226_v45 = vld [vmem:[%s15435_s2 + $0x1228] ss:$16 sps:$4 sm:$0xff]   ;;  %v9231_v46 = vld [vmem:[%s15435_s2 + $0x1244] ss:$16 sps:$4 sm:$0xff]  }
 0x18f   :  { %3832 = vmatpush1.bf16.msra.mxu0 %v9139_v47  ;;  %3918 = vmatpush1.bf16.msra.mxu1 %v9142_v48  ;;  %v9234_v47 = vld [vmem:[%s15435_s2 + $0x124c] ss:$16 sps:$4 sm:$0xff]  }
 0x190   :  { %3833 = vmatprep.subr.bf16.mxu0 %v9147_v49  ;;  %3919 = vmatprep.subr.bf16.mxu1 %v9150_v50  ;;  %v9699_v48 = vld [vmem:[%s15436_s1 + $0xc] ss:$16 sps:$4 sm:$0xff]   ;;  %v9229_v49 = vld [vmem:[%s15435_s2 + $0x1240] ss:$16 sps:$4 sm:$0xff]   ;;  %v9232_v50 = vld [vmem:[%s15435_s2 + $0x1248] ss:$16 sps:$4 sm:$0xff]  }
 0x193   :  { %3834 = vmatpush1.bf16.msra.mxu0 %v9145_v51  ;;  %3920 = vmatpush1.bf16.msra.mxu1 %v9148_v52  ;;  %v9237_v51 = vld [vmem:[%s15435_s2 + $0x1264] ss:$16 sps:$4 sm:$0xff]   ;;  %v9240_v52 = vld [vmem:[%s15435_s2 + $0x126c] ss:$16 sps:$4 sm:$0xff]  }
 0x194   :  { %3835 = vmatprep.subr.bf16.mxu0 %v9153_v53  ;;  %3921 = vmatprep.subr.bf16.mxu1 %v9156_v54  ;;  %v9235_v53 = vld [vmem:[%s15435_s2 + $0x1260] ss:$16 sps:$4 sm:$0xff]   ;;  %v9238_v54 = vld [vmem:[%s15435_s2 + $0x1268] ss:$16 sps:$4 sm:$0xff]  }
 0x197   :  { %3836 = vmatpush1.bf16.msra.mxu0 %v9151_v55  ;;  %3922 = vmatpush1.bf16.msra.mxu1 %v9154_v56  ;;  %v9243_v55 = vld [vmem:[%s15435_s2 + $0x1284] ss:$16 sps:$4 sm:$0xff]   ;;  %v9246_v56 = vld [vmem:[%s15435_s2 + $0x128c] ss:$16 sps:$4 sm:$0xff]  }
 0x198   :  { %3837 = vmatprep.subr.bf16.mxu0 %v9159_v57  ;;  %3923 = vmatprep.subr.bf16.mxu1 %v9162_v58  ;;  %v9241_v57 = vld [vmem:[%s15435_s2 + $0x1280] ss:$16 sps:$4 sm:$0xff]   ;;  %v9244_v58 = vld [vmem:[%s15435_s2 + $0x1288] ss:$16 sps:$4 sm:$0xff]  }
 0x19b   :  { %3838 = vmatpush1.bf16.msra.mxu0 %v9157_v59  ;;  %3924 = vmatpush1.bf16.msra.mxu1 %v9160_v60  ;;  %v9249_v59 = vld [vmem:[%s15435_s2 + $0x12a4] ss:$16 sps:$4 sm:$0xff]   ;;  %v9252_v60 = vld [vmem:[%s15435_s2 + $0x12ac] ss:$16 sps:$4 sm:$0xff]  }
 0x19c   :  { %3839 = vmatprep.subr.bf16.mxu0 %v9165_v61  ;;  %3925 = vmatprep.subr.bf16.mxu1 %v9168_v62  ;;  %v9247_v61 = vld [vmem:[%s15435_s2 + $0x12a0] ss:$16 sps:$4 sm:$0xff]   ;;  %v9250_v62 = vld [vmem:[%s15435_s2 + $0x12a8] ss:$16 sps:$4 sm:$0xff]  }
 0x19f   :  { %3840 = vmatpush1.bf16.msra.mxu0 %v9163_v63  ;;  %3926 = vmatpush1.bf16.msra.mxu1 %v9166_v0  ;;  %v9255_v63 = vld [vmem:[%s15435_s2 + $0x12c4] ss:$16 sps:$4 sm:$0xff]   ;;  %v9258_v0 = vld [vmem:[%s15435_s2 + $0x12cc] ss:$16 sps:$4 sm:$0xff]  }
 0x1a0   :  { %3841 = vmatprep.subr.bf16.mxu0 %v9171_v1  ;;  %3927 = vmatprep.subr.bf16.mxu1 %v9174_v2  ;;  %v9253_v1 = vld [vmem:[%s15435_s2 + $0x12c0] ss:$16 sps:$4 sm:$0xff]   ;;  %v9256_v2 = vld [vmem:[%s15435_s2 + $0x12c8] ss:$16 sps:$4 sm:$0xff]  }
 0x1a3   :  { %3842 = vmatpush1.bf16.msra.mxu0 %v9169_v3  ;;  %3928 = vmatpush1.bf16.msra.mxu1 %v9172_v4  ;;  %v9261_v3 = vld [vmem:[%s15435_s2 + $0x12e4] ss:$16 sps:$4 sm:$0xff]   ;;  %v9264_v4 = vld [vmem:[%s15435_s2 + $0x12ec] ss:$16 sps:$4 sm:$0xff]  }
 0x1a4   :  { %3843 = vmatprep.subr.bf16.mxu0 %v9177_v5  ;;  %3929 = vmatprep.subr.bf16.mxu1 %v9180_v6  ;;  %v9259_v5 = vld [vmem:[%s15435_s2 + $0x12e0] ss:$16 sps:$4 sm:$0xff]   ;;  %v9262_v6 = vld [vmem:[%s15435_s2 + $0x12e8] ss:$16 sps:$4 sm:$0xff]  }
 0x1a7   :  { %3844 = vmatpush1.bf16.msra.mxu0 %v9175_v7  ;;  %3930 = vmatpush1.bf16.msra.mxu1 %v9178_v8  ;;  %v9267_v7 = vld [vmem:[%s15435_s2 + $0x1304] ss:$16 sps:$4 sm:$0xff]   ;;  %v9270_v8 = vld [vmem:[%s15435_s2 + $0x130c] ss:$16 sps:$4 sm:$0xff]  }
 0x1a8   :  { %3845 = vmatprep.subr.bf16.mxu0 %v9183_v10  ;;  %3931 = vmatprep.subr.bf16.mxu1 %v9186_v12  ;;  %v9265_v10 = vld [vmem:[%s15435_s2 + $0x1300] ss:$16 sps:$4 sm:$0xff]   ;;  %v9268_v12 = vld [vmem:[%s15435_s2 + $0x1308] ss:$16 sps:$4 sm:$0xff]  }
 0x1ab   :  { %3846 = vmatpush1.bf16.msra.mxu0 %v9181_v14  ;;  %3932 = vmatpush1.bf16.msra.mxu1 %v9184_v15  ;;  %v9273_v14 = vld [vmem:[%s15435_s2 + $0x1324] ss:$16 sps:$4 sm:$0xff]   ;;  %v9276_v15 = vld [vmem:[%s15435_s2 + $0x132c] ss:$16 sps:$4 sm:$0xff]  }
 0x1ac   :  { %3847 = vmatprep.subr.bf16.mxu0 %v9189_v16  ;;  %3933 = vmatprep.subr.bf16.mxu1 %v9192_v17  ;;  %v9271_v16 = vld [vmem:[%s15435_s2 + $0x1320] ss:$16 sps:$4 sm:$0xff]   ;;  %v9274_v17 = vld [vmem:[%s15435_s2 + $0x1328] ss:$16 sps:$4 sm:$0xff]  }
 0x1af   :  { %3848 = vmatpush1.bf16.msra.mxu0 %v9187_v19  ;;  %3934 = vmatpush1.bf16.msra.mxu1 %v9190_v11  ;;  %v9279_v19 = vld [vmem:[%s15435_s2 + $0x1344] ss:$16 sps:$4 sm:$0xff]   ;;  %v9282_v11 = vld [vmem:[%s15435_s2 + $0x134c] ss:$16 sps:$4 sm:$0xff]  }
 0x1b0   :  { %3849 = vmatprep.subr.bf16.mxu0 %v9195_v21  ;;  %3935 = vmatprep.subr.bf16.mxu1 %v9198_v22  ;;  %v9277_v21 = vld [vmem:[%s15435_s2 + $0x1340] ss:$16 sps:$4 sm:$0xff]   ;;  %v9280_v22 = vld [vmem:[%s15435_s2 + $0x1348] ss:$16 sps:$4 sm:$0xff]  }
 0x1b3   :  { %3850 = vmatpush1.bf16.msra.mxu0 %v9193_v23  ;;  %3936 = vmatpush1.bf16.msra.mxu1 %v9196_v9  ;;  %v9285_v23 = vld [vmem:[%s15435_s2 + $0x1364] ss:$16 sps:$4 sm:$0xff]   ;;  %v9288_v9 = vld [vmem:[%s15435_s2 + $0x136c] ss:$16 sps:$4 sm:$0xff]  }
 0x1b4   :  { %3851 = vmatprep.subr.bf16.mxu0 %v9201_v24  ;;  %3937 = vmatprep.subr.bf16.mxu1 %v9204_v25  ;;  %v9283_v24 = vld [vmem:[%s15435_s2 + $0x1360] ss:$16 sps:$4 sm:$0xff]   ;;  %v9286_v25 = vld [vmem:[%s15435_s2 + $0x1368] ss:$16 sps:$4 sm:$0xff]  }
 0x1b7   :  { %3852 = vmatpush1.bf16.msra.mxu0 %v9199_v27  ;;  %3938 = vmatpush1.bf16.msra.mxu1 %v9202_v28  ;;  %v9291_v27 = vld [vmem:[%s15435_s2 + $0x1384] ss:$16 sps:$4 sm:$0xff]   ;;  %v9294_v28 = vld [vmem:[%s15435_s2 + $0x138c] ss:$16 sps:$4 sm:$0xff]  }
 0x1b8   :  { %3853 = vmatprep.subr.bf16.mxu0 %v9207_v29  ;;  %3939 = vmatprep.subr.bf16.mxu1 %v9210_v13  ;;  %v9289_v29 = vld [vmem:[%s15435_s2 + $0x1380] ss:$16 sps:$4 sm:$0xff]   ;;  %v9292_v13 = vld [vmem:[%s15435_s2 + $0x1388] ss:$16 sps:$4 sm:$0xff]  }
 0x1bb   :  { %3854 = vmatpush1.bf16.msra.mxu0 %v9205_v31  ;;  %3940 = vmatpush1.bf16.msra.mxu1 %v9208_v32  ;;  %v9297_v31 = vld [vmem:[%s15435_s2 + $0x13a4] ss:$16 sps:$4 sm:$0xff]   ;;  %v9300_v32 = vld [vmem:[%s15435_s2 + $0x13ac] ss:$16 sps:$4 sm:$0xff]  }
 0x1bc   :  { %3855 = vmatprep.subr.bf16.mxu0 %v9213_v18  ;;  %3941 = vmatprep.subr.bf16.mxu1 %v9216_v34  ;;  %v9295_v18 = vld [vmem:[%s15435_s2 + $0x13a0] ss:$16 sps:$4 sm:$0xff]   ;;  %v9298_v34 = vld [vmem:[%s15435_s2 + $0x13a8] ss:$16 sps:$4 sm:$0xff]  }
 0x1bf   :  { %3856 = vmatpush1.bf16.msra.mxu0 %v9211_v35  ;;  %3942 = vmatpush1.bf16.msra.mxu1 %v9214_v36  ;;  %v9303_v35 = vld [vmem:[%s15435_s2 + $0x13c4] ss:$16 sps:$4 sm:$0xff]   ;;  %v9306_v36 = vld [vmem:[%s15435_s2 + $0x13cc] ss:$16 sps:$4 sm:$0xff]  }
 0x1c0   :  { %3868 = vmatprep.subr.bf16.mxu0 %v9219_v37  ;;  %3954 = vmatprep.subr.bf16.mxu1 %v9222_v38  ;;  %v9301_v37 = vld [vmem:[%s15435_s2 + $0x13c0] ss:$16 sps:$4 sm:$0xff]   ;;  %v9304_v38 = vld [vmem:[%s15435_s2 + $0x13c8] ss:$16 sps:$4 sm:$0xff]  }
 0x1c2   :  { %3858 = vmatmul.mubr.bf16.vlgmr.msra.gmra.mrb[4].mxu0 %v9698_v43  ;;  %3944 = vmatmul.mubr.bf16.vlgmr.msra.gmra.mrb[4].mxu1 %v9698_v43  ;;  %v9315_v43 = vld [vmem:[%s15435_s2 + $0xc04] ss:$16 sps:$4 sm:$0xff]  }
 0x1c3   :  { %3869 = vmatpush1.bf16.msra.mxu0 %v9217_v39  ;;  %3955 = vmatpush1.bf16.msra.mxu1 %v9220_v40  ;;  %v9309_v39 = vld [vmem:[%s15435_s2 + $0x13e4] ss:$16 sps:$4 sm:$0xff]   ;;  %v9312_v40 = vld [vmem:[%s15435_s2 + $0x13ec] ss:$16 sps:$4 sm:$0xff]  }
 0x1c4   :  { %3870 = vmatprep.subr.bf16.mxu0 %v9225_v41  ;;  %3956 = vmatprep.subr.bf16.mxu1 %v9228_v42  ;;  %v9307_v41 = vld [vmem:[%s15435_s2 + $0x13e0] ss:$16 sps:$4 sm:$0xff]   ;;  %v9310_v42 = vld [vmem:[%s15435_s2 + $0x13e8] ss:$16 sps:$4 sm:$0xff]  }
 0x1c5   :  { %3900 = vmatprep.mubr.bf16.mxu0 %v9699_v48  ;;  %3986 = vmatprep.mubr.bf16.mxu1 %v9699_v48  ;;  %v9324_v48 = vld [vmem:[%s15435_s2 + $0xc2c] ss:$16 sps:$4 sm:$0xff]  }
 0x1c7   :  { %3871 = vmatpush1.bf16.msra.mxu0 %v9223_v44  ;;  %3957 = vmatpush1.bf16.msra.mxu1 %v9226_v45  ;;  %v9318_v44 = vld [vmem:[%s15435_s2 + $0xc0c] ss:$16 sps:$4 sm:$0xff]   ;;  %v9313_v45 = vld [vmem:[%s15435_s2 + $0xc00] ss:$16 sps:$4 sm:$0xff]  }
 0x1c8   :  { %3872 = vmatprep.subr.bf16.mxu0 %v9231_v46  ;;  %3958 = vmatprep.subr.bf16.mxu1 %v9234_v47  ;;  %v9316_v46 = vld [vmem:[%s15435_s2 + $0xc08] ss:$16 sps:$4 sm:$0xff]   ;;  %v9321_v47 = vld [vmem:[%s15435_s2 + $0xc24] ss:$16 sps:$4 sm:$0xff]  }
 0x1cb   :  { %3873 = vmatpush1.bf16.msra.mxu0 %v9229_v49  ;;  %3959 = vmatpush1.bf16.msra.mxu1 %v9232_v50  ;;  %v9700_v49 = vld [vmem:[%s15436_s1 + $0x8] ss:$16 sps:$4 sm:$0xff]   ;;  %v9319_v50 = vld [vmem:[%s15435_s2 + $0xc20] ss:$16 sps:$4 sm:$0xff]  }
 0x1cc   :  { %3874 = vmatprep.subr.bf16.mxu0 %v9237_v51  ;;  %3960 = vmatprep.subr.bf16.mxu1 %v9240_v52  ;;  %v9322_v51 = vld [vmem:[%s15435_s2 + $0xc28] ss:$16 sps:$4 sm:$0xff]   ;;  %v9327_v52 = vld [vmem:[%s15435_s2 + $0xc44] ss:$16 sps:$4 sm:$0xff]  }
 0x1cf   :  { %3875 = vmatpush1.bf16.msra.mxu0 %v9235_v53  ;;  %3961 = vmatpush1.bf16.msra.mxu1 %v9238_v54  ;;  %v9330_v53 = vld [vmem:[%s15435_s2 + $0xc4c] ss:$16 sps:$4 sm:$0xff]   ;;  %v9701_v54 = vld [vmem:[%s15437_s0 + $0x4] ss:$16 sps:$4 sm:$0xff]  }
 0x1d0   :  { %3876 = vmatprep.subr.bf16.mxu0 %v9243_v55  ;;  %3962 = vmatprep.subr.bf16.mxu1 %v9246_v56  ;;  %v9325_v55 = vld [vmem:[%s15435_s2 + $0xc40] ss:$16 sps:$4 sm:$0xff]   ;;  %v9328_v56 = vld [vmem:[%s15435_s2 + $0xc48] ss:$16 sps:$4 sm:$0xff]  }
 0x1d3   :  { %3877 = vmatpush1.bf16.msra.mxu0 %v9241_v57  ;;  %3963 = vmatpush1.bf16.msra.mxu1 %v9244_v58  ;;  %v9333_v57 = vld [vmem:[%s15435_s2 + $0xc64] ss:$16 sps:$4 sm:$0xff]   ;;  %v9336_v58 = vld [vmem:[%s15435_s2 + $0xc6c] ss:$16 sps:$4 sm:$0xff]  }
 0x1d4   :  { %3878 = vmatprep.subr.bf16.mxu0 %v9249_v59  ;;  %3964 = vmatprep.subr.bf16.mxu1 %v9252_v60  ;;  %v9331_v59 = vld [vmem:[%s15435_s2 + $0xc60] ss:$16 sps:$4 sm:$0xff]   ;;  %v9334_v60 = vld [vmem:[%s15435_s2 + $0xc68] ss:$16 sps:$4 sm:$0xff]  }
 0x1d7   :  { %3879 = vmatpush1.bf16.msra.mxu0 %v9247_v61  ;;  %3965 = vmatpush1.bf16.msra.mxu1 %v9250_v62  ;;  %v9339_v61 = vld [vmem:[%s15435_s2 + $0xc84] ss:$16 sps:$4 sm:$0xff]   ;;  %v9342_v62 = vld [vmem:[%s15435_s2 + $0xc8c] ss:$16 sps:$4 sm:$0xff]  }
 0x1d8   :  { %3880 = vmatprep.subr.bf16.mxu0 %v9255_v63  ;;  %3966 = vmatprep.subr.bf16.mxu1 %v9258_v0  ;;  %v9337_v63 = vld [vmem:[%s15435_s2 + $0xc80] ss:$16 sps:$4 sm:$0xff]   ;;  %v9340_v0 = vld [vmem:[%s15435_s2 + $0xc88] ss:$16 sps:$4 sm:$0xff]  }
 0x1db   :  { %3881 = vmatpush1.bf16.msra.mxu0 %v9253_v1  ;;  %3967 = vmatpush1.bf16.msra.mxu1 %v9256_v2  ;;  %v9345_v1 = vld [vmem:[%s15435_s2 + $0xca4] ss:$16 sps:$4 sm:$0xff]   ;;  %v9348_v2 = vld [vmem:[%s15435_s2 + $0xcac] ss:$16 sps:$4 sm:$0xff]  }
 0x1dc   :  { %3882 = vmatprep.subr.bf16.mxu0 %v9261_v3  ;;  %3968 = vmatprep.subr.bf16.mxu1 %v9264_v4  ;;  %v9343_v3 = vld [vmem:[%s15435_s2 + $0xca0] ss:$16 sps:$4 sm:$0xff]   ;;  %v9346_v4 = vld [vmem:[%s15435_s2 + $0xca8] ss:$16 sps:$4 sm:$0xff]  }
 0x1df   :  { %3883 = vmatpush1.bf16.msra.mxu0 %v9259_v5  ;;  %3969 = vmatpush1.bf16.msra.mxu1 %v9262_v6  ;;  %v9351_v5 = vld [vmem:[%s15435_s2 + $0xcc4] ss:$16 sps:$4 sm:$0xff]   ;;  %v9354_v6 = vld [vmem:[%s15435_s2 + $0xccc] ss:$16 sps:$4 sm:$0xff]  }
 0x1e0   :  { %3884 = vmatprep.subr.bf16.mxu0 %v9267_v7  ;;  %3970 = vmatprep.subr.bf16.mxu1 %v9270_v8  ;;  %v9349_v7 = vld [vmem:[%s15435_s2 + $0xcc0] ss:$16 sps:$4 sm:$0xff]   ;;  %v9352_v8 = vld [vmem:[%s15435_s2 + $0xcc8] ss:$16 sps:$4 sm:$0xff]  }
 0x1e3   :  { %3885 = vmatpush1.bf16.msra.mxu0 %v9265_v10  ;;  %3971 = vmatpush1.bf16.msra.mxu1 %v9268_v12  ;;  %v9357_v10 = vld [vmem:[%s15435_s2 + $0xce4] ss:$16 sps:$4 sm:$0xff]   ;;  %v9360_v12 = vld [vmem:[%s15435_s2 + $0xcec] ss:$16 sps:$4 sm:$0xff]  }
 0x1e4   :  { %3886 = vmatprep.subr.bf16.mxu0 %v9273_v14  ;;  %3972 = vmatprep.subr.bf16.mxu1 %v9276_v15  ;;  %v9355_v14 = vld [vmem:[%s15435_s2 + $0xce0] ss:$16 sps:$4 sm:$0xff]   ;;  %v9358_v15 = vld [vmem:[%s15435_s2 + $0xce8] ss:$16 sps:$4 sm:$0xff]  }
 0x1e7   :  { %3887 = vmatpush1.bf16.msra.mxu0 %v9271_v16  ;;  %3973 = vmatpush1.bf16.msra.mxu1 %v9274_v17  ;;  %v9363_v16 = vld [vmem:[%s15435_s2 + $0xd04] ss:$16 sps:$4 sm:$0xff]   ;;  %v9366_v17 = vld [vmem:[%s15435_s2 + $0xd0c] ss:$16 sps:$4 sm:$0xff]  }
 0x1e8   :  { %3888 = vmatprep.subr.bf16.mxu0 %v9279_v19  ;;  %3974 = vmatprep.subr.bf16.mxu1 %v9282_v11  ;;  %v9361_v19 = vld [vmem:[%s15435_s2 + $0xd00] ss:$16 sps:$4 sm:$0xff]   ;;  %v9364_v11 = vld [vmem:[%s15435_s2 + $0xd08] ss:$16 sps:$4 sm:$0xff]  }
 0x1eb   :  { %3889 = vmatpush1.bf16.msra.mxu0 %v9277_v21  ;;  %3975 = vmatpush1.bf16.msra.mxu1 %v9280_v22  ;;  %v9369_v21 = vld [vmem:[%s15435_s2 + $0xd24] ss:$16 sps:$4 sm:$0xff]   ;;  %v9372_v22 = vld [vmem:[%s15435_s2 + $0xd2c] ss:$16 sps:$4 sm:$0xff]  }
 0x1ec   :  { %3890 = vmatprep.subr.bf16.mxu0 %v9285_v23  ;;  %3976 = vmatprep.subr.bf16.mxu1 %v9288_v9  ;;  %v9367_v23 = vld [vmem:[%s15435_s2 + $0xd20] ss:$16 sps:$4 sm:$0xff]   ;;  %v9370_v9 = vld [vmem:[%s15435_s2 + $0xd28] ss:$16 sps:$4 sm:$0xff]  }
 0x1ef   :  { %3891 = vmatpush1.bf16.msra.mxu0 %v9283_v24  ;;  %3977 = vmatpush1.bf16.msra.mxu1 %v9286_v25  ;;  %v9375_v24 = vld [vmem:[%s15435_s2 + $0xd44] ss:$16 sps:$4 sm:$0xff]   ;;  %v9378_v25 = vld [vmem:[%s15435_s2 + $0xd4c] ss:$16 sps:$4 sm:$0xff]  }
 0x1f0   :  { %3892 = vmatprep.subr.bf16.mxu0 %v9291_v27  ;;  %3978 = vmatprep.subr.bf16.mxu1 %v9294_v28  ;;  %v9373_v27 = vld [vmem:[%s15435_s2 + $0xd40] ss:$16 sps:$4 sm:$0xff]   ;;  %v9376_v28 = vld [vmem:[%s15435_s2 + $0xd48] ss:$16 sps:$4 sm:$0xff]  }
 0x1f3   :  { %3893 = vmatpush1.bf16.msra.mxu0 %v9289_v29  ;;  %3979 = vmatpush1.bf16.msra.mxu1 %v9292_v13  ;;  %v9381_v29 = vld [vmem:[%s15435_s2 + $0xd64] ss:$16 sps:$4 sm:$0xff]   ;;  %v9384_v13 = vld [vmem:[%s15435_s2 + $0xd6c] ss:$16 sps:$4 sm:$0xff]  }
 0x1f4   :  { %3894 = vmatprep.subr.bf16.mxu0 %v9297_v31  ;;  %3980 = vmatprep.subr.bf16.mxu1 %v9300_v32  ;;  %v9379_v31 = vld [vmem:[%s15435_s2 + $0xd60] ss:$16 sps:$4 sm:$0xff]   ;;  %v9382_v32 = vld [vmem:[%s15435_s2 + $0xd68] ss:$16 sps:$4 sm:$0xff]  }
 0x1f7   :  { %3895 = vmatpush1.bf16.msra.mxu0 %v9295_v18  ;;  %3981 = vmatpush1.bf16.msra.mxu1 %v9298_v34  ;;  %v9387_v18 = vld [vmem:[%s15435_s2 + $0xd84] ss:$16 sps:$4 sm:$0xff]   ;;  %v9390_v34 = vld [vmem:[%s15435_s2 + $0xd8c] ss:$16 sps:$4 sm:$0xff]  }
 0x1f8   :  { %3896 = vmatprep.subr.bf16.mxu0 %v9303_v35  ;;  %3982 = vmatprep.subr.bf16.mxu1 %v9306_v36  ;;  %v9385_v35 = vld [vmem:[%s15435_s2 + $0xd80] ss:$16 sps:$4 sm:$0xff]   ;;  %v9388_v36 = vld [vmem:[%s15435_s2 + $0xd88] ss:$16 sps:$4 sm:$0xff]  }
 0x1fb   :  { %3897 = vmatpush1.bf16.msra.mxu0 %v9301_v37  ;;  %3983 = vmatpush1.bf16.msra.mxu1 %v9304_v38  ;;  %v9393_v37 = vld [vmem:[%s15435_s2 + $0xda4] ss:$16 sps:$4 sm:$0xff]   ;;  %v9396_v38 = vld [vmem:[%s15435_s2 + $0xdac] ss:$16 sps:$4 sm:$0xff]  }
 0x1fc   :  { %3898 = vmatprep.subr.bf16.mxu0 %v9309_v39  ;;  %3984 = vmatprep.subr.bf16.mxu1 %v9312_v40  ;;  %v9391_v39 = vld [vmem:[%s15435_s2 + $0xda0] ss:$16 sps:$4 sm:$0xff]   ;;  %v9394_v40 = vld [vmem:[%s15435_s2 + $0xda8] ss:$16 sps:$4 sm:$0xff]  }
 0x1ff   :  { %3899 = vmatpush1.bf16.msra.mxu0 %v9307_v41  ;;  %3985 = vmatpush1.bf16.msra.mxu1 %v9310_v42  ;;  %v9399_v41 = vld [vmem:[%s15435_s2 + $0xdc4] ss:$16 sps:$4 sm:$0xff]   ;;  %v9402_v42 = vld [vmem:[%s15435_s2 + $0xdcc] ss:$16 sps:$4 sm:$0xff]  }
 0x200   :  { %4637 = vmatprep.subr.bf16.mxu0 %v9315_v43  ;;  %4723 = vmatprep.subr.bf16.mxu1 %v9318_v44  ;;  %v9397_v43 = vld [vmem:[%s15435_s2 + $0xdc0] ss:$16 sps:$4 sm:$0xff]   ;;  %v9400_v44 = vld [vmem:[%s15435_s2 + $0xdc8] ss:$16 sps:$4 sm:$0xff]  }
 0x202   :  { %3901 = vmatmul.mubr.bf16.vlgmr.msra.gmra.mrb[4].mxu0 %v9700_v49  ;;  %3987 = vmatmul.mubr.bf16.vlgmr.msra.gmra.mrb[4].mxu1 %v9700_v49  ;;  %v9411_v49 = vld [vmem:[%s15435_s2 + $0xe04] ss:$16 sps:$4 sm:$0xff]  }
 0x203   :  { %4638 = vmatpush1.bf16.msra.mxu0 %v9313_v45  ;;  %4724 = vmatpush1.bf16.msra.mxu1 %v9316_v46  ;;  %v9405_v45 = vld [vmem:[%s15435_s2 + $0xde4] ss:$16 sps:$4 sm:$0xff]   ;;  %v9408_v46 = vld [vmem:[%s15435_s2 + $0xdec] ss:$16 sps:$4 sm:$0xff]  }
 0x204   :  { %4639 = vmatprep.subr.bf16.mxu0 %v9321_v47  ;;  %4725 = vmatprep.subr.bf16.mxu1 %v9324_v48  ;;  %v9403_v47 = vld [vmem:[%s15435_s2 + $0xde0] ss:$16 sps:$4 sm:$0xff]   ;;  %v9406_v48 = vld [vmem:[%s15435_s2 + $0xde8] ss:$16 sps:$4 sm:$0xff]  }
 0x205   :  { %4669 = vmatprep.mubr.bf16.mxu0 %v9701_v54  ;;  %4755 = vmatprep.mubr.bf16.mxu1 %v9701_v54  ;;  %v9420_v54 = vld [vmem:[%s15435_s2 + $0xe2c] ss:$16 sps:$4 sm:$0xff]  }
 0x207   :  { %4640 = vmatpush1.bf16.msra.mxu0 %v9319_v50  ;;  %4726 = vmatpush1.bf16.msra.mxu1 %v9322_v51  ;;  %v9414_v50 = vld [vmem:[%s15435_s2 + $0xe0c] ss:$16 sps:$4 sm:$0xff]   ;;  %v9409_v51 = vld [vmem:[%s15435_s2 + $0xe00] ss:$16 sps:$4 sm:$0xff]  }
 0x208   :  { %4641 = vmatprep.subr.bf16.mxu0 %v9327_v52  ;;  %4727 = vmatprep.subr.bf16.mxu1 %v9330_v53  ;;  %v9412_v52 = vld [vmem:[%s15435_s2 + $0xe08] ss:$16 sps:$4 sm:$0xff]   ;;  %v9417_v53 = vld [vmem:[%s15435_s2 + $0xe24] ss:$16 sps:$4 sm:$0xff]  }
 0x20b   :  { %4642 = vmatpush1.bf16.msra.mxu0 %v9325_v55  ;;  %4728 = vmatpush1.bf16.msra.mxu1 %v9328_v56  ;;  %v9702_v55 = vld [vmem:[%s15437_s0] ss:$16 sps:$4 sm:$0xff]  }
 0x20c   :  { %4643 = vmatprep.subr.bf16.mxu0 %v9333_v57  ;;  %4729 = vmatprep.subr.bf16.mxu1 %v9336_v58  ;;  %v9415_v56 = vld [vmem:[%s15435_s2 + $0xe20] ss:$16 sps:$4 sm:$0xff]   ;;  %v9418_v57 = vld [vmem:[%s15435_s2 + $0xe28] ss:$16 sps:$4 sm:$0xff]   ;;  %v9423_v58 = vld [vmem:[%s15435_s2 + $0xe44] ss:$16 sps:$4 sm:$0xff]  }
 0x20f   :  { %4644 = vmatpush1.bf16.msra.mxu0 %v9331_v59  ;;  %4730 = vmatpush1.bf16.msra.mxu1 %v9334_v60  ;;  %v9426_v59 = vld [vmem:[%s15435_s2 + $0xe4c] ss:$16 sps:$4 sm:$0xff]  }
 0x210   :  { %4645 = vmatprep.subr.bf16.mxu0 %v9339_v61  ;;  %4731 = vmatprep.subr.bf16.mxu1 %v9342_v62  ;;  %v9703_v60 = vld [vmem:[%s15437_s0 + $0xc] ss:$16 sps:$4 sm:$0xff]   ;;  %v9421_v61 = vld [vmem:[%s15435_s2 + $0xe40] ss:$16 sps:$4 sm:$0xff]   ;;  %v9424_v62 = vld [vmem:[%s15435_s2 + $0xe48] ss:$16 sps:$4 sm:$0xff]  }
 0x213   :  { %4646 = vmatpush1.bf16.msra.mxu0 %v9337_v63  ;;  %4732 = vmatpush1.bf16.msra.mxu1 %v9340_v0  ;;  %v9429_v63 = vld [vmem:[%s15435_s2 + $0xe64] ss:$16 sps:$4 sm:$0xff]   ;;  %v9432_v0 = vld [vmem:[%s15435_s2 + $0xe6c] ss:$16 sps:$4 sm:$0xff]  }
 0x214   :  { %4647 = vmatprep.subr.bf16.mxu0 %v9345_v1  ;;  %4733 = vmatprep.subr.bf16.mxu1 %v9348_v2  ;;  %v9427_v1 = vld [vmem:[%s15435_s2 + $0xe60] ss:$16 sps:$4 sm:$0xff]   ;;  %v9430_v2 = vld [vmem:[%s15435_s2 + $0xe68] ss:$16 sps:$4 sm:$0xff]  }
 0x217   :  { %4648 = vmatpush1.bf16.msra.mxu0 %v9343_v3  ;;  %4734 = vmatpush1.bf16.msra.mxu1 %v9346_v4  ;;  %v9435_v3 = vld [vmem:[%s15435_s2 + $0xe84] ss:$16 sps:$4 sm:$0xff]   ;;  %v9438_v4 = vld [vmem:[%s15435_s2 + $0xe8c] ss:$16 sps:$4 sm:$0xff]  }
 0x218   :  { %4649 = vmatprep.subr.bf16.mxu0 %v9351_v5  ;;  %4735 = vmatprep.subr.bf16.mxu1 %v9354_v6  ;;  %v9433_v5 = vld [vmem:[%s15435_s2 + $0xe80] ss:$16 sps:$4 sm:$0xff]   ;;  %v9436_v6 = vld [vmem:[%s15435_s2 + $0xe88] ss:$16 sps:$4 sm:$0xff]  }
 0x21b   :  { %4650 = vmatpush1.bf16.msra.mxu0 %v9349_v7  ;;  %4736 = vmatpush1.bf16.msra.mxu1 %v9352_v8  ;;  %v9441_v7 = vld [vmem:[%s15435_s2 + $0xea4] ss:$16 sps:$4 sm:$0xff]   ;;  %v9444_v8 = vld [vmem:[%s15435_s2 + $0xeac] ss:$16 sps:$4 sm:$0xff]  }
 0x21c   :  { %4651 = vmatprep.subr.bf16.mxu0 %v9357_v10  ;;  %4737 = vmatprep.subr.bf16.mxu1 %v9360_v12  ;;  %v9439_v10 = vld [vmem:[%s15435_s2 + $0xea0] ss:$16 sps:$4 sm:$0xff]   ;;  %v9442_v12 = vld [vmem:[%s15435_s2 + $0xea8] ss:$16 sps:$4 sm:$0xff]  }
 0x21f   :  { %4652 = vmatpush1.bf16.msra.mxu0 %v9355_v14  ;;  %4738 = vmatpush1.bf16.msra.mxu1 %v9358_v15  ;;  %v9447_v14 = vld [vmem:[%s15435_s2 + $0xec4] ss:$16 sps:$4 sm:$0xff]   ;;  %v9450_v15 = vld [vmem:[%s15435_s2 + $0xecc] ss:$16 sps:$4 sm:$0xff]  }
 0x220   :  { %4653 = vmatprep.subr.bf16.mxu0 %v9363_v16  ;;  %4739 = vmatprep.subr.bf16.mxu1 %v9366_v17 }
 0x223   :  { %4654 = vmatpush1.bf16.msra.mxu0 %v9361_v19  ;;  %4740 = vmatpush1.bf16.msra.mxu1 %v9364_v11 }
 0x224   :  { %4655 = vmatprep.subr.bf16.mxu0 %v9369_v21  ;;  %4741 = vmatprep.subr.bf16.mxu1 %v9372_v22 }
 0x227   :  { %4656 = vmatpush1.bf16.msra.mxu0 %v9367_v23  ;;  %4742 = vmatpush1.bf16.msra.mxu1 %v9370_v9  ;;  %v9445_v23 = vld [vmem:[%s15435_s2 + $0xec0] ss:$16 sps:$4 sm:$0xff]   ;;  %v9448_v9 = vld [vmem:[%s15435_s2 + $0xec8] ss:$16 sps:$4 sm:$0xff]  }
 0x228   :  { %4657 = vmatprep.subr.bf16.mxu0 %v9375_v24  ;;  %4743 = vmatprep.subr.bf16.mxu1 %v9378_v25 }
 0x22b   :  { %4658 = vmatpush1.bf16.msra.mxu0 %v9373_v27  ;;  %4744 = vmatpush1.bf16.msra.mxu1 %v9376_v28  ;;  %v9453_v27 = vld [vmem:[%s15435_s2 + $0xee4] ss:$16 sps:$4 sm:$0xff]   ;;  %v9456_v28 = vld [vmem:[%s15435_s2 + $0xeec] ss:$16 sps:$4 sm:$0xff]  }
 0x22c   :  { %4659 = vmatprep.subr.bf16.mxu0 %v9381_v29  ;;  %4745 = vmatprep.subr.bf16.mxu1 %v9384_v13  ;;  %v9451_v29 = vld [vmem:[%s15435_s2 + $0xee0] ss:$16 sps:$4 sm:$0xff]   ;;  %v9454_v13 = vld [vmem:[%s15435_s2 + $0xee8] ss:$16 sps:$4 sm:$0xff]  }
 0x22f   :  { %4660 = vmatpush1.bf16.msra.mxu0 %v9379_v31  ;;  %4746 = vmatpush1.bf16.msra.mxu1 %v9382_v32  ;;  %v9459_v31 = vld [vmem:[%s15435_s2 + $0xf04] ss:$16 sps:$4 sm:$0xff]   ;;  %v9462_v32 = vld [vmem:[%s15435_s2 + $0xf0c] ss:$16 sps:$4 sm:$0xff]  }
 0x230   :  { %4661 = vmatprep.subr.bf16.mxu0 %v9387_v18  ;;  %4747 = vmatprep.subr.bf16.mxu1 %v9390_v34  ;;  %v9457_v18 = vld [vmem:[%s15435_s2 + $0xf00] ss:$16 sps:$4 sm:$0xff]   ;;  %v9460_v34 = vld [vmem:[%s15435_s2 + $0xf08] ss:$16 sps:$4 sm:$0xff]  }
 0x233   :  { %4662 = vmatpush1.bf16.msra.mxu0 %v9385_v35  ;;  %4748 = vmatpush1.bf16.msra.mxu1 %v9388_v36  ;;  %v9465_v35 = vld [vmem:[%s15435_s2 + $0xf24] ss:$16 sps:$4 sm:$0xff]   ;;  %v9468_v36 = vld [vmem:[%s15435_s2 + $0xf2c] ss:$16 sps:$4 sm:$0xff]  }
 0x234   :  { %4663 = vmatprep.subr.bf16.mxu0 %v9393_v37  ;;  %4749 = vmatprep.subr.bf16.mxu1 %v9396_v38  ;;  %v9463_v37 = vld [vmem:[%s15435_s2 + $0xf20] ss:$16 sps:$4 sm:$0xff]   ;;  %v9466_v38 = vld [vmem:[%s15435_s2 + $0xf28] ss:$16 sps:$4 sm:$0xff]  }
 0x237   :  { %4664 = vmatpush1.bf16.msra.mxu0 %v9391_v39  ;;  %4750 = vmatpush1.bf16.msra.mxu1 %v9394_v40  ;;  %v9471_v39 = vld [vmem:[%s15435_s2 + $0xf44] ss:$16 sps:$4 sm:$0xff]   ;;  %v9474_v40 = vld [vmem:[%s15435_s2 + $0xf4c] ss:$16 sps:$4 sm:$0xff]  }
 0x238   :  { %4665 = vmatprep.subr.bf16.mxu0 %v9399_v41  ;;  %4751 = vmatprep.subr.bf16.mxu1 %v9402_v42  ;;  %v9469_v41 = vld [vmem:[%s15435_s2 + $0xf40] ss:$16 sps:$4 sm:$0xff]   ;;  %v9472_v42 = vld [vmem:[%s15435_s2 + $0xf48] ss:$16 sps:$4 sm:$0xff]  }
 0x23b   :  { %4666 = vmatpush1.bf16.msra.mxu0 %v9397_v43  ;;  %4752 = vmatpush1.bf16.msra.mxu1 %v9400_v44  ;;  %v9477_v43 = vld [vmem:[%s15435_s2 + $0xf64] ss:$16 sps:$4 sm:$0xff]   ;;  %v9480_v44 = vld [vmem:[%s15435_s2 + $0xf6c] ss:$16 sps:$4 sm:$0xff]  }
 0x23c   :  { %4667 = vmatprep.subr.bf16.mxu0 %v9405_v45  ;;  %4753 = vmatprep.subr.bf16.mxu1 %v9408_v46  ;;  %v9475_v45 = vld [vmem:[%s15435_s2 + $0xf60] ss:$16 sps:$4 sm:$0xff]   ;;  %v9478_v46 = vld [vmem:[%s15435_s2 + $0xf68] ss:$16 sps:$4 sm:$0xff]  }
 0x23f   :  { %4668 = vmatpush1.bf16.msra.mxu0 %v9403_v47  ;;  %4754 = vmatpush1.bf16.msra.mxu1 %v9406_v48  ;;  %v9483_v47 = vld [vmem:[%s15435_s2 + $0xf84] ss:$16 sps:$4 sm:$0xff]   ;;  %v9486_v48 = vld [vmem:[%s15435_s2 + $0xf8c] ss:$16 sps:$4 sm:$0xff]  }
 0x240   :  { %4680 = vmatprep.subr.bf16.mxu0 %v9411_v49  ;;  %4766 = vmatprep.subr.bf16.mxu1 %v9414_v50  ;;  %v9481_v49 = vld [vmem:[%s15435_s2 + $0xf80] ss:$16 sps:$4 sm:$0xff]   ;;  %v9484_v50 = vld [vmem:[%s15435_s2 + $0xf88] ss:$16 sps:$4 sm:$0xff]  }
 0x242   :  { %4670 = vmatmul.mubr.bf16.vlgmr.msra.gmra.mrb[4].mxu0 %v9702_v55  ;;  %4756 = vmatmul.mubr.bf16.vlgmr.msra.gmra.mrb[4].mxu1 %v9702_v55  ;;  %v9495_v55 = vld [vmem:[%s15435_s2 + $0xfc4] ss:$16 sps:$4 sm:$0xff]  }
 0x243   :  { %4681 = vmatpush1.bf16.msra.mxu0 %v9409_v51  ;;  %4767 = vmatpush1.bf16.msra.mxu1 %v9412_v52  ;;  %v9489_v51 = vld [vmem:[%s15435_s2 + $0xfa4] ss:$16 sps:$4 sm:$0xff]   ;;  %v9492_v52 = vld [vmem:[%s15435_s2 + $0xfac] ss:$16 sps:$4 sm:$0xff]  }
 0x244   :  { %4682 = vmatprep.subr.bf16.mxu0 %v9417_v53  ;;  %4768 = vmatprep.subr.bf16.mxu1 %v9420_v54  ;;  %v9487_v53 = vld [vmem:[%s15435_s2 + $0xfa0] ss:$16 sps:$4 sm:$0xff]   ;;  %v9490_v54 = vld [vmem:[%s15435_s2 + $0xfa8] ss:$16 sps:$4 sm:$0xff]  }
 0x245   :  { %4712 = vmatprep.mubr.bf16.mxu0 %v9703_v60  ;;  %4798 = vmatprep.mubr.bf16.mxu1 %v9703_v60  ;;  %v9504_v60 = vld [vmem:[%s15435_s2 + $0xfec] ss:$16 sps:$4 sm:$0xff]  }
 0x247   :  { %4683 = vmatpush1.bf16.msra.mxu0 %v9415_v56  ;;  %4769 = vmatpush1.bf16.msra.mxu1 %v9418_v57  ;;  %v9498_v56 = vld [vmem:[%s15435_s2 + $0xfcc] ss:$16 sps:$4 sm:$0xff]   ;;  %v9493_v57 = vld [vmem:[%s15435_s2 + $0xfc0] ss:$16 sps:$4 sm:$0xff]  }
 0x248   :  { %4684 = vmatprep.subr.bf16.mxu0 %v9423_v58  ;;  %4770 = vmatprep.subr.bf16.mxu1 %v9426_v59  ;;  %v9496_v58 = vld [vmem:[%s15435_s2 + $0xfc8] ss:$16 sps:$4 sm:$0xff]   ;;  %v9501_v59 = vld [vmem:[%s15435_s2 + $0xfe4] ss:$16 sps:$4 sm:$0xff]  }
 0x24b   :  { %4685 = vmatpush1.bf16.msra.mxu0 %v9421_v61  ;;  %4771 = vmatpush1.bf16.msra.mxu1 %v9424_v62  ;;  %v9499_v61 = vld [vmem:[%s15435_s2 + $0xfe0] ss:$16 sps:$4 sm:$0xff]   ;;  %v9502_v62 = vld [vmem:[%s15435_s2 + $0xfe8] ss:$16 sps:$4 sm:$0xff]  }
 0x24c   :  { %4686 = vmatprep.subr.bf16.mxu0 %v9429_v63  ;;  %4772 = vmatprep.subr.bf16.mxu1 %v9432_v0  ;;  %v9507_v63 = vld [vmem:[%s15435_s2 + $0x1404] ss:$16 sps:$4 sm:$0xff]   ;;  %v9510_v0 = vld [vmem:[%s15435_s2 + $0x140c] ss:$16 sps:$4 sm:$0xff]  }
 0x24f   :  { %4687 = vmatpush1.bf16.msra.mxu0 %v9427_v1  ;;  %4773 = vmatpush1.bf16.msra.mxu1 %v9430_v2  ;;  %v9505_v1 = vld [vmem:[%s15435_s2 + $0x1400] ss:$16 sps:$4 sm:$0xff]   ;;  %v9508_v2 = vld [vmem:[%s15435_s2 + $0x1408] ss:$16 sps:$4 sm:$0xff]  }
 0x250   :  { %4688 = vmatprep.subr.bf16.mxu0 %v9435_v3  ;;  %4774 = vmatprep.subr.bf16.mxu1 %v9438_v4  ;;  %v9513_v3 = vld [vmem:[%s15435_s2 + $0x1424] ss:$16 sps:$4 sm:$0xff]   ;;  %v9516_v4 = vld [vmem:[%s15435_s2 + $0x142c] ss:$16 sps:$4 sm:$0xff]  }
 0x253   :  { %4689 = vmatpush1.bf16.msra.mxu0 %v9433_v5  ;;  %4775 = vmatpush1.bf16.msra.mxu1 %v9436_v6  ;;  %v9704_v5 = vld [vmem:[%s15437_s0 + $0x8] ss:$16 sps:$4 sm:$0xff]   ;;  %v9511_v6 = vld [vmem:[%s15435_s2 + $0x1420] ss:$16 sps:$4 sm:$0xff]  }
 0x254   :  { %4690 = vmatprep.subr.bf16.mxu0 %v9441_v7  ;;  %4776 = vmatprep.subr.bf16.mxu1 %v9444_v8  ;;  %v9514_v7 = vld [vmem:[%s15435_s2 + $0x1428] ss:$16 sps:$4 sm:$0xff]   ;;  %v9519_v8 = vld [vmem:[%s15435_s2 + $0x1444] ss:$16 sps:$4 sm:$0xff]  }
 0x255   :  { %v12393_v16 = vpop.f32.mrb[0].mxu0  ;;  %v12395_v17 = vpop.f32.mrb[0].mxu1 }
 0x256   :  { %v12397_v19 = vpop.f32.mrb[1].mxu0  ;;  %v12399_v11 = vpop.f32.mrb[1].mxu1 }
 0x257   :  { %v12401_v21 = vpop.f32.mrb[2].mxu0  ;;  %v12403_v22 = vpop.f32.mrb[2].mxu1  ;;  %4691 = vmatpush1.bf16.msra.mxu0 %v9439_v10  ;;  %4777 = vmatpush1.bf16.msra.mxu1 %v9442_v12  ;;  %v9522_v10 = vld [vmem:[%s15435_s2 + $0x144c] ss:$16 sps:$4 sm:$0xff]   ;;  %v9517_v12 = vld [vmem:[%s15435_s2 + $0x1440] ss:$16 sps:$4 sm:$0xff]  }
 0x258   :  { %v12411_v24 = vpop.f32.mrb[3].mxu0  ;;  %v12413_v25 = vpop.f32.mrb[3].mxu1  ;;  %4692 = vmatprep.subr.bf16.mxu0 %v9447_v14  ;;  %4778 = vmatprep.subr.bf16.mxu1 %v9450_v15  ;;  %v9520_v14 = vld [vmem:[%s15435_s2 + $0x1448] ss:$16 sps:$4 sm:$0xff]   ;;  %v9525_v15 = vld [vmem:[%s15435_s2 + $0x1464] ss:$16 sps:$4 sm:$0xff]  }
 0x25b   :  { %4693 = vmatpush1.bf16.msra.mxu0 %v9445_v23  ;;  %4779 = vmatpush1.bf16.msra.mxu1 %v9448_v9  ;;  %v9528_v23 = vld [vmem:[%s15435_s2 + $0x146c] ss:$16 sps:$4 sm:$0xff]   ;;  %v9523_v9 = vld [vmem:[%s15435_s2 + $0x1460] ss:$16 sps:$4 sm:$0xff]  }
 0x25c   :  { %4694 = vmatprep.subr.bf16.mxu0 %v9453_v27  ;;  %4780 = vmatprep.subr.bf16.mxu1 %v9456_v28  ;;  %v9526_v27 = vld [vmem:[%s15435_s2 + $0x1468] ss:$16 sps:$4 sm:$0xff]   ;;  %v9531_v28 = vld [vmem:[%s15435_s2 + $0x1484] ss:$16 sps:$4 sm:$0xff]  }
 0x25f   :  { %4695 = vmatpush1.bf16.msra.mxu0 %v9451_v29  ;;  %4781 = vmatpush1.bf16.msra.mxu1 %v9454_v13  ;;  %v9534_v29 = vld [vmem:[%s15435_s2 + $0x148c] ss:$16 sps:$4 sm:$0xff]   ;;  %v9529_v13 = vld [vmem:[%s15435_s2 + $0x1480] ss:$16 sps:$4 sm:$0xff]  }
 0x260   :  { %4696 = vmatprep.subr.bf16.mxu0 %v9459_v31  ;;  %4782 = vmatprep.subr.bf16.mxu1 %v9462_v32  ;;  %v9532_v31 = vld [vmem:[%s15435_s2 + $0x1488] ss:$16 sps:$4 sm:$0xff]   ;;  %v9537_v32 = vld [vmem:[%s15435_s2 + $0x14a4] ss:$16 sps:$4 sm:$0xff]  }
 0x263   :  { %4697 = vmatpush1.bf16.msra.mxu0 %v9457_v18  ;;  %4783 = vmatpush1.bf16.msra.mxu1 %v9460_v34  ;;  %v9540_v18 = vld [vmem:[%s15435_s2 + $0x14ac] ss:$16 sps:$4 sm:$0xff]   ;;  %v9535_v34 = vld [vmem:[%s15435_s2 + $0x14a0] ss:$16 sps:$4 sm:$0xff]  }
 0x264   :  { %4698 = vmatprep.subr.bf16.mxu0 %v9465_v35  ;;  %4784 = vmatprep.subr.bf16.mxu1 %v9468_v36  ;;  %v9538_v35 = vld [vmem:[%s15435_s2 + $0x14a8] ss:$16 sps:$4 sm:$0xff]   ;;  %v9543_v36 = vld [vmem:[%s15435_s2 + $0x14c4] ss:$16 sps:$4 sm:$0xff]  }
 0x267   :  { %4699 = vmatpush1.bf16.msra.mxu0 %v9463_v37  ;;  %4785 = vmatpush1.bf16.msra.mxu1 %v9466_v38  ;;  %v9546_v37 = vld [vmem:[%s15435_s2 + $0x14cc] ss:$16 sps:$4 sm:$0xff]   ;;  %v9541_v38 = vld [vmem:[%s15435_s2 + $0x14c0] ss:$16 sps:$4 sm:$0xff]  }
 0x268   :  { %4700 = vmatprep.subr.bf16.mxu0 %v9471_v39  ;;  %4786 = vmatprep.subr.bf16.mxu1 %v9474_v40  ;;  %v9544_v39 = vld [vmem:[%s15435_s2 + $0x14c8] ss:$16 sps:$4 sm:$0xff]   ;;  %v9549_v40 = vld [vmem:[%s15435_s2 + $0x14e4] ss:$16 sps:$4 sm:$0xff]  }
 0x26b   :  { %4701 = vmatpush1.bf16.msra.mxu0 %v9469_v41  ;;  %4787 = vmatpush1.bf16.msra.mxu1 %v9472_v42  ;;  %v9552_v41 = vld [vmem:[%s15435_s2 + $0x14ec] ss:$16 sps:$4 sm:$0xff]   ;;  %v9547_v42 = vld [vmem:[%s15435_s2 + $0x14e0] ss:$16 sps:$4 sm:$0xff]  }
 0x26c   :  { %4702 = vmatprep.subr.bf16.mxu0 %v9477_v43  ;;  %4788 = vmatprep.subr.bf16.mxu1 %v9480_v44  ;;  %v9550_v43 = vld [vmem:[%s15435_s2 + $0x14e8] ss:$16 sps:$4 sm:$0xff]   ;;  %v9555_v44 = vld [vmem:[%s15435_s2 + $0x1504] ss:$16 sps:$4 sm:$0xff]  }
 0x26f   :  { %4703 = vmatpush1.bf16.msra.mxu0 %v9475_v45  ;;  %4789 = vmatpush1.bf16.msra.mxu1 %v9478_v46  ;;  %v9558_v45 = vld [vmem:[%s15435_s2 + $0x150c] ss:$16 sps:$4 sm:$0xff]   ;;  %v9553_v46 = vld [vmem:[%s15435_s2 + $0x1500] ss:$16 sps:$4 sm:$0xff]  }
 0x270   :  { %4704 = vmatprep.subr.bf16.mxu0 %v9483_v47  ;;  %4790 = vmatprep.subr.bf16.mxu1 %v9486_v48  ;;  %v9556_v47 = vld [vmem:[%s15435_s2 + $0x1508] ss:$16 sps:$4 sm:$0xff]   ;;  %v9561_v48 = vld [vmem:[%s15435_s2 + $0x1524] ss:$16 sps:$4 sm:$0xff]  }
 0x273   :  { %4705 = vmatpush1.bf16.msra.mxu0 %v9481_v49  ;;  %4791 = vmatpush1.bf16.msra.mxu1 %v9484_v50  ;;  %v9564_v49 = vld [vmem:[%s15435_s2 + $0x152c] ss:$16 sps:$4 sm:$0xff]   ;;  %v9559_v50 = vld [vmem:[%s15435_s2 + $0x1520] ss:$16 sps:$4 sm:$0xff]  }
 0x274   :  { %4706 = vmatprep.subr.bf16.mxu0 %v9489_v51  ;;  %4792 = vmatprep.subr.bf16.mxu1 %v9492_v52  ;;  %v9562_v51 = vld [vmem:[%s15435_s2 + $0x1528] ss:$16 sps:$4 sm:$0xff]   ;;  %v9567_v52 = vld [vmem:[%s15435_s2 + $0x1544] ss:$16 sps:$4 sm:$0xff]  }
 0x277   :  { %4707 = vmatpush1.bf16.msra.mxu0 %v9487_v53  ;;  %4793 = vmatpush1.bf16.msra.mxu1 %v9490_v54  ;;  %v9570_v53 = vld [vmem:[%s15435_s2 + $0x154c] ss:$16 sps:$4 sm:$0xff]   ;;  %v9565_v54 = vld [vmem:[%s15435_s2 + $0x1540] ss:$16 sps:$4 sm:$0xff]  }
 0x278   :  { %4708 = vmatprep.subr.bf16.mxu0 %v9495_v55  ;;  %4794 = vmatprep.subr.bf16.mxu1 %v9498_v56  ;;  %v9568_v55 = vld [vmem:[%s15435_s2 + $0x1548] ss:$16 sps:$4 sm:$0xff]   ;;  %v9573_v56 = vld [vmem:[%s15435_s2 + $0x1564] ss:$16 sps:$4 sm:$0xff]  }
 0x27b   :  { %4709 = vmatpush1.bf16.msra.mxu0 %v9493_v57  ;;  %4795 = vmatpush1.bf16.msra.mxu1 %v9496_v58  ;;  %v9576_v57 = vld [vmem:[%s15435_s2 + $0x156c] ss:$16 sps:$4 sm:$0xff]   ;;  %v9571_v58 = vld [vmem:[%s15435_s2 + $0x1560] ss:$16 sps:$4 sm:$0xff]  }
 0x27c   :  { %4710 = vmatprep.subr.bf16.mxu0 %v9501_v59  ;;  %4796 = vmatprep.subr.bf16.mxu1 %v9504_v60  ;;  %v9574_v59 = vld [vmem:[%s15435_s2 + $0x1568] ss:$16 sps:$4 sm:$0xff]   ;;  %v9579_v60 = vld [vmem:[%s15435_s2 + $0x1584] ss:$16 sps:$4 sm:$0xff]  }
 0x27f   :  { %4711 = vmatpush1.bf16.msra.mxu0 %v9499_v61  ;;  %4797 = vmatpush1.bf16.msra.mxu1 %v9502_v62  ;;  %v9582_v61 = vld [vmem:[%s15435_s2 + $0x158c] ss:$16 sps:$4 sm:$0xff]   ;;  %v9577_v62 = vld [vmem:[%s15435_s2 + $0x1580] ss:$16 sps:$4 sm:$0xff]  }
 0x280   :  { %5578 = vmatprep.subr.bf16.mxu0 %v9507_v63  ;;  %5664 = vmatprep.subr.bf16.mxu1 %v9510_v0  ;;  %v9580_v63 = vld [vmem:[%s15435_s2 + $0x1588] ss:$16 sps:$4 sm:$0xff]   ;;  %v9585_v0 = vld [vmem:[%s15435_s2 + $0x15a4] ss:$16 sps:$4 sm:$0xff]  }
 0x282   :  { %4713 = vmatmul.mubr.bf16.vlgmr.msra.gmra.mrb[4].mxu0 %v9704_v5  ;;  %4799 = vmatmul.mubr.bf16.vlgmr.msra.gmra.mrb[4].mxu1 %v9704_v5  ;;  %v9594_v5 = vld [vmem:[%s15435_s2 + $0x15cc] ss:$16 sps:$4 sm:$0xff]  }
 0x283   :  { %5579 = vmatpush1.bf16.msra.mxu0 %v9505_v1  ;;  %5665 = vmatpush1.bf16.msra.mxu1 %v9508_v2  ;;  %v9588_v1 = vld [vmem:[%s15435_s2 + $0x15ac] ss:$16 sps:$4 sm:$0xff]   ;;  %v9583_v2 = vld [vmem:[%s15435_s2 + $0x15a0] ss:$16 sps:$4 sm:$0xff]  }
 0x284   :  { %5580 = vmatprep.subr.bf16.mxu0 %v9513_v3  ;;  %5666 = vmatprep.subr.bf16.mxu1 %v9516_v4  ;;  %v9586_v3 = vld [vmem:[%s15435_s2 + $0x15a8] ss:$16 sps:$4 sm:$0xff]   ;;  %v9591_v4 = vld [vmem:[%s15435_s2 + $0x15c4] ss:$16 sps:$4 sm:$0xff]  }
 0x285   :  { %5610 = vmatprep.mubr.bf16.mxu0 %v11328_v20  ;;  %5696 = vmatprep.mubr.bf16.mxu1 %v11328_v20 }
 0x287   :  { %5581 = vmatpush1.bf16.msra.mxu0 %v9511_v6  ;;  %5667 = vmatpush1.bf16.msra.mxu1 %v9514_v7  ;;  %v9589_v6 = vld [vmem:[%s15435_s2 + $0x15c0] ss:$16 sps:$4 sm:$0xff]   ;;  %v9592_v7 = vld [vmem:[%s15435_s2 + $0x15c8] ss:$16 sps:$4 sm:$0xff]  }
 0x288   :  { %5582 = vmatprep.subr.bf16.mxu0 %v9519_v8  ;;  %5668 = vmatprep.subr.bf16.mxu1 %v9522_v10  ;;  %v9597_v8 = vld [vmem:[%s15435_s2 + $0x15e4] ss:$16 sps:$4 sm:$0xff]   ;;  %v9600_v10 = vld [vmem:[%s15435_s2 + $0x15ec] ss:$16 sps:$4 sm:$0xff]  }
 0x28b   :  { %5583 = vmatpush1.bf16.msra.mxu0 %v9517_v12  ;;  %5669 = vmatpush1.bf16.msra.mxu1 %v9520_v14  ;;  %v9595_v12 = vld [vmem:[%s15435_s2 + $0x15e0] ss:$16 sps:$4 sm:$0xff]   ;;  %v9598_v14 = vld [vmem:[%s15435_s2 + $0x15e8] ss:$16 sps:$4 sm:$0xff]  }
 0x28c   :  { %5584 = vmatprep.subr.bf16.mxu0 %v9525_v15  ;;  %5670 = vmatprep.subr.bf16.mxu1 %v9528_v23  ;;  %v9603_v15 = vld [vmem:[%s15435_s2 + $0x1604] ss:$16 sps:$4 sm:$0xff]   ;;  %v9606_v23 = vld [vmem:[%s15435_s2 + $0x160c] ss:$16 sps:$4 sm:$0xff]  }
 0x28f   :  { %5585 = vmatpush1.bf16.msra.mxu0 %v9523_v9  ;;  %5671 = vmatpush1.bf16.msra.mxu1 %v9526_v27  ;;  %v9601_v9 = vld [vmem:[%s15435_s2 + $0x1600] ss:$16 sps:$4 sm:$0xff]   ;;  %v9604_v27 = vld [vmem:[%s15435_s2 + $0x1608] ss:$16 sps:$4 sm:$0xff]  }
 0x290   :  { %5586 = vmatprep.subr.bf16.mxu0 %v9531_v28  ;;  %5672 = vmatprep.subr.bf16.mxu1 %v9534_v29  ;;  %v9609_v28 = vld [vmem:[%s15435_s2 + $0x1624] ss:$16 sps:$4 sm:$0xff]   ;;  %v9612_v29 = vld [vmem:[%s15435_s2 + $0x162c] ss:$16 sps:$4 sm:$0xff]  }
 0x293   :  { %5587 = vmatpush1.bf16.msra.mxu0 %v9529_v13  ;;  %5673 = vmatpush1.bf16.msra.mxu1 %v9532_v31  ;;  %v9607_v13 = vld [vmem:[%s15435_s2 + $0x1620] ss:$16 sps:$4 sm:$0xff]   ;;  %v9610_v31 = vld [vmem:[%s15435_s2 + $0x1628] ss:$16 sps:$4 sm:$0xff]  }
 0x294   :  { %5588 = vmatprep.subr.bf16.mxu0 %v9537_v32  ;;  %5674 = vmatprep.subr.bf16.mxu1 %v9540_v18  ;;  %v9615_v32 = vld [vmem:[%s15435_s2 + $0x1644] ss:$16 sps:$4 sm:$0xff]   ;;  %v9618_v18 = vld [vmem:[%s15435_s2 + $0x164c] ss:$16 sps:$4 sm:$0xff]  }
 0x297   :  { %5589 = vmatpush1.bf16.msra.mxu0 %v9535_v34  ;;  %5675 = vmatpush1.bf16.msra.mxu1 %v9538_v35  ;;  %v9613_v34 = vld [vmem:[%s15435_s2 + $0x1640] ss:$16 sps:$4 sm:$0xff]   ;;  %v9616_v35 = vld [vmem:[%s15435_s2 + $0x1648] ss:$16 sps:$4 sm:$0xff]  }
 0x298   :  { %5590 = vmatprep.subr.bf16.mxu0 %v9543_v36  ;;  %5676 = vmatprep.subr.bf16.mxu1 %v9546_v37  ;;  %v9621_v36 = vld [vmem:[%s15435_s2 + $0x1664] ss:$16 sps:$4 sm:$0xff]   ;;  %v9624_v37 = vld [vmem:[%s15435_s2 + $0x166c] ss:$16 sps:$4 sm:$0xff]  }
 0x29b   :  { %5591 = vmatpush1.bf16.msra.mxu0 %v9541_v38  ;;  %5677 = vmatpush1.bf16.msra.mxu1 %v9544_v39  ;;  %v9619_v38 = vld [vmem:[%s15435_s2 + $0x1660] ss:$16 sps:$4 sm:$0xff]   ;;  %v9622_v39 = vld [vmem:[%s15435_s2 + $0x1668] ss:$16 sps:$4 sm:$0xff]  }
 0x29c   :  { %5592 = vmatprep.subr.bf16.mxu0 %v9549_v40  ;;  %5678 = vmatprep.subr.bf16.mxu1 %v9552_v41  ;;  %v9627_v40 = vld [vmem:[%s15435_s2 + $0x1684] ss:$16 sps:$4 sm:$0xff]   ;;  %v9630_v41 = vld [vmem:[%s15435_s2 + $0x168c] ss:$16 sps:$4 sm:$0xff]  }
 0x29f   :  { %5593 = vmatpush1.bf16.msra.mxu0 %v9547_v42  ;;  %5679 = vmatpush1.bf16.msra.mxu1 %v9550_v43  ;;  %v9625_v42 = vld [vmem:[%s15435_s2 + $0x1680] ss:$16 sps:$4 sm:$0xff]   ;;  %v9628_v43 = vld [vmem:[%s15435_s2 + $0x1688] ss:$16 sps:$4 sm:$0xff]  }
 0x2a0   :  { %5594 = vmatprep.subr.bf16.mxu0 %v9555_v44  ;;  %5680 = vmatprep.subr.bf16.mxu1 %v9558_v45  ;;  %v9633_v44 = vld [vmem:[%s15435_s2 + $0x16a4] ss:$16 sps:$4 sm:$0xff]   ;;  %v9636_v45 = vld [vmem:[%s15435_s2 + $0x16ac] ss:$16 sps:$4 sm:$0xff]  }
 0x2a3   :  { %5595 = vmatpush1.bf16.msra.mxu0 %v9553_v46  ;;  %5681 = vmatpush1.bf16.msra.mxu1 %v9556_v47  ;;  %v9631_v46 = vld [vmem:[%s15435_s2 + $0x16a0] ss:$16 sps:$4 sm:$0xff]   ;;  %v9634_v47 = vld [vmem:[%s15435_s2 + $0x16a8] ss:$16 sps:$4 sm:$0xff]  }
 0x2a4   :  { %5596 = vmatprep.subr.bf16.mxu0 %v9561_v48  ;;  %5682 = vmatprep.subr.bf16.mxu1 %v9564_v49  ;;  %v9639_v48 = vld [vmem:[%s15435_s2 + $0x16c4] ss:$16 sps:$4 sm:$0xff]   ;;  %v9642_v49 = vld [vmem:[%s15435_s2 + $0x16cc] ss:$16 sps:$4 sm:$0xff]  }
 0x2a7   :  { %5597 = vmatpush1.bf16.msra.mxu0 %v9559_v50  ;;  %5683 = vmatpush1.bf16.msra.mxu1 %v9562_v51  ;;  %v9637_v50 = vld [vmem:[%s15435_s2 + $0x16c0] ss:$16 sps:$4 sm:$0xff]   ;;  %v9640_v51 = vld [vmem:[%s15435_s2 + $0x16c8] ss:$16 sps:$4 sm:$0xff]  }
 0x2a8   :  { %5598 = vmatprep.subr.bf16.mxu0 %v9567_v52  ;;  %5684 = vmatprep.subr.bf16.mxu1 %v9570_v53  ;;  %v9645_v52 = vld [vmem:[%s15435_s2 + $0x16e4] ss:$16 sps:$4 sm:$0xff]   ;;  %v9648_v53 = vld [vmem:[%s15435_s2 + $0x16ec] ss:$16 sps:$4 sm:$0xff]  }
 0x2ab   :  { %5599 = vmatpush1.bf16.msra.mxu0 %v9565_v54  ;;  %5685 = vmatpush1.bf16.msra.mxu1 %v9568_v55  ;;  %v9643_v54 = vld [vmem:[%s15435_s2 + $0x16e0] ss:$16 sps:$4 sm:$0xff]   ;;  %v9646_v55 = vld [vmem:[%s15435_s2 + $0x16e8] ss:$16 sps:$4 sm:$0xff]  }
 0x2ac   :  { %5600 = vmatprep.subr.bf16.mxu0 %v9573_v56  ;;  %5686 = vmatprep.subr.bf16.mxu1 %v9576_v57  ;;  %v9651_v56 = vld [vmem:[%s15435_s2 + $0x1704] ss:$16 sps:$4 sm:$0xff]   ;;  %v9654_v57 = vld [vmem:[%s15435_s2 + $0x170c] ss:$16 sps:$4 sm:$0xff]  }
 0x2af   :  { %5601 = vmatpush1.bf16.msra.mxu0 %v9571_v58  ;;  %5687 = vmatpush1.bf16.msra.mxu1 %v9574_v59  ;;  %v9649_v58 = vld [vmem:[%s15435_s2 + $0x1700] ss:$16 sps:$4 sm:$0xff]   ;;  %v9652_v59 = vld [vmem:[%s15435_s2 + $0x1708] ss:$16 sps:$4 sm:$0xff]  }
 0x2b0   :  { %5602 = vmatprep.subr.bf16.mxu0 %v9579_v60  ;;  %5688 = vmatprep.subr.bf16.mxu1 %v9582_v61  ;;  %v9657_v60 = vld [vmem:[%s15435_s2 + $0x1724] ss:$16 sps:$4 sm:$0xff]   ;;  %v9660_v61 = vld [vmem:[%s15435_s2 + $0x172c] ss:$16 sps:$4 sm:$0xff]  }
 0x2b3   :  { %5603 = vmatpush1.bf16.msra.mxu0 %v9577_v62  ;;  %5689 = vmatpush1.bf16.msra.mxu1 %v9580_v63  ;;  %v9655_v62 = vld [vmem:[%s15435_s2 + $0x1720] ss:$16 sps:$4 sm:$0xff]   ;;  %v9658_v63 = vld [vmem:[%s15435_s2 + $0x1728] ss:$16 sps:$4 sm:$0xff]  }
 0x2b4   :  { %5604 = vmatprep.subr.bf16.mxu0 %v9585_v0  ;;  %5690 = vmatprep.subr.bf16.mxu1 %v9588_v1  ;;  %v9663_v0 = vld [vmem:[%s15435_s2 + $0x1744] ss:$16 sps:$4 sm:$0xff]   ;;  %v9666_v1 = vld [vmem:[%s15435_s2 + $0x174c] ss:$16 sps:$4 sm:$0xff]  }
 0x2b7   :  { %5605 = vmatpush1.bf16.msra.mxu0 %v9583_v2  ;;  %5691 = vmatpush1.bf16.msra.mxu1 %v9586_v3  ;;  %v9661_v2 = vld [vmem:[%s15435_s2 + $0x1740] ss:$16 sps:$4 sm:$0xff]   ;;  %v9664_v3 = vld [vmem:[%s15435_s2 + $0x1748] ss:$16 sps:$4 sm:$0xff]  }
 0x2b8   :  { %5606 = vmatprep.subr.bf16.mxu0 %v9591_v4  ;;  %5692 = vmatprep.subr.bf16.mxu1 %v9594_v5  ;;  %v9669_v4 = vld [vmem:[%s15435_s2 + $0x1764] ss:$16 sps:$4 sm:$0xff]   ;;  %v9672_v5 = vld [vmem:[%s15435_s2 + $0x176c] ss:$16 sps:$4 sm:$0xff]  }
 0x2bb   :  { %5607 = vmatpush1.bf16.msra.mxu0 %v9589_v6  ;;  %5693 = vmatpush1.bf16.msra.mxu1 %v9592_v7  ;;  %v9667_v6 = vld [vmem:[%s15435_s2 + $0x1760] ss:$16 sps:$4 sm:$0xff]   ;;  %v9670_v7 = vld [vmem:[%s15435_s2 + $0x1768] ss:$16 sps:$4 sm:$0xff]  }
 0x2bc   :  { %5608 = vmatprep.subr.bf16.mxu0 %v9597_v8  ;;  %5694 = vmatprep.subr.bf16.mxu1 %v9600_v10  ;;  %v9675_v8 = vld [vmem:[%s15435_s2 + $0x1784] ss:$16 sps:$4 sm:$0xff]   ;;  %v9678_v10 = vld [vmem:[%s15435_s2 + $0x178c] ss:$16 sps:$4 sm:$0xff]  }
 0x2bf   :  { %5609 = vmatpush1.bf16.msra.mxu0 %v9595_v12  ;;  %5695 = vmatpush1.bf16.msra.mxu1 %v9598_v14  ;;  %v9673_v12 = vld [vmem:[%s15435_s2 + $0x1780] ss:$16 sps:$4 sm:$0xff]   ;;  %v9676_v14 = vld [vmem:[%s15435_s2 + $0x1788] ss:$16 sps:$4 sm:$0xff]  }
 0x2c0   :  { %5621 = vmatprep.subr.bf16.mxu0 %v9603_v15  ;;  %5707 = vmatprep.subr.bf16.mxu1 %v9606_v23  ;;  %v9681_v15 = vld [vmem:[%s15435_s2 + $0x17a4] ss:$16 sps:$4 sm:$0xff]   ;;  %v9684_v23 = vld [vmem:[%s15435_s2 + $0x17ac] ss:$16 sps:$4 sm:$0xff]  }
 0x2c2   :  { %5611 = vmatmul.mubr.bf16.vlgmr.msra.gmra.mrb[4].mxu0 %v11518_v26  ;;  %5697 = vmatmul.mubr.bf16.vlgmr.msra.gmra.mrb[4].mxu1 %v11518_v26 }
 0x2c3   :  { %5622 = vmatpush1.bf16.msra.mxu0 %v9601_v9  ;;  %5708 = vmatpush1.bf16.msra.mxu1 %v9604_v27  ;;  %v9679_v9 = vld [vmem:[%s15435_s2 + $0x17a0] ss:$16 sps:$4 sm:$0xff]   ;;  %v9682_v27 = vld [vmem:[%s15435_s2 + $0x17a8] ss:$16 sps:$4 sm:$0xff]  }
 0x2c4   :  { %5623 = vmatprep.subr.bf16.mxu0 %v9609_v28  ;;  %5709 = vmatprep.subr.bf16.mxu1 %v9612_v29  ;;  %v9687_v28 = vld [vmem:[%s15435_s2 + $0x17c4] ss:$16 sps:$4 sm:$0xff]   ;;  %v9690_v29 = vld [vmem:[%s15435_s2 + $0x17cc] ss:$16 sps:$4 sm:$0xff]  }
 0x2c5   :  { %5653 = vmatprep.mubr.bf16.mxu0 %v11532_v30  ;;  %5739 = vmatprep.mubr.bf16.mxu1 %v11532_v30 }
 0x2c7   :  { %5624 = vmatpush1.bf16.msra.mxu0 %v9607_v13  ;;  %5710 = vmatpush1.bf16.msra.mxu1 %v9610_v31  ;;  %v9685_v13 = vld [vmem:[%s15435_s2 + $0x17c0] ss:$16 sps:$4 sm:$0xff]   ;;  %v9688_v31 = vld [vmem:[%s15435_s2 + $0x17c8] ss:$16 sps:$4 sm:$0xff]  }
 0x2c8   :  { %5625 = vmatprep.subr.bf16.mxu0 %v9615_v32  ;;  %5711 = vmatprep.subr.bf16.mxu1 %v9618_v18  ;;  %v9693_v32 = vld [vmem:[%s15435_s2 + $0x17e4] ss:$16 sps:$4 sm:$0xff]   ;;  %v9696_v18 = vld [vmem:[%s15435_s2 + $0x17ec] ss:$16 sps:$4 sm:$0xff]  }
 0x2cb   :  { %5626 = vmatpush1.bf16.msra.mxu0 %v9613_v34  ;;  %5712 = vmatpush1.bf16.msra.mxu1 %v9616_v35  ;;  %v9691_v34 = vld [vmem:[%s15435_s2 + $0x17e0] ss:$16 sps:$4 sm:$0xff]   ;;  %v9694_v35 = vld [vmem:[%s15435_s2 + $0x17e8] ss:$16 sps:$4 sm:$0xff]  }
 0x2cc   :  { %5627 = vmatprep.subr.bf16.mxu0 %v9621_v36  ;;  %5713 = vmatprep.subr.bf16.mxu1 %v9624_v37  ;;  %v9705_v36 = vld [vmem:[%s15435_s2 + $0x404] ss:$16 sps:$4 sm:$0xff]   ;;  %v9706_v37 = vld [vmem:[%s15435_s2 + $0x40c] ss:$16 sps:$4 sm:$0xff]  }
 0x2cf   :  { %5628 = vmatpush1.bf16.msra.mxu0 %v9619_v38  ;;  %5714 = vmatpush1.bf16.msra.mxu1 %v9622_v39  ;;  %v9707_v38 = vld [vmem:[%s15435_s2 + $0x400] ss:$16 sps:$4 sm:$0xff]   ;;  %v9708_v39 = vld [vmem:[%s15435_s2 + $0x408] ss:$16 sps:$4 sm:$0xff]  }
 0x2d0   :  { %5629 = vmatprep.subr.bf16.mxu0 %v9627_v40  ;;  %5715 = vmatprep.subr.bf16.mxu1 %v9630_v41  ;;  %v9709_v40 = vld [vmem:[%s15435_s2 + $0x424] ss:$16 sps:$4 sm:$0xff]   ;;  %v9710_v41 = vld [vmem:[%s15435_s2 + $0x42c] ss:$16 sps:$4 sm:$0xff]  }
 0x2d3   :  { %5630 = vmatpush1.bf16.msra.mxu0 %v9625_v42  ;;  %5716 = vmatpush1.bf16.msra.mxu1 %v9628_v43  ;;  %v9711_v42 = vld [vmem:[%s15435_s2 + $0x420] ss:$16 sps:$4 sm:$0xff]   ;;  %v9712_v43 = vld [vmem:[%s15435_s2 + $0x428] ss:$16 sps:$4 sm:$0xff]  }
 0x2d4   :  { %5631 = vmatprep.subr.bf16.mxu0 %v9633_v44  ;;  %5717 = vmatprep.subr.bf16.mxu1 %v9636_v45  ;;  %v9713_v44 = vld [vmem:[%s15435_s2 + $0x444] ss:$16 sps:$4 sm:$0xff]   ;;  %v9714_v45 = vld [vmem:[%s15435_s2 + $0x44c] ss:$16 sps:$4 sm:$0xff]  }
 0x2d7   :  { %5632 = vmatpush1.bf16.msra.mxu0 %v9631_v46  ;;  %5718 = vmatpush1.bf16.msra.mxu1 %v9634_v47  ;;  %v9715_v46 = vld [vmem:[%s15435_s2 + $0x440] ss:$16 sps:$4 sm:$0xff]   ;;  %v9716_v47 = vld [vmem:[%s15435_s2 + $0x448] ss:$16 sps:$4 sm:$0xff]  }
 0x2d8   :  { %5633 = vmatprep.subr.bf16.mxu0 %v9639_v48  ;;  %5719 = vmatprep.subr.bf16.mxu1 %v9642_v49  ;;  %v9717_v48 = vld [vmem:[%s15435_s2 + $0x464] ss:$16 sps:$4 sm:$0xff]   ;;  %v9718_v49 = vld [vmem:[%s15435_s2 + $0x46c] ss:$16 sps:$4 sm:$0xff]  }
 0x2db   :  { %5634 = vmatpush1.bf16.msra.mxu0 %v9637_v50  ;;  %5720 = vmatpush1.bf16.msra.mxu1 %v9640_v51  ;;  %v9719_v50 = vld [vmem:[%s15435_s2 + $0x460] ss:$16 sps:$4 sm:$0xff]   ;;  %v9720_v51 = vld [vmem:[%s15435_s2 + $0x468] ss:$16 sps:$4 sm:$0xff]  }
 0x2dc   :  { %5635 = vmatprep.subr.bf16.mxu0 %v9645_v52  ;;  %5721 = vmatprep.subr.bf16.mxu1 %v9648_v53  ;;  %v9721_v52 = vld [vmem:[%s15435_s2 + $0x484] ss:$16 sps:$4 sm:$0xff]   ;;  %v9722_v53 = vld [vmem:[%s15435_s2 + $0x48c] ss:$16 sps:$4 sm:$0xff]  }
 0x2df   :  { %5636 = vmatpush1.bf16.msra.mxu0 %v9643_v54  ;;  %5722 = vmatpush1.bf16.msra.mxu1 %v9646_v55  ;;  %v9723_v54 = vld [vmem:[%s15435_s2 + $0x480] ss:$16 sps:$4 sm:$0xff]   ;;  %v9724_v55 = vld [vmem:[%s15435_s2 + $0x488] ss:$16 sps:$4 sm:$0xff]  }
 0x2e0   :  { %5637 = vmatprep.subr.bf16.mxu0 %v9651_v56  ;;  %5723 = vmatprep.subr.bf16.mxu1 %v9654_v57  ;;  %v9725_v56 = vld [vmem:[%s15435_s2 + $0x4a4] ss:$16 sps:$4 sm:$0xff]   ;;  %v9726_v57 = vld [vmem:[%s15435_s2 + $0x4ac] ss:$16 sps:$4 sm:$0xff]  }
 0x2e3   :  { %5638 = vmatpush1.bf16.msra.mxu0 %v9649_v58  ;;  %5724 = vmatpush1.bf16.msra.mxu1 %v9652_v59  ;;  %v9727_v58 = vld [vmem:[%s15435_s2 + $0x4a0] ss:$16 sps:$4 sm:$0xff]   ;;  %v9728_v59 = vld [vmem:[%s15435_s2 + $0x4a8] ss:$16 sps:$4 sm:$0xff]  }
 0x2e4   :  { %5639 = vmatprep.subr.bf16.mxu0 %v9657_v60  ;;  %5725 = vmatprep.subr.bf16.mxu1 %v9660_v61  ;;  %v9729_v60 = vld [vmem:[%s15435_s2 + $0x4c4] ss:$16 sps:$4 sm:$0xff]   ;;  %v9730_v61 = vld [vmem:[%s15435_s2 + $0x4cc] ss:$16 sps:$4 sm:$0xff]  }
 0x2e7   :  { %5640 = vmatpush1.bf16.msra.mxu0 %v9655_v62  ;;  %5726 = vmatpush1.bf16.msra.mxu1 %v9658_v63  ;;  %v9731_v62 = vld [vmem:[%s15435_s2 + $0x4c0] ss:$16 sps:$4 sm:$0xff]   ;;  %v9732_v63 = vld [vmem:[%s15435_s2 + $0x4c8] ss:$16 sps:$4 sm:$0xff]  }
 0x2e8   :  { %5641 = vmatprep.subr.bf16.mxu0 %v9663_v0  ;;  %5727 = vmatprep.subr.bf16.mxu1 %v9666_v1  ;;  %v9733_v0 = vld [vmem:[%s15435_s2 + $0x4e4] ss:$16 sps:$4 sm:$0xff]   ;;  %v9734_v1 = vld [vmem:[%s15435_s2 + $0x4ec] ss:$16 sps:$4 sm:$0xff]  }
 0x2eb   :  { %5642 = vmatpush1.bf16.msra.mxu0 %v9661_v2  ;;  %5728 = vmatpush1.bf16.msra.mxu1 %v9664_v3  ;;  %v9735_v2 = vld [vmem:[%s15435_s2 + $0x4e0] ss:$16 sps:$4 sm:$0xff]   ;;  %v9736_v3 = vld [vmem:[%s15435_s2 + $0x4e8] ss:$16 sps:$4 sm:$0xff]  }
 0x2ec   :  { %5643 = vmatprep.subr.bf16.mxu0 %v9669_v4  ;;  %5729 = vmatprep.subr.bf16.mxu1 %v9672_v5  ;;  %v9737_v4 = vld [vmem:[%s15435_s2 + $0x504] ss:$16 sps:$4 sm:$0xff]   ;;  %v9738_v5 = vld [vmem:[%s15435_s2 + $0x50c] ss:$16 sps:$4 sm:$0xff]  }
 0x2ef   :  { %5644 = vmatpush1.bf16.msra.mxu0 %v9667_v6  ;;  %5730 = vmatpush1.bf16.msra.mxu1 %v9670_v7  ;;  %v9739_v6 = vld [vmem:[%s15435_s2 + $0x500] ss:$16 sps:$4 sm:$0xff]   ;;  %v9740_v7 = vld [vmem:[%s15435_s2 + $0x508] ss:$16 sps:$4 sm:$0xff]  }
 0x2f0   :  { %5645 = vmatprep.subr.bf16.mxu0 %v9675_v8  ;;  %5731 = vmatprep.subr.bf16.mxu1 %v9678_v10  ;;  %v9741_v8 = vld [vmem:[%s15435_s2 + $0x524] ss:$16 sps:$4 sm:$0xff]   ;;  %v9742_v10 = vld [vmem:[%s15435_s2 + $0x52c] ss:$16 sps:$4 sm:$0xff]  }
 0x2f3   :  { %5646 = vmatpush1.bf16.msra.mxu0 %v9673_v12  ;;  %5732 = vmatpush1.bf16.msra.mxu1 %v9676_v14  ;;  %v9743_v12 = vld [vmem:[%s15435_s2 + $0x520] ss:$16 sps:$4 sm:$0xff]   ;;  %v9744_v14 = vld [vmem:[%s15435_s2 + $0x528] ss:$16 sps:$4 sm:$0xff]  }
 0x2f4   :  { %5647 = vmatprep.subr.bf16.mxu0 %v9681_v15  ;;  %5733 = vmatprep.subr.bf16.mxu1 %v9684_v23  ;;  %v9745_v15 = vld [vmem:[%s15435_s2 + $0x544] ss:$16 sps:$4 sm:$0xff]   ;;  %v9746_v23 = vld [vmem:[%s15435_s2 + $0x54c] ss:$16 sps:$4 sm:$0xff]  }
 0x2f7   :  { %5648 = vmatpush1.bf16.msra.mxu0 %v9679_v9  ;;  %5734 = vmatpush1.bf16.msra.mxu1 %v9682_v27  ;;  %v9747_v9 = vld [vmem:[%s15435_s2 + $0x540] ss:$16 sps:$4 sm:$0xff]   ;;  %v9748_v27 = vld [vmem:[%s15435_s2 + $0x548] ss:$16 sps:$4 sm:$0xff]  }
 0x2f8   :  { %5649 = vmatprep.subr.bf16.mxu0 %v9687_v28  ;;  %5735 = vmatprep.subr.bf16.mxu1 %v9690_v29  ;;  %v9749_v28 = vld [vmem:[%s15435_s2 + $0x564] ss:$16 sps:$4 sm:$0xff]   ;;  %v9750_v29 = vld [vmem:[%s15435_s2 + $0x56c] ss:$16 sps:$4 sm:$0xff]  }
 0x2fb   :  { %5650 = vmatpush1.bf16.msra.mxu0 %v9685_v13  ;;  %5736 = vmatpush1.bf16.msra.mxu1 %v9688_v31  ;;  %v9751_v13 = vld [vmem:[%s15435_s2 + $0x560] ss:$16 sps:$4 sm:$0xff]   ;;  %v9752_v31 = vld [vmem:[%s15435_s2 + $0x568] ss:$16 sps:$4 sm:$0xff]  }
 0x2fc   :  { %5651 = vmatprep.subr.bf16.mxu0 %v9693_v32  ;;  %5737 = vmatprep.subr.bf16.mxu1 %v9696_v18  ;;  %v9753_v32 = vld [vmem:[%s15435_s2 + $0x584] ss:$16 sps:$4 sm:$0xff]   ;;  %v9754_v18 = vld [vmem:[%s15435_s2 + $0x58c] ss:$16 sps:$4 sm:$0xff]  }
 0x2ff   :  { %5652 = vmatpush1.bf16.msra.mxu0 %v9691_v34  ;;  %5738 = vmatpush1.bf16.msra.mxu1 %v9694_v35  ;;  %v9755_v34 = vld [vmem:[%s15435_s2 + $0x580] ss:$16 sps:$4 sm:$0xff]   ;;  %v9756_v35 = vld [vmem:[%s15435_s2 + $0x588] ss:$16 sps:$4 sm:$0xff]  }
 0x300   :  { %5766 = vmatprep.subr.bf16.mxu0 %v9705_v36  ;;  %5852 = vmatprep.subr.bf16.mxu1 %v9706_v37  ;;  %v9757_v36 = vld [vmem:[%s15435_s2 + $0x5a4] ss:$16 sps:$4 sm:$0xff]   ;;  %v9758_v37 = vld [vmem:[%s15435_s2 + $0x5ac] ss:$16 sps:$4 sm:$0xff]  }
 0x302   :  { %5654 = vmatmul.mubr.bf16.vlgmr.msra.gmra.mrb[4].mxu0 %v11720_v33  ;;  %5740 = vmatmul.mubr.bf16.vlgmr.msra.gmra.mrb[4].mxu1 %v11720_v33 }
 0x303   :  { %5767 = vmatpush1.bf16.msra.mxu0 %v9707_v38  ;;  %5853 = vmatpush1.bf16.msra.mxu1 %v9708_v39  ;;  %v9759_v38 = vld [vmem:[%s15435_s2 + $0x5a0] ss:$16 sps:$4 sm:$0xff]   ;;  %v9760_v39 = vld [vmem:[%s15435_s2 + $0x5a8] ss:$16 sps:$4 sm:$0xff]  }
 0x304   :  { %5768 = vmatprep.subr.bf16.mxu0 %v9709_v40  ;;  %5854 = vmatprep.subr.bf16.mxu1 %v9710_v41  ;;  %v9761_v40 = vld [vmem:[%s15435_s2 + $0x5c4] ss:$16 sps:$4 sm:$0xff]   ;;  %v9762_v41 = vld [vmem:[%s15435_s2 + $0x5cc] ss:$16 sps:$4 sm:$0xff]  }
 0x305   :  { %5798 = vmatprep.mubr.bf16.mxu0 %v11328_v20  ;;  %5884 = vmatprep.mubr.bf16.mxu1 %v11328_v20 }
 0x307   :  { %5769 = vmatpush1.bf16.msra.mxu0 %v9711_v42  ;;  %5855 = vmatpush1.bf16.msra.mxu1 %v9712_v43  ;;  %v9763_v42 = vld [vmem:[%s15435_s2 + $0x5c0] ss:$16 sps:$4 sm:$0xff]   ;;  %v9764_v43 = vld [vmem:[%s15435_s2 + $0x5c8] ss:$16 sps:$4 sm:$0xff]  }
 0x308   :  { %5770 = vmatprep.subr.bf16.mxu0 %v9713_v44  ;;  %5856 = vmatprep.subr.bf16.mxu1 %v9714_v45  ;;  %v9765_v44 = vld [vmem:[%s15435_s2 + $0x5e4] ss:$16 sps:$4 sm:$0xff]   ;;  %v9766_v45 = vld [vmem:[%s15435_s2 + $0x5ec] ss:$16 sps:$4 sm:$0xff]  }
 0x30b   :  { %5771 = vmatpush1.bf16.msra.mxu0 %v9715_v46  ;;  %5857 = vmatpush1.bf16.msra.mxu1 %v9716_v47  ;;  %v9767_v46 = vld [vmem:[%s15435_s2 + $0x5e0] ss:$16 sps:$4 sm:$0xff]   ;;  %v9768_v47 = vld [vmem:[%s15435_s2 + $0x5e8] ss:$16 sps:$4 sm:$0xff]  }
 0x30c   :  { %5772 = vmatprep.subr.bf16.mxu0 %v9717_v48  ;;  %5858 = vmatprep.subr.bf16.mxu1 %v9718_v49  ;;  %v9769_v48 = vld [vmem:[%s15435_s2 + $0x604] ss:$16 sps:$4 sm:$0xff]   ;;  %v9770_v49 = vld [vmem:[%s15435_s2 + $0x60c] ss:$16 sps:$4 sm:$0xff]  }
 0x30f   :  { %5773 = vmatpush1.bf16.msra.mxu0 %v9719_v50  ;;  %5859 = vmatpush1.bf16.msra.mxu1 %v9720_v51  ;;  %v9771_v50 = vld [vmem:[%s15435_s2 + $0x600] ss:$16 sps:$4 sm:$0xff]   ;;  %v9772_v51 = vld [vmem:[%s15435_s2 + $0x608] ss:$16 sps:$4 sm:$0xff]  }
 0x310   :  { %5774 = vmatprep.subr.bf16.mxu0 %v9721_v52  ;;  %5860 = vmatprep.subr.bf16.mxu1 %v9722_v53  ;;  %v9773_v52 = vld [vmem:[%s15435_s2 + $0x624] ss:$16 sps:$4 sm:$0xff]   ;;  %v9774_v53 = vld [vmem:[%s15435_s2 + $0x62c] ss:$16 sps:$4 sm:$0xff]  }
 0x313   :  { %5775 = vmatpush1.bf16.msra.mxu0 %v9723_v54  ;;  %5861 = vmatpush1.bf16.msra.mxu1 %v9724_v55  ;;  %v9775_v54 = vld [vmem:[%s15435_s2 + $0x620] ss:$16 sps:$4 sm:$0xff]   ;;  %v9776_v55 = vld [vmem:[%s15435_s2 + $0x628] ss:$16 sps:$4 sm:$0xff]  }
 0x314   :  { %5776 = vmatprep.subr.bf16.mxu0 %v9725_v56  ;;  %5862 = vmatprep.subr.bf16.mxu1 %v9726_v57  ;;  %v9777_v56 = vld [vmem:[%s15435_s2 + $0x644] ss:$16 sps:$4 sm:$0xff]   ;;  %v9778_v57 = vld [vmem:[%s15435_s2 + $0x64c] ss:$16 sps:$4 sm:$0xff]  }
 0x317   :  { %5777 = vmatpush1.bf16.msra.mxu0 %v9727_v58  ;;  %5863 = vmatpush1.bf16.msra.mxu1 %v9728_v59  ;;  %v9779_v58 = vld [vmem:[%s15435_s2 + $0x640] ss:$16 sps:$4 sm:$0xff]   ;;  %v9780_v59 = vld [vmem:[%s15435_s2 + $0x648] ss:$16 sps:$4 sm:$0xff]  }
 0x318   :  { %5778 = vmatprep.subr.bf16.mxu0 %v9729_v60  ;;  %5864 = vmatprep.subr.bf16.mxu1 %v9730_v61  ;;  %v9781_v60 = vld [vmem:[%s15435_s2 + $0x664] ss:$16 sps:$4 sm:$0xff]   ;;  %v9782_v61 = vld [vmem:[%s15435_s2 + $0x66c] ss:$16 sps:$4 sm:$0xff]  }
 0x31b   :  { %5779 = vmatpush1.bf16.msra.mxu0 %v9731_v62  ;;  %5865 = vmatpush1.bf16.msra.mxu1 %v9732_v63  ;;  %v9783_v62 = vld [vmem:[%s15435_s2 + $0x660] ss:$16 sps:$4 sm:$0xff]   ;;  %v9784_v63 = vld [vmem:[%s15435_s2 + $0x668] ss:$16 sps:$4 sm:$0xff]  }
 0x31c   :  { %5780 = vmatprep.subr.bf16.mxu0 %v9733_v0  ;;  %5866 = vmatprep.subr.bf16.mxu1 %v9734_v1  ;;  %v9785_v0 = vld [vmem:[%s15435_s2 + $0x684] ss:$16 sps:$4 sm:$0xff]   ;;  %v9786_v1 = vld [vmem:[%s15435_s2 + $0x68c] ss:$16 sps:$4 sm:$0xff]  }
 0x31f   :  { %5781 = vmatpush1.bf16.msra.mxu0 %v9735_v2  ;;  %5867 = vmatpush1.bf16.msra.mxu1 %v9736_v3  ;;  %v9787_v2 = vld [vmem:[%s15435_s2 + $0x680] ss:$16 sps:$4 sm:$0xff]   ;;  %v9788_v3 = vld [vmem:[%s15435_s2 + $0x688] ss:$16 sps:$4 sm:$0xff]  }
 0x320   :  { %5782 = vmatprep.subr.bf16.mxu0 %v9737_v4  ;;  %5868 = vmatprep.subr.bf16.mxu1 %v9738_v5  ;;  %v9789_v4 = vld [vmem:[%s15435_s2 + $0x6a4] ss:$16 sps:$4 sm:$0xff]   ;;  %v9790_v5 = vld [vmem:[%s15435_s2 + $0x6ac] ss:$16 sps:$4 sm:$0xff]  }
 0x323   :  { %5783 = vmatpush1.bf16.msra.mxu0 %v9739_v6  ;;  %5869 = vmatpush1.bf16.msra.mxu1 %v9740_v7  ;;  %v9791_v6 = vld [vmem:[%s15435_s2 + $0x6a0] ss:$16 sps:$4 sm:$0xff]   ;;  %v9792_v7 = vld [vmem:[%s15435_s2 + $0x6a8] ss:$16 sps:$4 sm:$0xff]  }
 0x324   :  { %5784 = vmatprep.subr.bf16.mxu0 %v9741_v8  ;;  %5870 = vmatprep.subr.bf16.mxu1 %v9742_v10  ;;  %v9793_v8 = vld [vmem:[%s15435_s2 + $0x6c4] ss:$16 sps:$4 sm:$0xff]   ;;  %v9794_v10 = vld [vmem:[%s15435_s2 + $0x6cc] ss:$16 sps:$4 sm:$0xff]  }
 0x327   :  { %5785 = vmatpush1.bf16.msra.mxu0 %v9743_v12  ;;  %5871 = vmatpush1.bf16.msra.mxu1 %v9744_v14  ;;  %v9795_v12 = vld [vmem:[%s15435_s2 + $0x6c0] ss:$16 sps:$4 sm:$0xff]   ;;  %v9796_v14 = vld [vmem:[%s15435_s2 + $0x6c8] ss:$16 sps:$4 sm:$0xff]  }
 0x328   :  { %5786 = vmatprep.subr.bf16.mxu0 %v9745_v15  ;;  %5872 = vmatprep.subr.bf16.mxu1 %v9746_v23  ;;  %v9797_v15 = vld [vmem:[%s15435_s2 + $0x6e4] ss:$16 sps:$4 sm:$0xff]   ;;  %v9798_v23 = vld [vmem:[%s15435_s2 + $0x6ec] ss:$16 sps:$4 sm:$0xff]  }
 0x32b   :  { %5787 = vmatpush1.bf16.msra.mxu0 %v9747_v9  ;;  %5873 = vmatpush1.bf16.msra.mxu1 %v9748_v27  ;;  %v9799_v9 = vld [vmem:[%s15435_s2 + $0x6e0] ss:$16 sps:$4 sm:$0xff]   ;;  %v9800_v27 = vld [vmem:[%s15435_s2 + $0x6e8] ss:$16 sps:$4 sm:$0xff]  }
 0x32c   :  { %5788 = vmatprep.subr.bf16.mxu0 %v9749_v28  ;;  %5874 = vmatprep.subr.bf16.mxu1 %v9750_v29  ;;  %v9801_v28 = vld [vmem:[%s15435_s2 + $0x704] ss:$16 sps:$4 sm:$0xff]   ;;  %v9802_v29 = vld [vmem:[%s15435_s2 + $0x70c] ss:$16 sps:$4 sm:$0xff]  }
 0x32f   :  { %5789 = vmatpush1.bf16.msra.mxu0 %v9751_v13  ;;  %5875 = vmatpush1.bf16.msra.mxu1 %v9752_v31  ;;  %v9803_v13 = vld [vmem:[%s15435_s2 + $0x700] ss:$16 sps:$4 sm:$0xff]   ;;  %v9804_v31 = vld [vmem:[%s15435_s2 + $0x708] ss:$16 sps:$4 sm:$0xff]  }
 0x330   :  { %5790 = vmatprep.subr.bf16.mxu0 %v9753_v32  ;;  %5876 = vmatprep.subr.bf16.mxu1 %v9754_v18  ;;  %v9805_v32 = vld [vmem:[%s15435_s2 + $0x724] ss:$16 sps:$4 sm:$0xff]   ;;  %v9806_v18 = vld [vmem:[%s15435_s2 + $0x72c] ss:$16 sps:$4 sm:$0xff]  }
 0x333   :  { %5791 = vmatpush1.bf16.msra.mxu0 %v9755_v34  ;;  %5877 = vmatpush1.bf16.msra.mxu1 %v9756_v35  ;;  %v9807_v34 = vld [vmem:[%s15435_s2 + $0x720] ss:$16 sps:$4 sm:$0xff]   ;;  %v9808_v35 = vld [vmem:[%s15435_s2 + $0x728] ss:$16 sps:$4 sm:$0xff]  }
 0x334   :  { %5792 = vmatprep.subr.bf16.mxu0 %v9757_v36  ;;  %5878 = vmatprep.subr.bf16.mxu1 %v9758_v37  ;;  %v9809_v36 = vld [vmem:[%s15435_s2 + $0x744] ss:$16 sps:$4 sm:$0xff]   ;;  %v9810_v37 = vld [vmem:[%s15435_s2 + $0x74c] ss:$16 sps:$4 sm:$0xff]  }
 0x337   :  { %5793 = vmatpush1.bf16.msra.mxu0 %v9759_v38  ;;  %5879 = vmatpush1.bf16.msra.mxu1 %v9760_v39  ;;  %v9811_v38 = vld [vmem:[%s15435_s2 + $0x740] ss:$16 sps:$4 sm:$0xff]   ;;  %v9812_v39 = vld [vmem:[%s15435_s2 + $0x748] ss:$16 sps:$4 sm:$0xff]  }
 0x338   :  { %5794 = vmatprep.subr.bf16.mxu0 %v9761_v40  ;;  %5880 = vmatprep.subr.bf16.mxu1 %v9762_v41  ;;  %v9813_v40 = vld [vmem:[%s15435_s2 + $0x764] ss:$16 sps:$4 sm:$0xff]   ;;  %v9814_v41 = vld [vmem:[%s15435_s2 + $0x76c] ss:$16 sps:$4 sm:$0xff]  }
 0x33b   :  { %5795 = vmatpush1.bf16.msra.mxu0 %v9763_v42  ;;  %5881 = vmatpush1.bf16.msra.mxu1 %v9764_v43  ;;  %v9815_v42 = vld [vmem:[%s15435_s2 + $0x760] ss:$16 sps:$4 sm:$0xff]   ;;  %v9816_v43 = vld [vmem:[%s15435_s2 + $0x768] ss:$16 sps:$4 sm:$0xff]  }
 0x33c   :  { %5796 = vmatprep.subr.bf16.mxu0 %v9765_v44  ;;  %5882 = vmatprep.subr.bf16.mxu1 %v9766_v45  ;;  %v9817_v44 = vld [vmem:[%s15435_s2 + $0x784] ss:$16 sps:$4 sm:$0xff]   ;;  %v9818_v45 = vld [vmem:[%s15435_s2 + $0x78c] ss:$16 sps:$4 sm:$0xff]  }
 0x33f   :  { %5797 = vmatpush1.bf16.msra.mxu0 %v9767_v46  ;;  %5883 = vmatpush1.bf16.msra.mxu1 %v9768_v47  ;;  %v9819_v46 = vld [vmem:[%s15435_s2 + $0x780] ss:$16 sps:$4 sm:$0xff]   ;;  %v9820_v47 = vld [vmem:[%s15435_s2 + $0x788] ss:$16 sps:$4 sm:$0xff]  }
 0x340   :  { %5809 = vmatprep.subr.bf16.mxu0 %v9769_v48  ;;  %5895 = vmatprep.subr.bf16.mxu1 %v9770_v49  ;;  %v9821_v48 = vld [vmem:[%s15435_s2 + $0x7a4] ss:$16 sps:$4 sm:$0xff]   ;;  %v9822_v49 = vld [vmem:[%s15435_s2 + $0x7ac] ss:$16 sps:$4 sm:$0xff]  }
 0x342   :  { %5799 = vmatmul.mubr.bf16.vlgmr.msra.gmra.mrb[8].mxu0 %v11518_v26  ;;  %5885 = vmatmul.mubr.bf16.vlgmr.msra.gmra.mrb[8].mxu1 %v11518_v26 }
 0x343   :  { %5810 = vmatpush1.bf16.msra.mxu0 %v9771_v50  ;;  %5896 = vmatpush1.bf16.msra.mxu1 %v9772_v51  ;;  %v9823_v50 = vld [vmem:[%s15435_s2 + $0x7a0] ss:$16 sps:$4 sm:$0xff]   ;;  %v9824_v51 = vld [vmem:[%s15435_s2 + $0x7a8] ss:$16 sps:$4 sm:$0xff]  }
 0x344   :  { %5811 = vmatprep.subr.bf16.mxu0 %v9773_v52  ;;  %5897 = vmatprep.subr.bf16.mxu1 %v9774_v53  ;;  %v9825_v52 = vld [vmem:[%s15435_s2 + $0x7c4] ss:$16 sps:$4 sm:$0xff]   ;;  %v9826_v53 = vld [vmem:[%s15435_s2 + $0x7cc] ss:$16 sps:$4 sm:$0xff]  }
 0x345   :  { %5841 = vmatprep.mubr.bf16.mxu0 %v11532_v30  ;;  %5927 = vmatprep.mubr.bf16.mxu1 %v11532_v30 }
 0x347   :  { %5812 = vmatpush1.bf16.msra.mxu0 %v9775_v54  ;;  %5898 = vmatpush1.bf16.msra.mxu1 %v9776_v55  ;;  %v9827_v54 = vld [vmem:[%s15435_s2 + $0x7c0] ss:$16 sps:$4 sm:$0xff]   ;;  %v9828_v55 = vld [vmem:[%s15435_s2 + $0x7c8] ss:$16 sps:$4 sm:$0xff]  }
 0x348   :  { %5813 = vmatprep.subr.bf16.mxu0 %v9777_v56  ;;  %5899 = vmatprep.subr.bf16.mxu1 %v9778_v57  ;;  %v9829_v56 = vld [vmem:[%s15435_s2 + $0x7e4] ss:$16 sps:$4 sm:$0xff]   ;;  %v9830_v57 = vld [vmem:[%s15435_s2 + $0x7ec] ss:$16 sps:$4 sm:$0xff]  }
 0x34b   :  { %5814 = vmatpush1.bf16.msra.mxu0 %v9779_v58  ;;  %5900 = vmatpush1.bf16.msra.mxu1 %v9780_v59  ;;  %v9831_v58 = vld [vmem:[%s15435_s2 + $0x7e0] ss:$16 sps:$4 sm:$0xff]   ;;  %v9832_v59 = vld [vmem:[%s15435_s2 + $0x7e8] ss:$16 sps:$4 sm:$0xff]  }
 0x34c   :  { %5815 = vmatprep.subr.bf16.mxu0 %v9781_v60  ;;  %5901 = vmatprep.subr.bf16.mxu1 %v9782_v61  ;;  %v9833_v60 = vld [vmem:[%s15435_s2 + $0x4] ss:$16 sps:$4 sm:$0xff]   ;;  %v9834_v61 = vld [vmem:[%s15435_s2 + $0xc] ss:$16 sps:$4 sm:$0xff]  }
 0x34f   :  { %5816 = vmatpush1.bf16.msra.mxu0 %v9783_v62  ;;  %5902 = vmatpush1.bf16.msra.mxu1 %v9784_v63  ;;  %v9835_v62 = vld [vmem:[%s15435_s2] ss:$16 sps:$4 sm:$0xff]   ;;  %v9836_v63 = vld [vmem:[%s15435_s2 + $0x8] ss:$16 sps:$4 sm:$0xff]  }
 0x350   :  { %5817 = vmatprep.subr.bf16.mxu0 %v9785_v0  ;;  %5903 = vmatprep.subr.bf16.mxu1 %v9786_v1  ;;  %v9837_v0 = vld [vmem:[%s15435_s2 + $0x24] ss:$16 sps:$4 sm:$0xff]   ;;  %v9838_v1 = vld [vmem:[%s15435_s2 + $0x2c] ss:$16 sps:$4 sm:$0xff]  }
 0x353   :  { %5818 = vmatpush1.bf16.msra.mxu0 %v9787_v2  ;;  %5904 = vmatpush1.bf16.msra.mxu1 %v9788_v3  ;;  %v13331_v2 = vld [vmem:[%s15436_s1 + $0x4] ss:$16 sps:$4 sm:$0xff]   ;;  %v9840_v3 = vld [vmem:[%s15435_s2 + $0x20] ss:$16 sps:$4 sm:$0xff]  }
 0x354   :  { %5819 = vmatprep.subr.bf16.mxu0 %v9789_v4  ;;  %5905 = vmatprep.subr.bf16.mxu1 %v9790_v5  ;;  %v9841_v4 = vld [vmem:[%s15435_s2 + $0x28] ss:$16 sps:$4 sm:$0xff]   ;;  %v9842_v5 = vld [vmem:[%s15435_s2 + $0x44] ss:$16 sps:$4 sm:$0xff]  }
 0x357   :  { %5820 = vmatpush1.bf16.msra.mxu0 %v9791_v6  ;;  %5906 = vmatpush1.bf16.msra.mxu1 %v9792_v7  ;;  %v9843_v6 = vld [vmem:[%s15435_s2 + $0x4c] ss:$16 sps:$4 sm:$0xff]   ;;  %v9844_v7 = vld [vmem:[%s15435_s2 + $0x40] ss:$16 sps:$4 sm:$0xff]  }
 0x358   :  { %5821 = vmatprep.subr.bf16.mxu0 %v9793_v8  ;;  %5907 = vmatprep.subr.bf16.mxu1 %v9794_v10  ;;  %v9845_v8 = vld [vmem:[%s15435_s2 + $0x48] ss:$16 sps:$4 sm:$0xff]   ;;  %v9846_v10 = vld [vmem:[%s15435_s2 + $0x64] ss:$16 sps:$4 sm:$0xff]  }
 0x35b   :  { %5822 = vmatpush1.bf16.msra.mxu0 %v9795_v12  ;;  %5908 = vmatpush1.bf16.msra.mxu1 %v9796_v14  ;;  %v9847_v12 = vld [vmem:[%s15435_s2 + $0x6c] ss:$16 sps:$4 sm:$0xff]   ;;  %v9848_v14 = vld [vmem:[%s15435_s2 + $0x60] ss:$16 sps:$4 sm:$0xff]  }
 0x35c   :  { %5823 = vmatprep.subr.bf16.mxu0 %v9797_v15  ;;  %5909 = vmatprep.subr.bf16.mxu1 %v9798_v23  ;;  %v9849_v15 = vld [vmem:[%s15435_s2 + $0x68] ss:$16 sps:$4 sm:$0xff]   ;;  %v9850_v23 = vld [vmem:[%s15435_s2 + $0x84] ss:$16 sps:$4 sm:$0xff]  }
 0x35f   :  { %5824 = vmatpush1.bf16.msra.mxu0 %v9799_v9  ;;  %5910 = vmatpush1.bf16.msra.mxu1 %v9800_v27  ;;  %v9851_v9 = vld [vmem:[%s15435_s2 + $0x8c] ss:$16 sps:$4 sm:$0xff]   ;;  %v9852_v27 = vld [vmem:[%s15435_s2 + $0x80] ss:$16 sps:$4 sm:$0xff]  }
 0x360   :  { %5825 = vmatprep.subr.bf16.mxu0 %v9801_v28  ;;  %5911 = vmatprep.subr.bf16.mxu1 %v9802_v29  ;;  %v9853_v28 = vld [vmem:[%s15435_s2 + $0x88] ss:$16 sps:$4 sm:$0xff]   ;;  %v9854_v29 = vld [vmem:[%s15435_s2 + $0xa4] ss:$16 sps:$4 sm:$0xff]  }
 0x363   :  { %5826 = vmatpush1.bf16.msra.mxu0 %v9803_v13  ;;  %5912 = vmatpush1.bf16.msra.mxu1 %v9804_v31  ;;  %v9855_v13 = vld [vmem:[%s15435_s2 + $0xac] ss:$16 sps:$4 sm:$0xff]   ;;  %v9856_v31 = vld [vmem:[%s15435_s2 + $0xa0] ss:$16 sps:$4 sm:$0xff]  }
 0x364   :  { %5827 = vmatprep.subr.bf16.mxu0 %v9805_v32  ;;  %5913 = vmatprep.subr.bf16.mxu1 %v9806_v18  ;;  %v9857_v32 = vld [vmem:[%s15435_s2 + $0xa8] ss:$16 sps:$4 sm:$0xff]   ;;  %v9858_v18 = vld [vmem:[%s15435_s2 + $0xc4] ss:$16 sps:$4 sm:$0xff]  }
 0x367   :  { %5828 = vmatpush1.bf16.msra.mxu0 %v9807_v34  ;;  %5914 = vmatpush1.bf16.msra.mxu1 %v9808_v35  ;;  %v9859_v34 = vld [vmem:[%s15435_s2 + $0xcc] ss:$16 sps:$4 sm:$0xff]   ;;  %v9860_v35 = vld [vmem:[%s15435_s2 + $0xc0] ss:$16 sps:$4 sm:$0xff]  }
 0x368   :  { %5829 = vmatprep.subr.bf16.mxu0 %v9809_v36  ;;  %5915 = vmatprep.subr.bf16.mxu1 %v9810_v37  ;;  %v9861_v36 = vld [vmem:[%s15435_s2 + $0xc8] ss:$16 sps:$4 sm:$0xff]   ;;  %v9862_v37 = vld [vmem:[%s15435_s2 + $0xe4] ss:$16 sps:$4 sm:$0xff]  }
 0x36b   :  { %5830 = vmatpush1.bf16.msra.mxu0 %v9811_v38  ;;  %5916 = vmatpush1.bf16.msra.mxu1 %v9812_v39  ;;  %v9863_v38 = vld [vmem:[%s15435_s2 + $0xec] ss:$16 sps:$4 sm:$0xff]   ;;  %v9864_v39 = vld [vmem:[%s15435_s2 + $0xe0] ss:$16 sps:$4 sm:$0xff]  }
 0x36c   :  { %5831 = vmatprep.subr.bf16.mxu0 %v9813_v40  ;;  %5917 = vmatprep.subr.bf16.mxu1 %v9814_v41  ;;  %v9865_v40 = vld [vmem:[%s15435_s2 + $0xe8] ss:$16 sps:$4 sm:$0xff]   ;;  %v9866_v41 = vld [vmem:[%s15435_s2 + $0x104] ss:$16 sps:$4 sm:$0xff]  }
 0x36f   :  { %5832 = vmatpush1.bf16.msra.mxu0 %v9815_v42  ;;  %5918 = vmatpush1.bf16.msra.mxu1 %v9816_v43  ;;  %v9867_v42 = vld [vmem:[%s15435_s2 + $0x10c] ss:$16 sps:$4 sm:$0xff]   ;;  %v9868_v43 = vld [vmem:[%s15435_s2 + $0x100] ss:$16 sps:$4 sm:$0xff]  }
 0x370   :  { %5833 = vmatprep.subr.bf16.mxu0 %v9817_v44  ;;  %5919 = vmatprep.subr.bf16.mxu1 %v9818_v45  ;;  %v9869_v44 = vld [vmem:[%s15435_s2 + $0x108] ss:$16 sps:$4 sm:$0xff]   ;;  %v9870_v45 = vld [vmem:[%s15435_s2 + $0x124] ss:$16 sps:$4 sm:$0xff]  }
 0x373   :  { %5834 = vmatpush1.bf16.msra.mxu0 %v9819_v46  ;;  %5920 = vmatpush1.bf16.msra.mxu1 %v9820_v47  ;;  %v9871_v46 = vld [vmem:[%s15435_s2 + $0x12c] ss:$16 sps:$4 sm:$0xff]   ;;  %v9872_v47 = vld [vmem:[%s15435_s2 + $0x120] ss:$16 sps:$4 sm:$0xff]  }
 0x374   :  { %5835 = vmatprep.subr.bf16.mxu0 %v9821_v48  ;;  %5921 = vmatprep.subr.bf16.mxu1 %v9822_v49  ;;  %v9873_v48 = vld [vmem:[%s15435_s2 + $0x128] ss:$16 sps:$4 sm:$0xff]   ;;  %v9874_v49 = vld [vmem:[%s15435_s2 + $0x144] ss:$16 sps:$4 sm:$0xff]  }
 0x377   :  { %5836 = vmatpush1.bf16.msra.mxu0 %v9823_v50  ;;  %5922 = vmatpush1.bf16.msra.mxu1 %v9824_v51  ;;  %v9875_v50 = vld [vmem:[%s15435_s2 + $0x14c] ss:$16 sps:$4 sm:$0xff]   ;;  %v9876_v51 = vld [vmem:[%s15435_s2 + $0x140] ss:$16 sps:$4 sm:$0xff]  }
 0x378   :  { %5837 = vmatprep.subr.bf16.mxu0 %v9825_v52  ;;  %5923 = vmatprep.subr.bf16.mxu1 %v9826_v53  ;;  %v9877_v52 = vld [vmem:[%s15435_s2 + $0x148] ss:$16 sps:$4 sm:$0xff]   ;;  %v9878_v53 = vld [vmem:[%s15435_s2 + $0x164] ss:$16 sps:$4 sm:$0xff]  }
 0x37b   :  { %5838 = vmatpush1.bf16.msra.mxu0 %v9827_v54  ;;  %5924 = vmatpush1.bf16.msra.mxu1 %v9828_v55  ;;  %v9879_v54 = vld [vmem:[%s15435_s2 + $0x16c] ss:$16 sps:$4 sm:$0xff]   ;;  %v9880_v55 = vld [vmem:[%s15435_s2 + $0x160] ss:$16 sps:$4 sm:$0xff]  }
 0x37c   :  { %5839 = vmatprep.subr.bf16.mxu0 %v9829_v56  ;;  %5925 = vmatprep.subr.bf16.mxu1 %v9830_v57  ;;  %v9881_v56 = vld [vmem:[%s15435_s2 + $0x168] ss:$16 sps:$4 sm:$0xff]   ;;  %v9882_v57 = vld [vmem:[%s15435_s2 + $0x184] ss:$16 sps:$4 sm:$0xff]  }
 0x37f   :  { %5840 = vmatpush1.bf16.msra.mxu0 %v9831_v58  ;;  %5926 = vmatpush1.bf16.msra.mxu1 %v9832_v59  ;;  %v9883_v58 = vld [vmem:[%s15435_s2 + $0x18c] ss:$16 sps:$4 sm:$0xff]   ;;  %v9884_v59 = vld [vmem:[%s15435_s2 + $0x180] ss:$16 sps:$4 sm:$0xff]  }
 0x380   :  { %5938 = vmatprep.subr.bf16.mxu0 %v9833_v60  ;;  %6024 = vmatprep.subr.bf16.mxu1 %v9834_v61  ;;  %v9885_v60 = vld [vmem:[%s15435_s2 + $0x188] ss:$16 sps:$4 sm:$0xff]   ;;  %v9886_v61 = vld [vmem:[%s15435_s2 + $0x1a4] ss:$16 sps:$4 sm:$0xff]  }
 0x382   :  { %5842 = vmatmul.mubr.bf16.vlgmr.msra.gmra.mrb[8].mxu0 %v11720_v33  ;;  %5928 = vmatmul.mubr.bf16.vlgmr.msra.gmra.mrb[8].mxu1 %v11720_v33 }
 0x383   :  { %5939 = vmatpush1.bf16.msra.mxu0 %v9835_v62  ;;  %6025 = vmatpush1.bf16.msra.mxu1 %v9836_v63  ;;  %v9887_v62 = vld [vmem:[%s15435_s2 + $0x1ac] ss:$16 sps:$4 sm:$0xff]   ;;  %v9888_v63 = vld [vmem:[%s15435_s2 + $0x1a0] ss:$16 sps:$4 sm:$0xff]  }
 0x384   :  { %5940 = vmatprep.subr.bf16.mxu0 %v9837_v0  ;;  %6026 = vmatprep.subr.bf16.mxu1 %v9838_v1  ;;  %v9889_v0 = vld [vmem:[%s15435_s2 + $0x1a8] ss:$16 sps:$4 sm:$0xff]   ;;  %v9890_v1 = vld [vmem:[%s15435_s2 + $0x1c4] ss:$16 sps:$4 sm:$0xff]  }
 0x385   :  { %5970 = vmatprep.mubr.bf16.mxu0 %v13331_v2  ;;  %6056 = vmatprep.mubr.bf16.mxu1 %v13331_v2 }
 0x387   :  { %5941 = vmatpush1.bf16.msra.mxu0 %v9840_v3  ;;  %6027 = vmatpush1.bf16.msra.mxu1 %v9841_v4  ;;  %v9891_v3 = vld [vmem:[%s15435_s2 + $0x1cc] ss:$16 sps:$4 sm:$0xff]   ;;  %v9892_v4 = vld [vmem:[%s15435_s2 + $0x1c0] ss:$16 sps:$4 sm:$0xff]  }
 0x388   :  { %5942 = vmatprep.subr.bf16.mxu0 %v9842_v5  ;;  %6028 = vmatprep.subr.bf16.mxu1 %v9843_v6  ;;  %v9893_v5 = vld [vmem:[%s15435_s2 + $0x1c8] ss:$16 sps:$4 sm:$0xff]   ;;  %v9894_v6 = vld [vmem:[%s15435_s2 + $0x1e4] ss:$16 sps:$4 sm:$0xff]  }
 0x38b   :  { %5943 = vmatpush1.bf16.msra.mxu0 %v9844_v7  ;;  %6029 = vmatpush1.bf16.msra.mxu1 %v9845_v8  ;;  %v9895_v7 = vld [vmem:[%s15435_s2 + $0x1ec] ss:$16 sps:$4 sm:$0xff]   ;;  %v9896_v8 = vld [vmem:[%s15435_s2 + $0x1e0] ss:$16 sps:$4 sm:$0xff]  }
 0x38c   :  { %5944 = vmatprep.subr.bf16.mxu0 %v9846_v10  ;;  %6030 = vmatprep.subr.bf16.mxu1 %v9847_v12  ;;  %v9897_v10 = vld [vmem:[%s15435_s2 + $0x1e8] ss:$16 sps:$4 sm:$0xff]   ;;  %v9898_v12 = vld [vmem:[%s15435_s2 + $0x204] ss:$16 sps:$4 sm:$0xff]  }
 0x38f   :  { %5945 = vmatpush1.bf16.msra.mxu0 %v9848_v14  ;;  %6031 = vmatpush1.bf16.msra.mxu1 %v9849_v15  ;;  %v9899_v14 = vld [vmem:[%s15435_s2 + $0x20c] ss:$16 sps:$4 sm:$0xff]   ;;  %v13518_v15 = vld [vmem:[%s15436_s1] ss:$16 sps:$4 sm:$0xff]  }
 0x390   :  { %5946 = vmatprep.subr.bf16.mxu0 %v9850_v23  ;;  %6032 = vmatprep.subr.bf16.mxu1 %v9851_v9  ;;  %v9901_v23 = vld [vmem:[%s15435_s2 + $0x200] ss:$16 sps:$4 sm:$0xff]   ;;  %v9902_v9 = vld [vmem:[%s15435_s2 + $0x208] ss:$16 sps:$4 sm:$0xff]  }
 0x393   :  { %5947 = vmatpush1.bf16.msra.mxu0 %v9852_v27  ;;  %6033 = vmatpush1.bf16.msra.mxu1 %v9853_v28  ;;  %v9903_v27 = vld [vmem:[%s15435_s2 + $0x224] ss:$16 sps:$4 sm:$0xff]   ;;  %v9904_v28 = vld [vmem:[%s15435_s2 + $0x22c] ss:$16 sps:$4 sm:$0xff]  }
 0x394   :  { %5948 = vmatprep.subr.bf16.mxu0 %v9854_v29  ;;  %6034 = vmatprep.subr.bf16.mxu1 %v9855_v13  ;;  %v13537_v29 = vld [vmem:[%s15436_s1 + $0xc] ss:$16 sps:$4 sm:$0xff]   ;;  %v9906_v13 = vld [vmem:[%s15435_s2 + $0x220] ss:$16 sps:$4 sm:$0xff]  }
 0x397   :  { %5949 = vmatpush1.bf16.msra.mxu0 %v9856_v31  ;;  %6035 = vmatpush1.bf16.msra.mxu1 %v9857_v32  ;;  %v9907_v31 = vld [vmem:[%s15435_s2 + $0x228] ss:$16 sps:$4 sm:$0xff]   ;;  %v9908_v32 = vld [vmem:[%s15435_s2 + $0x244] ss:$16 sps:$4 sm:$0xff]  }
 0x398   :  { %5950 = vmatprep.subr.bf16.mxu0 %v9858_v18  ;;  %6036 = vmatprep.subr.bf16.mxu1 %v9859_v34  ;;  %v9909_v18 = vld [vmem:[%s15435_s2 + $0x24c] ss:$16 sps:$4 sm:$0xff]   ;;  %v9910_v34 = vld [vmem:[%s15435_s2 + $0x240] ss:$16 sps:$4 sm:$0xff]  }
 0x39b   :  { %5951 = vmatpush1.bf16.msra.mxu0 %v9860_v35  ;;  %6037 = vmatpush1.bf16.msra.mxu1 %v9861_v36  ;;  %v9911_v35 = vld [vmem:[%s15435_s2 + $0x248] ss:$16 sps:$4 sm:$0xff]   ;;  %v9912_v36 = vld [vmem:[%s15435_s2 + $0x264] ss:$16 sps:$4 sm:$0xff]  }
 0x39c   :  { %5952 = vmatprep.subr.bf16.mxu0 %v9862_v37  ;;  %6038 = vmatprep.subr.bf16.mxu1 %v9863_v38  ;;  %v9913_v37 = vld [vmem:[%s15435_s2 + $0x26c] ss:$16 sps:$4 sm:$0xff]   ;;  %v9914_v38 = vld [vmem:[%s15435_s2 + $0x260] ss:$16 sps:$4 sm:$0xff]  }
 0x39f   :  { %5953 = vmatpush1.bf16.msra.mxu0 %v9864_v39  ;;  %6039 = vmatpush1.bf16.msra.mxu1 %v9865_v40  ;;  %v9915_v39 = vld [vmem:[%s15435_s2 + $0x268] ss:$16 sps:$4 sm:$0xff]   ;;  %v9916_v40 = vld [vmem:[%s15435_s2 + $0x284] ss:$16 sps:$4 sm:$0xff]  }
 0x3a0   :  { %5954 = vmatprep.subr.bf16.mxu0 %v9866_v41  ;;  %6040 = vmatprep.subr.bf16.mxu1 %v9867_v42  ;;  %v9917_v41 = vld [vmem:[%s15435_s2 + $0x28c] ss:$16 sps:$4 sm:$0xff]   ;;  %v9918_v42 = vld [vmem:[%s15435_s2 + $0x280] ss:$16 sps:$4 sm:$0xff]  }
 0x3a3   :  { %5955 = vmatpush1.bf16.msra.mxu0 %v9868_v43  ;;  %6041 = vmatpush1.bf16.msra.mxu1 %v9869_v44  ;;  %v9919_v43 = vld [vmem:[%s15435_s2 + $0x288] ss:$16 sps:$4 sm:$0xff]   ;;  %v9920_v44 = vld [vmem:[%s15435_s2 + $0x2a4] ss:$16 sps:$4 sm:$0xff]  }
 0x3a4   :  { %5956 = vmatprep.subr.bf16.mxu0 %v9870_v45  ;;  %6042 = vmatprep.subr.bf16.mxu1 %v9871_v46  ;;  %v9921_v45 = vld [vmem:[%s15435_s2 + $0x2ac] ss:$16 sps:$4 sm:$0xff]  }
 0x3a7   :  { %5957 = vmatpush1.bf16.msra.mxu0 %v9872_v47  ;;  %6043 = vmatpush1.bf16.msra.mxu1 %v9873_v48 }
 0x3a8   :  { %5958 = vmatprep.subr.bf16.mxu0 %v9874_v49  ;;  %6044 = vmatprep.subr.bf16.mxu1 %v9875_v50 }
 0x3ab   :  { %5959 = vmatpush1.bf16.msra.mxu0 %v9876_v51  ;;  %6045 = vmatpush1.bf16.msra.mxu1 %v9877_v52 }
 0x3ac   :  { %5960 = vmatprep.subr.bf16.mxu0 %v9878_v53  ;;  %6046 = vmatprep.subr.bf16.mxu1 %v9879_v54 }
 0x3af   :  { %5961 = vmatpush1.bf16.msra.mxu0 %v9880_v55  ;;  %6047 = vmatpush1.bf16.msra.mxu1 %v9881_v56  ;;  %v9922_v56 = vld [vmem:[%s15435_s2 + $0x2a0] ss:$16 sps:$4 sm:$0xff]  }
 0x3b0   :  { %5962 = vmatprep.subr.bf16.mxu0 %v9882_v57  ;;  %6048 = vmatprep.subr.bf16.mxu1 %v9883_v58  ;;  %v9923_v57 = vld [vmem:[%s15435_s2 + $0x2a8] ss:$16 sps:$4 sm:$0xff]  }
 0x3b3   :  { %5963 = vmatpush1.bf16.msra.mxu0 %v9884_v59  ;;  %6049 = vmatpush1.bf16.msra.mxu1 %v9885_v60 }
 0x3b4   :  { %5964 = vmatprep.subr.bf16.mxu0 %v9886_v61  ;;  %6050 = vmatprep.subr.bf16.mxu1 %v9887_v62  ;;  %v9924_v62 = vld [vmem:[%s15435_s2 + $0x2c4] ss:$16 sps:$4 sm:$0xff]  }
 0x3b7   :  { %5965 = vmatpush1.bf16.msra.mxu0 %v9888_v63  ;;  %6051 = vmatpush1.bf16.msra.mxu1 %v9889_v0  ;;  %v9925_v63 = vld [vmem:[%s15435_s2 + $0x2cc] ss:$16 sps:$4 sm:$0xff]  }
 0x3b8   :  { %5966 = vmatprep.subr.bf16.mxu0 %v9890_v1  ;;  %6052 = vmatprep.subr.bf16.mxu1 %v9891_v3  ;;  %v9926_v3 = vld [vmem:[%s15435_s2 + $0x2c0] ss:$16 sps:$4 sm:$0xff]  }
 0x3bb   :  { %5967 = vmatpush1.bf16.msra.mxu0 %v9892_v4  ;;  %6053 = vmatpush1.bf16.msra.mxu1 %v9893_v5  ;;  %v9927_v4 = vld [vmem:[%s15435_s2 + $0x2c8] ss:$16 sps:$4 sm:$0xff]   ;;  %v9928_v5 = vld [vmem:[%s15435_s2 + $0x2e4] ss:$16 sps:$4 sm:$0xff]  }
 0x3bc   :  { %5968 = vmatprep.subr.bf16.mxu0 %v9894_v6  ;;  %6054 = vmatprep.subr.bf16.mxu1 %v9895_v7  ;;  %v9929_v6 = vld [vmem:[%s15435_s2 + $0x2ec] ss:$16 sps:$4 sm:$0xff]   ;;  %v9930_v7 = vld [vmem:[%s15435_s2 + $0x2e0] ss:$16 sps:$4 sm:$0xff]  }
 0x3bf   :  { %5969 = vmatpush1.bf16.msra.mxu0 %v9896_v8  ;;  %6055 = vmatpush1.bf16.msra.mxu1 %v9897_v10  ;;  %v9931_v8 = vld [vmem:[%s15435_s2 + $0x2e8] ss:$16 sps:$4 sm:$0xff]   ;;  %v9932_v10 = vld [vmem:[%s15435_s2 + $0x304] ss:$16 sps:$4 sm:$0xff]  }
 0x3c0   :  { %5981 = vmatprep.subr.bf16.mxu0 %v9898_v12  ;;  %6067 = vmatprep.subr.bf16.mxu1 %v9899_v14  ;;  %v9933_v12 = vld [vmem:[%s15435_s2 + $0x30c] ss:$16 sps:$4 sm:$0xff]   ;;  %v9934_v14 = vld [vmem:[%s15435_s2 + $0x300] ss:$16 sps:$4 sm:$0xff]  }
 0x3c2   :  { %5971 = vmatmul.mubr.bf16.vlgmr.msra.gmra.mrb[8].mxu0 %v13518_v15  ;;  %6057 = vmatmul.mubr.bf16.vlgmr.msra.gmra.mrb[8].mxu1 %v13518_v15 }
 0x3c3   :  { %5982 = vmatpush1.bf16.msra.mxu0 %v9901_v23  ;;  %6068 = vmatpush1.bf16.msra.mxu1 %v9902_v9  ;;  %v9935_v23 = vld [vmem:[%s15435_s2 + $0x308] ss:$16 sps:$4 sm:$0xff]   ;;  %v9936_v9 = vld [vmem:[%s15435_s2 + $0x324] ss:$16 sps:$4 sm:$0xff]  }
 0x3c4   :  { %5983 = vmatprep.subr.bf16.mxu0 %v9903_v27  ;;  %6069 = vmatprep.subr.bf16.mxu1 %v9904_v28  ;;  %v9937_v27 = vld [vmem:[%s15435_s2 + $0x32c] ss:$16 sps:$4 sm:$0xff]   ;;  %v9938_v28 = vld [vmem:[%s15435_s2 + $0x320] ss:$16 sps:$4 sm:$0xff]  }
 0x3c5   :  { %6013 = vmatprep.mubr.bf16.mxu0 %v13537_v29  ;;  %6099 = vmatprep.mubr.bf16.mxu1 %v13537_v29 }
 0x3c7   :  { %5984 = vmatpush1.bf16.msra.mxu0 %v9906_v13  ;;  %6070 = vmatpush1.bf16.msra.mxu1 %v9907_v31  ;;  %v9939_v13 = vld [vmem:[%s15435_s2 + $0x328] ss:$16 sps:$4 sm:$0xff]   ;;  %v9940_v31 = vld [vmem:[%s15435_s2 + $0x344] ss:$16 sps:$4 sm:$0xff]  }
 0x3c8   :  { %5985 = vmatprep.subr.bf16.mxu0 %v9908_v32  ;;  %6071 = vmatprep.subr.bf16.mxu1 %v9909_v18  ;;  %v9941_v32 = vld [vmem:[%s15435_s2 + $0x34c] ss:$16 sps:$4 sm:$0xff]   ;;  %v9942_v18 = vld [vmem:[%s15435_s2 + $0x340] ss:$16 sps:$4 sm:$0xff]  }
 0x3cb   :  { %5986 = vmatpush1.bf16.msra.mxu0 %v9910_v34  ;;  %6072 = vmatpush1.bf16.msra.mxu1 %v9911_v35  ;;  %v9943_v34 = vld [vmem:[%s15435_s2 + $0x348] ss:$16 sps:$4 sm:$0xff]   ;;  %v9944_v35 = vld [vmem:[%s15435_s2 + $0x364] ss:$16 sps:$4 sm:$0xff]  }
 0x3cc   :  { %5987 = vmatprep.subr.bf16.mxu0 %v9912_v36  ;;  %6073 = vmatprep.subr.bf16.mxu1 %v9913_v37  ;;  %v9945_v36 = vld [vmem:[%s15435_s2 + $0x36c] ss:$16 sps:$4 sm:$0xff]   ;;  %v9946_v37 = vld [vmem:[%s15435_s2 + $0x360] ss:$16 sps:$4 sm:$0xff]  }
 0x3cf   :  { %5988 = vmatpush1.bf16.msra.mxu0 %v9914_v38  ;;  %6074 = vmatpush1.bf16.msra.mxu1 %v9915_v39  ;;  %v9947_v38 = vld [vmem:[%s15435_s2 + $0x368] ss:$16 sps:$4 sm:$0xff]   ;;  %v9948_v39 = vld [vmem:[%s15435_s2 + $0x384] ss:$16 sps:$4 sm:$0xff]  }
 0x3d0   :  { %5989 = vmatprep.subr.bf16.mxu0 %v9916_v40  ;;  %6075 = vmatprep.subr.bf16.mxu1 %v9917_v41  ;;  %v9949_v40 = vld [vmem:[%s15435_s2 + $0x38c] ss:$16 sps:$4 sm:$0xff]   ;;  %v9950_v41 = vld [vmem:[%s15435_s2 + $0x380] ss:$16 sps:$4 sm:$0xff]  }
 0x3d3   :  { %5990 = vmatpush1.bf16.msra.mxu0 %v9918_v42  ;;  %6076 = vmatpush1.bf16.msra.mxu1 %v9919_v43  ;;  %v9951_v42 = vld [vmem:[%s15435_s2 + $0x388] ss:$16 sps:$4 sm:$0xff]   ;;  %v9952_v43 = vld [vmem:[%s15435_s2 + $0x3a4] ss:$16 sps:$4 sm:$0xff]  }
 0x3d4   :  { %5991 = vmatprep.subr.bf16.mxu0 %v9920_v44  ;;  %6077 = vmatprep.subr.bf16.mxu1 %v9921_v45  ;;  %v9953_v44 = vld [vmem:[%s15435_s2 + $0x3ac] ss:$16 sps:$4 sm:$0xff]   ;;  %v9954_v45 = vld [vmem:[%s15435_s2 + $0x3a0] ss:$16 sps:$4 sm:$0xff]  }
 0x3d5   :  { %v13589_v46 = vpop.f32.mrb[4].mxu0  ;;  %v13591_v47 = vpop.f32.mrb[4].mxu1 }
 0x3d6   :  { %v5758_v48 = vmax.f32 %v12393_v16, %v13589_v46  ;;  %v5760_v49 = vmax.f32 %v12395_v17, %v13591_v47  ;;  %v13597_v50 = vpop.f32.mrb[5].mxu0  ;;  %v13599_v51 = vpop.f32.mrb[5].mxu1  ;;  %v10307_v17 = vld [vmem:[%s15435_s2 + $0xea0] ss:$16 sps:$4 sm:$0xff]   ;;  %v10308_v47 = vld [vmem:[%s15435_s2 + $0xea8] ss:$16 sps:$4 sm:$0xff]  }
 0x3d7   :  { %v5759_v52 = vmax.f32 %v12397_v19, %v13597_v50  ;;  %v5761_v53 = vmax.f32 %v12399_v11, %v13599_v51  ;;  %v13605_v54 = vpop.f32.mrb[6].mxu0  ;;  %v13607_v55 = vpop.f32.mrb[6].mxu1  ;;  %5992 = vmatpush1.bf16.msra.mxu0 %v9922_v56  ;;  %6078 = vmatpush1.bf16.msra.mxu1 %v9923_v57  ;;  %v9955_v56 = vld [vmem:[%s15435_s2 + $0x3a8] ss:$16 sps:$4 sm:$0xff]   ;;  %v9956_v57 = vld [vmem:[%s15435_s2 + $0x3c4] ss:$16 sps:$4 sm:$0xff]  }
 0x3d8   :  { %v5762_v58 = vmax.f32 %v12401_v21, %v13605_v54  ;;  %v5764_v59 = vmax.f32 %v12403_v22, %v13607_v55  ;;  %v13619_v60 = vpop.f32.mrb[7].mxu0  ;;  %v13621_v61 = vpop.f32.mrb[7].mxu1  ;;  %5993 = vmatprep.subr.bf16.mxu0 %v9924_v62  ;;  %6079 = vmatprep.subr.bf16.mxu1 %v9925_v63  ;;  %v9957_v62 = vld [vmem:[%s15435_s2 + $0x3cc] ss:$16 sps:$4 sm:$0xff]   ;;  %v6120_v63 = vshll.u32 %v13331_v2, 16 }
 0x3d9   :  { %v5763_v0 = vmax.f32 %v12411_v24, %v13619_v60  ;;  %v5765_v1 = vmax.f32 %v12413_v25, %v13621_v61  ;;  %v10309_v50 = vld [vmem:[%s15435_s2 + $0xec4] ss:$16 sps:$4 sm:$0xff]   ;;  %v10310_v51 = vld [vmem:[%s15435_s2 + $0xecc] ss:$16 sps:$4 sm:$0xff]   ;;  %v10315_v54 = vld [vmem:[%s15435_s2 + $0xee0] ss:$16 sps:$4 sm:$0xff]  }
 0x3da   :  { %v10313_v24 = vld [vmem:[%s15435_s2 + $0xee4] ss:$16 sps:$4 sm:$0xff]   ;;  %v10314_v25 = vld [vmem:[%s15435_s2 + $0xeec] ss:$16 sps:$4 sm:$0xff]   ;;  %v10316_v55 = vld [vmem:[%s15435_s2 + $0xee8] ss:$16 sps:$4 sm:$0xff]  }
 0x3db   :  { %5994 = vmatpush1.bf16.msra.mxu0 %v9926_v3  ;;  %6080 = vmatpush1.bf16.msra.mxu1 %v9927_v4  ;;  %v9958_v3 = vld [vmem:[%s15435_s2 + $0x3c0] ss:$16 sps:$4 sm:$0xff]   ;;  %v9959_v4 = vld [vmem:[%s15435_s2 + $0x3c8] ss:$16 sps:$4 sm:$0xff]  }
 0x3dc   :  { %5995 = vmatprep.subr.bf16.mxu0 %v9928_v5  ;;  %6081 = vmatprep.subr.bf16.mxu1 %v9929_v6  ;;  %v9960_v5 = vld [vmem:[%s15435_s2 + $0x3e4] ss:$16 sps:$4 sm:$0xff]   ;;  %v9961_v6 = vld [vmem:[%s15435_s2 + $0x3ec] ss:$16 sps:$4 sm:$0xff]   ;;  %v10319_v60 = vld [vmem:[%s15435_s2 + $0xf00] ss:$16 sps:$4 sm:$0xff]  }
 0x3dd   :  { %v10320_v61 = vld [vmem:[%s15435_s2 + $0xf08] ss:$16 sps:$4 sm:$0xff]  }
 0x3df   :  { %5996 = vmatpush1.bf16.msra.mxu0 %v9930_v7  ;;  %6082 = vmatpush1.bf16.msra.mxu1 %v9931_v8  ;;  %v6118_v7 = vshrl.u32 %v13331_v2, 16  ;;  %v6122_v8 = vrot.slane %v6120_v63, 1  ;;  %v9987_v63 = vld [vmem:[%s15435_s2 + $0x8a0] ss:$16 sps:$4 sm:$0xff]  }
 0x3e0   :  { %5997 = vmatprep.subr.bf16.mxu0 %v9932_v10  ;;  %6083 = vmatprep.subr.bf16.mxu1 %v9933_v12  ;;  %v9962_v10 = vld [vmem:[%s15435_s2 + $0x3e0] ss:$16 sps:$4 sm:$0xff]   ;;  %v9963_v12 = vld [vmem:[%s15435_s2 + $0x3e8] ss:$16 sps:$4 sm:$0xff]  }
 0x3e3   :  { %5998 = vmatpush1.bf16.msra.mxu0 %v9934_v14  ;;  %6084 = vmatpush1.bf16.msra.mxu1 %v9935_v23  ;;  %v9964_v14 = vld [vmem:[%s15435_s2 + $0x804] ss:$16 sps:$4 sm:$0xff]   ;;  %v9965_v23 = vld [vmem:[%s15435_s2 + $0x80c] ss:$16 sps:$4 sm:$0xff]  }
 0x3e4   :  { %5999 = vmatprep.subr.bf16.mxu0 %v9936_v9  ;;  %6085 = vmatprep.subr.bf16.mxu1 %v9937_v27  ;;  %v13755_v9 = vor.u32 %v6122_v8, %v6118_v7  ;;  %v13760_v27 = vld [vmem:[%s15436_s1 + $0x8] ss:$16 sps:$4 sm:$0xff]   ;;  %v9993_v8 = vld [vmem:[%s15435_s2 + $0x8e4] ss:$16 sps:$4 sm:$0xff]  }
 0x3e5   :  { %v9992_v7 = vld [vmem:[%s15435_s2 + $0x8c8] ss:$16 sps:$4 sm:$0xff]  }
 0x3e7   :  { %6000 = vmatpush1.bf16.msra.mxu0 %v9938_v28  ;;  %6086 = vmatpush1.bf16.msra.mxu1 %v9939_v13  ;;  %v9967_v28 = vld [vmem:[%s15435_s2 + $0x800] ss:$16 sps:$4 sm:$0xff]   ;;  %v9968_v13 = vld [vmem:[%s15435_s2 + $0x808] ss:$16 sps:$4 sm:$0xff]  }
 0x3e8   :  { %6001 = vmatprep.subr.bf16.mxu0 %v9940_v31  ;;  %6087 = vmatprep.subr.bf16.mxu1 %v9941_v32  ;;  %v9969_v31 = vld [vmem:[%s15435_s2 + $0x824] ss:$16 sps:$4 sm:$0xff]   ;;  %v9970_v32 = vld [vmem:[%s15435_s2 + $0x82c] ss:$16 sps:$4 sm:$0xff]  }
 0x3eb   :  { %6002 = vmatpush1.bf16.msra.mxu0 %v9942_v18  ;;  %6088 = vmatpush1.bf16.msra.mxu1 %v9943_v34  ;;  %v9971_v18 = vld [vmem:[%s15435_s2 + $0x820] ss:$16 sps:$4 sm:$0xff]   ;;  %v9972_v34 = vld [vmem:[%s15435_s2 + $0x828] ss:$16 sps:$4 sm:$0xff]  }
 0x3ec   :  { %6003 = vmatprep.subr.bf16.mxu0 %v9944_v35  ;;  %6089 = vmatprep.subr.bf16.mxu1 %v9945_v36  ;;  %v9973_v35 = vld [vmem:[%s15435_s2 + $0x844] ss:$16 sps:$4 sm:$0xff]   ;;  %v9974_v36 = vld [vmem:[%s15435_s2 + $0x84c] ss:$16 sps:$4 sm:$0xff]  }
 0x3ef   :  { %6004 = vmatpush1.bf16.msra.mxu0 %v9946_v37  ;;  %6090 = vmatpush1.bf16.msra.mxu1 %v9947_v38  ;;  %v9975_v37 = vld [vmem:[%s15435_s2 + $0x840] ss:$16 sps:$4 sm:$0xff]   ;;  %v9976_v38 = vld [vmem:[%s15435_s2 + $0x848] ss:$16 sps:$4 sm:$0xff]  }
 0x3f0   :  { %6005 = vmatprep.subr.bf16.mxu0 %v9948_v39  ;;  %6091 = vmatprep.subr.bf16.mxu1 %v9949_v40  ;;  %v9977_v39 = vld [vmem:[%s15435_s2 + $0x864] ss:$16 sps:$4 sm:$0xff]   ;;  %v9978_v40 = vld [vmem:[%s15435_s2 + $0x86c] ss:$16 sps:$4 sm:$0xff]  }
 0x3f3   :  { %6006 = vmatpush1.bf16.msra.mxu0 %v9950_v41  ;;  %6092 = vmatpush1.bf16.msra.mxu1 %v9951_v42  ;;  %v9979_v41 = vld [vmem:[%s15435_s2 + $0x860] ss:$16 sps:$4 sm:$0xff]   ;;  %v9980_v42 = vld [vmem:[%s15435_s2 + $0x868] ss:$16 sps:$4 sm:$0xff]  }
 0x3f4   :  { %6007 = vmatprep.subr.bf16.mxu0 %v9952_v43  ;;  %6093 = vmatprep.subr.bf16.mxu1 %v9953_v44  ;;  %v9981_v43 = vld [vmem:[%s15435_s2 + $0x884] ss:$16 sps:$4 sm:$0xff]   ;;  %v9982_v44 = vld [vmem:[%s15435_s2 + $0x88c] ss:$16 sps:$4 sm:$0xff]  }
 0x3f7   :  { %6008 = vmatpush1.bf16.msra.mxu0 %v9954_v45  ;;  %6094 = vmatpush1.bf16.msra.mxu1 %v9955_v56  ;;  %v9983_v45 = vld [vmem:[%s15435_s2 + $0x880] ss:$16 sps:$4 sm:$0xff]   ;;  %v9984_v56 = vld [vmem:[%s15435_s2 + $0x888] ss:$16 sps:$4 sm:$0xff]  }
 0x3f8   :  { %6009 = vmatprep.subr.bf16.mxu0 %v9956_v57  ;;  %6095 = vmatprep.subr.bf16.mxu1 %v9957_v62  ;;  %v9985_v57 = vld [vmem:[%s15435_s2 + $0x8a4] ss:$16 sps:$4 sm:$0xff]   ;;  %v9986_v62 = vld [vmem:[%s15435_s2 + $0x8ac] ss:$16 sps:$4 sm:$0xff]  }
 0x3fb   :  { %6010 = vmatpush1.bf16.msra.mxu0 %v9958_v3  ;;  %6096 = vmatpush1.bf16.msra.mxu1 %v9959_v4  ;;  %v9988_v3 = vld [vmem:[%s15435_s2 + $0x8a8] ss:$16 sps:$4 sm:$0xff]   ;;  %v9989_v4 = vld [vmem:[%s15435_s2 + $0x8c4] ss:$16 sps:$4 sm:$0xff]  }
 0x3fc   :  { %6011 = vmatprep.subr.bf16.mxu0 %v9960_v5  ;;  %6097 = vmatprep.subr.bf16.mxu1 %v9961_v6  ;;  %v9990_v5 = vld [vmem:[%s15435_s2 + $0x8cc] ss:$16 sps:$4 sm:$0xff]   ;;  %v9991_v6 = vld [vmem:[%s15435_s2 + $0x8c0] ss:$16 sps:$4 sm:$0xff]  }
 0x3ff   :  { %6012 = vmatpush1.bf16.msra.mxu0 %v9962_v10  ;;  %6098 = vmatpush1.bf16.msra.mxu1 %v9963_v12  ;;  %v9994_v10 = vld [vmem:[%s15435_s2 + $0x8ec] ss:$16 sps:$4 sm:$0xff]   ;;  %v9995_v12 = vld [vmem:[%s15435_s2 + $0x8e0] ss:$16 sps:$4 sm:$0xff]  }
 0x400   :  { %6142 = vmatprep.subr.bf16.mxu0 %v9964_v14  ;;  %6228 = vmatprep.subr.bf16.mxu1 %v9965_v23  ;;  %v9996_v14 = vld [vmem:[%s15435_s2 + $0x8e8] ss:$16 sps:$4 sm:$0xff]   ;;  %v9997_v23 = vld [vmem:[%s15435_s2 + $0x904] ss:$16 sps:$4 sm:$0xff]  }
 0x402   :  { %6014 = vmatmul.mubr.bf16.vlgmr.msra.gmra.mrb[8].mxu0 %v13760_v27  ;;  %6100 = vmatmul.mubr.bf16.vlgmr.msra.gmra.mrb[8].mxu1 %v13760_v27 }
 0x403   :  { %6143 = vmatpush1.bf16.msra.mxu0 %v9967_v28  ;;  %6229 = vmatpush1.bf16.msra.mxu1 %v9968_v13  ;;  %v9998_v28 = vld [vmem:[%s15435_s2 + $0x90c] ss:$16 sps:$4 sm:$0xff]   ;;  %v9999_v13 = vld [vmem:[%s15435_s2 + $0x900] ss:$16 sps:$4 sm:$0xff]  }
 0x404   :  { %6144 = vmatprep.subr.bf16.mxu0 %v9969_v31  ;;  %6230 = vmatprep.subr.bf16.mxu1 %v9970_v32  ;;  %v10000_v31 = vld [vmem:[%s15435_s2 + $0x908] ss:$16 sps:$4 sm:$0xff]   ;;  %v10001_v32 = vld [vmem:[%s15435_s2 + $0x924] ss:$16 sps:$4 sm:$0xff]  }
 0x405   :  { %6174 = vmatprep.mubr.bf16.mxu0 %v13755_v9  ;;  %6260 = vmatprep.mubr.bf16.mxu1 %v13755_v9 }
 0x407   :  { %6145 = vmatpush1.bf16.msra.mxu0 %v9971_v18  ;;  %6231 = vmatpush1.bf16.msra.mxu1 %v9972_v34  ;;  %v10002_v18 = vld [vmem:[%s15435_s2 + $0x92c] ss:$16 sps:$4 sm:$0xff]   ;;  %v10003_v34 = vld [vmem:[%s15435_s2 + $0x920] ss:$16 sps:$4 sm:$0xff]  }
 0x408   :  { %6146 = vmatprep.subr.bf16.mxu0 %v9973_v35  ;;  %6232 = vmatprep.subr.bf16.mxu1 %v9974_v36  ;;  %v10004_v35 = vld [vmem:[%s15435_s2 + $0x928] ss:$16 sps:$4 sm:$0xff]   ;;  %v10005_v36 = vld [vmem:[%s15435_s2 + $0x944] ss:$16 sps:$4 sm:$0xff]  }
 0x40b   :  { %6147 = vmatpush1.bf16.msra.mxu0 %v9975_v37  ;;  %6233 = vmatpush1.bf16.msra.mxu1 %v9976_v38  ;;  %v10006_v37 = vld [vmem:[%s15435_s2 + $0x94c] ss:$16 sps:$4 sm:$0xff]   ;;  %v10007_v38 = vld [vmem:[%s15435_s2 + $0x940] ss:$16 sps:$4 sm:$0xff]  }
 0x40c   :  { %6148 = vmatprep.subr.bf16.mxu0 %v9977_v39  ;;  %6234 = vmatprep.subr.bf16.mxu1 %v9978_v40  ;;  %v10008_v39 = vld [vmem:[%s15435_s2 + $0x948] ss:$16 sps:$4 sm:$0xff]   ;;  %v10009_v40 = vld [vmem:[%s15435_s2 + $0x964] ss:$16 sps:$4 sm:$0xff]  }
 0x40f   :  { %6149 = vmatpush1.bf16.msra.mxu0 %v9979_v41  ;;  %6235 = vmatpush1.bf16.msra.mxu1 %v9980_v42  ;;  %v10010_v41 = vld [vmem:[%s15435_s2 + $0x96c] ss:$16 sps:$4 sm:$0xff]   ;;  %v10011_v42 = vld [vmem:[%s15435_s2 + $0x960] ss:$16 sps:$4 sm:$0xff]  }
 0x410   :  { %6150 = vmatprep.subr.bf16.mxu0 %v9981_v43  ;;  %6236 = vmatprep.subr.bf16.mxu1 %v9982_v44  ;;  %v10012_v43 = vld [vmem:[%s15435_s2 + $0x968] ss:$16 sps:$4 sm:$0xff]   ;;  %v10013_v44 = vld [vmem:[%s15435_s2 + $0x984] ss:$16 sps:$4 sm:$0xff]  }
 0x413   :  { %6151 = vmatpush1.bf16.msra.mxu0 %v9983_v45  ;;  %6237 = vmatpush1.bf16.msra.mxu1 %v9984_v56  ;;  %v10014_v45 = vld [vmem:[%s15435_s2 + $0x98c] ss:$16 sps:$4 sm:$0xff]   ;;  %v10015_v56 = vld [vmem:[%s15435_s2 + $0x980] ss:$16 sps:$4 sm:$0xff]  }
 0x414   :  { %6152 = vmatprep.subr.bf16.mxu0 %v9985_v57  ;;  %6238 = vmatprep.subr.bf16.mxu1 %v9986_v62  ;;  %v10016_v57 = vld [vmem:[%s15435_s2 + $0x988] ss:$16 sps:$4 sm:$0xff]   ;;  %v10017_v62 = vld [vmem:[%s15435_s2 + $0x9a4] ss:$16 sps:$4 sm:$0xff]  }
 0x417   :  { %6153 = vmatpush1.bf16.msra.mxu0 %v9987_v63  ;;  %6239 = vmatpush1.bf16.msra.mxu1 %v9988_v3  ;;  %v10018_v63 = vld [vmem:[%s15435_s2 + $0x9ac] ss:$16 sps:$4 sm:$0xff]   ;;  %v6113_v3 = vshll.u32 %v13518_v15, 16 }
 0x418   :  { %6154 = vmatprep.subr.bf16.mxu0 %v9989_v4  ;;  %6240 = vmatprep.subr.bf16.mxu1 %v9990_v5  ;;  %v10019_v4 = vld [vmem:[%s15435_s2 + $0x9a0] ss:$16 sps:$4 sm:$0xff]   ;;  %v10020_v5 = vld [vmem:[%s15435_s2 + $0x9a8] ss:$16 sps:$4 sm:$0xff]  }
 0x41b   :  { %6155 = vmatpush1.bf16.msra.mxu0 %v9991_v6  ;;  %6241 = vmatpush1.bf16.msra.mxu1 %v9992_v7  ;;  %v10021_v6 = vld [vmem:[%s15435_s2 + $0x9c4] ss:$16 sps:$4 sm:$0xff]   ;;  %v10022_v7 = vld [vmem:[%s15435_s2 + $0x9cc] ss:$16 sps:$4 sm:$0xff]  }
 0x41c   :  { %6156 = vmatprep.subr.bf16.mxu0 %v9993_v8  ;;  %6242 = vmatprep.subr.bf16.mxu1 %v9994_v10  ;;  %v6134_v8 = vshll.u32 %v13537_v29, 16  ;;  %v6111_v10 = vshrl.u32 %v13518_v15, 16 }
 0x41f   :  { %6157 = vmatpush1.bf16.msra.mxu0 %v9995_v12  ;;  %6243 = vmatpush1.bf16.msra.mxu1 %v9996_v14  ;;  %v6115_v12 = vrot.slane %v6113_v3, 1  ;;  %v10023_v14 = vld [vmem:[%s15435_s2 + $0x9c0] ss:$16 sps:$4 sm:$0xff]   ;;  %v10042_v3 = vld [vmem:[%s15435_s2 + $0xa6c] ss:$16 sps:$4 sm:$0xff]  }
 0x420   :  { %6158 = vmatprep.subr.bf16.mxu0 %v9997_v23  ;;  %6244 = vmatprep.subr.bf16.mxu1 %v9998_v28  ;;  %v10024_v23 = vld [vmem:[%s15435_s2 + $0x9c8] ss:$16 sps:$4 sm:$0xff]   ;;  %v10025_v28 = vld [vmem:[%s15435_s2 + $0x9e4] ss:$16 sps:$4 sm:$0xff]  }
 0x423   :  { %6159 = vmatpush1.bf16.msra.mxu0 %v9999_v13  ;;  %6245 = vmatpush1.bf16.msra.mxu1 %v10000_v31  ;;  %v10026_v13 = vld [vmem:[%s15435_s2 + $0x9ec] ss:$16 sps:$4 sm:$0xff]   ;;  %v6132_v31 = vshrl.u32 %v13537_v29, 16 }
 0x424   :  { %6160 = vmatprep.subr.bf16.mxu0 %v10001_v32  ;;  %6246 = vmatprep.subr.bf16.mxu1 %v10002_v18  ;;  %v6136_v32 = vrot.slane %v6134_v8, 1  ;;  %v13950_v18 = vor.u32 %v6115_v12, %v6111_v10  ;;  %v10047_v8 = vld [vmem:[%s15435_s2 + $0xa80] ss:$16 sps:$4 sm:$0xff]   ;;  %v10048_v10 = vld [vmem:[%s15435_s2 + $0xa88] ss:$16 sps:$4 sm:$0xff]  }
 0x425   :  { %v10049_v12 = vld [vmem:[%s15435_s2 + $0xaa4] ss:$16 sps:$4 sm:$0xff]  }
 0x427   :  { %6161 = vmatpush1.bf16.msra.mxu0 %v10003_v34  ;;  %6247 = vmatpush1.bf16.msra.mxu1 %v10004_v35  ;;  %v10027_v34 = vld [vmem:[%s15435_s2 + $0x9e0] ss:$16 sps:$4 sm:$0xff]   ;;  %v10028_v35 = vld [vmem:[%s15435_s2 + $0x9e8] ss:$16 sps:$4 sm:$0xff]  }
 0x428   :  { %6162 = vmatprep.subr.bf16.mxu0 %v10005_v36  ;;  %6248 = vmatprep.subr.bf16.mxu1 %v10006_v37  ;;  %v10029_v36 = vld [vmem:[%s15435_s2 + $0xa04] ss:$16 sps:$4 sm:$0xff]   ;;  %v10030_v37 = vld [vmem:[%s15435_s2 + $0xa0c] ss:$16 sps:$4 sm:$0xff]  }
 0x42b   :  { %6163 = vmatpush1.bf16.msra.mxu0 %v10007_v38  ;;  %6249 = vmatpush1.bf16.msra.mxu1 %v10008_v39  ;;  %v13964_v38 = vor.u32 %v6136_v32, %v6132_v31  ;;  %v10031_v39 = vld [vmem:[%s15435_s2 + $0xa00] ss:$16 sps:$4 sm:$0xff]   ;;  %v10054_v31 = vld [vmem:[%s15435_s2 + $0xacc] ss:$16 sps:$4 sm:$0xff]  }
 0x42c   :  { %6164 = vmatprep.subr.bf16.mxu0 %v10009_v40  ;;  %6250 = vmatprep.subr.bf16.mxu1 %v10010_v41  ;;  %v10032_v40 = vld [vmem:[%s15435_s2 + $0xa08] ss:$16 sps:$4 sm:$0xff]   ;;  %v10033_v41 = vld [vmem:[%s15435_s2 + $0xa24] ss:$16 sps:$4 sm:$0xff]   ;;  %v10055_v32 = vld [vmem:[%s15435_s2 + $0xac0] ss:$16 sps:$4 sm:$0xff]  }
 0x42f   :  { %6165 = vmatpush1.bf16.msra.mxu0 %v10011_v42  ;;  %6251 = vmatpush1.bf16.msra.mxu1 %v10012_v43  ;;  %v10034_v42 = vld [vmem:[%s15435_s2 + $0xa2c] ss:$16 sps:$4 sm:$0xff]   ;;  %v10035_v43 = vld [vmem:[%s15435_s2 + $0xa20] ss:$16 sps:$4 sm:$0xff]  }
 0x430   :  { %6166 = vmatprep.subr.bf16.mxu0 %v10013_v44  ;;  %6252 = vmatprep.subr.bf16.mxu1 %v10014_v45  ;;  %v10036_v44 = vld [vmem:[%s15435_s2 + $0xa28] ss:$16 sps:$4 sm:$0xff]   ;;  %v10037_v45 = vld [vmem:[%s15435_s2 + $0xa44] ss:$16 sps:$4 sm:$0xff]  }
 0x433   :  { %6167 = vmatpush1.bf16.msra.mxu0 %v10015_v56  ;;  %6253 = vmatpush1.bf16.msra.mxu1 %v10016_v57  ;;  %v10038_v56 = vld [vmem:[%s15435_s2 + $0xa4c] ss:$16 sps:$4 sm:$0xff]   ;;  %v10039_v57 = vld [vmem:[%s15435_s2 + $0xa40] ss:$16 sps:$4 sm:$0xff]  }
 0x434   :  { %6168 = vmatprep.subr.bf16.mxu0 %v10017_v62  ;;  %6254 = vmatprep.subr.bf16.mxu1 %v10018_v63  ;;  %v10040_v62 = vld [vmem:[%s15435_s2 + $0xa48] ss:$16 sps:$4 sm:$0xff]   ;;  %v10041_v63 = vld [vmem:[%s15435_s2 + $0xa64] ss:$16 sps:$4 sm:$0xff]  }
 0x437   :  { %6169 = vmatpush1.bf16.msra.mxu0 %v10019_v4  ;;  %6255 = vmatpush1.bf16.msra.mxu1 %v10020_v5  ;;  %v10043_v4 = vld [vmem:[%s15435_s2 + $0xa60] ss:$16 sps:$4 sm:$0xff]   ;;  %v10044_v5 = vld [vmem:[%s15435_s2 + $0xa68] ss:$16 sps:$4 sm:$0xff]  }
 0x438   :  { %6170 = vmatprep.subr.bf16.mxu0 %v10021_v6  ;;  %6256 = vmatprep.subr.bf16.mxu1 %v10022_v7  ;;  %v10045_v6 = vld [vmem:[%s15435_s2 + $0xa84] ss:$16 sps:$4 sm:$0xff]   ;;  %v10046_v7 = vld [vmem:[%s15435_s2 + $0xa8c] ss:$16 sps:$4 sm:$0xff]  }
 0x43b   :  { %6171 = vmatpush1.bf16.msra.mxu0 %v10023_v14  ;;  %6257 = vmatpush1.bf16.msra.mxu1 %v10024_v23  ;;  %v10050_v14 = vld [vmem:[%s15435_s2 + $0xaac] ss:$16 sps:$4 sm:$0xff]   ;;  %v10051_v23 = vld [vmem:[%s15435_s2 + $0xaa0] ss:$16 sps:$4 sm:$0xff]  }
 0x43c   :  { %6172 = vmatprep.subr.bf16.mxu0 %v10025_v28  ;;  %6258 = vmatprep.subr.bf16.mxu1 %v10026_v13  ;;  %v10052_v28 = vld [vmem:[%s15435_s2 + $0xaa8] ss:$16 sps:$4 sm:$0xff]   ;;  %v10053_v13 = vld [vmem:[%s15435_s2 + $0xac4] ss:$16 sps:$4 sm:$0xff]  }
 0x43f   :  { %6173 = vmatpush1.bf16.msra.mxu0 %v10027_v34  ;;  %6259 = vmatpush1.bf16.msra.mxu1 %v10028_v35  ;;  %v10056_v34 = vld [vmem:[%s15435_s2 + $0xac8] ss:$16 sps:$4 sm:$0xff]   ;;  %v10057_v35 = vld [vmem:[%s15435_s2 + $0xae4] ss:$16 sps:$4 sm:$0xff]  }
 0x440   :  { %6185 = vmatprep.subr.bf16.mxu0 %v10029_v36  ;;  %6271 = vmatprep.subr.bf16.mxu1 %v10030_v37  ;;  %v10058_v36 = vld [vmem:[%s15435_s2 + $0xaec] ss:$16 sps:$4 sm:$0xff]   ;;  %v10059_v37 = vld [vmem:[%s15435_s2 + $0xae0] ss:$16 sps:$4 sm:$0xff]  }
 0x442   :  { %6175 = vmatmul.mubr.bf16.vlgmr.msra.gmra.mrb[8].mxu0 %v13950_v18  ;;  %6261 = vmatmul.mubr.bf16.vlgmr.msra.gmra.mrb[8].mxu1 %v13950_v18 }
 0x443   :  { %6186 = vmatpush1.bf16.msra.mxu0 %v10031_v39  ;;  %6272 = vmatpush1.bf16.msra.mxu1 %v10032_v40  ;;  %v10060_v39 = vld [vmem:[%s15435_s2 + $0xae8] ss:$16 sps:$4 sm:$0xff]   ;;  %v10061_v40 = vld [vmem:[%s15435_s2 + $0xb04] ss:$16 sps:$4 sm:$0xff]  }
 0x444   :  { %6187 = vmatprep.subr.bf16.mxu0 %v10033_v41  ;;  %6273 = vmatprep.subr.bf16.mxu1 %v10034_v42  ;;  %v10062_v41 = vld [vmem:[%s15435_s2 + $0xb0c] ss:$16 sps:$4 sm:$0xff]   ;;  %v10063_v42 = vld [vmem:[%s15435_s2 + $0xb00] ss:$16 sps:$4 sm:$0xff]  }
 0x445   :  { %6217 = vmatprep.mubr.bf16.mxu0 %v13964_v38  ;;  %6303 = vmatprep.mubr.bf16.mxu1 %v13964_v38 }
 0x447   :  { %6188 = vmatpush1.bf16.msra.mxu0 %v10035_v43  ;;  %6274 = vmatpush1.bf16.msra.mxu1 %v10036_v44  ;;  %v10064_v43 = vld [vmem:[%s15435_s2 + $0xb08] ss:$16 sps:$4 sm:$0xff]   ;;  %v10065_v44 = vld [vmem:[%s15435_s2 + $0xb24] ss:$16 sps:$4 sm:$0xff]  }
 0x448   :  { %6189 = vmatprep.subr.bf16.mxu0 %v10037_v45  ;;  %6275 = vmatprep.subr.bf16.mxu1 %v10038_v56  ;;  %v10066_v45 = vld [vmem:[%s15435_s2 + $0xb2c] ss:$16 sps:$4 sm:$0xff]   ;;  %v10067_v56 = vld [vmem:[%s15435_s2 + $0xb20] ss:$16 sps:$4 sm:$0xff]  }
 0x44b   :  { %6190 = vmatpush1.bf16.msra.mxu0 %v10039_v57  ;;  %6276 = vmatpush1.bf16.msra.mxu1 %v10040_v62  ;;  %v10068_v57 = vld [vmem:[%s15435_s2 + $0xb28] ss:$16 sps:$4 sm:$0xff]   ;;  %v10069_v62 = vld [vmem:[%s15435_s2 + $0xb44] ss:$16 sps:$4 sm:$0xff]  }
 0x44c   :  { %6191 = vmatprep.subr.bf16.mxu0 %v10041_v63  ;;  %6277 = vmatprep.subr.bf16.mxu1 %v10042_v3  ;;  %v10070_v63 = vld [vmem:[%s15435_s2 + $0xb4c] ss:$16 sps:$4 sm:$0xff]   ;;  %v10071_v3 = vld [vmem:[%s15435_s2 + $0xb40] ss:$16 sps:$4 sm:$0xff]  }
 0x44f   :  { %6192 = vmatpush1.bf16.msra.mxu0 %v10043_v4  ;;  %6278 = vmatpush1.bf16.msra.mxu1 %v10044_v5  ;;  %v10072_v4 = vld [vmem:[%s15435_s2 + $0xb48] ss:$16 sps:$4 sm:$0xff]   ;;  %v10073_v5 = vld [vmem:[%s15435_s2 + $0xb64] ss:$16 sps:$4 sm:$0xff]  }
 0x450   :  { %6193 = vmatprep.subr.bf16.mxu0 %v10045_v6  ;;  %6279 = vmatprep.subr.bf16.mxu1 %v10046_v7  ;;  %v10074_v6 = vld [vmem:[%s15435_s2 + $0xb6c] ss:$16 sps:$4 sm:$0xff]   ;;  %v10075_v7 = vld [vmem:[%s15435_s2 + $0xb60] ss:$16 sps:$4 sm:$0xff]  }
 0x453   :  { %6194 = vmatpush1.bf16.msra.mxu0 %v10047_v8  ;;  %6280 = vmatpush1.bf16.msra.mxu1 %v10048_v10  ;;  %v10076_v8 = vld [vmem:[%s15435_s2 + $0xb68] ss:$16 sps:$4 sm:$0xff]   ;;  %v10077_v10 = vld [vmem:[%s15435_s2 + $0xb84] ss:$16 sps:$4 sm:$0xff]  }
 0x454   :  { %6195 = vmatprep.subr.bf16.mxu0 %v10049_v12  ;;  %6281 = vmatprep.subr.bf16.mxu1 %v10050_v14  ;;  %v10078_v12 = vld [vmem:[%s15435_s2 + $0xb8c] ss:$16 sps:$4 sm:$0xff]   ;;  %v10079_v14 = vld [vmem:[%s15435_s2 + $0xb80] ss:$16 sps:$4 sm:$0xff]  }
 0x457   :  { %6196 = vmatpush1.bf16.msra.mxu0 %v10051_v23  ;;  %6282 = vmatpush1.bf16.msra.mxu1 %v10052_v28  ;;  %v10080_v23 = vld [vmem:[%s15435_s2 + $0xb88] ss:$16 sps:$4 sm:$0xff]   ;;  %v10081_v28 = vld [vmem:[%s15435_s2 + $0xba4] ss:$16 sps:$4 sm:$0xff]  }
 0x458   :  { %6197 = vmatprep.subr.bf16.mxu0 %v10053_v13  ;;  %6283 = vmatprep.subr.bf16.mxu1 %v10054_v31  ;;  %v10082_v13 = vld [vmem:[%s15435_s2 + $0xbac] ss:$16 sps:$4 sm:$0xff]   ;;  %v6127_v31 = vshll.u32 %v13760_v27, 16 }
 0x45b   :  { %6198 = vmatpush1.bf16.msra.mxu0 %v10055_v32  ;;  %6284 = vmatpush1.bf16.msra.mxu1 %v10056_v34  ;;  %v10083_v32 = vld [vmem:[%s15435_s2 + $0xba0] ss:$16 sps:$4 sm:$0xff]   ;;  %v10084_v34 = vld [vmem:[%s15435_s2 + $0xba8] ss:$16 sps:$4 sm:$0xff]  }
 0x45c   :  { %6199 = vmatprep.subr.bf16.mxu0 %v10057_v35  ;;  %6285 = vmatprep.subr.bf16.mxu1 %v10058_v36  ;;  %v10085_v35 = vld [vmem:[%s15435_s2 + $0xbc4] ss:$16 sps:$4 sm:$0xff]   ;;  %v10086_v36 = vld [vmem:[%s15435_s2 + $0xbcc] ss:$16 sps:$4 sm:$0xff]  }
 0x45f   :  { %6200 = vmatpush1.bf16.msra.mxu0 %v10059_v37  ;;  %6286 = vmatpush1.bf16.msra.mxu1 %v10060_v39  ;;  %v6125_v37 = vshrl.u32 %v13760_v27, 16  ;;  %v6129_v39 = vrot.slane %v6127_v31, 1  ;;  %v10109_v31 = vld [vmem:[%s15435_s2 + $0x1084] ss:$16 sps:$4 sm:$0xff]  }
 0x460   :  { %6201 = vmatprep.subr.bf16.mxu0 %v10061_v40  ;;  %6287 = vmatprep.subr.bf16.mxu1 %v10062_v41  ;;  %v10087_v40 = vld [vmem:[%s15435_s2 + $0xbc0] ss:$16 sps:$4 sm:$0xff]   ;;  %v10088_v41 = vld [vmem:[%s15435_s2 + $0xbc8] ss:$16 sps:$4 sm:$0xff]  }
 0x463   :  { %6202 = vmatpush1.bf16.msra.mxu0 %v10063_v42  ;;  %6288 = vmatpush1.bf16.msra.mxu1 %v10064_v43  ;;  %v10089_v42 = vld [vmem:[%s15435_s2 + $0xbe4] ss:$16 sps:$4 sm:$0xff]   ;;  %v10090_v43 = vld [vmem:[%s15435_s2 + $0xbec] ss:$16 sps:$4 sm:$0xff]  }
 0x464   :  { %6203 = vmatprep.subr.bf16.mxu0 %v10065_v44  ;;  %6289 = vmatprep.subr.bf16.mxu1 %v10066_v45  ;;  %v14152_v44 = vor.u32 %v6129_v39, %v6125_v37  ;;  %v10091_v45 = vld [vmem:[%s15435_s2 + $0xbe0] ss:$16 sps:$4 sm:$0xff]   ;;  %v10114_v37 = vld [vmem:[%s15435_s2 + $0x10ac] ss:$16 sps:$4 sm:$0xff]  }
 0x465   :  { %v10115_v39 = vld [vmem:[%s15435_s2 + $0x10a0] ss:$16 sps:$4 sm:$0xff]  }
 0x467   :  { %6204 = vmatpush1.bf16.msra.mxu0 %v10067_v56  ;;  %6290 = vmatpush1.bf16.msra.mxu1 %v10068_v57  ;;  %v10092_v56 = vld [vmem:[%s15435_s2 + $0xbe8] ss:$16 sps:$4 sm:$0xff]   ;;  %v10093_v57 = vld [vmem:[%s15435_s2 + $0x1004] ss:$16 sps:$4 sm:$0xff]  }
 0x468   :  { %6205 = vmatprep.subr.bf16.mxu0 %v10069_v62  ;;  %6291 = vmatprep.subr.bf16.mxu1 %v10070_v63  ;;  %v10094_v62 = vld [vmem:[%s15435_s2 + $0x100c] ss:$16 sps:$4 sm:$0xff]   ;;  %v10095_v63 = vld [vmem:[%s15435_s2 + $0x1000] ss:$16 sps:$4 sm:$0xff]  }
 0x46b   :  { %6206 = vmatpush1.bf16.msra.mxu0 %v10071_v3  ;;  %6292 = vmatpush1.bf16.msra.mxu1 %v10072_v4  ;;  %v10096_v3 = vld [vmem:[%s15435_s2 + $0x1008] ss:$16 sps:$4 sm:$0xff]   ;;  %v10097_v4 = vld [vmem:[%s15435_s2 + $0x1024] ss:$16 sps:$4 sm:$0xff]  }
 0x46c   :  { %6207 = vmatprep.subr.bf16.mxu0 %v10073_v5  ;;  %6293 = vmatprep.subr.bf16.mxu1 %v10074_v6  ;;  %v10098_v5 = vld [vmem:[%s15435_s2 + $0x102c] ss:$16 sps:$4 sm:$0xff]   ;;  %v10099_v6 = vld [vmem:[%s15435_s2 + $0x1020] ss:$16 sps:$4 sm:$0xff]  }
 0x46f   :  { %6208 = vmatpush1.bf16.msra.mxu0 %v10075_v7  ;;  %6294 = vmatpush1.bf16.msra.mxu1 %v10076_v8  ;;  %v10100_v7 = vld [vmem:[%s15435_s2 + $0x1028] ss:$16 sps:$4 sm:$0xff]   ;;  %v10101_v8 = vld [vmem:[%s15435_s2 + $0x1044] ss:$16 sps:$4 sm:$0xff]  }
 0x470   :  { %6209 = vmatprep.subr.bf16.mxu0 %v10077_v10  ;;  %6295 = vmatprep.subr.bf16.mxu1 %v10078_v12  ;;  %v10102_v10 = vld [vmem:[%s15435_s2 + $0x104c] ss:$16 sps:$4 sm:$0xff]   ;;  %v10104_v12 = vld [vmem:[%s15435_s2 + $0x1048] ss:$16 sps:$4 sm:$0xff]  }
 0x473   :  { %6210 = vmatpush1.bf16.msra.mxu0 %v10079_v14  ;;  %6296 = vmatpush1.bf16.msra.mxu1 %v10080_v23  ;;  %v10105_v14 = vld [vmem:[%s15435_s2 + $0x1064] ss:$16 sps:$4 sm:$0xff]   ;;  %v10106_v23 = vld [vmem:[%s15435_s2 + $0x106c] ss:$16 sps:$4 sm:$0xff]  }
 0x474   :  { %6211 = vmatprep.subr.bf16.mxu0 %v10081_v28  ;;  %6297 = vmatprep.subr.bf16.mxu1 %v10082_v13  ;;  %v10107_v28 = vld [vmem:[%s15435_s2 + $0x1060] ss:$16 sps:$4 sm:$0xff]   ;;  %v10108_v13 = vld [vmem:[%s15435_s2 + $0x1068] ss:$16 sps:$4 sm:$0xff]  }
 0x477   :  { %6212 = vmatpush1.bf16.msra.mxu0 %v10083_v32  ;;  %6298 = vmatpush1.bf16.msra.mxu1 %v10084_v34  ;;  %v10110_v32 = vld [vmem:[%s15435_s2 + $0x108c] ss:$16 sps:$4 sm:$0xff]   ;;  %v10111_v34 = vld [vmem:[%s15435_s2 + $0x1080] ss:$16 sps:$4 sm:$0xff]  }
 0x478   :  { %6213 = vmatprep.subr.bf16.mxu0 %v10085_v35  ;;  %6299 = vmatprep.subr.bf16.mxu1 %v10086_v36  ;;  %v10112_v35 = vld [vmem:[%s15435_s2 + $0x1088] ss:$16 sps:$4 sm:$0xff]   ;;  %v10113_v36 = vld [vmem:[%s15435_s2 + $0x10a4] ss:$16 sps:$4 sm:$0xff]  }
 0x47b   :  { %6214 = vmatpush1.bf16.msra.mxu0 %v10087_v40  ;;  %6300 = vmatpush1.bf16.msra.mxu1 %v10088_v41  ;;  %v10116_v40 = vld [vmem:[%s15435_s2 + $0x10a8] ss:$16 sps:$4 sm:$0xff]   ;;  %v10117_v41 = vld [vmem:[%s15435_s2 + $0x10c4] ss:$16 sps:$4 sm:$0xff]  }
 0x47c   :  { %6215 = vmatprep.subr.bf16.mxu0 %v10089_v42  ;;  %6301 = vmatprep.subr.bf16.mxu1 %v10090_v43  ;;  %v10118_v42 = vld [vmem:[%s15435_s2 + $0x10cc] ss:$16 sps:$4 sm:$0xff]   ;;  %v10119_v43 = vld [vmem:[%s15435_s2 + $0x10c0] ss:$16 sps:$4 sm:$0xff]  }
 0x47f   :  { %6216 = vmatpush1.bf16.msra.mxu0 %v10091_v45  ;;  %6302 = vmatpush1.bf16.msra.mxu1 %v10092_v56  ;;  %v10120_v45 = vld [vmem:[%s15435_s2 + $0x10c8] ss:$16 sps:$4 sm:$0xff]   ;;  %v10121_v56 = vld [vmem:[%s15435_s2 + $0x10e4] ss:$16 sps:$4 sm:$0xff]  }
 0x480   :  { %6330 = vmatprep.subr.bf16.mxu0 %v10093_v57  ;;  %6416 = vmatprep.subr.bf16.mxu1 %v10094_v62  ;;  %v10122_v57 = vld [vmem:[%s15435_s2 + $0x10ec] ss:$16 sps:$4 sm:$0xff]   ;;  %v10123_v62 = vld [vmem:[%s15435_s2 + $0x10e0] ss:$16 sps:$4 sm:$0xff]  }
 0x482   :  { %6218 = vmatmul.mubr.bf16.vlgmr.msra.gmra.mrb[8].mxu0 %v14152_v44  ;;  %6304 = vmatmul.mubr.bf16.vlgmr.msra.gmra.mrb[8].mxu1 %v14152_v44 }
 0x483   :  { %6331 = vmatpush1.bf16.msra.mxu0 %v10095_v63  ;;  %6417 = vmatpush1.bf16.msra.mxu1 %v10096_v3  ;;  %v10124_v63 = vld [vmem:[%s15435_s2 + $0x10e8] ss:$16 sps:$4 sm:$0xff]   ;;  %v10125_v3 = vld [vmem:[%s15435_s2 + $0x1104] ss:$16 sps:$4 sm:$0xff]  }
 0x484   :  { %6332 = vmatprep.subr.bf16.mxu0 %v10097_v4  ;;  %6418 = vmatprep.subr.bf16.mxu1 %v10098_v5  ;;  %v10126_v4 = vld [vmem:[%s15435_s2 + $0x110c] ss:$16 sps:$4 sm:$0xff]   ;;  %v10127_v5 = vld [vmem:[%s15435_s2 + $0x1100] ss:$16 sps:$4 sm:$0xff]  }
 0x485   :  { %6362 = vmatprep.mubr.bf16.mxu0 %v11328_v20  ;;  %6448 = vmatprep.mubr.bf16.mxu1 %v11328_v20  ;;  %v10103_v20 = vld [vmem:[%s15435_s2 + $0x1040] ss:$16 sps:$4 sm:$0xff]  }
 0x487   :  { %6333 = vmatpush1.bf16.msra.mxu0 %v10099_v6  ;;  %6419 = vmatpush1.bf16.msra.mxu1 %v10100_v7  ;;  %v10128_v6 = vld [vmem:[%s15435_s2 + $0x1108] ss:$16 sps:$4 sm:$0xff]   ;;  %v10129_v7 = vld [vmem:[%s15435_s2 + $0x1124] ss:$16 sps:$4 sm:$0xff]  }
 0x488   :  { %6334 = vmatprep.subr.bf16.mxu0 %v10101_v8  ;;  %6420 = vmatprep.subr.bf16.mxu1 %v10102_v10  ;;  %v10130_v8 = vld [vmem:[%s15435_s2 + $0x112c] ss:$16 sps:$4 sm:$0xff]   ;;  %v10131_v10 = vld [vmem:[%s15435_s2 + $0x1120] ss:$16 sps:$4 sm:$0xff]  }
 0x48b   :  { %6335 = vmatpush1.bf16.msra.mxu0 %v10103_v20  ;;  %6421 = vmatpush1.bf16.msra.mxu1 %v10104_v12  ;;  %v10132_v20 = vld [vmem:[%s15435_s2 + $0x1128] ss:$16 sps:$4 sm:$0xff]   ;;  %v10133_v12 = vld [vmem:[%s15435_s2 + $0x1144] ss:$16 sps:$4 sm:$0xff]  }
 0x48c   :  { %6336 = vmatprep.subr.bf16.mxu0 %v10105_v14  ;;  %6422 = vmatprep.subr.bf16.mxu1 %v10106_v23  ;;  %v10134_v14 = vld [vmem:[%s15435_s2 + $0x114c] ss:$16 sps:$4 sm:$0xff]   ;;  %v10135_v23 = vld [vmem:[%s15435_s2 + $0x1140] ss:$16 sps:$4 sm:$0xff]  }
 0x48f   :  { %6337 = vmatpush1.bf16.msra.mxu0 %v10107_v28  ;;  %6423 = vmatpush1.bf16.msra.mxu1 %v10108_v13  ;;  %v10136_v28 = vld [vmem:[%s15435_s2 + $0x1148] ss:$16 sps:$4 sm:$0xff]   ;;  %v10137_v13 = vld [vmem:[%s15435_s2 + $0x1164] ss:$16 sps:$4 sm:$0xff]  }
 0x490   :  { %6338 = vmatprep.subr.bf16.mxu0 %v10109_v31  ;;  %6424 = vmatprep.subr.bf16.mxu1 %v10110_v32  ;;  %v10138_v31 = vld [vmem:[%s15435_s2 + $0x116c] ss:$16 sps:$4 sm:$0xff]   ;;  %v10139_v32 = vld [vmem:[%s15435_s2 + $0x1160] ss:$16 sps:$4 sm:$0xff]  }
 0x493   :  { %6339 = vmatpush1.bf16.msra.mxu0 %v10111_v34  ;;  %6425 = vmatpush1.bf16.msra.mxu1 %v10112_v35  ;;  %v10140_v34 = vld [vmem:[%s15435_s2 + $0x1168] ss:$16 sps:$4 sm:$0xff]   ;;  %v10141_v35 = vld [vmem:[%s15435_s2 + $0x1184] ss:$16 sps:$4 sm:$0xff]  }
 0x494   :  { %6340 = vmatprep.subr.bf16.mxu0 %v10113_v36  ;;  %6426 = vmatprep.subr.bf16.mxu1 %v10114_v37  ;;  %v10142_v36 = vld [vmem:[%s15435_s2 + $0x118c] ss:$16 sps:$4 sm:$0xff]   ;;  %v10143_v37 = vld [vmem:[%s15435_s2 + $0x1180] ss:$16 sps:$4 sm:$0xff]  }
 0x497   :  { %6341 = vmatpush1.bf16.msra.mxu0 %v10115_v39  ;;  %6427 = vmatpush1.bf16.msra.mxu1 %v10116_v40  ;;  %v10144_v39 = vld [vmem:[%s15435_s2 + $0x1188] ss:$16 sps:$4 sm:$0xff]   ;;  %v10145_v40 = vld [vmem:[%s15435_s2 + $0x11a4] ss:$16 sps:$4 sm:$0xff]  }
 0x498   :  { %6342 = vmatprep.subr.bf16.mxu0 %v10117_v41  ;;  %6428 = vmatprep.subr.bf16.mxu1 %v10118_v42  ;;  %v10146_v41 = vld [vmem:[%s15435_s2 + $0x11ac] ss:$16 sps:$4 sm:$0xff]   ;;  %v10147_v42 = vld [vmem:[%s15435_s2 + $0x11a0] ss:$16 sps:$4 sm:$0xff]  }
 0x49b   :  { %6343 = vmatpush1.bf16.msra.mxu0 %v10119_v43  ;;  %6429 = vmatpush1.bf16.msra.mxu1 %v10120_v45  ;;  %v10148_v43 = vld [vmem:[%s15435_s2 + $0x11a8] ss:$16 sps:$4 sm:$0xff]   ;;  %v10149_v45 = vld [vmem:[%s15435_s2 + $0x11c4] ss:$16 sps:$4 sm:$0xff]  }
 0x49c   :  { %6344 = vmatprep.subr.bf16.mxu0 %v10121_v56  ;;  %6430 = vmatprep.subr.bf16.mxu1 %v10122_v57  ;;  %v10150_v56 = vld [vmem:[%s15435_s2 + $0x11cc] ss:$16 sps:$4 sm:$0xff]   ;;  %v10151_v57 = vld [vmem:[%s15435_s2 + $0x11c0] ss:$16 sps:$4 sm:$0xff]  }
 0x49f   :  { %6345 = vmatpush1.bf16.msra.mxu0 %v10123_v62  ;;  %6431 = vmatpush1.bf16.msra.mxu1 %v10124_v63  ;;  %v10152_v62 = vld [vmem:[%s15435_s2 + $0x11c8] ss:$16 sps:$4 sm:$0xff]   ;;  %v10153_v63 = vld [vmem:[%s15435_s2 + $0x11e4] ss:$16 sps:$4 sm:$0xff]  }
 0x4a0   :  { %6346 = vmatprep.subr.bf16.mxu0 %v10125_v3  ;;  %6432 = vmatprep.subr.bf16.mxu1 %v10126_v4  ;;  %v10154_v3 = vld [vmem:[%s15435_s2 + $0x11ec] ss:$16 sps:$4 sm:$0xff]   ;;  %v10155_v4 = vld [vmem:[%s15435_s2 + $0x11e0] ss:$16 sps:$4 sm:$0xff]  }
 0x4a3   :  { %6347 = vmatpush1.bf16.msra.mxu0 %v10127_v5  ;;  %6433 = vmatpush1.bf16.msra.mxu1 %v10128_v6  ;;  %v10156_v5 = vld [vmem:[%s15435_s2 + $0x11e8] ss:$16 sps:$4 sm:$0xff]   ;;  %v10157_v6 = vld [vmem:[%s15435_s2 + $0x1204] ss:$16 sps:$4 sm:$0xff]  }
 0x4a4   :  { %6348 = vmatprep.subr.bf16.mxu0 %v10129_v7  ;;  %6434 = vmatprep.subr.bf16.mxu1 %v10130_v8  ;;  %v10158_v7 = vld [vmem:[%s15435_s2 + $0x120c] ss:$16 sps:$4 sm:$0xff]   ;;  %v10159_v8 = vld [vmem:[%s15435_s2 + $0x1200] ss:$16 sps:$4 sm:$0xff]  }
 0x4a7   :  { %6349 = vmatpush1.bf16.msra.mxu0 %v10131_v10  ;;  %6435 = vmatpush1.bf16.msra.mxu1 %v10132_v20  ;;  %v10160_v10 = vld [vmem:[%s15435_s2 + $0x1208] ss:$16 sps:$4 sm:$0xff]   ;;  %v10161_v20 = vld [vmem:[%s15435_s2 + $0x1224] ss:$16 sps:$4 sm:$0xff]  }
 0x4a8   :  { %6350 = vmatprep.subr.bf16.mxu0 %v10133_v12  ;;  %6436 = vmatprep.subr.bf16.mxu1 %v10134_v14  ;;  %v10162_v12 = vld [vmem:[%s15435_s2 + $0x122c] ss:$16 sps:$4 sm:$0xff]   ;;  %v10164_v14 = vld [vmem:[%s15435_s2 + $0x1228] ss:$16 sps:$4 sm:$0xff]  }
 0x4ab   :  { %6351 = vmatpush1.bf16.msra.mxu0 %v10135_v23  ;;  %6437 = vmatpush1.bf16.msra.mxu1 %v10136_v28  ;;  %v10165_v23 = vld [vmem:[%s15435_s2 + $0x1244] ss:$16 sps:$4 sm:$0xff]   ;;  %v10166_v28 = vld [vmem:[%s15435_s2 + $0x124c] ss:$16 sps:$4 sm:$0xff]  }
 0x4ac   :  { %6352 = vmatprep.subr.bf16.mxu0 %v10137_v13  ;;  %6438 = vmatprep.subr.bf16.mxu1 %v10138_v31  ;;  %v10168_v13 = vld [vmem:[%s15435_s2 + $0x1248] ss:$16 sps:$4 sm:$0xff]   ;;  %v10169_v31 = vld [vmem:[%s15435_s2 + $0x1264] ss:$16 sps:$4 sm:$0xff]  }
 0x4af   :  { %6353 = vmatpush1.bf16.msra.mxu0 %v10139_v32  ;;  %6439 = vmatpush1.bf16.msra.mxu1 %v10140_v34  ;;  %v10170_v32 = vld [vmem:[%s15435_s2 + $0x126c] ss:$16 sps:$4 sm:$0xff]   ;;  %v10171_v34 = vld [vmem:[%s15435_s2 + $0x1260] ss:$16 sps:$4 sm:$0xff]  }
 0x4b0   :  { %6354 = vmatprep.subr.bf16.mxu0 %v10141_v35  ;;  %6440 = vmatprep.subr.bf16.mxu1 %v10142_v36  ;;  %v10172_v35 = vld [vmem:[%s15435_s2 + $0x1268] ss:$16 sps:$4 sm:$0xff]   ;;  %v10173_v36 = vld [vmem:[%s15435_s2 + $0x1284] ss:$16 sps:$4 sm:$0xff]  }
 0x4b3   :  { %6355 = vmatpush1.bf16.msra.mxu0 %v10143_v37  ;;  %6441 = vmatpush1.bf16.msra.mxu1 %v10144_v39  ;;  %v10174_v37 = vld [vmem:[%s15435_s2 + $0x128c] ss:$16 sps:$4 sm:$0xff]   ;;  %v10175_v39 = vld [vmem:[%s15435_s2 + $0x1280] ss:$16 sps:$4 sm:$0xff]  }
 0x4b4   :  { %6356 = vmatprep.subr.bf16.mxu0 %v10145_v40  ;;  %6442 = vmatprep.subr.bf16.mxu1 %v10146_v41  ;;  %v10176_v40 = vld [vmem:[%s15435_s2 + $0x1288] ss:$16 sps:$4 sm:$0xff]   ;;  %v10177_v41 = vld [vmem:[%s15435_s2 + $0x12a4] ss:$16 sps:$4 sm:$0xff]  }
 0x4b7   :  { %6357 = vmatpush1.bf16.msra.mxu0 %v10147_v42  ;;  %6443 = vmatpush1.bf16.msra.mxu1 %v10148_v43  ;;  %v10178_v42 = vld [vmem:[%s15435_s2 + $0x12ac] ss:$16 sps:$4 sm:$0xff]   ;;  %v10179_v43 = vld [vmem:[%s15435_s2 + $0x12a0] ss:$16 sps:$4 sm:$0xff]  }
 0x4b8   :  { %6358 = vmatprep.subr.bf16.mxu0 %v10149_v45  ;;  %6444 = vmatprep.subr.bf16.mxu1 %v10150_v56  ;;  %v10180_v45 = vld [vmem:[%s15435_s2 + $0x12a8] ss:$16 sps:$4 sm:$0xff]   ;;  %v10181_v56 = vld [vmem:[%s15435_s2 + $0x12c4] ss:$16 sps:$4 sm:$0xff]  }
 0x4bb   :  { %6359 = vmatpush1.bf16.msra.mxu0 %v10151_v57  ;;  %6445 = vmatpush1.bf16.msra.mxu1 %v10152_v62  ;;  %v10182_v57 = vld [vmem:[%s15435_s2 + $0x12cc] ss:$16 sps:$4 sm:$0xff]   ;;  %v10183_v62 = vld [vmem:[%s15435_s2 + $0x12c0] ss:$16 sps:$4 sm:$0xff]  }
 0x4bc   :  { %6360 = vmatprep.subr.bf16.mxu0 %v10153_v63  ;;  %6446 = vmatprep.subr.bf16.mxu1 %v10154_v3  ;;  %v10184_v63 = vld [vmem:[%s15435_s2 + $0x12c8] ss:$16 sps:$4 sm:$0xff]   ;;  %v10185_v3 = vld [vmem:[%s15435_s2 + $0x12e4] ss:$16 sps:$4 sm:$0xff]  }
 0x4bf   :  { %6361 = vmatpush1.bf16.msra.mxu0 %v10155_v4  ;;  %6447 = vmatpush1.bf16.msra.mxu1 %v10156_v5  ;;  %v10186_v4 = vld [vmem:[%s15435_s2 + $0x12ec] ss:$16 sps:$4 sm:$0xff]   ;;  %v10187_v5 = vld [vmem:[%s15435_s2 + $0x12e0] ss:$16 sps:$4 sm:$0xff]  }
 0x4c0   :  { %6373 = vmatprep.subr.bf16.mxu0 %v10157_v6  ;;  %6459 = vmatprep.subr.bf16.mxu1 %v10158_v7  ;;  %v10188_v6 = vld [vmem:[%s15435_s2 + $0x12e8] ss:$16 sps:$4 sm:$0xff]   ;;  %v10189_v7 = vld [vmem:[%s15435_s2 + $0x1304] ss:$16 sps:$4 sm:$0xff]  }
 0x4c2   :  { %6363 = vmatmul.mubr.bf16.vlgmr.msra.gmra.mrb[12].mxu0 %v11518_v26  ;;  %6449 = vmatmul.mubr.bf16.vlgmr.msra.gmra.mrb[12].mxu1 %v11518_v26  ;;  %v10163_v26 = vld [vmem:[%s15435_s2 + $0x1220] ss:$16 sps:$4 sm:$0xff]  }
 0x4c3   :  { %6374 = vmatpush1.bf16.msra.mxu0 %v10159_v8  ;;  %6460 = vmatpush1.bf16.msra.mxu1 %v10160_v10  ;;  %v10190_v8 = vld [vmem:[%s15435_s2 + $0x130c] ss:$16 sps:$4 sm:$0xff]   ;;  %v10191_v10 = vld [vmem:[%s15435_s2 + $0x1300] ss:$16 sps:$4 sm:$0xff]  }
 0x4c4   :  { %6375 = vmatprep.subr.bf16.mxu0 %v10161_v20  ;;  %6461 = vmatprep.subr.bf16.mxu1 %v10162_v12  ;;  %v10192_v20 = vld [vmem:[%s15435_s2 + $0x1308] ss:$16 sps:$4 sm:$0xff]   ;;  %v10193_v12 = vld [vmem:[%s15435_s2 + $0x1324] ss:$16 sps:$4 sm:$0xff]  }
 0x4c5   :  { %6405 = vmatprep.mubr.bf16.mxu0 %v11532_v30  ;;  %6491 = vmatprep.mubr.bf16.mxu1 %v11532_v30  ;;  %v10167_v30 = vld [vmem:[%s15435_s2 + $0x1240] ss:$16 sps:$4 sm:$0xff]  }
 0x4c7   :  { %6376 = vmatpush1.bf16.msra.mxu0 %v10163_v26  ;;  %6462 = vmatpush1.bf16.msra.mxu1 %v10164_v14  ;;  %v10194_v26 = vld [vmem:[%s15435_s2 + $0x132c] ss:$16 sps:$4 sm:$0xff]   ;;  %v10195_v14 = vld [vmem:[%s15435_s2 + $0x1320] ss:$16 sps:$4 sm:$0xff]  }
 0x4c8   :  { %6377 = vmatprep.subr.bf16.mxu0 %v10165_v23  ;;  %6463 = vmatprep.subr.bf16.mxu1 %v10166_v28  ;;  %v10196_v23 = vld [vmem:[%s15435_s2 + $0x1328] ss:$16 sps:$4 sm:$0xff]   ;;  %v10197_v28 = vld [vmem:[%s15435_s2 + $0x1344] ss:$16 sps:$4 sm:$0xff]  }
 0x4cb   :  { %6378 = vmatpush1.bf16.msra.mxu0 %v10167_v30  ;;  %6464 = vmatpush1.bf16.msra.mxu1 %v10168_v13  ;;  %v10198_v30 = vld [vmem:[%s15435_s2 + $0x134c] ss:$16 sps:$4 sm:$0xff]   ;;  %v10199_v13 = vld [vmem:[%s15435_s2 + $0x1340] ss:$16 sps:$4 sm:$0xff]  }
 0x4cc   :  { %6379 = vmatprep.subr.bf16.mxu0 %v10169_v31  ;;  %6465 = vmatprep.subr.bf16.mxu1 %v10170_v32  ;;  %v10200_v31 = vld [vmem:[%s15435_s2 + $0x1348] ss:$16 sps:$4 sm:$0xff]   ;;  %v10201_v32 = vld [vmem:[%s15435_s2 + $0x1364] ss:$16 sps:$4 sm:$0xff]  }
 0x4cf   :  { %6380 = vmatpush1.bf16.msra.mxu0 %v10171_v34  ;;  %6466 = vmatpush1.bf16.msra.mxu1 %v10172_v35  ;;  %v10202_v34 = vld [vmem:[%s15435_s2 + $0x136c] ss:$16 sps:$4 sm:$0xff]   ;;  %v10203_v35 = vld [vmem:[%s15435_s2 + $0x1360] ss:$16 sps:$4 sm:$0xff]  }
 0x4d0   :  { %6381 = vmatprep.subr.bf16.mxu0 %v10173_v36  ;;  %6467 = vmatprep.subr.bf16.mxu1 %v10174_v37  ;;  %v10204_v36 = vld [vmem:[%s15435_s2 + $0x1368] ss:$16 sps:$4 sm:$0xff]   ;;  %v10205_v37 = vld [vmem:[%s15435_s2 + $0x1384] ss:$16 sps:$4 sm:$0xff]  }
 0x4d3   :  { %6382 = vmatpush1.bf16.msra.mxu0 %v10175_v39  ;;  %6468 = vmatpush1.bf16.msra.mxu1 %v10176_v40  ;;  %v10206_v39 = vld [vmem:[%s15435_s2 + $0x138c] ss:$16 sps:$4 sm:$0xff]   ;;  %v10207_v40 = vld [vmem:[%s15435_s2 + $0x1380] ss:$16 sps:$4 sm:$0xff]  }
 0x4d4   :  { %6383 = vmatprep.subr.bf16.mxu0 %v10177_v41  ;;  %6469 = vmatprep.subr.bf16.mxu1 %v10178_v42  ;;  %v10208_v41 = vld [vmem:[%s15435_s2 + $0x1388] ss:$16 sps:$4 sm:$0xff]   ;;  %v10209_v42 = vld [vmem:[%s15435_s2 + $0x13a4] ss:$16 sps:$4 sm:$0xff]  }
 0x4d7   :  { %6384 = vmatpush1.bf16.msra.mxu0 %v10179_v43  ;;  %6470 = vmatpush1.bf16.msra.mxu1 %v10180_v45  ;;  %v10210_v43 = vld [vmem:[%s15435_s2 + $0x13ac] ss:$16 sps:$4 sm:$0xff]   ;;  %v10211_v45 = vld [vmem:[%s15435_s2 + $0x13a0] ss:$16 sps:$4 sm:$0xff]  }
 0x4d8   :  { %6385 = vmatprep.subr.bf16.mxu0 %v10181_v56  ;;  %6471 = vmatprep.subr.bf16.mxu1 %v10182_v57  ;;  %v10212_v56 = vld [vmem:[%s15435_s2 + $0x13a8] ss:$16 sps:$4 sm:$0xff]   ;;  %v10213_v57 = vld [vmem:[%s15435_s2 + $0x13c4] ss:$16 sps:$4 sm:$0xff]  }
 0x4db   :  { %6386 = vmatpush1.bf16.msra.mxu0 %v10183_v62  ;;  %6472 = vmatpush1.bf16.msra.mxu1 %v10184_v63  ;;  %v10214_v62 = vld [vmem:[%s15435_s2 + $0x13cc] ss:$16 sps:$4 sm:$0xff]   ;;  %v10215_v63 = vld [vmem:[%s15435_s2 + $0x13c0] ss:$16 sps:$4 sm:$0xff]  }
 0x4dc   :  { %6387 = vmatprep.subr.bf16.mxu0 %v10185_v3  ;;  %6473 = vmatprep.subr.bf16.mxu1 %v10186_v4  ;;  %v10216_v3 = vld [vmem:[%s15435_s2 + $0x13c8] ss:$16 sps:$4 sm:$0xff]   ;;  %v10217_v4 = vld [vmem:[%s15435_s2 + $0x13e4] ss:$16 sps:$4 sm:$0xff]  }
 0x4df   :  { %6388 = vmatpush1.bf16.msra.mxu0 %v10187_v5  ;;  %6474 = vmatpush1.bf16.msra.mxu1 %v10188_v6  ;;  %v10218_v5 = vld [vmem:[%s15435_s2 + $0x13ec] ss:$16 sps:$4 sm:$0xff]   ;;  %v10219_v6 = vld [vmem:[%s15435_s2 + $0x13e0] ss:$16 sps:$4 sm:$0xff]  }
 0x4e0   :  { %6389 = vmatprep.subr.bf16.mxu0 %v10189_v7  ;;  %6475 = vmatprep.subr.bf16.mxu1 %v10190_v8  ;;  %v10220_v7 = vld [vmem:[%s15435_s2 + $0x13e8] ss:$16 sps:$4 sm:$0xff]   ;;  %v10221_v8 = vld [vmem:[%s15435_s2 + $0xc04] ss:$16 sps:$4 sm:$0xff]  }
 0x4e3   :  { %6390 = vmatpush1.bf16.msra.mxu0 %v10191_v10  ;;  %6476 = vmatpush1.bf16.msra.mxu1 %v10192_v20  ;;  %v10222_v10 = vld [vmem:[%s15435_s2 + $0xc0c] ss:$16 sps:$4 sm:$0xff]   ;;  %v10223_v20 = vld [vmem:[%s15435_s2 + $0xc00] ss:$16 sps:$4 sm:$0xff]  }
 0x4e4   :  { %6391 = vmatprep.subr.bf16.mxu0 %v10193_v12  ;;  %6477 = vmatprep.subr.bf16.mxu1 %v10194_v26  ;;  %v10224_v12 = vld [vmem:[%s15435_s2 + $0xc08] ss:$16 sps:$4 sm:$0xff]   ;;  %v10225_v26 = vld [vmem:[%s15435_s2 + $0xc24] ss:$16 sps:$4 sm:$0xff]  }
 0x4e7   :  { %6392 = vmatpush1.bf16.msra.mxu0 %v10195_v14  ;;  %6478 = vmatpush1.bf16.msra.mxu1 %v10196_v23  ;;  %v10226_v14 = vld [vmem:[%s15435_s2 + $0xc2c] ss:$16 sps:$4 sm:$0xff]   ;;  %v10228_v23 = vld [vmem:[%s15435_s2 + $0xc28] ss:$16 sps:$4 sm:$0xff]  }
 0x4e8   :  { %6393 = vmatprep.subr.bf16.mxu0 %v10197_v28  ;;  %6479 = vmatprep.subr.bf16.mxu1 %v10198_v30  ;;  %v10229_v28 = vld [vmem:[%s15435_s2 + $0xc44] ss:$16 sps:$4 sm:$0xff]   ;;  %v10230_v30 = vld [vmem:[%s15435_s2 + $0xc4c] ss:$16 sps:$4 sm:$0xff]  }
 0x4eb   :  { %6394 = vmatpush1.bf16.msra.mxu0 %v10199_v13  ;;  %6480 = vmatpush1.bf16.msra.mxu1 %v10200_v31  ;;  %v10232_v13 = vld [vmem:[%s15435_s2 + $0xc48] ss:$16 sps:$4 sm:$0xff]   ;;  %v10233_v31 = vld [vmem:[%s15435_s2 + $0xc64] ss:$16 sps:$4 sm:$0xff]  }
 0x4ec   :  { %6395 = vmatprep.subr.bf16.mxu0 %v10201_v32  ;;  %6481 = vmatprep.subr.bf16.mxu1 %v10202_v34  ;;  %v10234_v32 = vld [vmem:[%s15435_s2 + $0xc6c] ss:$16 sps:$4 sm:$0xff]   ;;  %v10235_v34 = vld [vmem:[%s15435_s2 + $0xc60] ss:$16 sps:$4 sm:$0xff]  }
 0x4ef   :  { %6396 = vmatpush1.bf16.msra.mxu0 %v10203_v35  ;;  %6482 = vmatpush1.bf16.msra.mxu1 %v10204_v36  ;;  %v10236_v35 = vld [vmem:[%s15435_s2 + $0xc68] ss:$16 sps:$4 sm:$0xff]   ;;  %v10237_v36 = vld [vmem:[%s15435_s2 + $0xc84] ss:$16 sps:$4 sm:$0xff]  }
 0x4f0   :  { %6397 = vmatprep.subr.bf16.mxu0 %v10205_v37  ;;  %6483 = vmatprep.subr.bf16.mxu1 %v10206_v39  ;;  %v10238_v37 = vld [vmem:[%s15435_s2 + $0xc8c] ss:$16 sps:$4 sm:$0xff]   ;;  %v10239_v39 = vld [vmem:[%s15435_s2 + $0xc80] ss:$16 sps:$4 sm:$0xff]  }
 0x4f3   :  { %6398 = vmatpush1.bf16.msra.mxu0 %v10207_v40  ;;  %6484 = vmatpush1.bf16.msra.mxu1 %v10208_v41  ;;  %v10240_v40 = vld [vmem:[%s15435_s2 + $0xc88] ss:$16 sps:$4 sm:$0xff]   ;;  %v10241_v41 = vld [vmem:[%s15435_s2 + $0xca4] ss:$16 sps:$4 sm:$0xff]  }
 0x4f4   :  { %6399 = vmatprep.subr.bf16.mxu0 %v10209_v42  ;;  %6485 = vmatprep.subr.bf16.mxu1 %v10210_v43  ;;  %v10242_v42 = vld [vmem:[%s15435_s2 + $0xcac] ss:$16 sps:$4 sm:$0xff]   ;;  %v10243_v43 = vld [vmem:[%s15435_s2 + $0xca0] ss:$16 sps:$4 sm:$0xff]  }
 0x4f7   :  { %6400 = vmatpush1.bf16.msra.mxu0 %v10211_v45  ;;  %6486 = vmatpush1.bf16.msra.mxu1 %v10212_v56  ;;  %v10244_v45 = vld [vmem:[%s15435_s2 + $0xca8] ss:$16 sps:$4 sm:$0xff]   ;;  %v10245_v56 = vld [vmem:[%s15435_s2 + $0xcc4] ss:$16 sps:$4 sm:$0xff]  }
 0x4f8   :  { %6401 = vmatprep.subr.bf16.mxu0 %v10213_v57  ;;  %6487 = vmatprep.subr.bf16.mxu1 %v10214_v62  ;;  %v10246_v57 = vld [vmem:[%s15435_s2 + $0xccc] ss:$16 sps:$4 sm:$0xff]   ;;  %v10247_v62 = vld [vmem:[%s15435_s2 + $0xcc0] ss:$16 sps:$4 sm:$0xff]  }
 0x4fb   :  { %6402 = vmatpush1.bf16.msra.mxu0 %v10215_v63  ;;  %6488 = vmatpush1.bf16.msra.mxu1 %v10216_v3  ;;  %v10248_v63 = vld [vmem:[%s15435_s2 + $0xcc8] ss:$16 sps:$4 sm:$0xff]   ;;  %v10249_v3 = vld [vmem:[%s15435_s2 + $0xce4] ss:$16 sps:$4 sm:$0xff]  }
 0x4fc   :  { %6403 = vmatprep.subr.bf16.mxu0 %v10217_v4  ;;  %6489 = vmatprep.subr.bf16.mxu1 %v10218_v5  ;;  %v10250_v4 = vld [vmem:[%s15435_s2 + $0xcec] ss:$16 sps:$4 sm:$0xff]   ;;  %v10251_v5 = vld [vmem:[%s15435_s2 + $0xce0] ss:$16 sps:$4 sm:$0xff]  }
 0x4ff   :  { %6404 = vmatpush1.bf16.msra.mxu0 %v10219_v6  ;;  %6490 = vmatpush1.bf16.msra.mxu1 %v10220_v7  ;;  %v10252_v6 = vld [vmem:[%s15435_s2 + $0xce8] ss:$16 sps:$4 sm:$0xff]   ;;  %v10253_v7 = vld [vmem:[%s15435_s2 + $0xd04] ss:$16 sps:$4 sm:$0xff]  }
 0x500   :  { %6502 = vmatprep.subr.bf16.mxu0 %v10221_v8  ;;  %6588 = vmatprep.subr.bf16.mxu1 %v10222_v10  ;;  %v10254_v8 = vld [vmem:[%s15435_s2 + $0xd0c] ss:$16 sps:$4 sm:$0xff]   ;;  %v10255_v10 = vld [vmem:[%s15435_s2 + $0xd00] ss:$16 sps:$4 sm:$0xff]  }
 0x502   :  { %6406 = vmatmul.mubr.bf16.vlgmr.msra.gmra.mrb[12].mxu0 %v11720_v33  ;;  %6492 = vmatmul.mubr.bf16.vlgmr.msra.gmra.mrb[12].mxu1 %v11720_v33  ;;  %v10227_v33 = vld [vmem:[%s15435_s2 + $0xc20] ss:$16 sps:$4 sm:$0xff]  }
 0x503   :  { %6503 = vmatpush1.bf16.msra.mxu0 %v10223_v20  ;;  %6589 = vmatpush1.bf16.msra.mxu1 %v10224_v12  ;;  %v10256_v20 = vld [vmem:[%s15435_s2 + $0xd08] ss:$16 sps:$4 sm:$0xff]   ;;  %v10257_v12 = vld [vmem:[%s15435_s2 + $0xd24] ss:$16 sps:$4 sm:$0xff]  }
 0x504   :  { %6504 = vmatprep.subr.bf16.mxu0 %v10225_v26  ;;  %6590 = vmatprep.subr.bf16.mxu1 %v10226_v14  ;;  %v10258_v26 = vld [vmem:[%s15435_s2 + $0xd2c] ss:$16 sps:$4 sm:$0xff]   ;;  %v10259_v14 = vld [vmem:[%s15435_s2 + $0xd20] ss:$16 sps:$4 sm:$0xff]  }
 0x505   :  { %6534 = vmatprep.mubr.bf16.mxu0 %v13331_v2  ;;  %6620 = vmatprep.mubr.bf16.mxu1 %v13331_v2  ;;  %v10231_v2 = vld [vmem:[%s15435_s2 + $0xc40] ss:$16 sps:$4 sm:$0xff]  }
 0x507   :  { %6505 = vmatpush1.bf16.msra.mxu0 %v10227_v33  ;;  %6591 = vmatpush1.bf16.msra.mxu1 %v10228_v23  ;;  %v10260_v33 = vld [vmem:[%s15435_s2 + $0xd28] ss:$16 sps:$4 sm:$0xff]   ;;  %v10261_v23 = vld [vmem:[%s15435_s2 + $0xd44] ss:$16 sps:$4 sm:$0xff]  }
 0x508   :  { %6506 = vmatprep.subr.bf16.mxu0 %v10229_v28  ;;  %6592 = vmatprep.subr.bf16.mxu1 %v10230_v30  ;;  %v10262_v28 = vld [vmem:[%s15435_s2 + $0xd4c] ss:$16 sps:$4 sm:$0xff]   ;;  %v10263_v30 = vld [vmem:[%s15435_s2 + $0xd40] ss:$16 sps:$4 sm:$0xff]  }
 0x50b   :  { %6507 = vmatpush1.bf16.msra.mxu0 %v10231_v2  ;;  %6593 = vmatpush1.bf16.msra.mxu1 %v10232_v13  ;;  %v10264_v2 = vld [vmem:[%s15435_s2 + $0xd48] ss:$16 sps:$4 sm:$0xff]   ;;  %v10265_v13 = vld [vmem:[%s15435_s2 + $0xd64] ss:$16 sps:$4 sm:$0xff]  }
 0x50c   :  { %6508 = vmatprep.subr.bf16.mxu0 %v10233_v31  ;;  %6594 = vmatprep.subr.bf16.mxu1 %v10234_v32  ;;  %v10266_v31 = vld [vmem:[%s15435_s2 + $0xd6c] ss:$16 sps:$4 sm:$0xff]   ;;  %v10267_v32 = vld [vmem:[%s15435_s2 + $0xd60] ss:$16 sps:$4 sm:$0xff]  }
 0x50f   :  { %6509 = vmatpush1.bf16.msra.mxu0 %v10235_v34  ;;  %6595 = vmatpush1.bf16.msra.mxu1 %v10236_v35  ;;  %v10268_v34 = vld [vmem:[%s15435_s2 + $0xd68] ss:$16 sps:$4 sm:$0xff]   ;;  %v10269_v35 = vld [vmem:[%s15435_s2 + $0xd84] ss:$16 sps:$4 sm:$0xff]  }
 0x510   :  { %6510 = vmatprep.subr.bf16.mxu0 %v10237_v36  ;;  %6596 = vmatprep.subr.bf16.mxu1 %v10238_v37  ;;  %v10270_v36 = vld [vmem:[%s15435_s2 + $0xd8c] ss:$16 sps:$4 sm:$0xff]   ;;  %v10271_v37 = vld [vmem:[%s15435_s2 + $0xd80] ss:$16 sps:$4 sm:$0xff]  }
 0x513   :  { %6511 = vmatpush1.bf16.msra.mxu0 %v10239_v39  ;;  %6597 = vmatpush1.bf16.msra.mxu1 %v10240_v40  ;;  %v10272_v39 = vld [vmem:[%s15435_s2 + $0xd88] ss:$16 sps:$4 sm:$0xff]   ;;  %v10273_v40 = vld [vmem:[%s15435_s2 + $0xda4] ss:$16 sps:$4 sm:$0xff]  }
 0x514   :  { %6512 = vmatprep.subr.bf16.mxu0 %v10241_v41  ;;  %6598 = vmatprep.subr.bf16.mxu1 %v10242_v42  ;;  %v10274_v41 = vld [vmem:[%s15435_s2 + $0xdac] ss:$16 sps:$4 sm:$0xff]   ;;  %v10275_v42 = vld [vmem:[%s15435_s2 + $0xda0] ss:$16 sps:$4 sm:$0xff]  }
 0x517   :  { %6513 = vmatpush1.bf16.msra.mxu0 %v10243_v43  ;;  %6599 = vmatpush1.bf16.msra.mxu1 %v10244_v45  ;;  %v10276_v43 = vld [vmem:[%s15435_s2 + $0xda8] ss:$16 sps:$4 sm:$0xff]   ;;  %v10277_v45 = vld [vmem:[%s15435_s2 + $0xdc4] ss:$16 sps:$4 sm:$0xff]  }
 0x518   :  { %6514 = vmatprep.subr.bf16.mxu0 %v10245_v56  ;;  %6600 = vmatprep.subr.bf16.mxu1 %v10246_v57  ;;  %v10278_v56 = vld [vmem:[%s15435_s2 + $0xdcc] ss:$16 sps:$4 sm:$0xff]   ;;  %v10279_v57 = vld [vmem:[%s15435_s2 + $0xdc0] ss:$16 sps:$4 sm:$0xff]  }
 0x51b   :  { %6515 = vmatpush1.bf16.msra.mxu0 %v10247_v62  ;;  %6601 = vmatpush1.bf16.msra.mxu1 %v10248_v63  ;;  %v10280_v62 = vld [vmem:[%s15435_s2 + $0xdc8] ss:$16 sps:$4 sm:$0xff]   ;;  %v10281_v63 = vld [vmem:[%s15435_s2 + $0xde4] ss:$16 sps:$4 sm:$0xff]  }
 0x51c   :  { %6516 = vmatprep.subr.bf16.mxu0 %v10249_v3  ;;  %6602 = vmatprep.subr.bf16.mxu1 %v10250_v4  ;;  %v10282_v3 = vld [vmem:[%s15435_s2 + $0xdec] ss:$16 sps:$4 sm:$0xff]   ;;  %v10283_v4 = vld [vmem:[%s15435_s2 + $0xde0] ss:$16 sps:$4 sm:$0xff]  }
 0x51f   :  { %6517 = vmatpush1.bf16.msra.mxu0 %v10251_v5  ;;  %6603 = vmatpush1.bf16.msra.mxu1 %v10252_v6  ;;  %v10284_v5 = vld [vmem:[%s15435_s2 + $0xde8] ss:$16 sps:$4 sm:$0xff]   ;;  %v10285_v6 = vld [vmem:[%s15435_s2 + $0xe04] ss:$16 sps:$4 sm:$0xff]  }
 0x520   :  { %6518 = vmatprep.subr.bf16.mxu0 %v10253_v7  ;;  %6604 = vmatprep.subr.bf16.mxu1 %v10254_v8  ;;  %v10286_v7 = vld [vmem:[%s15435_s2 + $0xe0c] ss:$16 sps:$4 sm:$0xff]   ;;  %v10287_v8 = vld [vmem:[%s15435_s2 + $0xe00] ss:$16 sps:$4 sm:$0xff]  }
 0x523   :  { %6519 = vmatpush1.bf16.msra.mxu0 %v10255_v10  ;;  %6605 = vmatpush1.bf16.msra.mxu1 %v10256_v20  ;;  %v10288_v10 = vld [vmem:[%s15435_s2 + $0xe08] ss:$16 sps:$4 sm:$0xff]   ;;  %v10289_v20 = vld [vmem:[%s15435_s2 + $0xe24] ss:$16 sps:$4 sm:$0xff]  }
 0x524   :  { %6520 = vmatprep.subr.bf16.mxu0 %v10257_v12  ;;  %6606 = vmatprep.subr.bf16.mxu1 %v10258_v26  ;;  %v10290_v12 = vld [vmem:[%s15435_s2 + $0xe2c] ss:$16 sps:$4 sm:$0xff]   ;;  %v10292_v26 = vld [vmem:[%s15435_s2 + $0xe28] ss:$16 sps:$4 sm:$0xff]  }
 0x527   :  { %6521 = vmatpush1.bf16.msra.mxu0 %v10259_v14  ;;  %6607 = vmatpush1.bf16.msra.mxu1 %v10260_v33  ;;  %v10293_v14 = vld [vmem:[%s15435_s2 + $0xe44] ss:$16 sps:$4 sm:$0xff]   ;;  %v10294_v33 = vld [vmem:[%s15435_s2 + $0xe4c] ss:$16 sps:$4 sm:$0xff]  }
 0x528   :  { %6522 = vmatprep.subr.bf16.mxu0 %v10261_v23  ;;  %6608 = vmatprep.subr.bf16.mxu1 %v10262_v28  ;;  %v10296_v23 = vld [vmem:[%s15435_s2 + $0xe48] ss:$16 sps:$4 sm:$0xff]   ;;  %v10297_v28 = vld [vmem:[%s15435_s2 + $0xe64] ss:$16 sps:$4 sm:$0xff]  }
 0x52b   :  { %6523 = vmatpush1.bf16.msra.mxu0 %v10263_v30  ;;  %6609 = vmatpush1.bf16.msra.mxu1 %v10264_v2  ;;  %v10298_v30 = vld [vmem:[%s15435_s2 + $0xe6c] ss:$16 sps:$4 sm:$0xff]   ;;  %v10299_v2 = vld [vmem:[%s15435_s2 + $0xe60] ss:$16 sps:$4 sm:$0xff]  }
 0x52c   :  { %6524 = vmatprep.subr.bf16.mxu0 %v10265_v13  ;;  %6610 = vmatprep.subr.bf16.mxu1 %v10266_v31  ;;  %v10300_v13 = vld [vmem:[%s15435_s2 + $0xe68] ss:$16 sps:$4 sm:$0xff]   ;;  %v10301_v31 = vld [vmem:[%s15435_s2 + $0xe84] ss:$16 sps:$4 sm:$0xff]  }
 0x52f   :  { %6525 = vmatpush1.bf16.msra.mxu0 %v10267_v32  ;;  %6611 = vmatpush1.bf16.msra.mxu1 %v10268_v34  ;;  %v10302_v32 = vld [vmem:[%s15435_s2 + $0xe8c] ss:$16 sps:$4 sm:$0xff]   ;;  %v10303_v34 = vld [vmem:[%s15435_s2 + $0xe80] ss:$16 sps:$4 sm:$0xff]  }
 0x530   :  { %6526 = vmatprep.subr.bf16.mxu0 %v10269_v35  ;;  %6612 = vmatprep.subr.bf16.mxu1 %v10270_v36  ;;  %v10304_v35 = vld [vmem:[%s15435_s2 + $0xe88] ss:$16 sps:$4 sm:$0xff]   ;;  %v10305_v36 = vld [vmem:[%s15435_s2 + $0xea4] ss:$16 sps:$4 sm:$0xff]  }
 0x533   :  { %6527 = vmatpush1.bf16.msra.mxu0 %v10271_v37  ;;  %6613 = vmatpush1.bf16.msra.mxu1 %v10272_v39  ;;  %v10306_v37 = vld [vmem:[%s15435_s2 + $0xeac] ss:$16 sps:$4 sm:$0xff]  }
 0x534   :  { %6528 = vmatprep.subr.bf16.mxu0 %v10273_v40  ;;  %6614 = vmatprep.subr.bf16.mxu1 %v10274_v41 }
 0x537   :  { %6529 = vmatpush1.bf16.msra.mxu0 %v10275_v42  ;;  %6615 = vmatpush1.bf16.msra.mxu1 %v10276_v43 }
 0x538   :  { %6530 = vmatprep.subr.bf16.mxu0 %v10277_v45  ;;  %6616 = vmatprep.subr.bf16.mxu1 %v10278_v56 }
 0x53b   :  { %6531 = vmatpush1.bf16.msra.mxu0 %v10279_v57  ;;  %6617 = vmatpush1.bf16.msra.mxu1 %v10280_v62  ;;  %v10323_v62 = vld [vmem:[%s15435_s2 + $0xf20] ss:$16 sps:$4 sm:$0xff]  }
 0x53c   :  { %6532 = vmatprep.subr.bf16.mxu0 %v10281_v63  ;;  %6618 = vmatprep.subr.bf16.mxu1 %v10282_v3  ;;  %v10324_v63 = vld [vmem:[%s15435_s2 + $0xf28] ss:$16 sps:$4 sm:$0xff]   ;;  %v10325_v3 = vld [vmem:[%s15435_s2 + $0xf44] ss:$16 sps:$4 sm:$0xff]  }
 0x53f   :  { %6533 = vmatpush1.bf16.msra.mxu0 %v10283_v4  ;;  %6619 = vmatpush1.bf16.msra.mxu1 %v10284_v5  ;;  %v10326_v4 = vld [vmem:[%s15435_s2 + $0xf4c] ss:$16 sps:$4 sm:$0xff]   ;;  %v10327_v5 = vld [vmem:[%s15435_s2 + $0xf40] ss:$16 sps:$4 sm:$0xff]  }
 0x540   :  { %6545 = vmatprep.subr.bf16.mxu0 %v10285_v6  ;;  %6631 = vmatprep.subr.bf16.mxu1 %v10286_v7  ;;  %v10328_v6 = vld [vmem:[%s15435_s2 + $0xf48] ss:$16 sps:$4 sm:$0xff]   ;;  %v10329_v7 = vld [vmem:[%s15435_s2 + $0xf64] ss:$16 sps:$4 sm:$0xff]  }
 0x542   :  { %6535 = vmatmul.mubr.bf16.vlgmr.msra.gmra.mrb[12].mxu0 %v13518_v15  ;;  %6621 = vmatmul.mubr.bf16.vlgmr.msra.gmra.mrb[12].mxu1 %v13518_v15  ;;  %v10291_v15 = vld [vmem:[%s15435_s2 + $0xe20] ss:$16 sps:$4 sm:$0xff]  }
 0x543   :  { %6546 = vmatpush1.bf16.msra.mxu0 %v10287_v8  ;;  %6632 = vmatpush1.bf16.msra.mxu1 %v10288_v10  ;;  %v10330_v8 = vld [vmem:[%s15435_s2 + $0xf6c] ss:$16 sps:$4 sm:$0xff]   ;;  %v10331_v10 = vld [vmem:[%s15435_s2 + $0xf60] ss:$16 sps:$4 sm:$0xff]  }
 0x544   :  { %6547 = vmatprep.subr.bf16.mxu0 %v10289_v20  ;;  %6633 = vmatprep.subr.bf16.mxu1 %v10290_v12  ;;  %v10332_v20 = vld [vmem:[%s15435_s2 + $0xf68] ss:$16 sps:$4 sm:$0xff]   ;;  %v10333_v12 = vld [vmem:[%s15435_s2 + $0xf84] ss:$16 sps:$4 sm:$0xff]  }
 0x545   :  { %6577 = vmatprep.mubr.bf16.mxu0 %v13537_v29  ;;  %6663 = vmatprep.mubr.bf16.mxu1 %v13537_v29  ;;  %v10295_v29 = vld [vmem:[%s15435_s2 + $0xe40] ss:$16 sps:$4 sm:$0xff]  }
 0x547   :  { %6548 = vmatpush1.bf16.msra.mxu0 %v10291_v15  ;;  %6634 = vmatpush1.bf16.msra.mxu1 %v10292_v26  ;;  %v10334_v15 = vld [vmem:[%s15435_s2 + $0xf8c] ss:$16 sps:$4 sm:$0xff]   ;;  %v10335_v26 = vld [vmem:[%s15435_s2 + $0xf80] ss:$16 sps:$4 sm:$0xff]  }
 0x548   :  { %6549 = vmatprep.subr.bf16.mxu0 %v10293_v14  ;;  %6635 = vmatprep.subr.bf16.mxu1 %v10294_v33  ;;  %v10336_v14 = vld [vmem:[%s15435_s2 + $0xf88] ss:$16 sps:$4 sm:$0xff]   ;;  %v10337_v33 = vld [vmem:[%s15435_s2 + $0xfa4] ss:$16 sps:$4 sm:$0xff]  }
 0x54b   :  { %6550 = vmatpush1.bf16.msra.mxu0 %v10295_v29  ;;  %6636 = vmatpush1.bf16.msra.mxu1 %v10296_v23  ;;  %v10338_v29 = vld [vmem:[%s15435_s2 + $0xfac] ss:$16 sps:$4 sm:$0xff]   ;;  %v10339_v23 = vld [vmem:[%s15435_s2 + $0xfa0] ss:$16 sps:$4 sm:$0xff]  }
 0x54c   :  { %6551 = vmatprep.subr.bf16.mxu0 %v10297_v28  ;;  %6637 = vmatprep.subr.bf16.mxu1 %v10298_v30  ;;  %v10340_v28 = vld [vmem:[%s15435_s2 + $0xfa8] ss:$16 sps:$4 sm:$0xff]   ;;  %v10341_v30 = vld [vmem:[%s15435_s2 + $0xfc4] ss:$16 sps:$4 sm:$0xff]  }
 0x54f   :  { %6552 = vmatpush1.bf16.msra.mxu0 %v10299_v2  ;;  %6638 = vmatpush1.bf16.msra.mxu1 %v10300_v13  ;;  %v10342_v2 = vld [vmem:[%s15435_s2 + $0xfcc] ss:$16 sps:$4 sm:$0xff]   ;;  %v10343_v13 = vld [vmem:[%s15435_s2 + $0xfc0] ss:$16 sps:$4 sm:$0xff]  }
 0x550   :  { %6553 = vmatprep.subr.bf16.mxu0 %v10301_v31  ;;  %6639 = vmatprep.subr.bf16.mxu1 %v10302_v32  ;;  %v10344_v31 = vld [vmem:[%s15435_s2 + $0xfc8] ss:$16 sps:$4 sm:$0xff]   ;;  %v10345_v32 = vld [vmem:[%s15435_s2 + $0xfe4] ss:$16 sps:$4 sm:$0xff]  }
 0x553   :  { %6554 = vmatpush1.bf16.msra.mxu0 %v10303_v34  ;;  %6640 = vmatpush1.bf16.msra.mxu1 %v10304_v35  ;;  %v10346_v34 = vld [vmem:[%s15435_s2 + $0xfec] ss:$16 sps:$4 sm:$0xff]   ;;  %v10347_v35 = vld [vmem:[%s15435_s2 + $0xfe0] ss:$16 sps:$4 sm:$0xff]  }
 0x554   :  { %6555 = vmatprep.subr.bf16.mxu0 %v10305_v36  ;;  %6641 = vmatprep.subr.bf16.mxu1 %v10306_v37  ;;  %v10348_v36 = vld [vmem:[%s15435_s2 + $0xfe8] ss:$16 sps:$4 sm:$0xff]   ;;  %v10349_v37 = vld [vmem:[%s15435_s2 + $0x1404] ss:$16 sps:$4 sm:$0xff]  }
 0x555   :  { %v6219_v39 = vpop.f32.mrb[8].mxu0  ;;  %v6305_v40 = vpop.f32.mrb[8].mxu1 }
 0x556   :  { %v14821_v41 = vmax.f32 %v5758_v48, %v6219_v39  ;;  %v14826_v42 = vmax.f32 %v5760_v49, %v6305_v40  ;;  %v6221_v43 = vpop.f32.mrb[9].mxu0  ;;  %v6307_v45 = vpop.f32.mrb[9].mxu1  ;;  %v10350_v39 = vld [vmem:[%s15435_s2 + $0x140c] ss:$16 sps:$4 sm:$0xff]   ;;  %v10351_v40 = vld [vmem:[%s15435_s2 + $0x1400] ss:$16 sps:$4 sm:$0xff]  }
 0x557   :  { %v14831_v56 = vmax.f32 %v5759_v52, %v6221_v43  ;;  %v14836_v57 = vmax.f32 %v5761_v53, %v6307_v45  ;;  %v6223_v16 = vpop.f32.mrb[10].mxu0  ;;  %v6309_v46 = vpop.f32.mrb[10].mxu1  ;;  %6556 = vmatpush1.bf16.msra.mxu0 %v10307_v17  ;;  %6642 = vmatpush1.bf16.msra.mxu1 %v10308_v47  ;;  %v10311_v52 = vld [vmem:[%s15435_s2 + $0xec0] ss:$16 sps:$4 sm:$0xff]   ;;  %v10312_v53 = vld [vmem:[%s15435_s2 + $0xec8] ss:$16 sps:$4 sm:$0xff]  }
 0x558   :  { %v14847_v19 = vmax.f32 %v5762_v58, %v6223_v16  ;;  %v14852_v11 = vmax.f32 %v5764_v59, %v6309_v46  ;;  %v6225_v48 = vpop.f32.mrb[11].mxu0  ;;  %v6311_v49 = vpop.f32.mrb[11].mxu1  ;;  %6557 = vmatprep.subr.bf16.mxu0 %v10309_v50  ;;  %6643 = vmatprep.subr.bf16.mxu1 %v10310_v51  ;;  %v10317_v58 = vld [vmem:[%s15435_s2 + $0xf04] ss:$16 sps:$4 sm:$0xff]   ;;  %v10318_v59 = vld [vmem:[%s15435_s2 + $0xf0c] ss:$16 sps:$4 sm:$0xff]  }
 0x559   :  { %v14863_v21 = vmax.f32 %v5763_v0, %v6225_v48  ;;  %v14868_v22 = vmax.f32 %v5765_v1, %v6311_v49  ;;  %v10321_v0 = vld [vmem:[%s15435_s2 + $0xf24] ss:$16 sps:$4 sm:$0xff]   ;;  %v10322_v1 = vld [vmem:[%s15435_s2 + $0xf2c] ss:$16 sps:$4 sm:$0xff]   ;;  %v10352_v43 = vld [vmem:[%s15435_s2 + $0x1408] ss:$16 sps:$4 sm:$0xff]  }
 0x55a   :  { %v10353_v45 = vld [vmem:[%s15435_s2 + $0x1424] ss:$16 sps:$4 sm:$0xff]   ;;  %v10354_v16 = vld [vmem:[%s15435_s2 + $0x142c] ss:$16 sps:$4 sm:$0xff]   ;;  %v10356_v46 = vld [vmem:[%s15435_s2 + $0x1428] ss:$16 sps:$4 sm:$0xff]  }
 0x55b   :  { %6558 = vmatpush1.bf16.msra.mxu0 %v10311_v52  ;;  %6644 = vmatpush1.bf16.msra.mxu1 %v10312_v53  ;;  %v10357_v17 = vld [vmem:[%s15435_s2 + $0x1444] ss:$16 sps:$4 sm:$0xff]   ;;  %v10358_v47 = vld [vmem:[%s15435_s2 + $0x144c] ss:$16 sps:$4 sm:$0xff]   ;;  %v10360_v48 = vld [vmem:[%s15435_s2 + $0x1448] ss:$16 sps:$4 sm:$0xff]  }
 0x55c   :  { %6559 = vmatprep.subr.bf16.mxu0 %v10313_v24  ;;  %6645 = vmatprep.subr.bf16.mxu1 %v10314_v25  ;;  %v10361_v49 = vld [vmem:[%s15435_s2 + $0x1464] ss:$16 sps:$4 sm:$0xff]   ;;  %v10362_v50 = vld [vmem:[%s15435_s2 + $0x146c] ss:$16 sps:$4 sm:$0xff]   ;;  %v10363_v51 = vld [vmem:[%s15435_s2 + $0x1460] ss:$16 sps:$4 sm:$0xff]  }
 0x55d   :  { %v10364_v52 = vld [vmem:[%s15435_s2 + $0x1468] ss:$16 sps:$4 sm:$0xff]   ;;  %v10365_v53 = vld [vmem:[%s15435_s2 + $0x1484] ss:$16 sps:$4 sm:$0xff]   ;;  %v10366_v24 = vld [vmem:[%s15435_s2 + $0x148c] ss:$16 sps:$4 sm:$0xff]  }
 0x55e   :  { %v10367_v25 = vld [vmem:[%s15435_s2 + $0x1480] ss:$16 sps:$4 sm:$0xff]  }
 0x55f   :  { %6560 = vmatpush1.bf16.msra.mxu0 %v10315_v54  ;;  %6646 = vmatpush1.bf16.msra.mxu1 %v10316_v55  ;;  %v10368_v54 = vld [vmem:[%s15435_s2 + $0x1488] ss:$16 sps:$4 sm:$0xff]   ;;  %v10369_v55 = vld [vmem:[%s15435_s2 + $0x14a4] ss:$16 sps:$4 sm:$0xff]  }
 0x560   :  { %6561 = vmatprep.subr.bf16.mxu0 %v10317_v58  ;;  %6647 = vmatprep.subr.bf16.mxu1 %v10318_v59  ;;  %v10370_v58 = vld [vmem:[%s15435_s2 + $0x14ac] ss:$16 sps:$4 sm:$0xff]   ;;  %v10371_v59 = vld [vmem:[%s15435_s2 + $0x14a0] ss:$16 sps:$4 sm:$0xff]  }
 0x563   :  { %6562 = vmatpush1.bf16.msra.mxu0 %v10319_v60  ;;  %6648 = vmatpush1.bf16.msra.mxu1 %v10320_v61  ;;  %v10372_v60 = vld [vmem:[%s15435_s2 + $0x14a8] ss:$16 sps:$4 sm:$0xff]   ;;  %v10373_v61 = vld [vmem:[%s15435_s2 + $0x14c4] ss:$16 sps:$4 sm:$0xff]  }
 0x564   :  { %6563 = vmatprep.subr.bf16.mxu0 %v10321_v0  ;;  %6649 = vmatprep.subr.bf16.mxu1 %v10322_v1  ;;  %v10374_v0 = vld [vmem:[%s15435_s2 + $0x14cc] ss:$16 sps:$4 sm:$0xff]   ;;  %v10375_v1 = vld [vmem:[%s15435_s2 + $0x14c0] ss:$16 sps:$4 sm:$0xff]  }
 0x567   :  { %6564 = vmatpush1.bf16.msra.mxu0 %v10323_v62  ;;  %6650 = vmatpush1.bf16.msra.mxu1 %v10324_v63  ;;  %v10376_v62 = vld [vmem:[%s15435_s2 + $0x14c8] ss:$16 sps:$4 sm:$0xff]   ;;  %v10377_v63 = vld [vmem:[%s15435_s2 + $0x14e4] ss:$16 sps:$4 sm:$0xff]  }
 0x568   :  { %6565 = vmatprep.subr.bf16.mxu0 %v10325_v3  ;;  %6651 = vmatprep.subr.bf16.mxu1 %v10326_v4  ;;  %v10378_v3 = vld [vmem:[%s15435_s2 + $0x14ec] ss:$16 sps:$4 sm:$0xff]   ;;  %v10379_v4 = vld [vmem:[%s15435_s2 + $0x14e0] ss:$16 sps:$4 sm:$0xff]  }
 0x56b   :  { %6566 = vmatpush1.bf16.msra.mxu0 %v10327_v5  ;;  %6652 = vmatpush1.bf16.msra.mxu1 %v10328_v6  ;;  %v10380_v5 = vld [vmem:[%s15435_s2 + $0x14e8] ss:$16 sps:$4 sm:$0xff]   ;;  %v10381_v6 = vld [vmem:[%s15435_s2 + $0x1504] ss:$16 sps:$4 sm:$0xff]  }
 0x56c   :  { %6567 = vmatprep.subr.bf16.mxu0 %v10329_v7  ;;  %6653 = vmatprep.subr.bf16.mxu1 %v10330_v8  ;;  %v10382_v7 = vld [vmem:[%s15435_s2 + $0x150c] ss:$16 sps:$4 sm:$0xff]   ;;  %v10383_v8 = vld [vmem:[%s15435_s2 + $0x1500] ss:$16 sps:$4 sm:$0xff]  }
 0x56f   :  { %6568 = vmatpush1.bf16.msra.mxu0 %v10331_v10  ;;  %6654 = vmatpush1.bf16.msra.mxu1 %v10332_v20  ;;  %v10384_v10 = vld [vmem:[%s15435_s2 + $0x1508] ss:$16 sps:$4 sm:$0xff]   ;;  %v10385_v20 = vld [vmem:[%s15435_s2 + $0x1524] ss:$16 sps:$4 sm:$0xff]  }
 0x570   :  { %6569 = vmatprep.subr.bf16.mxu0 %v10333_v12  ;;  %6655 = vmatprep.subr.bf16.mxu1 %v10334_v15  ;;  %v10386_v12 = vld [vmem:[%s15435_s2 + $0x152c] ss:$16 sps:$4 sm:$0xff]   ;;  %v10387_v15 = vld [vmem:[%s15435_s2 + $0x1520] ss:$16 sps:$4 sm:$0xff]  }
 0x573   :  { %6570 = vmatpush1.bf16.msra.mxu0 %v10335_v26  ;;  %6656 = vmatpush1.bf16.msra.mxu1 %v10336_v14  ;;  %v10388_v26 = vld [vmem:[%s15435_s2 + $0x1528] ss:$16 sps:$4 sm:$0xff]   ;;  %v10389_v14 = vld [vmem:[%s15435_s2 + $0x1544] ss:$16 sps:$4 sm:$0xff]  }
 0x574   :  { %6571 = vmatprep.subr.bf16.mxu0 %v10337_v33  ;;  %6657 = vmatprep.subr.bf16.mxu1 %v10338_v29  ;;  %v10390_v33 = vld [vmem:[%s15435_s2 + $0x154c] ss:$16 sps:$4 sm:$0xff]   ;;  %v10391_v29 = vld [vmem:[%s15435_s2 + $0x1540] ss:$16 sps:$4 sm:$0xff]  }
 0x577   :  { %6572 = vmatpush1.bf16.msra.mxu0 %v10339_v23  ;;  %6658 = vmatpush1.bf16.msra.mxu1 %v10340_v28  ;;  %v10392_v23 = vld [vmem:[%s15435_s2 + $0x1548] ss:$16 sps:$4 sm:$0xff]   ;;  %v10393_v28 = vld [vmem:[%s15435_s2 + $0x1564] ss:$16 sps:$4 sm:$0xff]  }
 0x578   :  { %6573 = vmatprep.subr.bf16.mxu0 %v10341_v30  ;;  %6659 = vmatprep.subr.bf16.mxu1 %v10342_v2  ;;  %v10394_v30 = vld [vmem:[%s15435_s2 + $0x156c] ss:$16 sps:$4 sm:$0xff]   ;;  %v10395_v2 = vld [vmem:[%s15435_s2 + $0x1560] ss:$16 sps:$4 sm:$0xff]  }
 0x57b   :  { %6574 = vmatpush1.bf16.msra.mxu0 %v10343_v13  ;;  %6660 = vmatpush1.bf16.msra.mxu1 %v10344_v31  ;;  %v10396_v13 = vld [vmem:[%s15435_s2 + $0x1568] ss:$16 sps:$4 sm:$0xff]   ;;  %v10397_v31 = vld [vmem:[%s15435_s2 + $0x1584] ss:$16 sps:$4 sm:$0xff]  }
 0x57c   :  { %6575 = vmatprep.subr.bf16.mxu0 %v10345_v32  ;;  %6661 = vmatprep.subr.bf16.mxu1 %v10346_v34  ;;  %v10398_v32 = vld [vmem:[%s15435_s2 + $0x158c] ss:$16 sps:$4 sm:$0xff]   ;;  %v10399_v34 = vld [vmem:[%s15435_s2 + $0x1580] ss:$16 sps:$4 sm:$0xff]  }
 0x57f   :  { %6576 = vmatpush1.bf16.msra.mxu0 %v10347_v35  ;;  %6662 = vmatpush1.bf16.msra.mxu1 %v10348_v36  ;;  %v10400_v35 = vld [vmem:[%s15435_s2 + $0x1588] ss:$16 sps:$4 sm:$0xff]   ;;  %v10401_v36 = vld [vmem:[%s15435_s2 + $0x15a4] ss:$16 sps:$4 sm:$0xff]  }
 0x580   :  { %6674 = vmatprep.subr.bf16.mxu0 %v10349_v37  ;;  %6760 = vmatprep.subr.bf16.mxu1 %v10350_v39  ;;  %v10402_v37 = vld [vmem:[%s15435_s2 + $0x15ac] ss:$16 sps:$4 sm:$0xff]   ;;  %v10403_v39 = vld [vmem:[%s15435_s2 + $0x15a0] ss:$16 sps:$4 sm:$0xff]  }
 0x582   :  { %6578 = vmatmul.mubr.bf16.vlgmr.msra.gmra.mrb[12].mxu0 %v13760_v27  ;;  %6664 = vmatmul.mubr.bf16.vlgmr.msra.gmra.mrb[12].mxu1 %v13760_v27  ;;  %v10355_v27 = vld [vmem:[%s15435_s2 + $0x1420] ss:$16 sps:$4 sm:$0xff]  }
 0x583   :  { %6675 = vmatpush1.bf16.msra.mxu0 %v10351_v40  ;;  %6761 = vmatpush1.bf16.msra.mxu1 %v10352_v43  ;;  %v10404_v40 = vld [vmem:[%s15435_s2 + $0x15a8] ss:$16 sps:$4 sm:$0xff]   ;;  %v10405_v43 = vld [vmem:[%s15435_s2 + $0x15c4] ss:$16 sps:$4 sm:$0xff]  }
 0x584   :  { %6676 = vmatprep.subr.bf16.mxu0 %v10353_v45  ;;  %6762 = vmatprep.subr.bf16.mxu1 %v10354_v16  ;;  %v10406_v45 = vld [vmem:[%s15435_s2 + $0x15cc] ss:$16 sps:$4 sm:$0xff]   ;;  %v10407_v16 = vld [vmem:[%s15435_s2 + $0x15c0] ss:$16 sps:$4 sm:$0xff]  }
 0x585   :  { %6706 = vmatprep.mubr.bf16.mxu0 %v13755_v9  ;;  %6792 = vmatprep.mubr.bf16.mxu1 %v13755_v9  ;;  %v10359_v9 = vld [vmem:[%s15435_s2 + $0x1440] ss:$16 sps:$4 sm:$0xff]  }
 0x587   :  { %6677 = vmatpush1.bf16.msra.mxu0 %v10355_v27  ;;  %6763 = vmatpush1.bf16.msra.mxu1 %v10356_v46  ;;  %v10408_v27 = vld [vmem:[%s15435_s2 + $0x15c8] ss:$16 sps:$4 sm:$0xff]   ;;  %v10409_v46 = vld [vmem:[%s15435_s2 + $0x15e4] ss:$16 sps:$4 sm:$0xff]  }
 0x588   :  { %6678 = vmatprep.subr.bf16.mxu0 %v10357_v17  ;;  %6764 = vmatprep.subr.bf16.mxu1 %v10358_v47  ;;  %v10410_v17 = vld [vmem:[%s15435_s2 + $0x15ec] ss:$16 sps:$4 sm:$0xff]   ;;  %v10411_v47 = vld [vmem:[%s15435_s2 + $0x15e0] ss:$16 sps:$4 sm:$0xff]  }
 0x58b   :  { %6679 = vmatpush1.bf16.msra.mxu0 %v10359_v9  ;;  %6765 = vmatpush1.bf16.msra.mxu1 %v10360_v48  ;;  %v10412_v9 = vld [vmem:[%s15435_s2 + $0x15e8] ss:$16 sps:$4 sm:$0xff]   ;;  %v10413_v48 = vld [vmem:[%s15435_s2 + $0x1604] ss:$16 sps:$4 sm:$0xff]  }
 0x58c   :  { %6680 = vmatprep.subr.bf16.mxu0 %v10361_v49  ;;  %6766 = vmatprep.subr.bf16.mxu1 %v10362_v50  ;;  %v10414_v49 = vld [vmem:[%s15435_s2 + $0x160c] ss:$16 sps:$4 sm:$0xff]   ;;  %v10415_v50 = vld [vmem:[%s15435_s2 + $0x1600] ss:$16 sps:$4 sm:$0xff]  }
 0x58f   :  { %6681 = vmatpush1.bf16.msra.mxu0 %v10363_v51  ;;  %6767 = vmatpush1.bf16.msra.mxu1 %v10364_v52  ;;  %v10416_v51 = vld [vmem:[%s15435_s2 + $0x1608] ss:$16 sps:$4 sm:$0xff]   ;;  %v10417_v52 = vld [vmem:[%s15435_s2 + $0x1624] ss:$16 sps:$4 sm:$0xff]  }
 0x590   :  { %6682 = vmatprep.subr.bf16.mxu0 %v10365_v53  ;;  %6768 = vmatprep.subr.bf16.mxu1 %v10366_v24  ;;  %v10418_v53 = vld [vmem:[%s15435_s2 + $0x162c] ss:$16 sps:$4 sm:$0xff]   ;;  %v10420_v24 = vld [vmem:[%s15435_s2 + $0x1628] ss:$16 sps:$4 sm:$0xff]  }
 0x593   :  { %6683 = vmatpush1.bf16.msra.mxu0 %v10367_v25  ;;  %6769 = vmatpush1.bf16.msra.mxu1 %v10368_v54  ;;  %v10421_v25 = vld [vmem:[%s15435_s2 + $0x1644] ss:$16 sps:$4 sm:$0xff]   ;;  %v10422_v54 = vld [vmem:[%s15435_s2 + $0x164c] ss:$16 sps:$4 sm:$0xff]  }
 0x594   :  { %6684 = vmatprep.subr.bf16.mxu0 %v10369_v55  ;;  %6770 = vmatprep.subr.bf16.mxu1 %v10370_v58  ;;  %v10424_v55 = vld [vmem:[%s15435_s2 + $0x1648] ss:$16 sps:$4 sm:$0xff]   ;;  %v10425_v58 = vld [vmem:[%s15435_s2 + $0x1664] ss:$16 sps:$4 sm:$0xff]  }
 0x597   :  { %6685 = vmatpush1.bf16.msra.mxu0 %v10371_v59  ;;  %6771 = vmatpush1.bf16.msra.mxu1 %v10372_v60  ;;  %v10426_v59 = vld [vmem:[%s15435_s2 + $0x166c] ss:$16 sps:$4 sm:$0xff]   ;;  %v10427_v60 = vld [vmem:[%s15435_s2 + $0x1660] ss:$16 sps:$4 sm:$0xff]  }
 0x598   :  { %6686 = vmatprep.subr.bf16.mxu0 %v10373_v61  ;;  %6772 = vmatprep.subr.bf16.mxu1 %v10374_v0  ;;  %v10428_v61 = vld [vmem:[%s15435_s2 + $0x1668] ss:$16 sps:$4 sm:$0xff]   ;;  %v10429_v0 = vld [vmem:[%s15435_s2 + $0x1684] ss:$16 sps:$4 sm:$0xff]  }
 0x59b   :  { %6687 = vmatpush1.bf16.msra.mxu0 %v10375_v1  ;;  %6773 = vmatpush1.bf16.msra.mxu1 %v10376_v62  ;;  %v10430_v1 = vld [vmem:[%s15435_s2 + $0x168c] ss:$16 sps:$4 sm:$0xff]   ;;  %v10431_v62 = vld [vmem:[%s15435_s2 + $0x1680] ss:$16 sps:$4 sm:$0xff]  }
 0x59c   :  { %6688 = vmatprep.subr.bf16.mxu0 %v10377_v63  ;;  %6774 = vmatprep.subr.bf16.mxu1 %v10378_v3  ;;  %v10432_v63 = vld [vmem:[%s15435_s2 + $0x1688] ss:$16 sps:$4 sm:$0xff]   ;;  %v10433_v3 = vld [vmem:[%s15435_s2 + $0x16a4] ss:$16 sps:$4 sm:$0xff]  }
 0x59f   :  { %6689 = vmatpush1.bf16.msra.mxu0 %v10379_v4  ;;  %6775 = vmatpush1.bf16.msra.mxu1 %v10380_v5  ;;  %v10434_v4 = vld [vmem:[%s15435_s2 + $0x16ac] ss:$16 sps:$4 sm:$0xff]   ;;  %v10435_v5 = vld [vmem:[%s15435_s2 + $0x16a0] ss:$16 sps:$4 sm:$0xff]  }
 0x5a0   :  { %6690 = vmatprep.subr.bf16.mxu0 %v10381_v6  ;;  %6776 = vmatprep.subr.bf16.mxu1 %v10382_v7  ;;  %v10436_v6 = vld [vmem:[%s15435_s2 + $0x16a8] ss:$16 sps:$4 sm:$0xff]   ;;  %v10437_v7 = vld [vmem:[%s15435_s2 + $0x16c4] ss:$16 sps:$4 sm:$0xff]  }
 0x5a3   :  { %6691 = vmatpush1.bf16.msra.mxu0 %v10383_v8  ;;  %6777 = vmatpush1.bf16.msra.mxu1 %v10384_v10  ;;  %v10438_v8 = vld [vmem:[%s15435_s2 + $0x16cc] ss:$16 sps:$4 sm:$0xff]   ;;  %v10439_v10 = vld [vmem:[%s15435_s2 + $0x16c0] ss:$16 sps:$4 sm:$0xff]  }
 0x5a4   :  { %6692 = vmatprep.subr.bf16.mxu0 %v10385_v20  ;;  %6778 = vmatprep.subr.bf16.mxu1 %v10386_v12  ;;  %v10440_v20 = vld [vmem:[%s15435_s2 + $0x16c8] ss:$16 sps:$4 sm:$0xff]   ;;  %v10441_v12 = vld [vmem:[%s15435_s2 + $0x16e4] ss:$16 sps:$4 sm:$0xff]  }
 0x5a7   :  { %6693 = vmatpush1.bf16.msra.mxu0 %v10387_v15  ;;  %6779 = vmatpush1.bf16.msra.mxu1 %v10388_v26  ;;  %v10442_v15 = vld [vmem:[%s15435_s2 + $0x16ec] ss:$16 sps:$4 sm:$0xff]   ;;  %v10443_v26 = vld [vmem:[%s15435_s2 + $0x16e0] ss:$16 sps:$4 sm:$0xff]  }
 0x5a8   :  { %6694 = vmatprep.subr.bf16.mxu0 %v10389_v14  ;;  %6780 = vmatprep.subr.bf16.mxu1 %v10390_v33  ;;  %v10444_v14 = vld [vmem:[%s15435_s2 + $0x16e8] ss:$16 sps:$4 sm:$0xff]   ;;  %v10445_v33 = vld [vmem:[%s15435_s2 + $0x1704] ss:$16 sps:$4 sm:$0xff]  }
 0x5ab   :  { %6695 = vmatpush1.bf16.msra.mxu0 %v10391_v29  ;;  %6781 = vmatpush1.bf16.msra.mxu1 %v10392_v23  ;;  %v10446_v29 = vld [vmem:[%s15435_s2 + $0x170c] ss:$16 sps:$4 sm:$0xff]   ;;  %v10447_v23 = vld [vmem:[%s15435_s2 + $0x1700] ss:$16 sps:$4 sm:$0xff]  }
 0x5ac   :  { %6696 = vmatprep.subr.bf16.mxu0 %v10393_v28  ;;  %6782 = vmatprep.subr.bf16.mxu1 %v10394_v30  ;;  %v10448_v28 = vld [vmem:[%s15435_s2 + $0x1708] ss:$16 sps:$4 sm:$0xff]   ;;  %v10449_v30 = vld [vmem:[%s15435_s2 + $0x1724] ss:$16 sps:$4 sm:$0xff]  }
 0x5af   :  { %6697 = vmatpush1.bf16.msra.mxu0 %v10395_v2  ;;  %6783 = vmatpush1.bf16.msra.mxu1 %v10396_v13  ;;  %v10450_v2 = vld [vmem:[%s15435_s2 + $0x172c] ss:$16 sps:$4 sm:$0xff]   ;;  %v10451_v13 = vld [vmem:[%s15435_s2 + $0x1720] ss:$16 sps:$4 sm:$0xff]  }
 0x5b0   :  { %6698 = vmatprep.subr.bf16.mxu0 %v10397_v31  ;;  %6784 = vmatprep.subr.bf16.mxu1 %v10398_v32  ;;  %v10452_v31 = vld [vmem:[%s15435_s2 + $0x1728] ss:$16 sps:$4 sm:$0xff]   ;;  %v10453_v32 = vld [vmem:[%s15435_s2 + $0x1744] ss:$16 sps:$4 sm:$0xff]  }
 0x5b3   :  { %6699 = vmatpush1.bf16.msra.mxu0 %v10399_v34  ;;  %6785 = vmatpush1.bf16.msra.mxu1 %v10400_v35  ;;  %v10454_v34 = vld [vmem:[%s15435_s2 + $0x174c] ss:$16 sps:$4 sm:$0xff]   ;;  %v10455_v35 = vld [vmem:[%s15435_s2 + $0x1740] ss:$16 sps:$4 sm:$0xff]  }
 0x5b4   :  { %6700 = vmatprep.subr.bf16.mxu0 %v10401_v36  ;;  %6786 = vmatprep.subr.bf16.mxu1 %v10402_v37  ;;  %v10456_v36 = vld [vmem:[%s15435_s2 + $0x1748] ss:$16 sps:$4 sm:$0xff]   ;;  %v10457_v37 = vld [vmem:[%s15435_s2 + $0x1764] ss:$16 sps:$4 sm:$0xff]  }
 0x5b7   :  { %6701 = vmatpush1.bf16.msra.mxu0 %v10403_v39  ;;  %6787 = vmatpush1.bf16.msra.mxu1 %v10404_v40  ;;  %v10458_v39 = vld [vmem:[%s15435_s2 + $0x176c] ss:$16 sps:$4 sm:$0xff]   ;;  %v10459_v40 = vld [vmem:[%s15435_s2 + $0x1760] ss:$16 sps:$4 sm:$0xff]  }
 0x5b8   :  { %6702 = vmatprep.subr.bf16.mxu0 %v10405_v43  ;;  %6788 = vmatprep.subr.bf16.mxu1 %v10406_v45  ;;  %v10460_v43 = vld [vmem:[%s15435_s2 + $0x1768] ss:$16 sps:$4 sm:$0xff]   ;;  %v10461_v45 = vld [vmem:[%s15435_s2 + $0x1784] ss:$16 sps:$4 sm:$0xff]  }
 0x5bb   :  { %6703 = vmatpush1.bf16.msra.mxu0 %v10407_v16  ;;  %6789 = vmatpush1.bf16.msra.mxu1 %v10408_v27  ;;  %v10462_v16 = vld [vmem:[%s15435_s2 + $0x178c] ss:$16 sps:$4 sm:$0xff]   ;;  %v10463_v27 = vld [vmem:[%s15435_s2 + $0x1780] ss:$16 sps:$4 sm:$0xff]  }
 0x5bc   :  { %6704 = vmatprep.subr.bf16.mxu0 %v10409_v46  ;;  %6790 = vmatprep.subr.bf16.mxu1 %v10410_v17  ;;  %v10464_v46 = vld [vmem:[%s15435_s2 + $0x1788] ss:$16 sps:$4 sm:$0xff]   ;;  %v10465_v17 = vld [vmem:[%s15435_s2 + $0x17a4] ss:$16 sps:$4 sm:$0xff]  }
 0x5bf   :  { %6705 = vmatpush1.bf16.msra.mxu0 %v10411_v47  ;;  %6791 = vmatpush1.bf16.msra.mxu1 %v10412_v9  ;;  %v10466_v47 = vld [vmem:[%s15435_s2 + $0x17ac] ss:$16 sps:$4 sm:$0xff]   ;;  %v10467_v9 = vld [vmem:[%s15435_s2 + $0x17a0] ss:$16 sps:$4 sm:$0xff]  }
 0x5c0   :  { %6717 = vmatprep.subr.bf16.mxu0 %v10413_v48  ;;  %6803 = vmatprep.subr.bf16.mxu1 %v10414_v49  ;;  %v10468_v48 = vld [vmem:[%s15435_s2 + $0x17a8] ss:$16 sps:$4 sm:$0xff]   ;;  %v10469_v49 = vld [vmem:[%s15435_s2 + $0x17c4] ss:$16 sps:$4 sm:$0xff]  }
 0x5c2   :  { %6707 = vmatmul.mubr.bf16.vlgmr.msra.gmra.mrb[12].mxu0 %v13950_v18  ;;  %6793 = vmatmul.mubr.bf16.vlgmr.msra.gmra.mrb[12].mxu1 %v13950_v18  ;;  %v10419_v18 = vld [vmem:[%s15435_s2 + $0x1620] ss:$16 sps:$4 sm:$0xff]  }
 0x5c3   :  { %6718 = vmatpush1.bf16.msra.mxu0 %v10415_v50  ;;  %6804 = vmatpush1.bf16.msra.mxu1 %v10416_v51  ;;  %v10470_v50 = vld [vmem:[%s15435_s2 + $0x17cc] ss:$16 sps:$4 sm:$0xff]   ;;  %v10471_v51 = vld [vmem:[%s15435_s2 + $0x17c0] ss:$16 sps:$4 sm:$0xff]  }
 0x5c4   :  { %6719 = vmatprep.subr.bf16.mxu0 %v10417_v52  ;;  %6805 = vmatprep.subr.bf16.mxu1 %v10418_v53  ;;  %v10472_v52 = vld [vmem:[%s15435_s2 + $0x17c8] ss:$16 sps:$4 sm:$0xff]   ;;  %v10473_v53 = vld [vmem:[%s15435_s2 + $0x17e4] ss:$16 sps:$4 sm:$0xff]  }
 0x5c5   :  { %6749 = vmatprep.mubr.bf16.mxu0 %v13964_v38  ;;  %6835 = vmatprep.mubr.bf16.mxu1 %v13964_v38  ;;  %v10423_v38 = vld [vmem:[%s15435_s2 + $0x1640] ss:$16 sps:$4 sm:$0xff]  }
 0x5c7   :  { %6720 = vmatpush1.bf16.msra.mxu0 %v10419_v18  ;;  %6806 = vmatpush1.bf16.msra.mxu1 %v10420_v24  ;;  %v10474_v18 = vld [vmem:[%s15435_s2 + $0x17ec] ss:$16 sps:$4 sm:$0xff]   ;;  %v10475_v24 = vld [vmem:[%s15435_s2 + $0x17e0] ss:$16 sps:$4 sm:$0xff]  }
 0x5c8   :  { %6721 = vmatprep.subr.bf16.mxu0 %v10421_v25  ;;  %6807 = vmatprep.subr.bf16.mxu1 %v10422_v54  ;;  %v10476_v25 = vld [vmem:[%s15435_s2 + $0x17e8] ss:$16 sps:$4 sm:$0xff]   ;;  %v6864_v54 = vlaneseq }
 0x5cb   :  { %6722 = vmatpush1.bf16.msra.mxu0 %v10423_v38  ;;  %6808 = vmatpush1.bf16.msra.mxu1 %v10424_v55  ;;  %v6865_v38 = vshrl.u32 %v6864_v54, 7 }
 0x5cc   :  { %6723 = vmatprep.subr.bf16.mxu0 %v10425_v58  ;;  %6809 = vmatprep.subr.bf16.mxu1 %v10426_v59  ;;  %v6862_v59 = vld [vmem:[%s15438_s3] sm:$0xf] }
 0x5cd   :  { %v6866_v55 = vsub.s32 0, %v6865_v38  ;;  %v6874_v58 = vsub.s32 2, %v6865_v38 }
 0x5cf   :  { %6724 = vmatpush1.bf16.msra.mxu0 %v10427_v60  ;;  %6810 = vmatpush1.bf16.msra.mxu1 %v10428_v61  ;;  %v6870_v60 = vsub.s32 1, %v6865_v38  ;;  %v6878_v61 = vsub.s32 3, %v6865_v38 }
 0x5d0   :  { %6725 = vmatprep.subr.bf16.mxu0 %v10429_v0  ;;  %6811 = vmatprep.subr.bf16.mxu1 %v10430_v1  ;;  %v6867_v0 = vrot.slane %v6862_v59, %v6866_v55  ;;  %v6875_v1 = vrot.slane %v6862_v59, %v6874_v58 }
 0x5d3   :  { %6726 = vmatpush1.bf16.msra.mxu0 %v10431_v62  ;;  %6812 = vmatpush1.bf16.msra.mxu1 %v10432_v63 }
 0x5d4   :  { %6727 = vmatprep.subr.bf16.mxu0 %v10433_v3  ;;  %6813 = vmatprep.subr.bf16.mxu1 %v10434_v4  ;;  %v6871_v3 = vrot.slane %v6862_v59, %v6870_v60  ;;  %v6879_v4 = vrot.slane %v6862_v59, %v6878_v61 }
 0x5d7   :  { %6728 = vmatpush1.bf16.msra.mxu0 %v10435_v5  ;;  %6814 = vmatpush1.bf16.msra.mxu1 %v10436_v6 }
 0x5d8   :  { %6729 = vmatprep.subr.bf16.mxu0 %v10437_v7  ;;  %6815 = vmatprep.subr.bf16.mxu1 %v10438_v8 }
 0x5db   :  { %6730 = vmatpush1.bf16.msra.mxu0 %v10439_v10  ;;  %6816 = vmatpush1.bf16.msra.mxu1 %v10440_v20 }
 0x5dc   :  { %6731 = vmatprep.subr.bf16.mxu0 %v10441_v12  ;;  %6817 = vmatprep.subr.bf16.mxu1 %v10442_v15 }
 0x5df   :  { %6732 = vmatpush1.bf16.msra.mxu0 %v10443_v26  ;;  %6818 = vmatpush1.bf16.msra.mxu1 %v10444_v14 }
 0x5e0   :  { %6733 = vmatprep.subr.bf16.mxu0 %v10445_v33  ;;  %6819 = vmatprep.subr.bf16.mxu1 %v10446_v29 }
 0x5e3   :  { %6734 = vmatpush1.bf16.msra.mxu0 %v10447_v23  ;;  %6820 = vmatpush1.bf16.msra.mxu1 %v10448_v28 }
 0x5e4   :  { %6735 = vmatprep.subr.bf16.mxu0 %v10449_v30  ;;  %6821 = vmatprep.subr.bf16.mxu1 %v10450_v2 }
 0x5e7   :  { %6736 = vmatpush1.bf16.msra.mxu0 %v10451_v13  ;;  %6822 = vmatpush1.bf16.msra.mxu1 %v10452_v31 }
 0x5e8   :  { %6737 = vmatprep.subr.bf16.mxu0 %v10453_v32  ;;  %6823 = vmatprep.subr.bf16.mxu1 %v10454_v34 }
 0x5eb   :  { %6738 = vmatpush1.bf16.msra.mxu0 %v10455_v35  ;;  %6824 = vmatpush1.bf16.msra.mxu1 %v10456_v36 }
 0x5ec   :  { %6739 = vmatprep.subr.bf16.mxu0 %v10457_v37  ;;  %6825 = vmatprep.subr.bf16.mxu1 %v10458_v39 }
 0x5ef   :  { %6740 = vmatpush1.bf16.msra.mxu0 %v10459_v40  ;;  %6826 = vmatpush1.bf16.msra.mxu1 %v10460_v43 }
 0x5f0   :  { %6741 = vmatprep.subr.bf16.mxu0 %v10461_v45  ;;  %6827 = vmatprep.subr.bf16.mxu1 %v10462_v16  ;;  %v6936_v45 = vld [vmem:[%s15439_s4 + $0x10] sm:$0xff]  ;;  %v6942_v16 = vld [vmem:[%s15439_s4 + $0x18] sm:$0xff] }
 0x5f3   :  { %6742 = vmatpush1.bf16.msra.mxu0 %v10463_v27  ;;  %6828 = vmatpush1.bf16.msra.mxu1 %v10464_v46 }
 0x5f4   :  { %6743 = vmatprep.subr.bf16.mxu0 %v10465_v17  ;;  %6829 = vmatprep.subr.bf16.mxu1 %v10466_v47 }
 0x5f7   :  { %6744 = vmatpush1.bf16.msra.mxu0 %v10467_v9  ;;  %6830 = vmatpush1.bf16.msra.mxu1 %v10468_v48 }
 0x5f8   :  { %6745 = vmatprep.subr.bf16.mxu0 %v10469_v49  ;;  %6831 = vmatprep.subr.bf16.mxu1 %v10470_v50 }
 0x5fb   :  { %6746 = vmatpush1.bf16.msra.mxu0 %v10471_v51  ;;  %6832 = vmatpush1.bf16.msra.mxu1 %v10472_v52 }
 0x5fc   :  { %6747 = vmatprep.subr.bf16.mxu0 %v10473_v53  ;;  %6833 = vmatprep.subr.bf16.mxu1 %v10474_v18 }
 0x5ff   :  { %6748 = vmatpush1.bf16.msra.mxu0 %v10475_v24  ;;  %6834 = vmatpush1.bf16.msra.mxu1 %v10476_v25 }
 0x602   :  { %6750 = vmatmul.mubr.bf16.vlgmr.msra.gmra.mrb[12].mxu0 %v14152_v44  ;;  %6836 = vmatmul.mubr.bf16.vlgmr.msra.gmra.mrb[12].mxu1 %v14152_v44 }
 0x6d5   :  { %v6751_v62 = vpop.f32.mrb[12].mxu0  ;;  %v6837_v63 = vpop.f32.mrb[12].mxu1 }
 0x6d6   :  { %v6854_v5 = vmax.f32 %v14821_v41, %v6751_v62  ;;  %v6856_v44 = vmax.f32 %v14826_v42, %v6837_v63  ;;  %v6753_v6 = vpop.f32.mrb[13].mxu0  ;;  %v6839_v7 = vpop.f32.mrb[13].mxu1 }
 0x6d7   :  { %v6855_v8 = vmax.f32 %v14831_v56, %v6753_v6  ;;  %v6857_v10 = vmax.f32 %v14836_v57, %v6839_v7  ;;  %v6755_v20 = vpop.f32.mrb[14].mxu0  ;;  %v6841_v12 = vpop.f32.mrb[14].mxu1 }
 0x6d8   :  { %v6884_v15 = vadd.f32 %v6867_v0, %v6854_v5  ;;  %v6886_v26 = vadd.f32 %v6875_v1, %v6856_v44  ;;  %v6858_v14 = vmax.f32 %v14847_v19, %v6755_v20  ;;  %v6860_v41 = vmax.f32 %v14852_v11, %v6841_v12  ;;  %v6757_v33 = vpop.f32.mrb[15].mxu0  ;;  %v6843_v42 = vpop.f32.mrb[15].mxu1 }
 0x6d9   :  { %v6885_v29 = vadd.f32 %v6871_v3, %v6855_v8  ;;  %v6887_v23 = vadd.f32 %v6879_v4, %v6857_v10  ;;  %v6859_v28 = vmax.f32 %v14863_v21, %v6757_v33  ;;  %v6861_v57 = vmax.f32 %v14868_v22, %v6843_v42 }
 0x6da   :  { %v6892_v30 = vmax.f32 %v6884_v15, 0.0  ;;  %v6894_v2 = vmax.f32 %v6886_v26, 0.0  ;;  %v6888_v13 = vadd.f32 %v6867_v0, %v6858_v14  ;;  %v6890_v19 = vadd.f32 %v6875_v1, %v6860_v41 }
 0x6db   :  { %v6893_v31 = vmax.f32 %v6885_v29, 0.0  ;;  %v6895_v21 = vmax.f32 %v6887_v23, 0.0  ;;  %v6889_v32 = vadd.f32 %v6871_v3, %v6859_v28  ;;  %v6891_v34 = vadd.f32 %v6879_v4, %v6861_v57 }
 0x6dc   :  { %v6896_v22 = vmax.f32 %v6888_v13, 0.0  ;;  %v6898_v36 = vmax.f32 %v6890_v19, 0.0 }
 0x6dd   :  { %v8369_v37 = vpack.c.bf16 %v6893_v31, %v6892_v30  ;;  %v8370_v39 = vpack.c.bf16 %v6895_v21, %v6894_v2  ;;  %v6897_v40 = vmax.f32 %v6889_v32, 0.0  ;;  %v6899_v43 = vmax.f32 %v6891_v34, 0.0 }
 0x6df   :  { %6924 = vst [vmem:[%s15439_s4] sm:$0xff] %v8369_v37  ;;  %6928 = vst.msk [vmem:[%s15439_s4 + $0x8] sm:$0xff] %vm6927_vm8, %v8370_v39  ;;  %v8371_v27 = vpack.c.bf16 %v6897_v40, %v6896_v22  ;;  %v8372_v46 = vpack.c.bf16 %v6899_v43, %v6898_v36 }
 0x6e1   :  { %v6937_v17 = vsel %vm6935_vm9, %v8371_v27, %v6936_v45  ;;  %v6943_v47 = vsel %vm6941_vm10, %v8372_v46, %v6942_v16 }
 0x6e2   :  { %6938 = vst [vmem:[%s15439_s4 + $0x10] sm:$0xff] %v6937_v17  ;;  %6944 = vst [vmem:[%s15439_s4 + $0x18] sm:$0xff] %v6943_v47 }

// kernel: classifier_cnn3_forward.6
= control target key start
LH: loop header
LB: loop body
LE: loop exit
PB: predicated region body
PF: predicated region fallthrough
CT: control target
= control target key end

     0   :  { %vm560_vm0 = vcmask 523264   ;;  %vm4378_vm1 = vcmask 1040384   ;;  %vm4379_vm2 = vsmask.f32 256  ;;  %vm4381_vm3 = vcmask 520196   ;;  %s9263_s2 = inlined_call_operand.vmem [shape: bf16[6,576,192], index: 2, kind: input, shape index: {}]   ;;  %s9264_s1 = inlined_call_operand.vmem [shape: bf16[10,576], index: 1, kind: input, shape index: {}]   ;;  %s9265_s0 = inlined_call_operand.vmem [shape: bf16[10,576], index: 0, kind: input, shape index: {}]   ;;  %s9266_s3 = inlined_call_operand.vmem [shape: f32[1,192], index: 3, kind: input, shape index: {}]   ;;  %s9267_s4 = inlined_call_operand.vmem [shape: bf16[10,192], index: 4, kind: output, shape index: {}]  }
   0x1   :  { %v5339_v0 = vld [vmem:[%s9263_s2 + $0x244] ss:$8 sps:$4 sm:$0xff]   ;;  %v5343_v2 = vld [vmem:[%s9263_s2 + $0x240] ss:$8 sps:$4 sm:$0xff]   ;;  %v5345_v4 = vld [vmem:[%s9263_s2 + $0x254] ss:$8 sps:$4 sm:$0xff]  }
   0x2   :  { %v5341_v1 = vld [vmem:[%s9263_s2 + $0x904] ss:$8 sps:$4 sm:$0xff]   ;;  %564 = vmatprep.subr.bf16.mxu0 %v5339_v0  ;;  %v5344_v3 = vld [vmem:[%s9263_s2 + $0x900] ss:$8 sps:$4 sm:$0xff]   ;;  %v5347_v5 = vld [vmem:[%s9263_s2 + $0x914] ss:$8 sps:$4 sm:$0xff]  }
   0x3   :  { %2323 = vmatprep.subr.bf16.mxu1 %v5341_v1  ;;  %565 = vmatpush1.bf16.msra.mxu0 %v5343_v2  ;;  %v5349_v6 = vld [vmem:[%s9263_s2 + $0x250] ss:$8 sps:$4 sm:$0xff]   ;;  %v5351_v8 = vld [vmem:[%s9263_s2 + $0x264] ss:$8 sps:$4 sm:$0xff]   ;;  %v5355_v10 = vld [vmem:[%s9263_s2 + $0x260] ss:$8 sps:$4 sm:$0xff]  }
   0x4   :  { %2324 = vmatpush1.bf16.msra.mxu1 %v5344_v3  ;;  %566 = vmatprep.subr.bf16.mxu0 %v5345_v4  ;;  %v5350_v7 = vld [vmem:[%s9263_s2 + $0x910] ss:$8 sps:$4 sm:$0xff]   ;;  %v5353_v9 = vld [vmem:[%s9263_s2 + $0x924] ss:$8 sps:$4 sm:$0xff]   ;;  %v5356_v11 = vld [vmem:[%s9263_s2 + $0x920] ss:$8 sps:$4 sm:$0xff]  }
   0x5   :  { %2325 = vmatprep.subr.bf16.mxu1 %v5347_v5  ;;  %v5357_v12 = vld [vmem:[%s9263_s2 + $0x274] ss:$8 sps:$4 sm:$0xff]   ;;  %v5361_v14 = vld [vmem:[%s9263_s2 + $0x270] ss:$8 sps:$4 sm:$0xff]   ;;  %v5363_v16 = vld [vmem:[%s9263_s2 + $0x284] ss:$8 sps:$4 sm:$0xff]  }
   0x6   :  { %v5359_v13 = vld [vmem:[%s9263_s2 + $0x934] ss:$8 sps:$4 sm:$0xff]   ;;  %v5362_v15 = vld [vmem:[%s9263_s2 + $0x930] ss:$8 sps:$4 sm:$0xff]   ;;  %v5365_v17 = vld [vmem:[%s9263_s2 + $0x944] ss:$8 sps:$4 sm:$0xff]  }
   0x7   :  { %567 = vmatpush1.bf16.msra.mxu0 %v5349_v6  ;;  %v5367_v18 = vld [vmem:[%s9263_s2 + $0x280] ss:$8 sps:$4 sm:$0xff]   ;;  %v5369_v20 = vld [vmem:[%s9263_s2 + $0x294] ss:$8 sps:$4 sm:$0xff]   ;;  %v5373_v22 = vld [vmem:[%s9263_s2 + $0x290] ss:$8 sps:$4 sm:$0xff]  }
   0x8   :  { %2326 = vmatpush1.bf16.msra.mxu1 %v5350_v7  ;;  %568 = vmatprep.subr.bf16.mxu0 %v5351_v8  ;;  %v5368_v19 = vld [vmem:[%s9263_s2 + $0x940] ss:$8 sps:$4 sm:$0xff]   ;;  %v5371_v21 = vld [vmem:[%s9263_s2 + $0x954] ss:$8 sps:$4 sm:$0xff]   ;;  %v5374_v23 = vld [vmem:[%s9263_s2 + $0x950] ss:$8 sps:$4 sm:$0xff]  }
   0x9   :  { %2327 = vmatprep.subr.bf16.mxu1 %v5353_v9  ;;  %v5375_v24 = vld [vmem:[%s9263_s2 + $0x2a4] ss:$8 sps:$4 sm:$0xff]   ;;  %v5379_v26 = vld [vmem:[%s9263_s2 + $0x2a0] ss:$8 sps:$4 sm:$0xff]   ;;  %v5381_v28 = vld [vmem:[%s9263_s2 + $0x2b4] ss:$8 sps:$4 sm:$0xff]  }
   0xa   :  { %v5377_v25 = vld [vmem:[%s9263_s2 + $0x964] ss:$8 sps:$4 sm:$0xff]   ;;  %v5380_v27 = vld [vmem:[%s9263_s2 + $0x960] ss:$8 sps:$4 sm:$0xff]   ;;  %v5383_v29 = vld [vmem:[%s9263_s2 + $0x974] ss:$8 sps:$4 sm:$0xff]  }
   0xb   :  { %569 = vmatpush1.bf16.msra.mxu0 %v5355_v10  ;;  %v5385_v30 = vld [vmem:[%s9263_s2 + $0x2b0] ss:$8 sps:$4 sm:$0xff]   ;;  %v5387_v32 = vld [vmem:[%s9263_s2 + $0x2c4] ss:$8 sps:$4 sm:$0xff]   ;;  %v5391_v34 = vld [vmem:[%s9263_s2 + $0x2c0] ss:$8 sps:$4 sm:$0xff]  }
   0xc   :  { %2328 = vmatpush1.bf16.msra.mxu1 %v5356_v11  ;;  %570 = vmatprep.subr.bf16.mxu0 %v5357_v12  ;;  %v5386_v31 = vld [vmem:[%s9263_s2 + $0x970] ss:$8 sps:$4 sm:$0xff]   ;;  %v5389_v33 = vld [vmem:[%s9263_s2 + $0x984] ss:$8 sps:$4 sm:$0xff]   ;;  %v5392_v35 = vld [vmem:[%s9263_s2 + $0x980] ss:$8 sps:$4 sm:$0xff]  }
   0xd   :  { %2329 = vmatprep.subr.bf16.mxu1 %v5359_v13  ;;  %v5393_v36 = vld [vmem:[%s9263_s2 + $0x2d4] ss:$8 sps:$4 sm:$0xff]   ;;  %v5397_v38 = vld [vmem:[%s9263_s2 + $0x2d0] ss:$8 sps:$4 sm:$0xff]   ;;  %v5399_v40 = vld [vmem:[%s9263_s2 + $0x2e4] ss:$8 sps:$4 sm:$0xff]  }
   0xe   :  { %v5395_v37 = vld [vmem:[%s9263_s2 + $0x994] ss:$8 sps:$4 sm:$0xff]   ;;  %v5398_v39 = vld [vmem:[%s9263_s2 + $0x990] ss:$8 sps:$4 sm:$0xff]   ;;  %v5401_v41 = vld [vmem:[%s9263_s2 + $0x9a4] ss:$8 sps:$4 sm:$0xff]  }
   0xf   :  { %571 = vmatpush1.bf16.msra.mxu0 %v5361_v14  ;;  %v5403_v42 = vld [vmem:[%s9263_s2 + $0x2e0] ss:$8 sps:$4 sm:$0xff]   ;;  %v5405_v44 = vld [vmem:[%s9263_s2 + $0x2f4] ss:$8 sps:$4 sm:$0xff]   ;;  %v5409_v46 = vld [vmem:[%s9263_s2 + $0x2f0] ss:$8 sps:$4 sm:$0xff]  }
  0x10   :  { %2330 = vmatpush1.bf16.msra.mxu1 %v5362_v15  ;;  %572 = vmatprep.subr.bf16.mxu0 %v5363_v16  ;;  %v5404_v43 = vld [vmem:[%s9263_s2 + $0x9a0] ss:$8 sps:$4 sm:$0xff]   ;;  %v5407_v45 = vld [vmem:[%s9263_s2 + $0x9b4] ss:$8 sps:$4 sm:$0xff]   ;;  %v5410_v48 = vld [vmem:[%s9263_s2 + $0x9b0] ss:$8 sps:$4 sm:$0xff]  }
  0x11   :  { %2331 = vmatprep.subr.bf16.mxu1 %v5365_v17  ;;  %v5435_v47 = vld [vmem:[%s9264_s1 + $0x4] ss:$20 sps:$4 sm:$0x1f]   ;;  %v5415_v51 = vld [vmem:[%s9263_s2 + $0x300] ss:$8 sps:$4 sm:$0xff]   ;;  %vm4374_vm5 = vcmask 1043456   ;;  %vm4380_vm7 = vmand %vm4378_vm1, %vm4379_vm2 }
  0x12   :  { %v5411_v49 = vld [vmem:[%s9263_s2 + $0x304] ss:$8 sps:$4 sm:$0xff]   ;;  %596 = vmatprep.mubr.bf16.mxu0 %v5435_v47  ;;  %2355 = vmatprep.mubr.bf16.mxu1 %v5435_v47  ;;  %v5416_v52 = vld [vmem:[%s9263_s2 + $0x9c0] ss:$8 sps:$4 sm:$0xff]   ;;  %v5417_v53 = vld [vmem:[%s9263_s2 + $0x314] ss:$8 sps:$4 sm:$0xff]  }
  0x13   :  { %573 = vmatpush1.bf16.msra.mxu0 %v5367_v18  ;;  %v5413_v50 = vld [vmem:[%s9263_s2 + $0x9c4] ss:$8 sps:$4 sm:$0xff]   ;;  %v5419_v54 = vld [vmem:[%s9263_s2 + $0x9d4] ss:$8 sps:$4 sm:$0xff]   ;;  %v5421_v55 = vld [vmem:[%s9263_s2 + $0x310] ss:$8 sps:$4 sm:$0xff]  }
  0x14   :  { %2332 = vmatpush1.bf16.msra.mxu1 %v5368_v19  ;;  %574 = vmatprep.subr.bf16.mxu0 %v5369_v20  ;;  %v5422_v56 = vld [vmem:[%s9263_s2 + $0x9d0] ss:$8 sps:$4 sm:$0xff]   ;;  %v5423_v57 = vld [vmem:[%s9263_s2 + $0x324] ss:$8 sps:$4 sm:$0xff]   ;;  %v5427_v59 = vld [vmem:[%s9263_s2 + $0x320] ss:$8 sps:$4 sm:$0xff]  }
  0x15   :  { %2333 = vmatprep.subr.bf16.mxu1 %v5371_v21  ;;  %v5425_v58 = vld [vmem:[%s9263_s2 + $0x9e4] ss:$8 sps:$4 sm:$0xff]   ;;  %v5428_v60 = vld [vmem:[%s9263_s2 + $0x9e0] ss:$8 sps:$4 sm:$0xff]   ;;  %v5429_v61 = vld [vmem:[%s9263_s2 + $0x334] ss:$8 sps:$4 sm:$0xff]  }
  0x16   :  { %v5431_v62 = vld [vmem:[%s9263_s2 + $0x9f4] ss:$8 sps:$4 sm:$0xff]   ;;  %v5433_v63 = vld [vmem:[%s9263_s2 + $0x330] ss:$8 sps:$4 sm:$0xff]   ;;  %v5439_v1 = vld [vmem:[%s9263_s2 + $0x344] ss:$8 sps:$4 sm:$0xff]  }
  0x17   :  { %575 = vmatpush1.bf16.msra.mxu0 %v5373_v22  ;;  %v5434_v0 = vld [vmem:[%s9263_s2 + $0x9f0] ss:$8 sps:$4 sm:$0xff]   ;;  %v5442_v2 = vld [vmem:[%s9263_s2 + $0xa04] ss:$8 sps:$4 sm:$0xff]   ;;  %v5437_v3 = vld [vmem:[%s9263_s2 + $0x340] ss:$8 sps:$4 sm:$0xff]  }
  0x18   :  { %2334 = vmatpush1.bf16.msra.mxu1 %v5374_v23  ;;  %576 = vmatprep.subr.bf16.mxu0 %v5375_v24  ;;  %v5440_v4 = vld [vmem:[%s9263_s2 + $0xa00] ss:$8 sps:$4 sm:$0xff]   ;;  %v5446_v6 = vld [vmem:[%s9263_s2 + $0x354] ss:$8 sps:$4 sm:$0xff]   ;;  %v5444_v8 = vld [vmem:[%s9263_s2 + $0x350] ss:$8 sps:$4 sm:$0xff]  }
  0x19   :  { %2335 = vmatprep.subr.bf16.mxu1 %v5377_v25  ;;  %v5443_v5 = vld [vmem:[%s9264_s1] ss:$20 sps:$4 sm:$0x1f]   ;;  %v5447_v9 = vld [vmem:[%s9263_s2 + $0xa10] ss:$8 sps:$4 sm:$0xff]   ;;  %vm4375_vm6 = vcmask 523268  }
  0x1a   :  { %v5449_v7 = vld [vmem:[%s9263_s2 + $0xa14] ss:$8 sps:$4 sm:$0xff]   ;;  %v5452_v10 = vld [vmem:[%s9263_s2 + $0x364] ss:$8 sps:$4 sm:$0xff]   ;;  %v5450_v12 = vld [vmem:[%s9263_s2 + $0x360] ss:$8 sps:$4 sm:$0xff]  }
  0x1b   :  { %577 = vmatpush1.bf16.msra.mxu0 %v5379_v26  ;;  %v5455_v11 = vld [vmem:[%s9263_s2 + $0xa24] ss:$8 sps:$4 sm:$0xff]   ;;  %v5453_v13 = vld [vmem:[%s9263_s2 + $0xa20] ss:$8 sps:$4 sm:$0xff]   ;;  %v5458_v14 = vld [vmem:[%s9263_s2 + $0x374] ss:$8 sps:$4 sm:$0xff]  }
  0x1c   :  { %2336 = vmatpush1.bf16.msra.mxu1 %v5380_v27  ;;  %578 = vmatprep.subr.bf16.mxu0 %v5381_v28  ;;  %v5461_v15 = vld [vmem:[%s9263_s2 + $0xa34] ss:$8 sps:$4 sm:$0xff]   ;;  %v5456_v16 = vld [vmem:[%s9263_s2 + $0x370] ss:$8 sps:$4 sm:$0xff]   ;;  %v5464_v18 = vld [vmem:[%s9263_s2 + $0x384] ss:$8 sps:$4 sm:$0xff]  }
  0x1d   :  { %2337 = vmatprep.subr.bf16.mxu1 %v5383_v29  ;;  %v5459_v17 = vld [vmem:[%s9263_s2 + $0xa30] ss:$8 sps:$4 sm:$0xff]   ;;  %v5467_v19 = vld [vmem:[%s9263_s2 + $0xa44] ss:$8 sps:$4 sm:$0xff]   ;;  %v5462_v20 = vld [vmem:[%s9263_s2 + $0x380] ss:$8 sps:$4 sm:$0xff]  }
  0x1e   :  { %v5465_v21 = vld [vmem:[%s9263_s2 + $0xa40] ss:$8 sps:$4 sm:$0xff]   ;;  %v5470_v22 = vld [vmem:[%s9263_s2 + $0x394] ss:$8 sps:$4 sm:$0xff]   ;;  %v5468_v24 = vld [vmem:[%s9263_s2 + $0x390] ss:$8 sps:$4 sm:$0xff]  }
  0x1f   :  { %579 = vmatpush1.bf16.msra.mxu0 %v5385_v30  ;;  %v5473_v23 = vld [vmem:[%s9263_s2 + $0xa54] ss:$8 sps:$4 sm:$0xff]   ;;  %v5471_v25 = vld [vmem:[%s9263_s2 + $0xa50] ss:$8 sps:$4 sm:$0xff]   ;;  %v5476_v26 = vld [vmem:[%s9263_s2 + $0x3a4] ss:$8 sps:$4 sm:$0xff]  }
  0x20   :  { %2338 = vmatpush1.bf16.msra.mxu1 %v5386_v31  ;;  %580 = vmatprep.subr.bf16.mxu0 %v5387_v32  ;;  %v5479_v27 = vld [vmem:[%s9263_s2 + $0xa64] ss:$8 sps:$4 sm:$0xff]   ;;  %v5474_v28 = vld [vmem:[%s9263_s2 + $0x3a0] ss:$8 sps:$4 sm:$0xff]   ;;  %v5482_v31 = vld [vmem:[%s9263_s2 + $0x3b4] ss:$8 sps:$4 sm:$0xff]  }
  0x21   :  { %2339 = vmatprep.subr.bf16.mxu1 %v5389_v33  ;;  %v5534_v29 = vld [vmem:[%s9264_s1 + $0xc] ss:$20 sps:$4 sm:$0x1f]   ;;  %v5485_v32 = vld [vmem:[%s9263_s2 + $0xa74] ss:$8 sps:$4 sm:$0xff]   ;;  %vm4376_vm9 = vmor %vm4375_vm6, %vm4374_vm5 }
  0x22   :  { %v5477_v30 = vld [vmem:[%s9263_s2 + $0xa60] ss:$8 sps:$4 sm:$0xff]   ;;  %v5480_v33 = vld [vmem:[%s9263_s2 + $0x3b0] ss:$8 sps:$4 sm:$0xff]   ;;  %v5506_v47 = vld [vmem:[%s9263_s2 + $0x3f4] ss:$8 sps:$4 sm:$0xff]  }
  0x23   :  { %581 = vmatpush1.bf16.msra.mxu0 %v5391_v34  ;;  %v5483_v34 = vld [vmem:[%s9263_s2 + $0xa70] ss:$8 sps:$4 sm:$0xff]   ;;  %vm4382_vm4 = vsmask.f32 4352 }
  0x24   :  { %2340 = vmatpush1.bf16.msra.mxu1 %v5392_v35  ;;  %582 = vmatprep.subr.bf16.mxu0 %v5393_v36  ;;  %v5488_v35 = vld [vmem:[%s9263_s2 + $0x3c4] ss:$8 sps:$4 sm:$0xff]   ;;  %vm4383_vm8 = vmand %vm4381_vm3, %vm4382_vm4 }
  0x25   :  { %2341 = vmatprep.subr.bf16.mxu1 %v5395_v37  ;;  %v5491_v36 = vld [vmem:[%s9263_s2 + $0xa84] ss:$8 sps:$4 sm:$0xff]   ;;  %v5486_v37 = vld [vmem:[%s9263_s2 + $0x3c0] ss:$8 sps:$4 sm:$0xff]   ;;  %vm4384_vm10 = vmor %vm4383_vm8, %vm4380_vm7 }
  0x27   :  { %583 = vmatpush1.bf16.msra.mxu0 %v5397_v38  ;;  %v5489_v38 = vld [vmem:[%s9263_s2 + $0xa80] ss:$8 sps:$4 sm:$0xff]  }
  0x28   :  { %2342 = vmatpush1.bf16.msra.mxu1 %v5398_v39  ;;  %584 = vmatprep.subr.bf16.mxu0 %v5399_v40  ;;  %v5494_v39 = vld [vmem:[%s9263_s2 + $0x3d4] ss:$8 sps:$4 sm:$0xff]  }
  0x29   :  { %2343 = vmatprep.subr.bf16.mxu1 %v5401_v41  ;;  %v5497_v40 = vld [vmem:[%s9263_s2 + $0xa94] ss:$8 sps:$4 sm:$0xff]   ;;  %v5492_v41 = vld [vmem:[%s9263_s2 + $0x3d0] ss:$8 sps:$4 sm:$0xff]  }
  0x2b   :  { %585 = vmatpush1.bf16.msra.mxu0 %v5403_v42  ;;  %v5495_v42 = vld [vmem:[%s9263_s2 + $0xa90] ss:$8 sps:$4 sm:$0xff]  }
  0x2c   :  { %2344 = vmatpush1.bf16.msra.mxu1 %v5404_v43  ;;  %586 = vmatprep.subr.bf16.mxu0 %v5405_v44  ;;  %v5500_v43 = vld [vmem:[%s9263_s2 + $0x3e4] ss:$8 sps:$4 sm:$0xff]  }
  0x2d   :  { %2345 = vmatprep.subr.bf16.mxu1 %v5407_v45  ;;  %v5503_v44 = vld [vmem:[%s9263_s2 + $0xaa4] ss:$8 sps:$4 sm:$0xff]   ;;  %v5498_v45 = vld [vmem:[%s9263_s2 + $0x3e0] ss:$8 sps:$4 sm:$0xff]  }
  0x2f   :  { %587 = vmatpush1.bf16.msra.mxu0 %v5409_v46  ;;  %v5501_v46 = vld [vmem:[%s9263_s2 + $0xaa0] ss:$8 sps:$4 sm:$0xff]  }
  0x30   :  { %2346 = vmatpush1.bf16.msra.mxu1 %v5410_v48  ;;  %588 = vmatprep.subr.bf16.mxu0 %v5411_v49  ;;  %v5509_v48 = vld [vmem:[%s9263_s2 + $0xab4] ss:$8 sps:$4 sm:$0xff]   ;;  %v5504_v49 = vld [vmem:[%s9263_s2 + $0x3f0] ss:$8 sps:$4 sm:$0xff]  }
  0x31   :  { %2347 = vmatprep.subr.bf16.mxu1 %v5413_v50  ;;  %v5507_v50 = vld [vmem:[%s9263_s2 + $0xab0] ss:$8 sps:$4 sm:$0xff]  }
  0x33   :  { %589 = vmatpush1.bf16.msra.mxu0 %v5415_v51  ;;  %v5512_v51 = vld [vmem:[%s9263_s2 + $0x404] ss:$8 sps:$4 sm:$0xff]  }
  0x34   :  { %2348 = vmatpush1.bf16.msra.mxu1 %v5416_v52  ;;  %590 = vmatprep.subr.bf16.mxu0 %v5417_v53  ;;  %v5515_v52 = vld [vmem:[%s9263_s2 + $0xac4] ss:$8 sps:$4 sm:$0xff]   ;;  %v5510_v53 = vld [vmem:[%s9263_s2 + $0x400] ss:$8 sps:$4 sm:$0xff]  }
  0x35   :  { %2349 = vmatprep.subr.bf16.mxu1 %v5419_v54  ;;  %v5513_v54 = vld [vmem:[%s9263_s2 + $0xac0] ss:$8 sps:$4 sm:$0xff]  }
  0x37   :  { %591 = vmatpush1.bf16.msra.mxu0 %v5421_v55  ;;  %v5518_v55 = vld [vmem:[%s9263_s2 + $0x414] ss:$8 sps:$4 sm:$0xff]  }
  0x38   :  { %2350 = vmatpush1.bf16.msra.mxu1 %v5422_v56  ;;  %592 = vmatprep.subr.bf16.mxu0 %v5423_v57  ;;  %v5521_v56 = vld [vmem:[%s9263_s2 + $0xad4] ss:$8 sps:$4 sm:$0xff]   ;;  %v5516_v57 = vld [vmem:[%s9263_s2 + $0x410] ss:$8 sps:$4 sm:$0xff]  }
  0x39   :  { %2351 = vmatprep.subr.bf16.mxu1 %v5425_v58  ;;  %v5519_v58 = vld [vmem:[%s9263_s2 + $0xad0] ss:$8 sps:$4 sm:$0xff]  }
  0x3b   :  { %593 = vmatpush1.bf16.msra.mxu0 %v5427_v59  ;;  %v5524_v59 = vld [vmem:[%s9263_s2 + $0x424] ss:$8 sps:$4 sm:$0xff]  }
  0x3c   :  { %2352 = vmatpush1.bf16.msra.mxu1 %v5428_v60  ;;  %594 = vmatprep.subr.bf16.mxu0 %v5429_v61  ;;  %v5527_v60 = vld [vmem:[%s9263_s2 + $0xae4] ss:$8 sps:$4 sm:$0xff]   ;;  %v5522_v61 = vld [vmem:[%s9263_s2 + $0x420] ss:$8 sps:$4 sm:$0xff]  }
  0x3d   :  { %2353 = vmatprep.subr.bf16.mxu1 %v5431_v62  ;;  %v5525_v62 = vld [vmem:[%s9263_s2 + $0xae0] ss:$8 sps:$4 sm:$0xff]  }
  0x3f   :  { %595 = vmatpush1.bf16.msra.mxu0 %v5433_v63  ;;  %v5530_v63 = vld [vmem:[%s9263_s2 + $0x434] ss:$8 sps:$4 sm:$0xff]  }
  0x40   :  { %2354 = vmatpush1.bf16.msra.mxu1 %v5434_v0  ;;  %607 = vmatprep.subr.bf16.mxu0 %v5439_v1  ;;  %v5533_v0 = vld [vmem:[%s9263_s2 + $0xaf4] ss:$8 sps:$4 sm:$0xff]   ;;  %v5528_v1 = vld [vmem:[%s9263_s2 + $0x430] ss:$8 sps:$4 sm:$0xff]  }
  0x41   :  { %2366 = vmatprep.subr.bf16.mxu1 %v5442_v2  ;;  %v5531_v2 = vld [vmem:[%s9263_s2 + $0xaf0] ss:$8 sps:$4 sm:$0xff]  }
  0x42   :  { %597 = vmatmul.mubr.bf16.vlgmr.msra.gmra.mrb[0].mxu0 %v5443_v5 }
  0x43   :  { %2356 = vmatmul.mubr.bf16.vlgmr.msra.gmra.mrb[0].mxu1 %v5443_v5  ;;  %608 = vmatpush1.bf16.msra.mxu0 %v5437_v3  ;;  %v5538_v3 = vld [vmem:[%s9263_s2 + $0x444] ss:$8 sps:$4 sm:$0xff]   ;;  %v5536_v5 = vld [vmem:[%s9263_s2 + $0x440] ss:$8 sps:$4 sm:$0xff]  }
  0x44   :  { %2367 = vmatpush1.bf16.msra.mxu1 %v5440_v4  ;;  %609 = vmatprep.subr.bf16.mxu0 %v5446_v6  ;;  %v5541_v4 = vld [vmem:[%s9263_s2 + $0xb04] ss:$8 sps:$4 sm:$0xff]   ;;  %v5542_v6 = vld [vmem:[%s9264_s1 + $0x8] ss:$20 sps:$4 sm:$0x1f]  }
  0x45   :  { %2368 = vmatprep.subr.bf16.mxu1 %v5449_v7  ;;  %639 = vmatprep.mubr.bf16.mxu0 %v5534_v29  ;;  %v5539_v7 = vld [vmem:[%s9263_s2 + $0xb00] ss:$8 sps:$4 sm:$0xff]  }
  0x46   :  { %2398 = vmatprep.mubr.bf16.mxu1 %v5534_v29  ;;  %v5568_v29 = vld [vmem:[%s9263_s2 + $0x10] ss:$8 sps:$4 sm:$0xff]  }
  0x47   :  { %610 = vmatpush1.bf16.msra.mxu0 %v5444_v8  ;;  %v5545_v8 = vld [vmem:[%s9263_s2 + $0x454] ss:$8 sps:$4 sm:$0xff]  }
  0x48   :  { %2369 = vmatpush1.bf16.msra.mxu1 %v5447_v9  ;;  %611 = vmatprep.subr.bf16.mxu0 %v5452_v10  ;;  %v5548_v9 = vld [vmem:[%s9263_s2 + $0xb14] ss:$8 sps:$4 sm:$0xff]   ;;  %v5543_v10 = vld [vmem:[%s9263_s2 + $0x450] ss:$8 sps:$4 sm:$0xff]  }
  0x49   :  { %2370 = vmatprep.subr.bf16.mxu1 %v5455_v11  ;;  %v5546_v11 = vld [vmem:[%s9263_s2 + $0xb10] ss:$8 sps:$4 sm:$0xff]  }
  0x4b   :  { %612 = vmatpush1.bf16.msra.mxu0 %v5450_v12  ;;  %v5551_v12 = vld [vmem:[%s9263_s2 + $0x464] ss:$8 sps:$4 sm:$0xff]  }
  0x4c   :  { %2371 = vmatpush1.bf16.msra.mxu1 %v5453_v13  ;;  %613 = vmatprep.subr.bf16.mxu0 %v5458_v14  ;;  %v5554_v13 = vld [vmem:[%s9263_s2 + $0xb24] ss:$8 sps:$4 sm:$0xff]   ;;  %v6432_v14 = vmov 0  }
  0x4d   :  { %2372 = vmatprep.subr.bf16.mxu1 %v5461_v15  ;;  %v5549_v15 = vld [vmem:[%s9263_s2 + $0x460] ss:$8 sps:$4 sm:$0xff]  }
  0x4f   :  { %614 = vmatpush1.bf16.msra.mxu0 %v5456_v16  ;;  %v5552_v16 = vld [vmem:[%s9263_s2 + $0xb20] ss:$8 sps:$4 sm:$0xff]  }
  0x50   :  { %2373 = vmatpush1.bf16.msra.mxu1 %v5459_v17  ;;  %615 = vmatprep.subr.bf16.mxu0 %v5464_v18  ;;  %v5557_v17 = vld [vmem:[%s9263_s2 + $0x474] ss:$8 sps:$4 sm:$0xff]  }
  0x51   :  { %2374 = vmatprep.subr.bf16.mxu1 %v5467_v19  ;;  %v5560_v18 = vld [vmem:[%s9263_s2 + $0xb34] ss:$8 sps:$4 sm:$0xff]   ;;  %v5555_v19 = vld [vmem:[%s9263_s2 + $0x470] ss:$8 sps:$4 sm:$0xff]  }
  0x53   :  { %616 = vmatpush1.bf16.msra.mxu0 %v5462_v20  ;;  %v5558_v20 = vld [vmem:[%s9263_s2 + $0xb30] ss:$8 sps:$4 sm:$0xff]  }
  0x54   :  { %2375 = vmatpush1.bf16.msra.mxu1 %v5465_v21  ;;  %617 = vmatprep.subr.bf16.mxu0 %v5470_v22  ;;  %v5563_v21 = vld [vmem:[%s9263_s2 + $0x4] ss:$8 sps:$4 sm:$0xff]  }
  0x55   :  { %2376 = vmatprep.subr.bf16.mxu1 %v5473_v23  ;;  %v5566_v22 = vld [vmem:[%s9263_s2 + $0x6c4] ss:$8 sps:$4 sm:$0xff]  }
  0x56   :  { %v5567_v23 = vld [vmem:[%s9264_s1 + $0x10] ss:$20 sps:$4 sm:$0x1f]  }
  0x57   :  { %618 = vmatpush1.bf16.msra.mxu0 %v5468_v24  ;;  %v5561_v24 = vld [vmem:[%s9263_s2] ss:$8 sps:$4 sm:$0xff]  }
  0x58   :  { %2377 = vmatpush1.bf16.msra.mxu1 %v5471_v25  ;;  %619 = vmatprep.subr.bf16.mxu0 %v5476_v26  ;;  %v5564_v25 = vld [vmem:[%s9263_s2 + $0x6c0] ss:$8 sps:$4 sm:$0xff]   ;;  %v5570_v26 = vld [vmem:[%s9263_s2 + $0x14] ss:$8 sps:$4 sm:$0xff]  }
  0x59   :  { %2378 = vmatprep.subr.bf16.mxu1 %v5479_v27  ;;  %v5573_v27 = vld [vmem:[%s9263_s2 + $0x6d4] ss:$8 sps:$4 sm:$0xff]  }
  0x5b   :  { %620 = vmatpush1.bf16.msra.mxu0 %v5474_v28  ;;  %v6928_v28 = vld [vmem:[%s9265_s0 + $0x4] ss:$20 sps:$4 sm:$0x1f]  }
  0x5c   :  { %2379 = vmatpush1.bf16.msra.mxu1 %v5477_v30  ;;  %621 = vmatprep.subr.bf16.mxu0 %v5482_v31  ;;  %v5571_v30 = vld [vmem:[%s9263_s2 + $0x6d0] ss:$8 sps:$4 sm:$0xff]   ;;  %v5576_v31 = vld [vmem:[%s9263_s2 + $0x24] ss:$8 sps:$4 sm:$0xff]  }
  0x5d   :  { %2380 = vmatprep.subr.bf16.mxu1 %v5485_v32  ;;  %v5579_v32 = vld [vmem:[%s9263_s2 + $0x6e4] ss:$8 sps:$4 sm:$0xff]  }
  0x5f   :  { %622 = vmatpush1.bf16.msra.mxu0 %v5480_v33  ;;  %v5574_v33 = vld [vmem:[%s9263_s2 + $0x20] ss:$8 sps:$4 sm:$0xff]  }
  0x60   :  { %2381 = vmatpush1.bf16.msra.mxu1 %v5483_v34  ;;  %623 = vmatprep.subr.bf16.mxu0 %v5488_v35  ;;  %v5577_v34 = vld [vmem:[%s9263_s2 + $0x6e0] ss:$8 sps:$4 sm:$0xff]   ;;  %v5582_v35 = vld [vmem:[%s9263_s2 + $0x34] ss:$8 sps:$4 sm:$0xff]  }
  0x61   :  { %2382 = vmatprep.subr.bf16.mxu1 %v5491_v36  ;;  %v5585_v36 = vld [vmem:[%s9263_s2 + $0x6f4] ss:$8 sps:$4 sm:$0xff]  }
  0x63   :  { %624 = vmatpush1.bf16.msra.mxu0 %v5486_v37  ;;  %v5580_v37 = vld [vmem:[%s9263_s2 + $0x30] ss:$8 sps:$4 sm:$0xff]  }
  0x64   :  { %2383 = vmatpush1.bf16.msra.mxu1 %v5489_v38  ;;  %625 = vmatprep.subr.bf16.mxu0 %v5494_v39  ;;  %v5583_v38 = vld [vmem:[%s9263_s2 + $0x6f0] ss:$8 sps:$4 sm:$0xff]   ;;  %v5588_v39 = vld [vmem:[%s9263_s2 + $0x44] ss:$8 sps:$4 sm:$0xff]  }
  0x65   :  { %2384 = vmatprep.subr.bf16.mxu1 %v5497_v40  ;;  %v5591_v40 = vld [vmem:[%s9263_s2 + $0x704] ss:$8 sps:$4 sm:$0xff]  }
  0x67   :  { %626 = vmatpush1.bf16.msra.mxu0 %v5492_v41  ;;  %v5586_v41 = vld [vmem:[%s9263_s2 + $0x40] ss:$8 sps:$4 sm:$0xff]  }
  0x68   :  { %2385 = vmatpush1.bf16.msra.mxu1 %v5495_v42  ;;  %627 = vmatprep.subr.bf16.mxu0 %v5500_v43  ;;  %v5589_v42 = vld [vmem:[%s9263_s2 + $0x700] ss:$8 sps:$4 sm:$0xff]   ;;  %v5594_v43 = vld [vmem:[%s9263_s2 + $0x54] ss:$8 sps:$4 sm:$0xff]  }
  0x69   :  { %2386 = vmatprep.subr.bf16.mxu1 %v5503_v44  ;;  %v5597_v44 = vld [vmem:[%s9263_s2 + $0x714] ss:$8 sps:$4 sm:$0xff]  }
  0x6b   :  { %628 = vmatpush1.bf16.msra.mxu0 %v5498_v45  ;;  %v5592_v45 = vld [vmem:[%s9263_s2 + $0x50] ss:$8 sps:$4 sm:$0xff]  }
  0x6c   :  { %2387 = vmatpush1.bf16.msra.mxu1 %v5501_v46  ;;  %629 = vmatprep.subr.bf16.mxu0 %v5506_v47  ;;  %v5595_v46 = vld [vmem:[%s9263_s2 + $0x710] ss:$8 sps:$4 sm:$0xff]   ;;  %v5600_v47 = vld [vmem:[%s9263_s2 + $0x64] ss:$8 sps:$4 sm:$0xff]  }
  0x6d   :  { %2388 = vmatprep.subr.bf16.mxu1 %v5509_v48  ;;  %v5603_v48 = vld [vmem:[%s9263_s2 + $0x724] ss:$8 sps:$4 sm:$0xff]  }
  0x6f   :  { %630 = vmatpush1.bf16.msra.mxu0 %v5504_v49  ;;  %v5598_v49 = vld [vmem:[%s9263_s2 + $0x60] ss:$8 sps:$4 sm:$0xff]  }
  0x70   :  { %2389 = vmatpush1.bf16.msra.mxu1 %v5507_v50  ;;  %631 = vmatprep.subr.bf16.mxu0 %v5512_v51  ;;  %v5601_v50 = vld [vmem:[%s9263_s2 + $0x720] ss:$8 sps:$4 sm:$0xff]   ;;  %v5606_v51 = vld [vmem:[%s9263_s2 + $0x74] ss:$8 sps:$4 sm:$0xff]  }
  0x71   :  { %2390 = vmatprep.subr.bf16.mxu1 %v5515_v52  ;;  %v5609_v52 = vld [vmem:[%s9263_s2 + $0x734] ss:$8 sps:$4 sm:$0xff]  }
  0x73   :  { %632 = vmatpush1.bf16.msra.mxu0 %v5510_v53  ;;  %v5604_v53 = vld [vmem:[%s9263_s2 + $0x70] ss:$8 sps:$4 sm:$0xff]  }
  0x74   :  { %2391 = vmatpush1.bf16.msra.mxu1 %v5513_v54  ;;  %633 = vmatprep.subr.bf16.mxu0 %v5518_v55  ;;  %v5607_v54 = vld [vmem:[%s9263_s2 + $0x730] ss:$8 sps:$4 sm:$0xff]   ;;  %v5612_v55 = vld [vmem:[%s9263_s2 + $0x84] ss:$8 sps:$4 sm:$0xff]  }
  0x75   :  { %2392 = vmatprep.subr.bf16.mxu1 %v5521_v56  ;;  %v5615_v56 = vld [vmem:[%s9263_s2 + $0x744] ss:$8 sps:$4 sm:$0xff]  }
  0x77   :  { %634 = vmatpush1.bf16.msra.mxu0 %v5516_v57  ;;  %v5610_v57 = vld [vmem:[%s9263_s2 + $0x80] ss:$8 sps:$4 sm:$0xff]  }
  0x78   :  { %2393 = vmatpush1.bf16.msra.mxu1 %v5519_v58  ;;  %635 = vmatprep.subr.bf16.mxu0 %v5524_v59  ;;  %v5613_v58 = vld [vmem:[%s9263_s2 + $0x740] ss:$8 sps:$4 sm:$0xff]   ;;  %v5618_v59 = vld [vmem:[%s9263_s2 + $0x94] ss:$8 sps:$4 sm:$0xff]  }
  0x79   :  { %2394 = vmatprep.subr.bf16.mxu1 %v5527_v60  ;;  %v5621_v60 = vld [vmem:[%s9263_s2 + $0x754] ss:$8 sps:$4 sm:$0xff]  }
  0x7b   :  { %636 = vmatpush1.bf16.msra.mxu0 %v5522_v61  ;;  %v5616_v61 = vld [vmem:[%s9263_s2 + $0x90] ss:$8 sps:$4 sm:$0xff]  }
  0x7c   :  { %2395 = vmatpush1.bf16.msra.mxu1 %v5525_v62  ;;  %637 = vmatprep.subr.bf16.mxu0 %v5530_v63  ;;  %v5619_v62 = vld [vmem:[%s9263_s2 + $0x750] ss:$8 sps:$4 sm:$0xff]   ;;  %v5624_v63 = vld [vmem:[%s9263_s2 + $0xa4] ss:$8 sps:$4 sm:$0xff]  }
  0x7d   :  { %2396 = vmatprep.subr.bf16.mxu1 %v5533_v0  ;;  %v5627_v0 = vld [vmem:[%s9263_s2 + $0x764] ss:$8 sps:$4 sm:$0xff]  }
  0x7f   :  { %638 = vmatpush1.bf16.msra.mxu0 %v5528_v1  ;;  %v5622_v1 = vld [vmem:[%s9263_s2 + $0xa0] ss:$8 sps:$4 sm:$0xff]  }
  0x80   :  { %2397 = vmatpush1.bf16.msra.mxu1 %v5531_v2  ;;  %650 = vmatprep.subr.bf16.mxu0 %v5538_v3  ;;  %v5625_v2 = vld [vmem:[%s9263_s2 + $0x760] ss:$8 sps:$4 sm:$0xff]   ;;  %v5630_v3 = vld [vmem:[%s9263_s2 + $0xb4] ss:$8 sps:$4 sm:$0xff]  }
  0x81   :  { %2409 = vmatprep.subr.bf16.mxu1 %v5541_v4  ;;  %v5633_v4 = vld [vmem:[%s9263_s2 + $0x774] ss:$8 sps:$4 sm:$0xff]  }
  0x82   :  { %640 = vmatmul.mubr.bf16.vlgmr.msra.gmra.mrb[0].mxu0 %v5542_v6 }
  0x83   :  { %2399 = vmatmul.mubr.bf16.vlgmr.msra.gmra.mrb[0].mxu1 %v5542_v6  ;;  %651 = vmatpush1.bf16.msra.mxu0 %v5536_v5  ;;  %v5628_v5 = vld [vmem:[%s9263_s2 + $0xb0] ss:$8 sps:$4 sm:$0xff]  }
  0x84   :  { %2410 = vmatpush1.bf16.msra.mxu1 %v5539_v7  ;;  %652 = vmatprep.subr.bf16.mxu0 %v5545_v8  ;;  %v5631_v6 = vld [vmem:[%s9263_s2 + $0x770] ss:$8 sps:$4 sm:$0xff]   ;;  %v5636_v7 = vld [vmem:[%s9263_s2 + $0xc4] ss:$8 sps:$4 sm:$0xff]  }
  0x85   :  { %2411 = vmatprep.subr.bf16.mxu1 %v5548_v9  ;;  %682 = vmatprep.mubr.bf16.mxu0 %v6432_v14  ;;  %v5639_v8 = vld [vmem:[%s9263_s2 + $0x784] ss:$8 sps:$4 sm:$0xff]   ;;  %v5634_v9 = vld [vmem:[%s9263_s2 + $0xc0] ss:$8 sps:$4 sm:$0xff]  }
  0x86   :  { %2441 = vmatprep.mubr.bf16.mxu1 %v6432_v14 }
  0x87   :  { %653 = vmatpush1.bf16.msra.mxu0 %v5543_v10  ;;  %v5637_v10 = vld [vmem:[%s9263_s2 + $0x780] ss:$8 sps:$4 sm:$0xff]  }
  0x88   :  { %2412 = vmatpush1.bf16.msra.mxu1 %v5546_v11  ;;  %654 = vmatprep.subr.bf16.mxu0 %v5551_v12  ;;  %v5642_v11 = vld [vmem:[%s9263_s2 + $0xd4] ss:$8 sps:$4 sm:$0xff]  }
  0x89   :  { %2413 = vmatprep.subr.bf16.mxu1 %v5554_v13  ;;  %v5645_v12 = vld [vmem:[%s9263_s2 + $0x794] ss:$8 sps:$4 sm:$0xff]   ;;  %v5640_v13 = vld [vmem:[%s9263_s2 + $0xd0] ss:$8 sps:$4 sm:$0xff]  }
  0x8b   :  { %655 = vmatpush1.bf16.msra.mxu0 %v5549_v15  ;;  %v5643_v15 = vld [vmem:[%s9263_s2 + $0x790] ss:$8 sps:$4 sm:$0xff]  }
  0x8c   :  { %2414 = vmatpush1.bf16.msra.mxu1 %v5552_v16  ;;  %656 = vmatprep.subr.bf16.mxu0 %v5557_v17  ;;  %v5648_v16 = vld [vmem:[%s9263_s2 + $0xe4] ss:$8 sps:$4 sm:$0xff]  }
  0x8d   :  { %2415 = vmatprep.subr.bf16.mxu1 %v5560_v18  ;;  %v5651_v17 = vld [vmem:[%s9263_s2 + $0x7a4] ss:$8 sps:$4 sm:$0xff]   ;;  %v5646_v18 = vld [vmem:[%s9263_s2 + $0xe0] ss:$8 sps:$4 sm:$0xff]  }
  0x8f   :  { %657 = vmatpush1.bf16.msra.mxu0 %v5555_v19  ;;  %v5649_v19 = vld [vmem:[%s9263_s2 + $0x7a0] ss:$8 sps:$4 sm:$0xff]  }
  0x90   :  { %2416 = vmatpush1.bf16.msra.mxu1 %v5558_v20  ;;  %1081 = vmatprep.subr.bf16.mxu0 %v5563_v21  ;;  %v5654_v20 = vld [vmem:[%s9263_s2 + $0xf4] ss:$8 sps:$4 sm:$0xff]  }
  0x91   :  { %2812 = vmatprep.subr.bf16.mxu1 %v5566_v22  ;;  %v5657_v21 = vld [vmem:[%s9263_s2 + $0x7b4] ss:$8 sps:$4 sm:$0xff]   ;;  %v5652_v22 = vld [vmem:[%s9263_s2 + $0xf0] ss:$8 sps:$4 sm:$0xff]  }
  0x92   :  { %4541 = vmatmul.mubr.msk.bf16.vlgmr.msra.gmra.mrb[0].mxu0 %vm560_vm0, %v5567_v23 }
  0x93   :  { %4981 = vmatmul.mubr.msk.bf16.vlgmr.msra.gmra.mrb[0].mxu1 %vm560_vm0, %v5567_v23  ;;  %1082 = vmatpush1.bf16.msra.mxu0 %v5561_v24  ;;  %v5655_v23 = vld [vmem:[%s9263_s2 + $0x7b0] ss:$8 sps:$4 sm:$0xff]   ;;  %v5662_v24 = vld [vmem:[%s9263_s2 + $0x104] ss:$8 sps:$4 sm:$0xff]  }
  0x94   :  { %2813 = vmatpush1.bf16.msra.mxu1 %v5564_v25  ;;  %1083 = vmatprep.subr.bf16.mxu0 %v5570_v26  ;;  %v5665_v25 = vld [vmem:[%s9263_s2 + $0x7c4] ss:$8 sps:$4 sm:$0xff]   ;;  %v7117_v26 = vld [vmem:[%s9265_s0] ss:$20 sps:$4 sm:$0x1f]  }
  0x95   :  { %2814 = vmatprep.subr.bf16.mxu1 %v5573_v27  ;;  %1113 = vmatprep.mubr.bf16.mxu0 %v6928_v28  ;;  %v5660_v27 = vld [vmem:[%s9263_s2 + $0x100] ss:$8 sps:$4 sm:$0xff]  }
  0x96   :  { %2844 = vmatprep.mubr.bf16.mxu1 %v6928_v28 }
  0x97   :  { %1084 = vmatpush1.bf16.msra.mxu0 %v5568_v29  ;;  %v5663_v29 = vld [vmem:[%s9263_s2 + $0x7c0] ss:$8 sps:$4 sm:$0xff]  }
  0x98   :  { %2815 = vmatpush1.bf16.msra.mxu1 %v5571_v30  ;;  %1085 = vmatprep.subr.bf16.mxu0 %v5576_v31  ;;  %v5669_v30 = vld [vmem:[%s9263_s2 + $0x114] ss:$8 sps:$4 sm:$0xff]  }
  0x99   :  { %2816 = vmatprep.subr.bf16.mxu1 %v5579_v32  ;;  %v5672_v31 = vld [vmem:[%s9263_s2 + $0x7d4] ss:$8 sps:$4 sm:$0xff]   ;;  %v7134_v32 = vld [vmem:[%s9265_s0 + $0xc] ss:$20 sps:$4 sm:$0x1f]  }
  0x9b   :  { %1086 = vmatpush1.bf16.msra.mxu0 %v5574_v33  ;;  %v5667_v33 = vld [vmem:[%s9263_s2 + $0x110] ss:$8 sps:$4 sm:$0xff]  }
  0x9c   :  { %2817 = vmatpush1.bf16.msra.mxu1 %v5577_v34  ;;  %1087 = vmatprep.subr.bf16.mxu0 %v5582_v35  ;;  %v5670_v34 = vld [vmem:[%s9263_s2 + $0x7d0] ss:$8 sps:$4 sm:$0xff]   ;;  %v5675_v35 = vld [vmem:[%s9263_s2 + $0x124] ss:$8 sps:$4 sm:$0xff]  }
  0x9d   :  { %2818 = vmatprep.subr.bf16.mxu1 %v5585_v36  ;;  %v5678_v36 = vld [vmem:[%s9263_s2 + $0x7e4] ss:$8 sps:$4 sm:$0xff]  }
  0x9f   :  { %1088 = vmatpush1.bf16.msra.mxu0 %v5580_v37  ;;  %v5673_v37 = vld [vmem:[%s9263_s2 + $0x120] ss:$8 sps:$4 sm:$0xff]  }
  0xa0   :  { %2819 = vmatpush1.bf16.msra.mxu1 %v5583_v38  ;;  %1089 = vmatprep.subr.bf16.mxu0 %v5588_v39  ;;  %v5676_v38 = vld [vmem:[%s9263_s2 + $0x7e0] ss:$8 sps:$4 sm:$0xff]   ;;  %v5681_v39 = vld [vmem:[%s9263_s2 + $0x134] ss:$8 sps:$4 sm:$0xff]  }
  0xa1   :  { %2820 = vmatprep.subr.bf16.mxu1 %v5591_v40  ;;  %v5684_v40 = vld [vmem:[%s9263_s2 + $0x7f4] ss:$8 sps:$4 sm:$0xff]  }
  0xa3   :  { %1090 = vmatpush1.bf16.msra.mxu0 %v5586_v41  ;;  %v5679_v41 = vld [vmem:[%s9263_s2 + $0x130] ss:$8 sps:$4 sm:$0xff]  }
  0xa4   :  { %2821 = vmatpush1.bf16.msra.mxu1 %v5589_v42  ;;  %1091 = vmatprep.subr.bf16.mxu0 %v5594_v43  ;;  %v5682_v42 = vld [vmem:[%s9263_s2 + $0x7f0] ss:$8 sps:$4 sm:$0xff]   ;;  %v5687_v43 = vld [vmem:[%s9263_s2 + $0x144] ss:$8 sps:$4 sm:$0xff]  }
  0xa5   :  { %2822 = vmatprep.subr.bf16.mxu1 %v5597_v44  ;;  %v5690_v44 = vld [vmem:[%s9263_s2 + $0x804] ss:$8 sps:$4 sm:$0xff]  }
  0xa7   :  { %1092 = vmatpush1.bf16.msra.mxu0 %v5592_v45  ;;  %v5685_v45 = vld [vmem:[%s9263_s2 + $0x140] ss:$8 sps:$4 sm:$0xff]  }
  0xa8   :  { %2823 = vmatpush1.bf16.msra.mxu1 %v5595_v46  ;;  %1093 = vmatprep.subr.bf16.mxu0 %v5600_v47  ;;  %v5688_v46 = vld [vmem:[%s9263_s2 + $0x800] ss:$8 sps:$4 sm:$0xff]   ;;  %v5693_v47 = vld [vmem:[%s9263_s2 + $0x154] ss:$8 sps:$4 sm:$0xff]  }
  0xa9   :  { %2824 = vmatprep.subr.bf16.mxu1 %v5603_v48  ;;  %v5696_v48 = vld [vmem:[%s9263_s2 + $0x814] ss:$8 sps:$4 sm:$0xff]  }
  0xab   :  { %1094 = vmatpush1.bf16.msra.mxu0 %v5598_v49  ;;  %v5691_v49 = vld [vmem:[%s9263_s2 + $0x150] ss:$8 sps:$4 sm:$0xff]  }
  0xac   :  { %2825 = vmatpush1.bf16.msra.mxu1 %v5601_v50  ;;  %1095 = vmatprep.subr.bf16.mxu0 %v5606_v51  ;;  %v5694_v50 = vld [vmem:[%s9263_s2 + $0x810] ss:$8 sps:$4 sm:$0xff]   ;;  %v5699_v51 = vld [vmem:[%s9263_s2 + $0x164] ss:$8 sps:$4 sm:$0xff]  }
  0xad   :  { %2826 = vmatprep.subr.bf16.mxu1 %v5609_v52  ;;  %v5702_v52 = vld [vmem:[%s9263_s2 + $0x824] ss:$8 sps:$4 sm:$0xff]  }
  0xaf   :  { %1096 = vmatpush1.bf16.msra.mxu0 %v5604_v53  ;;  %v5697_v53 = vld [vmem:[%s9263_s2 + $0x160] ss:$8 sps:$4 sm:$0xff]  }
  0xb0   :  { %2827 = vmatpush1.bf16.msra.mxu1 %v5607_v54  ;;  %1097 = vmatprep.subr.bf16.mxu0 %v5612_v55  ;;  %v5700_v54 = vld [vmem:[%s9263_s2 + $0x820] ss:$8 sps:$4 sm:$0xff]   ;;  %v5705_v55 = vld [vmem:[%s9263_s2 + $0x174] ss:$8 sps:$4 sm:$0xff]  }
  0xb1   :  { %2828 = vmatprep.subr.bf16.mxu1 %v5615_v56  ;;  %v5708_v56 = vld [vmem:[%s9263_s2 + $0x834] ss:$8 sps:$4 sm:$0xff]  }
  0xb3   :  { %1098 = vmatpush1.bf16.msra.mxu0 %v5610_v57  ;;  %v5703_v57 = vld [vmem:[%s9263_s2 + $0x170] ss:$8 sps:$4 sm:$0xff]  }
  0xb4   :  { %2829 = vmatpush1.bf16.msra.mxu1 %v5613_v58  ;;  %1099 = vmatprep.subr.bf16.mxu0 %v5618_v59  ;;  %v5706_v58 = vld [vmem:[%s9263_s2 + $0x830] ss:$8 sps:$4 sm:$0xff]   ;;  %v5711_v59 = vld [vmem:[%s9263_s2 + $0x184] ss:$8 sps:$4 sm:$0xff]  }
  0xb5   :  { %2830 = vmatprep.subr.bf16.mxu1 %v5621_v60  ;;  %v5714_v60 = vld [vmem:[%s9263_s2 + $0x844] ss:$8 sps:$4 sm:$0xff]  }
  0xb7   :  { %1100 = vmatpush1.bf16.msra.mxu0 %v5616_v61  ;;  %v5709_v61 = vld [vmem:[%s9263_s2 + $0x180] ss:$8 sps:$4 sm:$0xff]  }
  0xb8   :  { %2831 = vmatpush1.bf16.msra.mxu1 %v5619_v62  ;;  %1101 = vmatprep.subr.bf16.mxu0 %v5624_v63  ;;  %v5712_v62 = vld [vmem:[%s9263_s2 + $0x840] ss:$8 sps:$4 sm:$0xff]   ;;  %v5717_v63 = vld [vmem:[%s9263_s2 + $0x194] ss:$8 sps:$4 sm:$0xff]  }
  0xb9   :  { %2832 = vmatprep.subr.bf16.mxu1 %v5627_v0  ;;  %v5720_v0 = vld [vmem:[%s9263_s2 + $0x854] ss:$8 sps:$4 sm:$0xff]  }
  0xbb   :  { %1102 = vmatpush1.bf16.msra.mxu0 %v5622_v1  ;;  %v5715_v1 = vld [vmem:[%s9263_s2 + $0x190] ss:$8 sps:$4 sm:$0xff]  }
  0xbc   :  { %2833 = vmatpush1.bf16.msra.mxu1 %v5625_v2  ;;  %1103 = vmatprep.subr.bf16.mxu0 %v5630_v3  ;;  %v5718_v2 = vld [vmem:[%s9263_s2 + $0x850] ss:$8 sps:$4 sm:$0xff]   ;;  %v5723_v3 = vld [vmem:[%s9263_s2 + $0x1a4] ss:$8 sps:$4 sm:$0xff]  }
  0xbd   :  { %2834 = vmatprep.subr.bf16.mxu1 %v5633_v4  ;;  %v5726_v4 = vld [vmem:[%s9263_s2 + $0x864] ss:$8 sps:$4 sm:$0xff]  }
  0xbf   :  { %1104 = vmatpush1.bf16.msra.mxu0 %v5628_v5  ;;  %v5721_v5 = vld [vmem:[%s9263_s2 + $0x1a0] ss:$8 sps:$4 sm:$0xff]  }
  0xc0   :  { %2835 = vmatpush1.bf16.msra.mxu1 %v5631_v6  ;;  %1105 = vmatprep.subr.bf16.mxu0 %v5636_v7  ;;  %v5724_v6 = vld [vmem:[%s9263_s2 + $0x860] ss:$8 sps:$4 sm:$0xff]   ;;  %v5729_v7 = vld [vmem:[%s9263_s2 + $0x1b4] ss:$8 sps:$4 sm:$0xff]  }
  0xc1   :  { %2836 = vmatprep.subr.bf16.mxu1 %v5639_v8  ;;  %v5732_v8 = vld [vmem:[%s9263_s2 + $0x874] ss:$8 sps:$4 sm:$0xff]  }
  0xc3   :  { %1106 = vmatpush1.bf16.msra.mxu0 %v5634_v9  ;;  %v5727_v9 = vld [vmem:[%s9263_s2 + $0x1b0] ss:$8 sps:$4 sm:$0xff]  }
  0xc4   :  { %2837 = vmatpush1.bf16.msra.mxu1 %v5637_v10  ;;  %1107 = vmatprep.subr.bf16.mxu0 %v5642_v11  ;;  %v5730_v10 = vld [vmem:[%s9263_s2 + $0x870] ss:$8 sps:$4 sm:$0xff]   ;;  %v5735_v11 = vld [vmem:[%s9263_s2 + $0x1c4] ss:$8 sps:$4 sm:$0xff]  }
  0xc5   :  { %2838 = vmatprep.subr.bf16.mxu1 %v5645_v12  ;;  %v5738_v12 = vld [vmem:[%s9263_s2 + $0x884] ss:$8 sps:$4 sm:$0xff]  }
  0xc7   :  { %1108 = vmatpush1.bf16.msra.mxu0 %v5640_v13  ;;  %v5733_v13 = vld [vmem:[%s9263_s2 + $0x1c0] ss:$8 sps:$4 sm:$0xff]  }
  0xc8   :  { %2839 = vmatpush1.bf16.msra.mxu1 %v5643_v15  ;;  %1109 = vmatprep.subr.bf16.mxu0 %v5648_v16  ;;  %v5736_v15 = vld [vmem:[%s9263_s2 + $0x880] ss:$8 sps:$4 sm:$0xff]   ;;  %v5741_v16 = vld [vmem:[%s9263_s2 + $0x1d4] ss:$8 sps:$4 sm:$0xff]  }
  0xc9   :  { %2840 = vmatprep.subr.bf16.mxu1 %v5651_v17  ;;  %v5744_v17 = vld [vmem:[%s9263_s2 + $0x894] ss:$8 sps:$4 sm:$0xff]  }
  0xcb   :  { %1110 = vmatpush1.bf16.msra.mxu0 %v5646_v18  ;;  %v5739_v18 = vld [vmem:[%s9263_s2 + $0x1d0] ss:$8 sps:$4 sm:$0xff]  }
  0xcc   :  { %2841 = vmatpush1.bf16.msra.mxu1 %v5649_v19  ;;  %1111 = vmatprep.subr.bf16.mxu0 %v5654_v20  ;;  %v5742_v19 = vld [vmem:[%s9263_s2 + $0x890] ss:$8 sps:$4 sm:$0xff]   ;;  %v5747_v20 = vld [vmem:[%s9263_s2 + $0x1e4] ss:$8 sps:$4 sm:$0xff]  }
  0xcd   :  { %2842 = vmatprep.subr.bf16.mxu1 %v5657_v21  ;;  %v5750_v21 = vld [vmem:[%s9263_s2 + $0x8a4] ss:$8 sps:$4 sm:$0xff]  }
  0xcf   :  { %1112 = vmatpush1.bf16.msra.mxu0 %v5652_v22  ;;  %v5745_v22 = vld [vmem:[%s9263_s2 + $0x1e0] ss:$8 sps:$4 sm:$0xff]  }
  0xd0   :  { %2843 = vmatpush1.bf16.msra.mxu1 %v5655_v23  ;;  %1124 = vmatprep.subr.bf16.mxu0 %v5662_v24  ;;  %v5748_v23 = vld [vmem:[%s9263_s2 + $0x8a0] ss:$8 sps:$4 sm:$0xff]   ;;  %v5753_v24 = vld [vmem:[%s9263_s2 + $0x1f4] ss:$8 sps:$4 sm:$0xff]  }
  0xd1   :  { %2855 = vmatprep.subr.bf16.mxu1 %v5665_v25  ;;  %v5756_v25 = vld [vmem:[%s9263_s2 + $0x8b4] ss:$8 sps:$4 sm:$0xff]  }
  0xd2   :  { %1114 = vmatmul.mubr.bf16.vlgmr.msra.gmra.mrb[0].mxu0 %v7117_v26 }
  0xd3   :  { %2845 = vmatmul.mubr.bf16.vlgmr.msra.gmra.mrb[0].mxu1 %v7117_v26  ;;  %1125 = vmatpush1.bf16.msra.mxu0 %v5660_v27  ;;  %v5751_v27 = vld [vmem:[%s9263_s2 + $0x1f0] ss:$8 sps:$4 sm:$0xff]  }
  0xd4   :  { %2856 = vmatpush1.bf16.msra.mxu1 %v5663_v29  ;;  %1126 = vmatprep.subr.bf16.mxu0 %v5669_v30  ;;  %v5754_v29 = vld [vmem:[%s9263_s2 + $0x8b0] ss:$8 sps:$4 sm:$0xff]   ;;  %v5761_v30 = vld [vmem:[%s9263_s2 + $0x204] ss:$8 sps:$4 sm:$0xff]  }
  0xd5   :  { %2857 = vmatprep.subr.bf16.mxu1 %v5672_v31  ;;  %1156 = vmatprep.mubr.bf16.mxu0 %v7134_v32  ;;  %v5764_v31 = vld [vmem:[%s9263_s2 + $0x8c4] ss:$8 sps:$4 sm:$0xff]  }
  0xd6   :  { %2887 = vmatprep.mubr.bf16.mxu1 %v7134_v32 }
  0xd7   :  { %1127 = vmatpush1.bf16.msra.mxu0 %v5667_v33  ;;  %v7323_v33 = vld [vmem:[%s9265_s0 + $0x8] ss:$20 sps:$4 sm:$0x1f]  }
  0xd8   :  { %2858 = vmatpush1.bf16.msra.mxu1 %v5670_v34  ;;  %1128 = vmatprep.subr.bf16.mxu0 %v5675_v35  ;;  %v5759_v34 = vld [vmem:[%s9263_s2 + $0x200] ss:$8 sps:$4 sm:$0xff]  }
  0xd9   :  { %2859 = vmatprep.subr.bf16.mxu1 %v5678_v36  ;;  %v5762_v35 = vld [vmem:[%s9263_s2 + $0x8c0] ss:$8 sps:$4 sm:$0xff]   ;;  %v5768_v36 = vld [vmem:[%s9263_s2 + $0x214] ss:$8 sps:$4 sm:$0xff]  }
  0xdb   :  { %1129 = vmatpush1.bf16.msra.mxu0 %v5673_v37  ;;  %v5771_v37 = vld [vmem:[%s9263_s2 + $0x8d4] ss:$8 sps:$4 sm:$0xff]  }
  0xdc   :  { %2860 = vmatpush1.bf16.msra.mxu1 %v5676_v38  ;;  %1130 = vmatprep.subr.bf16.mxu0 %v5681_v39  ;;  %v5766_v38 = vld [vmem:[%s9263_s2 + $0x210] ss:$8 sps:$4 sm:$0xff]  }
  0xdd   :  { %2861 = vmatprep.subr.bf16.mxu1 %v5684_v40  ;;  %v5769_v39 = vld [vmem:[%s9263_s2 + $0x8d0] ss:$8 sps:$4 sm:$0xff]   ;;  %v5774_v40 = vld [vmem:[%s9263_s2 + $0x224] ss:$8 sps:$4 sm:$0xff]  }
  0xdf   :  { %1131 = vmatpush1.bf16.msra.mxu0 %v5679_v41  ;;  %v5777_v41 = vld [vmem:[%s9263_s2 + $0x8e4] ss:$8 sps:$4 sm:$0xff]  }
  0xe0   :  { %2862 = vmatpush1.bf16.msra.mxu1 %v5682_v42  ;;  %1132 = vmatprep.subr.bf16.mxu0 %v5687_v43  ;;  %v5772_v42 = vld [vmem:[%s9263_s2 + $0x220] ss:$8 sps:$4 sm:$0xff]  }
  0xe1   :  { %2863 = vmatprep.subr.bf16.mxu1 %v5690_v44  ;;  %v5775_v43 = vld [vmem:[%s9263_s2 + $0x8e0] ss:$8 sps:$4 sm:$0xff]   ;;  %v5780_v44 = vld [vmem:[%s9263_s2 + $0x234] ss:$8 sps:$4 sm:$0xff]  }
  0xe3   :  { %1133 = vmatpush1.bf16.msra.mxu0 %v5685_v45  ;;  %v5783_v45 = vld [vmem:[%s9263_s2 + $0x8f4] ss:$8 sps:$4 sm:$0xff]  }
  0xe4   :  { %2864 = vmatpush1.bf16.msra.mxu1 %v5688_v46  ;;  %1134 = vmatprep.subr.bf16.mxu0 %v5693_v47  ;;  %v5778_v46 = vld [vmem:[%s9263_s2 + $0x230] ss:$8 sps:$4 sm:$0xff]   ;;  %v1293_v47 = vshll.u32 %v6928_v28, 16 }
  0xe5   :  { %2865 = vmatprep.subr.bf16.mxu1 %v5696_v48  ;;  %v5781_v48 = vld [vmem:[%s9263_s2 + $0x8f0] ss:$8 sps:$4 sm:$0xff]  }
  0xe7   :  { %1135 = vmatpush1.bf16.msra.mxu0 %v5691_v49  ;;  %v5786_v49 = vld [vmem:[%s9263_s2 + $0x484] ss:$8 sps:$4 sm:$0xff]  }
  0xe8   :  { %2866 = vmatpush1.bf16.msra.mxu1 %v5694_v50  ;;  %1136 = vmatprep.subr.bf16.mxu0 %v5699_v51  ;;  %v5789_v50 = vld [vmem:[%s9263_s2 + $0xb44] ss:$8 sps:$4 sm:$0xff]  }
  0xe9   :  { %2867 = vmatprep.subr.bf16.mxu1 %v5702_v52  ;;  %v7381_v51 = vld [vmem:[%s9265_s0 + $0x10] ss:$20 sps:$4 sm:$0x1f]   ;;  %v1291_v52 = vshrl.u32 %v6928_v28, 16  ;;  %v5796_v28 = vld [vmem:[%s9263_s2 + $0xb54] ss:$8 sps:$4 sm:$0xff]  }
  0xeb   :  { %1137 = vmatpush1.bf16.msra.mxu0 %v5697_v53  ;;  %v1295_v53 = vrot.slane %v1293_v47, 1  ;;  %v5863_v47 = vld [vmem:[%s9263_s2 + $0x550] ss:$8 sps:$4 sm:$0xff]  }
  0xec   :  { %2868 = vmatpush1.bf16.msra.mxu1 %v5700_v54  ;;  %1138 = vmatprep.subr.bf16.mxu0 %v5705_v55  ;;  %v5784_v54 = vld [vmem:[%s9263_s2 + $0x480] ss:$8 sps:$4 sm:$0xff]  }
  0xed   :  { %2869 = vmatprep.subr.bf16.mxu1 %v5708_v56  ;;  %v5787_v55 = vld [vmem:[%s9263_s2 + $0xb40] ss:$8 sps:$4 sm:$0xff]   ;;  %v5793_v56 = vld [vmem:[%s9263_s2 + $0x494] ss:$8 sps:$4 sm:$0xff]  }
  0xef   :  { %1139 = vmatpush1.bf16.msra.mxu0 %v5703_v57  ;;  %v7396_v57 = vor.u32 %v1295_v53, %v1291_v52  ;;  %v1286_v52 = vshll.u32 %v7117_v26, 16  ;;  %v5869_v53 = vld [vmem:[%s9263_s2 + $0x560] ss:$8 sps:$4 sm:$0xff]  }
  0xf0   :  { %2870 = vmatpush1.bf16.msra.mxu1 %v5706_v58  ;;  %1140 = vmatprep.subr.bf16.mxu0 %v5711_v59  ;;  %v5791_v58 = vld [vmem:[%s9263_s2 + $0x490] ss:$8 sps:$4 sm:$0xff]  }
  0xf1   :  { %2871 = vmatprep.subr.bf16.mxu1 %v5714_v60  ;;  %v5794_v59 = vld [vmem:[%s9263_s2 + $0xb50] ss:$8 sps:$4 sm:$0xff]   ;;  %v5799_v60 = vld [vmem:[%s9263_s2 + $0x4a4] ss:$8 sps:$4 sm:$0xff]  }
  0xf3   :  { %1141 = vmatpush1.bf16.msra.mxu0 %v5709_v61  ;;  %v5802_v61 = vld [vmem:[%s9263_s2 + $0xb64] ss:$8 sps:$4 sm:$0xff]  }
  0xf4   :  { %2872 = vmatpush1.bf16.msra.mxu1 %v5712_v62  ;;  %1142 = vmatprep.subr.bf16.mxu0 %v5717_v63  ;;  %v5797_v62 = vld [vmem:[%s9263_s2 + $0x4a0] ss:$8 sps:$4 sm:$0xff]  }
  0xf5   :  { %2873 = vmatprep.subr.bf16.mxu1 %v5720_v0  ;;  %v5800_v63 = vld [vmem:[%s9263_s2 + $0xb60] ss:$8 sps:$4 sm:$0xff]   ;;  %v5805_v0 = vld [vmem:[%s9263_s2 + $0x4b4] ss:$8 sps:$4 sm:$0xff]  }
  0xf7   :  { %1143 = vmatpush1.bf16.msra.mxu0 %v5715_v1  ;;  %v5808_v1 = vld [vmem:[%s9263_s2 + $0xb74] ss:$8 sps:$4 sm:$0xff]  }
  0xf8   :  { %2874 = vmatpush1.bf16.msra.mxu1 %v5718_v2  ;;  %1144 = vmatprep.subr.bf16.mxu0 %v5723_v3  ;;  %v5803_v2 = vld [vmem:[%s9263_s2 + $0x4b0] ss:$8 sps:$4 sm:$0xff]  }
  0xf9   :  { %2875 = vmatprep.subr.bf16.mxu1 %v5726_v4  ;;  %v5806_v3 = vld [vmem:[%s9263_s2 + $0xb70] ss:$8 sps:$4 sm:$0xff]   ;;  %v5811_v4 = vld [vmem:[%s9263_s2 + $0x4c4] ss:$8 sps:$4 sm:$0xff]  }
  0xfb   :  { %1145 = vmatpush1.bf16.msra.mxu0 %v5721_v5  ;;  %v5814_v5 = vld [vmem:[%s9263_s2 + $0xb84] ss:$8 sps:$4 sm:$0xff]  }
  0xfc   :  { %2876 = vmatpush1.bf16.msra.mxu1 %v5724_v6  ;;  %1146 = vmatprep.subr.bf16.mxu0 %v5729_v7  ;;  %v5809_v6 = vld [vmem:[%s9263_s2 + $0x4c0] ss:$8 sps:$4 sm:$0xff]  }
  0xfd   :  { %2877 = vmatprep.subr.bf16.mxu1 %v5732_v8  ;;  %v5812_v7 = vld [vmem:[%s9263_s2 + $0xb80] ss:$8 sps:$4 sm:$0xff]   ;;  %v5817_v8 = vld [vmem:[%s9263_s2 + $0x4d4] ss:$8 sps:$4 sm:$0xff]  }
  0xff   :  { %1147 = vmatpush1.bf16.msra.mxu0 %v5727_v9  ;;  %v5820_v9 = vld [vmem:[%s9263_s2 + $0xb94] ss:$8 sps:$4 sm:$0xff]  }
 0x100   :  { %2878 = vmatpush1.bf16.msra.mxu1 %v5730_v10  ;;  %1148 = vmatprep.subr.bf16.mxu0 %v5735_v11  ;;  %v5815_v10 = vld [vmem:[%s9263_s2 + $0x4d0] ss:$8 sps:$4 sm:$0xff]  }
 0x101   :  { %2879 = vmatprep.subr.bf16.mxu1 %v5738_v12  ;;  %v5818_v11 = vld [vmem:[%s9263_s2 + $0xb90] ss:$8 sps:$4 sm:$0xff]   ;;  %v5823_v12 = vld [vmem:[%s9263_s2 + $0x4e4] ss:$8 sps:$4 sm:$0xff]  }
 0x103   :  { %1149 = vmatpush1.bf16.msra.mxu0 %v5733_v13  ;;  %v5826_v13 = vld [vmem:[%s9263_s2 + $0xba4] ss:$8 sps:$4 sm:$0xff]  }
 0x104   :  { %2880 = vmatpush1.bf16.msra.mxu1 %v5736_v15  ;;  %1150 = vmatprep.subr.bf16.mxu0 %v5741_v16  ;;  %v5821_v15 = vld [vmem:[%s9263_s2 + $0x4e0] ss:$8 sps:$4 sm:$0xff]  }
 0x105   :  { %2881 = vmatprep.subr.bf16.mxu1 %v5744_v17  ;;  %v5824_v16 = vld [vmem:[%s9263_s2 + $0xba0] ss:$8 sps:$4 sm:$0xff]   ;;  %v5829_v17 = vld [vmem:[%s9263_s2 + $0x4f4] ss:$8 sps:$4 sm:$0xff]  }
 0x107   :  { %1151 = vmatpush1.bf16.msra.mxu0 %v5739_v18  ;;  %v5832_v18 = vld [vmem:[%s9263_s2 + $0xbb4] ss:$8 sps:$4 sm:$0xff]  }
 0x108   :  { %2882 = vmatpush1.bf16.msra.mxu1 %v5742_v19  ;;  %1152 = vmatprep.subr.bf16.mxu0 %v5747_v20  ;;  %v5827_v19 = vld [vmem:[%s9263_s2 + $0x4f0] ss:$8 sps:$4 sm:$0xff]  }
 0x109   :  { %2883 = vmatprep.subr.bf16.mxu1 %v5750_v21  ;;  %v5830_v20 = vld [vmem:[%s9263_s2 + $0xbb0] ss:$8 sps:$4 sm:$0xff]   ;;  %v5835_v21 = vld [vmem:[%s9263_s2 + $0x504] ss:$8 sps:$4 sm:$0xff]  }
 0x10b   :  { %1153 = vmatpush1.bf16.msra.mxu0 %v5745_v22  ;;  %v5838_v22 = vld [vmem:[%s9263_s2 + $0xbc4] ss:$8 sps:$4 sm:$0xff]  }
 0x10c   :  { %2884 = vmatpush1.bf16.msra.mxu1 %v5748_v23  ;;  %1154 = vmatprep.subr.bf16.mxu0 %v5753_v24  ;;  %v5833_v23 = vld [vmem:[%s9263_s2 + $0x500] ss:$8 sps:$4 sm:$0xff]  }
 0x10d   :  { %2885 = vmatprep.subr.bf16.mxu1 %v5756_v25  ;;  %v5836_v24 = vld [vmem:[%s9263_s2 + $0xbc0] ss:$8 sps:$4 sm:$0xff]   ;;  %v5841_v25 = vld [vmem:[%s9263_s2 + $0x514] ss:$8 sps:$4 sm:$0xff]  }
 0x10f   :  { %1155 = vmatpush1.bf16.msra.mxu0 %v5751_v27  ;;  %v5844_v27 = vld [vmem:[%s9263_s2 + $0xbd4] ss:$8 sps:$4 sm:$0xff]  }
 0x110   :  { %2886 = vmatpush1.bf16.msra.mxu1 %v5754_v29  ;;  %1167 = vmatprep.subr.bf16.mxu0 %v5761_v30  ;;  %v5839_v29 = vld [vmem:[%s9263_s2 + $0x510] ss:$8 sps:$4 sm:$0xff]  }
 0x111   :  { %2898 = vmatprep.subr.bf16.mxu1 %v5764_v31  ;;  %v5842_v30 = vld [vmem:[%s9263_s2 + $0xbd0] ss:$8 sps:$4 sm:$0xff]   ;;  %v5847_v31 = vld [vmem:[%s9263_s2 + $0x524] ss:$8 sps:$4 sm:$0xff]  }
 0x112   :  { %1157 = vmatmul.mubr.bf16.vlgmr.msra.gmra.mrb[0].mxu0 %v7323_v33 }
 0x113   :  { %2888 = vmatmul.mubr.bf16.vlgmr.msra.gmra.mrb[0].mxu1 %v7323_v33  ;;  %1168 = vmatpush1.bf16.msra.mxu0 %v5759_v34  ;;  %v5850_v34 = vld [vmem:[%s9263_s2 + $0xbe4] ss:$8 sps:$4 sm:$0xff]  }
 0x114   :  { %2899 = vmatpush1.bf16.msra.mxu1 %v5762_v35  ;;  %1169 = vmatprep.subr.bf16.mxu0 %v5768_v36  ;;  %v5845_v35 = vld [vmem:[%s9263_s2 + $0x520] ss:$8 sps:$4 sm:$0xff]  }
 0x115   :  { %2900 = vmatprep.subr.bf16.mxu1 %v5771_v37  ;;  %1199 = vmatprep.mubr.bf16.mxu0 %v6432_v14  ;;  %v5848_v36 = vld [vmem:[%s9263_s2 + $0xbe0] ss:$8 sps:$4 sm:$0xff]   ;;  %v5853_v37 = vld [vmem:[%s9263_s2 + $0x534] ss:$8 sps:$4 sm:$0xff]  }
 0x116   :  { %2930 = vmatprep.mubr.bf16.mxu1 %v6432_v14 }
 0x117   :  { %1170 = vmatpush1.bf16.msra.mxu0 %v5766_v38  ;;  %v5856_v38 = vld [vmem:[%s9263_s2 + $0xbf4] ss:$8 sps:$4 sm:$0xff]  }
 0x118   :  { %2901 = vmatpush1.bf16.msra.mxu1 %v5769_v39  ;;  %1171 = vmatprep.subr.bf16.mxu0 %v5774_v40  ;;  %v5851_v39 = vld [vmem:[%s9263_s2 + $0x530] ss:$8 sps:$4 sm:$0xff]  }
 0x119   :  { %2902 = vmatprep.subr.bf16.mxu1 %v5777_v41  ;;  %v5854_v40 = vld [vmem:[%s9263_s2 + $0xbf0] ss:$8 sps:$4 sm:$0xff]   ;;  %v5859_v41 = vld [vmem:[%s9263_s2 + $0x544] ss:$8 sps:$4 sm:$0xff]  }
 0x11b   :  { %1172 = vmatpush1.bf16.msra.mxu0 %v5772_v42  ;;  %v5862_v42 = vld [vmem:[%s9263_s2 + $0xc04] ss:$8 sps:$4 sm:$0xff]  }
 0x11c   :  { %2903 = vmatpush1.bf16.msra.mxu1 %v5775_v43  ;;  %1173 = vmatprep.subr.bf16.mxu0 %v5780_v44  ;;  %v5857_v43 = vld [vmem:[%s9263_s2 + $0x540] ss:$8 sps:$4 sm:$0xff]  }
 0x11d   :  { %2904 = vmatprep.subr.bf16.mxu1 %v5783_v45  ;;  %v5860_v44 = vld [vmem:[%s9263_s2 + $0xc00] ss:$8 sps:$4 sm:$0xff]   ;;  %v5865_v45 = vld [vmem:[%s9263_s2 + $0x554] ss:$8 sps:$4 sm:$0xff]  }
 0x11f   :  { %1174 = vmatpush1.bf16.msra.mxu0 %v5778_v46  ;;  %v5868_v46 = vld [vmem:[%s9263_s2 + $0xc14] ss:$8 sps:$4 sm:$0xff]  }
 0x120   :  { %2905 = vmatpush1.bf16.msra.mxu1 %v5781_v48  ;;  %1684 = vmatprep.subr.bf16.mxu0 %v5786_v49  ;;  %v5866_v48 = vld [vmem:[%s9263_s2 + $0xc10] ss:$8 sps:$4 sm:$0xff]   ;;  %v5871_v49 = vld [vmem:[%s9263_s2 + $0x564] ss:$8 sps:$4 sm:$0xff]  }
 0x121   :  { %3374 = vmatprep.subr.bf16.mxu1 %v5789_v50  ;;  %v5874_v50 = vld [vmem:[%s9263_s2 + $0xc24] ss:$8 sps:$4 sm:$0xff]  }
 0x122   :  { %4619 = vmatmul.mubr.msk.bf16.vlgmr.msra.gmra.mrb[0].mxu0 %vm560_vm0, %v7381_v51 }
 0x123   :  { %5054 = vmatmul.mubr.msk.bf16.vlgmr.msra.gmra.mrb[0].mxu1 %vm560_vm0, %v7381_v51  ;;  %1685 = vmatpush1.bf16.msra.mxu0 %v5784_v54  ;;  %v5872_v54 = vld [vmem:[%s9263_s2 + $0xc20] ss:$8 sps:$4 sm:$0xff]  }
 0x124   :  { %3375 = vmatpush1.bf16.msra.mxu1 %v5787_v55  ;;  %1686 = vmatprep.subr.bf16.mxu0 %v5793_v56  ;;  %v5877_v55 = vld [vmem:[%s9263_s2 + $0x574] ss:$8 sps:$4 sm:$0xff]  }
 0x125   :  { %3376 = vmatprep.subr.bf16.mxu1 %v5796_v28  ;;  %1716 = vmatprep.mubr.bf16.mxu0 %v7396_v57  ;;  %v5880_v56 = vld [vmem:[%s9263_s2 + $0xc34] ss:$8 sps:$4 sm:$0xff]   ;;  %v1307_v28 = vshll.u32 %v7134_v32, 16 }
 0x126   :  { %3406 = vmatprep.mubr.bf16.mxu1 %v7396_v57 }
 0x127   :  { %1687 = vmatpush1.bf16.msra.mxu0 %v5791_v58  ;;  %v1284_v58 = vshrl.u32 %v7117_v26, 16  ;;  %v5886_v26 = vld [vmem:[%s9263_s2 + $0xc44] ss:$8 sps:$4 sm:$0xff]  }
 0x128   :  { %3377 = vmatpush1.bf16.msra.mxu1 %v5794_v59  ;;  %1688 = vmatprep.subr.bf16.mxu0 %v5799_v60  ;;  %v1288_v59 = vrot.slane %v1286_v52, 1  ;;  %v5875_v60 = vld [vmem:[%s9263_s2 + $0x570] ss:$8 sps:$4 sm:$0xff]  }
 0x129   :  { %3378 = vmatprep.subr.bf16.mxu1 %v5802_v61  ;;  %v5878_v61 = vld [vmem:[%s9263_s2 + $0xc30] ss:$8 sps:$4 sm:$0xff]  }
 0x12a   :  { %v5947_v52 = vld [vmem:[%s9263_s2 + $0x630] ss:$8 sps:$4 sm:$0xff]  }
 0x12b   :  { %1689 = vmatpush1.bf16.msra.mxu0 %v5797_v62  ;;  %v5883_v62 = vld [vmem:[%s9263_s2 + $0x584] ss:$8 sps:$4 sm:$0xff]  }
 0x12c   :  { %3379 = vmatpush1.bf16.msra.mxu1 %v5800_v63  ;;  %1690 = vmatprep.subr.bf16.mxu0 %v5805_v0  ;;  %v1305_v63 = vshrl.u32 %v7134_v32, 16  ;;  %v1309_v0 = vrot.slane %v1307_v28, 1  ;;  %v5892_v32 = vld [vmem:[%s9263_s2 + $0xc54] ss:$8 sps:$4 sm:$0xff]   ;;  %v5956_v28 = vld [vmem:[%s9263_s2 + $0xd00] ss:$8 sps:$4 sm:$0xff]  }
 0x12d   :  { %3380 = vmatprep.subr.bf16.mxu1 %v5808_v1  ;;  %v7588_v1 = vor.u32 %v1288_v59, %v1284_v58  ;;  %v5961_v58 = vld [vmem:[%s9263_s2 + $0x654] ss:$8 sps:$4 sm:$0xff]  }
 0x12e   :  { %v5964_v59 = vld [vmem:[%s9263_s2 + $0xd14] ss:$8 sps:$4 sm:$0xff]  }
 0x12f   :  { %1691 = vmatpush1.bf16.msra.mxu0 %v5803_v2  ;;  %v5881_v2 = vld [vmem:[%s9263_s2 + $0x580] ss:$8 sps:$4 sm:$0xff]  }
 0x130   :  { %3381 = vmatpush1.bf16.msra.mxu1 %v5806_v3  ;;  %1692 = vmatprep.subr.bf16.mxu0 %v5811_v4  ;;  %v5884_v3 = vld [vmem:[%s9263_s2 + $0xc40] ss:$8 sps:$4 sm:$0xff]   ;;  %v5889_v4 = vld [vmem:[%s9263_s2 + $0x594] ss:$8 sps:$4 sm:$0xff]  }
 0x131   :  { %3382 = vmatprep.subr.bf16.mxu1 %v5814_v5  ;;  %v7602_v5 = vor.u32 %v1309_v0, %v1305_v63  ;;  %v1300_v63 = vshll.u32 %v7323_v33, 16  ;;  %v5965_v0 = vld [vmem:[%s9263_s2 + $0x660] ss:$8 sps:$4 sm:$0xff]  }
 0x133   :  { %1693 = vmatpush1.bf16.msra.mxu0 %v5809_v6  ;;  %v5887_v6 = vld [vmem:[%s9263_s2 + $0x590] ss:$8 sps:$4 sm:$0xff]  }
 0x134   :  { %3383 = vmatpush1.bf16.msra.mxu1 %v5812_v7  ;;  %1694 = vmatprep.subr.bf16.mxu0 %v5817_v8  ;;  %v5890_v7 = vld [vmem:[%s9263_s2 + $0xc50] ss:$8 sps:$4 sm:$0xff]   ;;  %v5895_v8 = vld [vmem:[%s9263_s2 + $0x5a4] ss:$8 sps:$4 sm:$0xff]  }
 0x135   :  { %3384 = vmatprep.subr.bf16.mxu1 %v5820_v9  ;;  %v5898_v9 = vld [vmem:[%s9263_s2 + $0xc64] ss:$8 sps:$4 sm:$0xff]  }
 0x137   :  { %1695 = vmatpush1.bf16.msra.mxu0 %v5815_v10  ;;  %v5893_v10 = vld [vmem:[%s9263_s2 + $0x5a0] ss:$8 sps:$4 sm:$0xff]  }
 0x138   :  { %3385 = vmatpush1.bf16.msra.mxu1 %v5818_v11  ;;  %1696 = vmatprep.subr.bf16.mxu0 %v5823_v12  ;;  %v5896_v11 = vld [vmem:[%s9263_s2 + $0xc60] ss:$8 sps:$4 sm:$0xff]   ;;  %v5901_v12 = vld [vmem:[%s9263_s2 + $0x5b4] ss:$8 sps:$4 sm:$0xff]  }
 0x139   :  { %3386 = vmatprep.subr.bf16.mxu1 %v5826_v13  ;;  %v5904_v13 = vld [vmem:[%s9263_s2 + $0xc74] ss:$8 sps:$4 sm:$0xff]  }
 0x13b   :  { %1697 = vmatpush1.bf16.msra.mxu0 %v5821_v15  ;;  %v5899_v15 = vld [vmem:[%s9263_s2 + $0x5b0] ss:$8 sps:$4 sm:$0xff]  }
 0x13c   :  { %3387 = vmatpush1.bf16.msra.mxu1 %v5824_v16  ;;  %1698 = vmatprep.subr.bf16.mxu0 %v5829_v17  ;;  %v5902_v16 = vld [vmem:[%s9263_s2 + $0xc70] ss:$8 sps:$4 sm:$0xff]   ;;  %v5907_v17 = vld [vmem:[%s9263_s2 + $0x5c4] ss:$8 sps:$4 sm:$0xff]  }
 0x13d   :  { %3388 = vmatprep.subr.bf16.mxu1 %v5832_v18  ;;  %v5910_v18 = vld [vmem:[%s9263_s2 + $0xc84] ss:$8 sps:$4 sm:$0xff]  }
 0x13f   :  { %1699 = vmatpush1.bf16.msra.mxu0 %v5827_v19  ;;  %v5905_v19 = vld [vmem:[%s9263_s2 + $0x5c0] ss:$8 sps:$4 sm:$0xff]  }
 0x140   :  { %3389 = vmatpush1.bf16.msra.mxu1 %v5830_v20  ;;  %1700 = vmatprep.subr.bf16.mxu0 %v5835_v21  ;;  %v5908_v20 = vld [vmem:[%s9263_s2 + $0xc80] ss:$8 sps:$4 sm:$0xff]   ;;  %v5913_v21 = vld [vmem:[%s9263_s2 + $0x5d4] ss:$8 sps:$4 sm:$0xff]  }
 0x141   :  { %3390 = vmatprep.subr.bf16.mxu1 %v5838_v22  ;;  %v5916_v22 = vld [vmem:[%s9263_s2 + $0xc94] ss:$8 sps:$4 sm:$0xff]  }
 0x143   :  { %1701 = vmatpush1.bf16.msra.mxu0 %v5833_v23  ;;  %v5911_v23 = vld [vmem:[%s9263_s2 + $0x5d0] ss:$8 sps:$4 sm:$0xff]  }
 0x144   :  { %3391 = vmatpush1.bf16.msra.mxu1 %v5836_v24  ;;  %1702 = vmatprep.subr.bf16.mxu0 %v5841_v25  ;;  %v5914_v24 = vld [vmem:[%s9263_s2 + $0xc90] ss:$8 sps:$4 sm:$0xff]   ;;  %v5919_v25 = vld [vmem:[%s9263_s2 + $0x5e4] ss:$8 sps:$4 sm:$0xff]  }
 0x145   :  { %3392 = vmatprep.subr.bf16.mxu1 %v5844_v27  ;;  %v5922_v27 = vld [vmem:[%s9263_s2 + $0xca4] ss:$8 sps:$4 sm:$0xff]  }
 0x147   :  { %1703 = vmatpush1.bf16.msra.mxu0 %v5839_v29  ;;  %v5917_v29 = vld [vmem:[%s9263_s2 + $0x5e0] ss:$8 sps:$4 sm:$0xff]  }
 0x148   :  { %3393 = vmatpush1.bf16.msra.mxu1 %v5842_v30  ;;  %1704 = vmatprep.subr.bf16.mxu0 %v5847_v31  ;;  %v5920_v30 = vld [vmem:[%s9263_s2 + $0xca0] ss:$8 sps:$4 sm:$0xff]   ;;  %v5925_v31 = vld [vmem:[%s9263_s2 + $0x5f4] ss:$8 sps:$4 sm:$0xff]  }
 0x149   :  { %3394 = vmatprep.subr.bf16.mxu1 %v5850_v34  ;;  %v5928_v34 = vld [vmem:[%s9263_s2 + $0xcb4] ss:$8 sps:$4 sm:$0xff]  }
 0x14b   :  { %1705 = vmatpush1.bf16.msra.mxu0 %v5845_v35  ;;  %v5923_v35 = vld [vmem:[%s9263_s2 + $0x5f0] ss:$8 sps:$4 sm:$0xff]  }
 0x14c   :  { %3395 = vmatpush1.bf16.msra.mxu1 %v5848_v36  ;;  %1706 = vmatprep.subr.bf16.mxu0 %v5853_v37  ;;  %v5926_v36 = vld [vmem:[%s9263_s2 + $0xcb0] ss:$8 sps:$4 sm:$0xff]   ;;  %v5931_v37 = vld [vmem:[%s9263_s2 + $0x604] ss:$8 sps:$4 sm:$0xff]  }
 0x14d   :  { %3396 = vmatprep.subr.bf16.mxu1 %v5856_v38  ;;  %v5934_v38 = vld [vmem:[%s9263_s2 + $0xcc4] ss:$8 sps:$4 sm:$0xff]  }
 0x14f   :  { %1707 = vmatpush1.bf16.msra.mxu0 %v5851_v39  ;;  %v5929_v39 = vld [vmem:[%s9263_s2 + $0x600] ss:$8 sps:$4 sm:$0xff]  }
 0x150   :  { %3397 = vmatpush1.bf16.msra.mxu1 %v5854_v40  ;;  %1708 = vmatprep.subr.bf16.mxu0 %v5859_v41  ;;  %v5932_v40 = vld [vmem:[%s9263_s2 + $0xcc0] ss:$8 sps:$4 sm:$0xff]   ;;  %v5937_v41 = vld [vmem:[%s9263_s2 + $0x614] ss:$8 sps:$4 sm:$0xff]  }
 0x151   :  { %3398 = vmatprep.subr.bf16.mxu1 %v5862_v42  ;;  %v5940_v42 = vld [vmem:[%s9263_s2 + $0xcd4] ss:$8 sps:$4 sm:$0xff]  }
 0x153   :  { %1709 = vmatpush1.bf16.msra.mxu0 %v5857_v43  ;;  %v5935_v43 = vld [vmem:[%s9263_s2 + $0x610] ss:$8 sps:$4 sm:$0xff]  }
 0x154   :  { %3399 = vmatpush1.bf16.msra.mxu1 %v5860_v44  ;;  %1710 = vmatprep.subr.bf16.mxu0 %v5865_v45  ;;  %v5938_v44 = vld [vmem:[%s9263_s2 + $0xcd0] ss:$8 sps:$4 sm:$0xff]   ;;  %v5943_v45 = vld [vmem:[%s9263_s2 + $0x624] ss:$8 sps:$4 sm:$0xff]  }
 0x155   :  { %3400 = vmatprep.subr.bf16.mxu1 %v5868_v46  ;;  %v5946_v46 = vld [vmem:[%s9263_s2 + $0xce4] ss:$8 sps:$4 sm:$0xff]  }
 0x157   :  { %1711 = vmatpush1.bf16.msra.mxu0 %v5863_v47  ;;  %v5941_v47 = vld [vmem:[%s9263_s2 + $0x620] ss:$8 sps:$4 sm:$0xff]  }
 0x158   :  { %3401 = vmatpush1.bf16.msra.mxu1 %v5866_v48  ;;  %1712 = vmatprep.subr.bf16.mxu0 %v5871_v49  ;;  %v5944_v48 = vld [vmem:[%s9263_s2 + $0xce0] ss:$8 sps:$4 sm:$0xff]   ;;  %v5949_v49 = vld [vmem:[%s9263_s2 + $0x634] ss:$8 sps:$4 sm:$0xff]  }
 0x159   :  { %3402 = vmatprep.subr.bf16.mxu1 %v5874_v50  ;;  %v5952_v50 = vld [vmem:[%s9263_s2 + $0xcf4] ss:$8 sps:$4 sm:$0xff]  }
 0x15b   :  { %1713 = vmatpush1.bf16.msra.mxu0 %v5869_v53  ;;  %v5950_v53 = vld [vmem:[%s9263_s2 + $0xcf0] ss:$8 sps:$4 sm:$0xff]  }
 0x15c   :  { %3403 = vmatpush1.bf16.msra.mxu1 %v5872_v54  ;;  %1714 = vmatprep.subr.bf16.mxu0 %v5877_v55  ;;  %v5955_v54 = vld [vmem:[%s9263_s2 + $0x644] ss:$8 sps:$4 sm:$0xff]  }
 0x15d   :  { %3404 = vmatprep.subr.bf16.mxu1 %v5880_v56  ;;  %v5958_v55 = vld [vmem:[%s9263_s2 + $0xd04] ss:$8 sps:$4 sm:$0xff]   ;;  %v5953_v56 = vld [vmem:[%s9263_s2 + $0x640] ss:$8 sps:$4 sm:$0xff]  }
 0x15f   :  { %1715 = vmatpush1.bf16.msra.mxu0 %v5875_v60  ;;  %v5959_v60 = vld [vmem:[%s9263_s2 + $0x650] ss:$8 sps:$4 sm:$0xff]  }
 0x160   :  { %3405 = vmatpush1.bf16.msra.mxu1 %v5878_v61  ;;  %1727 = vmatprep.subr.bf16.mxu0 %v5883_v62  ;;  %v5962_v61 = vld [vmem:[%s9263_s2 + $0xd10] ss:$8 sps:$4 sm:$0xff]   ;;  %v5967_v62 = vld [vmem:[%s9263_s2 + $0x664] ss:$8 sps:$4 sm:$0xff]  }
 0x161   :  { %3417 = vmatprep.subr.bf16.mxu1 %v5886_v26  ;;  %v5970_v26 = vld [vmem:[%s9263_s2 + $0xd24] ss:$8 sps:$4 sm:$0xff]  }
 0x162   :  { %1717 = vmatmul.mubr.bf16.vlgmr.msra.gmra.mrb[0].mxu0 %v7588_v1 }
 0x163   :  { %3407 = vmatmul.mubr.bf16.vlgmr.msra.gmra.mrb[0].mxu1 %v7588_v1  ;;  %1728 = vmatpush1.bf16.msra.mxu0 %v5881_v2  ;;  %v5968_v2 = vld [vmem:[%s9263_s2 + $0xd20] ss:$8 sps:$4 sm:$0xff]  }
 0x164   :  { %3418 = vmatpush1.bf16.msra.mxu1 %v5884_v3  ;;  %1729 = vmatprep.subr.bf16.mxu0 %v5889_v4  ;;  %v5973_v3 = vld [vmem:[%s9263_s2 + $0x674] ss:$8 sps:$4 sm:$0xff]  }
 0x165   :  { %3419 = vmatprep.subr.bf16.mxu1 %v5892_v32  ;;  %1759 = vmatprep.mubr.bf16.mxu0 %v7602_v5  ;;  %v5976_v4 = vld [vmem:[%s9263_s2 + $0xd34] ss:$8 sps:$4 sm:$0xff]   ;;  %v1298_v32 = vshrl.u32 %v7323_v33, 16  ;;  %v5982_v33 = vld [vmem:[%s9263_s2 + $0xd44] ss:$8 sps:$4 sm:$0xff]  }
 0x166   :  { %3449 = vmatprep.mubr.bf16.mxu1 %v7602_v5 }
 0x167   :  { %1730 = vmatpush1.bf16.msra.mxu0 %v5887_v6  ;;  %v1302_v6 = vrot.slane %v1300_v63, 1  ;;  %v6032_v63 = vld [vmem:[%s9263_s2 + $0x970] ss:$8 sps:$4 sm:$0xff]  }
 0x168   :  { %3420 = vmatpush1.bf16.msra.mxu1 %v5890_v7  ;;  %1731 = vmatprep.subr.bf16.mxu0 %v5895_v8  ;;  %v5971_v7 = vld [vmem:[%s9263_s2 + $0x670] ss:$8 sps:$4 sm:$0xff]  }
 0x169   :  { %3421 = vmatprep.subr.bf16.mxu1 %v5898_v9  ;;  %v5974_v8 = vld [vmem:[%s9263_s2 + $0xd30] ss:$8 sps:$4 sm:$0xff]   ;;  %v5979_v9 = vld [vmem:[%s9263_s2 + $0x684] ss:$8 sps:$4 sm:$0xff]  }
 0x16b   :  { %1732 = vmatpush1.bf16.msra.mxu0 %v5893_v10  ;;  %v7790_v10 = vor.u32 %v1302_v6, %v1298_v32  ;;  %v6037_v32 = vld [vmem:[%s9263_s2 + $0x2d4] ss:$8 sps:$4 sm:$0xff]  }
 0x16c   :  { %3422 = vmatpush1.bf16.msra.mxu1 %v5896_v11  ;;  %1733 = vmatprep.subr.bf16.mxu0 %v5901_v12  ;;  %v5977_v11 = vld [vmem:[%s9263_s2 + $0x680] ss:$8 sps:$4 sm:$0xff]   ;;  %v6038_v6 = vld [vmem:[%s9263_s2 + $0x994] ss:$8 sps:$4 sm:$0xff]  }
 0x16d   :  { %3423 = vmatprep.subr.bf16.mxu1 %v5904_v13  ;;  %v5980_v12 = vld [vmem:[%s9263_s2 + $0xd40] ss:$8 sps:$4 sm:$0xff]   ;;  %v5985_v13 = vld [vmem:[%s9263_s2 + $0x694] ss:$8 sps:$4 sm:$0xff]  }
 0x16f   :  { %1734 = vmatpush1.bf16.msra.mxu0 %v5899_v15  ;;  %v5988_v15 = vld [vmem:[%s9263_s2 + $0xd54] ss:$8 sps:$4 sm:$0xff]  }
 0x170   :  { %3424 = vmatpush1.bf16.msra.mxu1 %v5902_v16  ;;  %1735 = vmatprep.subr.bf16.mxu0 %v5907_v17  ;;  %v5983_v16 = vld [vmem:[%s9263_s2 + $0x690] ss:$8 sps:$4 sm:$0xff]  }
 0x171   :  { %3425 = vmatprep.subr.bf16.mxu1 %v5910_v18  ;;  %v5986_v17 = vld [vmem:[%s9263_s2 + $0xd50] ss:$8 sps:$4 sm:$0xff]   ;;  %v5991_v18 = vld [vmem:[%s9263_s2 + $0x6a4] ss:$8 sps:$4 sm:$0xff]  }
 0x173   :  { %1736 = vmatpush1.bf16.msra.mxu0 %v5905_v19  ;;  %v5994_v19 = vld [vmem:[%s9263_s2 + $0xd64] ss:$8 sps:$4 sm:$0xff]  }
 0x174   :  { %3426 = vmatpush1.bf16.msra.mxu1 %v5908_v20  ;;  %1737 = vmatprep.subr.bf16.mxu0 %v5913_v21  ;;  %v1313_v20 = vshll.u32 %v7381_v51, 16  ;;  %v7824_v21 = vld [vmem:[%s9263_s2 + $0x6a0] ss:$8 sps:$4 sm:$0xff]  }
 0x175   :  { %3427 = vmatprep.subr.bf16.mxu1 %v5916_v22  ;;  %v7829_v22 = vld [vmem:[%s9263_s2 + $0xd60] ss:$8 sps:$4 sm:$0xff]  }
 0x177   :  { %1738 = vmatpush1.bf16.msra.mxu0 %v5911_v23  ;;  %v7834_v23 = vld [vmem:[%s9263_s2 + $0x6b4] ss:$8 sps:$4 sm:$0xff]  }
 0x178   :  { %3428 = vmatpush1.bf16.msra.mxu1 %v5914_v24  ;;  %1739 = vmatprep.subr.bf16.mxu0 %v5919_v25  ;;  %v7839_v24 = vld [vmem:[%s9263_s2 + $0xd74] ss:$8 sps:$4 sm:$0xff]   ;;  %v1311_v25 = vshrl.u32 %v7381_v51, 16 }
 0x179   :  { %3429 = vmatprep.subr.bf16.mxu1 %v5922_v27  ;;  %v1315_v27 = vrot.slane %v1313_v20, 1  ;;  %v6051_v20 = vld [vmem:[%s9263_s2 + $0x300] ss:$8 sps:$4 sm:$0xff]  }
 0x17b   :  { %1740 = vmatpush1.bf16.msra.mxu0 %v5917_v29  ;;  %v7847_v29 = vld [vmem:[%s9263_s2 + $0x6b0] ss:$8 sps:$4 sm:$0xff]   ;;  %v7856_v51 = vor.u32 %v1315_v27, %v1311_v25  ;;  %v6052_v25 = vld [vmem:[%s9263_s2 + $0x9c0] ss:$8 sps:$4 sm:$0xff]   ;;  %v6053_v27 = vld [vmem:[%s9263_s2 + $0x314] ss:$8 sps:$4 sm:$0xff]  }
 0x17c   :  { %3430 = vmatpush1.bf16.msra.mxu1 %v5920_v30  ;;  %1741 = vmatprep.subr.bf16.mxu0 %v5925_v31  ;;  %v7852_v30 = vld [vmem:[%s9263_s2 + $0xd70] ss:$8 sps:$4 sm:$0xff]   ;;  %v6001_v31 = vld [vmem:[%s9263_s2 + $0x244] ss:$8 sps:$4 sm:$0xff]  }
 0x17d   :  { %3431 = vmatprep.subr.bf16.mxu1 %v5928_v34  ;;  %v6002_v34 = vld [vmem:[%s9263_s2 + $0x904] ss:$8 sps:$4 sm:$0xff]  }
 0x17f   :  { %1742 = vmatpush1.bf16.msra.mxu0 %v5923_v35  ;;  %v6003_v35 = vld [vmem:[%s9263_s2 + $0x240] ss:$8 sps:$4 sm:$0xff]  }
 0x180   :  { %3432 = vmatpush1.bf16.msra.mxu1 %v5926_v36  ;;  %1743 = vmatprep.subr.bf16.mxu0 %v5931_v37  ;;  %v6004_v36 = vld [vmem:[%s9263_s2 + $0x900] ss:$8 sps:$4 sm:$0xff]   ;;  %v6005_v37 = vld [vmem:[%s9263_s2 + $0x254] ss:$8 sps:$4 sm:$0xff]  }
 0x181   :  { %3433 = vmatprep.subr.bf16.mxu1 %v5934_v38  ;;  %v6006_v38 = vld [vmem:[%s9263_s2 + $0x914] ss:$8 sps:$4 sm:$0xff]  }
 0x183   :  { %1744 = vmatpush1.bf16.msra.mxu0 %v5929_v39  ;;  %v6007_v39 = vld [vmem:[%s9263_s2 + $0x250] ss:$8 sps:$4 sm:$0xff]  }
 0x184   :  { %3434 = vmatpush1.bf16.msra.mxu1 %v5932_v40  ;;  %1745 = vmatprep.subr.bf16.mxu0 %v5937_v41  ;;  %v6008_v40 = vld [vmem:[%s9263_s2 + $0x910] ss:$8 sps:$4 sm:$0xff]   ;;  %v6009_v41 = vld [vmem:[%s9263_s2 + $0x264] ss:$8 sps:$4 sm:$0xff]  }
 0x185   :  { %3435 = vmatprep.subr.bf16.mxu1 %v5940_v42  ;;  %v6010_v42 = vld [vmem:[%s9263_s2 + $0x924] ss:$8 sps:$4 sm:$0xff]  }
 0x187   :  { %1746 = vmatpush1.bf16.msra.mxu0 %v5935_v43  ;;  %v6012_v43 = vld [vmem:[%s9263_s2 + $0x920] ss:$8 sps:$4 sm:$0xff]  }
 0x188   :  { %3436 = vmatpush1.bf16.msra.mxu1 %v5938_v44  ;;  %1747 = vmatprep.subr.bf16.mxu0 %v5943_v45  ;;  %v6013_v44 = vld [vmem:[%s9263_s2 + $0x274] ss:$8 sps:$4 sm:$0xff]  }
 0x189   :  { %3437 = vmatprep.subr.bf16.mxu1 %v5946_v46  ;;  %v6014_v45 = vld [vmem:[%s9263_s2 + $0x934] ss:$8 sps:$4 sm:$0xff]   ;;  %v6015_v46 = vld [vmem:[%s9263_s2 + $0x270] ss:$8 sps:$4 sm:$0xff]  }
 0x18b   :  { %1748 = vmatpush1.bf16.msra.mxu0 %v5941_v47  ;;  %v6016_v47 = vld [vmem:[%s9263_s2 + $0x930] ss:$8 sps:$4 sm:$0xff]  }
 0x18c   :  { %3438 = vmatpush1.bf16.msra.mxu1 %v5944_v48  ;;  %1749 = vmatprep.subr.bf16.mxu0 %v5949_v49  ;;  %v6017_v48 = vld [vmem:[%s9263_s2 + $0x284] ss:$8 sps:$4 sm:$0xff]  }
 0x18d   :  { %3439 = vmatprep.subr.bf16.mxu1 %v5952_v50  ;;  %v6018_v49 = vld [vmem:[%s9263_s2 + $0x944] ss:$8 sps:$4 sm:$0xff]   ;;  %v6019_v50 = vld [vmem:[%s9263_s2 + $0x280] ss:$8 sps:$4 sm:$0xff]  }
 0x18f   :  { %1750 = vmatpush1.bf16.msra.mxu0 %v5947_v52  ;;  %v6020_v52 = vld [vmem:[%s9263_s2 + $0x940] ss:$8 sps:$4 sm:$0xff]  }
 0x190   :  { %3440 = vmatpush1.bf16.msra.mxu1 %v5950_v53  ;;  %1751 = vmatprep.subr.bf16.mxu0 %v5955_v54  ;;  %v6021_v53 = vld [vmem:[%s9263_s2 + $0x294] ss:$8 sps:$4 sm:$0xff]  }
 0x191   :  { %3441 = vmatprep.subr.bf16.mxu1 %v5958_v55  ;;  %v6022_v54 = vld [vmem:[%s9263_s2 + $0x954] ss:$8 sps:$4 sm:$0xff]   ;;  %v6023_v55 = vld [vmem:[%s9263_s2 + $0x290] ss:$8 sps:$4 sm:$0xff]  }
 0x193   :  { %1752 = vmatpush1.bf16.msra.mxu0 %v5953_v56  ;;  %v6024_v56 = vld [vmem:[%s9263_s2 + $0x950] ss:$8 sps:$4 sm:$0xff]  }
 0x194   :  { %3442 = vmatpush1.bf16.msra.mxu1 %v5956_v28  ;;  %1753 = vmatprep.subr.bf16.mxu0 %v5961_v58  ;;  %v6025_v28 = vld [vmem:[%s9263_s2 + $0x2a4] ss:$8 sps:$4 sm:$0xff]  }
 0x195   :  { %3443 = vmatprep.subr.bf16.mxu1 %v5964_v59  ;;  %v6026_v58 = vld [vmem:[%s9263_s2 + $0x964] ss:$8 sps:$4 sm:$0xff]   ;;  %v6027_v59 = vld [vmem:[%s9263_s2 + $0x2a0] ss:$8 sps:$4 sm:$0xff]  }
 0x197   :  { %1754 = vmatpush1.bf16.msra.mxu0 %v5959_v60  ;;  %v6028_v60 = vld [vmem:[%s9263_s2 + $0x960] ss:$8 sps:$4 sm:$0xff]  }
 0x198   :  { %3444 = vmatpush1.bf16.msra.mxu1 %v5962_v61  ;;  %1755 = vmatprep.subr.bf16.mxu0 %v5967_v62  ;;  %v6029_v61 = vld [vmem:[%s9263_s2 + $0x2b4] ss:$8 sps:$4 sm:$0xff]  }
 0x199   :  { %3445 = vmatprep.subr.bf16.mxu1 %v5970_v26  ;;  %v6030_v62 = vld [vmem:[%s9263_s2 + $0x974] ss:$8 sps:$4 sm:$0xff]   ;;  %v6031_v26 = vld [vmem:[%s9263_s2 + $0x2b0] ss:$8 sps:$4 sm:$0xff]  }
 0x19b   :  { %1756 = vmatpush1.bf16.msra.mxu0 %v5965_v0  ;;  %v6033_v0 = vld [vmem:[%s9263_s2 + $0x2c4] ss:$8 sps:$4 sm:$0xff]  }
 0x19c   :  { %3446 = vmatpush1.bf16.msra.mxu1 %v5968_v2  ;;  %1757 = vmatprep.subr.bf16.mxu0 %v5973_v3  ;;  %v6034_v2 = vld [vmem:[%s9263_s2 + $0x984] ss:$8 sps:$4 sm:$0xff]   ;;  %v6035_v3 = vld [vmem:[%s9263_s2 + $0x2c0] ss:$8 sps:$4 sm:$0xff]  }
 0x19d   :  { %3447 = vmatprep.subr.bf16.mxu1 %v5976_v4  ;;  %v6036_v4 = vld [vmem:[%s9263_s2 + $0x980] ss:$8 sps:$4 sm:$0xff]  }
 0x19f   :  { %1758 = vmatpush1.bf16.msra.mxu0 %v5971_v7  ;;  %v6039_v7 = vld [vmem:[%s9263_s2 + $0x2d0] ss:$8 sps:$4 sm:$0xff]  }
 0x1a0   :  { %3448 = vmatpush1.bf16.msra.mxu1 %v5974_v8  ;;  %1770 = vmatprep.subr.bf16.mxu0 %v5979_v9  ;;  %v6040_v8 = vld [vmem:[%s9263_s2 + $0x990] ss:$8 sps:$4 sm:$0xff]   ;;  %v6041_v9 = vld [vmem:[%s9263_s2 + $0x2e4] ss:$8 sps:$4 sm:$0xff]  }
 0x1a1   :  { %3460 = vmatprep.subr.bf16.mxu1 %v5982_v33  ;;  %v6042_v33 = vld [vmem:[%s9263_s2 + $0x9a4] ss:$8 sps:$4 sm:$0xff]  }
 0x1a2   :  { %1760 = vmatmul.mubr.bf16.vlgmr.msra.gmra.mrb[0].mxu0 %v7790_v10 }
 0x1a3   :  { %3450 = vmatmul.mubr.bf16.vlgmr.msra.gmra.mrb[0].mxu1 %v7790_v10  ;;  %1771 = vmatpush1.bf16.msra.mxu0 %v5977_v11  ;;  %v6043_v11 = vld [vmem:[%s9263_s2 + $0x2e0] ss:$8 sps:$4 sm:$0xff]  }
 0x1a4   :  { %3461 = vmatpush1.bf16.msra.mxu1 %v5980_v12  ;;  %1772 = vmatprep.subr.bf16.mxu0 %v5985_v13  ;;  %v6044_v12 = vld [vmem:[%s9263_s2 + $0x9a0] ss:$8 sps:$4 sm:$0xff]   ;;  %v6045_v13 = vld [vmem:[%s9263_s2 + $0x2f4] ss:$8 sps:$4 sm:$0xff]  }
 0x1a5   :  { %3462 = vmatprep.subr.bf16.mxu1 %v5988_v15  ;;  %1802 = vmatprep.mubr.bf16.mxu0 %v6432_v14  ;;  %v6046_v15 = vld [vmem:[%s9263_s2 + $0x9b4] ss:$8 sps:$4 sm:$0xff]  }
 0x1a6   :  { %3492 = vmatprep.mubr.bf16.mxu1 %v6432_v14 }
 0x1a7   :  { %1773 = vmatpush1.bf16.msra.mxu0 %v5983_v16  ;;  %v6047_v16 = vld [vmem:[%s9263_s2 + $0x2f0] ss:$8 sps:$4 sm:$0xff]  }
 0x1a8   :  { %3463 = vmatpush1.bf16.msra.mxu1 %v5986_v17  ;;  %1774 = vmatprep.subr.bf16.mxu0 %v5991_v18  ;;  %v6048_v17 = vld [vmem:[%s9263_s2 + $0x9b0] ss:$8 sps:$4 sm:$0xff]   ;;  %v6049_v18 = vld [vmem:[%s9263_s2 + $0x304] ss:$8 sps:$4 sm:$0xff]  }
 0x1a9   :  { %3464 = vmatprep.subr.bf16.mxu1 %v5994_v19  ;;  %v6050_v19 = vld [vmem:[%s9263_s2 + $0x9c4] ss:$8 sps:$4 sm:$0xff]  }
 0x1ab   :  { %1775 = vmatpush1.bf16.msra.mxu0 %v7824_v21 }
 0x1ac   :  { %3465 = vmatpush1.bf16.msra.mxu1 %v7829_v22  ;;  %1776 = vmatprep.subr.bf16.mxu0 %v7834_v23 }
 0x1ad   :  { %3466 = vmatprep.subr.bf16.mxu1 %v7839_v24 }
 0x1af   :  { %1777 = vmatpush1.bf16.msra.mxu0 %v7847_v29 }
 0x1b0   :  { %3467 = vmatpush1.bf16.msra.mxu1 %v7852_v30  ;;  %3511 = vmatprep.subr.bf16.mxu0 %v6001_v31  ;;  %v6054_v31 = vld [vmem:[%s9263_s2 + $0x9d4] ss:$8 sps:$4 sm:$0xff]  }
 0x1b1   :  { %3947 = vmatprep.subr.bf16.mxu1 %v6002_v34  ;;  %v6055_v34 = vld [vmem:[%s9263_s2 + $0x310] ss:$8 sps:$4 sm:$0xff]  }
 0x1b2   :  { %4764 = vmatmul.mubr.msk.bf16.vlgmr.msra.gmra.mrb[0].mxu0 %vm560_vm0, %v7856_v51 }
 0x1b3   :  { %5199 = vmatmul.mubr.msk.bf16.vlgmr.msra.gmra.mrb[0].mxu1 %vm560_vm0, %v7856_v51  ;;  %3512 = vmatpush1.bf16.msra.mxu0 %v6003_v35  ;;  %v6056_v35 = vld [vmem:[%s9263_s2 + $0x9d0] ss:$8 sps:$4 sm:$0xff]  }
 0x1b4   :  { %3948 = vmatpush1.bf16.msra.mxu1 %v6004_v36  ;;  %3513 = vmatprep.subr.bf16.mxu0 %v6005_v37  ;;  %v6057_v36 = vld [vmem:[%s9263_s2 + $0x324] ss:$8 sps:$4 sm:$0xff]  }
 0x1b5   :  { %3949 = vmatprep.subr.bf16.mxu1 %v6006_v38  ;;  %3543 = vmatprep.mubr.bf16.mxu0 %v7396_v57  ;;  %v6058_v37 = vld [vmem:[%s9263_s2 + $0x9e4] ss:$8 sps:$4 sm:$0xff]   ;;  %v6059_v38 = vld [vmem:[%s9263_s2 + $0x320] ss:$8 sps:$4 sm:$0xff]  }
 0x1b6   :  { %3979 = vmatprep.mubr.bf16.mxu1 %v7396_v57  ;;  %v6011_v57 = vld [vmem:[%s9263_s2 + $0x260] ss:$8 sps:$4 sm:$0xff]  }
 0x1b7   :  { %3514 = vmatpush1.bf16.msra.mxu0 %v6007_v39  ;;  %v6060_v39 = vld [vmem:[%s9263_s2 + $0x9e0] ss:$8 sps:$4 sm:$0xff]  }
 0x1b8   :  { %3950 = vmatpush1.bf16.msra.mxu1 %v6008_v40  ;;  %3515 = vmatprep.subr.bf16.mxu0 %v6009_v41  ;;  %v6061_v40 = vld [vmem:[%s9263_s2 + $0x334] ss:$8 sps:$4 sm:$0xff]  }
 0x1b9   :  { %3951 = vmatprep.subr.bf16.mxu1 %v6010_v42  ;;  %v6062_v41 = vld [vmem:[%s9263_s2 + $0x9f4] ss:$8 sps:$4 sm:$0xff]   ;;  %v6063_v42 = vld [vmem:[%s9263_s2 + $0x330] ss:$8 sps:$4 sm:$0xff]  }
 0x1bb   :  { %3516 = vmatpush1.bf16.msra.mxu0 %v6011_v57  ;;  %v6064_v57 = vld [vmem:[%s9263_s2 + $0x9f0] ss:$8 sps:$4 sm:$0xff]  }
 0x1bc   :  { %3952 = vmatpush1.bf16.msra.mxu1 %v6012_v43  ;;  %3517 = vmatprep.subr.bf16.mxu0 %v6013_v44  ;;  %v6065_v43 = vld [vmem:[%s9263_s2 + $0x344] ss:$8 sps:$4 sm:$0xff]  }
 0x1bd   :  { %3953 = vmatprep.subr.bf16.mxu1 %v6014_v45  ;;  %v6066_v44 = vld [vmem:[%s9263_s2 + $0xa04] ss:$8 sps:$4 sm:$0xff]   ;;  %v6067_v45 = vld [vmem:[%s9263_s2 + $0x340] ss:$8 sps:$4 sm:$0xff]  }
 0x1bf   :  { %3518 = vmatpush1.bf16.msra.mxu0 %v6015_v46  ;;  %v6068_v46 = vld [vmem:[%s9263_s2 + $0xa00] ss:$8 sps:$4 sm:$0xff]  }
 0x1c0   :  { %3954 = vmatpush1.bf16.msra.mxu1 %v6016_v47  ;;  %3519 = vmatprep.subr.bf16.mxu0 %v6017_v48  ;;  %v6069_v47 = vld [vmem:[%s9263_s2 + $0x354] ss:$8 sps:$4 sm:$0xff]  }
 0x1c1   :  { %3955 = vmatprep.subr.bf16.mxu1 %v6018_v49  ;;  %v6070_v48 = vld [vmem:[%s9263_s2 + $0xa14] ss:$8 sps:$4 sm:$0xff]   ;;  %v6072_v49 = vld [vmem:[%s9263_s2 + $0xa10] ss:$8 sps:$4 sm:$0xff]  }
 0x1c3   :  { %3520 = vmatpush1.bf16.msra.mxu0 %v6019_v50  ;;  %v6073_v50 = vld [vmem:[%s9263_s2 + $0x364] ss:$8 sps:$4 sm:$0xff]  }
 0x1c4   :  { %3956 = vmatpush1.bf16.msra.mxu1 %v6020_v52  ;;  %3521 = vmatprep.subr.bf16.mxu0 %v6021_v53  ;;  %v6074_v52 = vld [vmem:[%s9263_s2 + $0xa24] ss:$8 sps:$4 sm:$0xff]   ;;  %v6076_v53 = vld [vmem:[%s9263_s2 + $0xa20] ss:$8 sps:$4 sm:$0xff]  }
 0x1c5   :  { %3957 = vmatprep.subr.bf16.mxu1 %v6022_v54  ;;  %v6077_v54 = vld [vmem:[%s9263_s2 + $0x374] ss:$8 sps:$4 sm:$0xff]  }
 0x1c7   :  { %3522 = vmatpush1.bf16.msra.mxu0 %v6023_v55  ;;  %v6078_v55 = vld [vmem:[%s9263_s2 + $0xa34] ss:$8 sps:$4 sm:$0xff]  }
 0x1c8   :  { %3958 = vmatpush1.bf16.msra.mxu1 %v6024_v56  ;;  %3523 = vmatprep.subr.bf16.mxu0 %v6025_v28  ;;  %v6079_v56 = vld [vmem:[%s9263_s2 + $0x370] ss:$8 sps:$4 sm:$0xff]  }
 0x1c9   :  { %3959 = vmatprep.subr.bf16.mxu1 %v6026_v58  ;;  %v6080_v28 = vld [vmem:[%s9263_s2 + $0xa30] ss:$8 sps:$4 sm:$0xff]   ;;  %v6081_v58 = vld [vmem:[%s9263_s2 + $0x384] ss:$8 sps:$4 sm:$0xff]  }
 0x1cb   :  { %3524 = vmatpush1.bf16.msra.mxu0 %v6027_v59  ;;  %v6082_v59 = vld [vmem:[%s9263_s2 + $0xa44] ss:$8 sps:$4 sm:$0xff]  }
 0x1cc   :  { %3960 = vmatpush1.bf16.msra.mxu1 %v6028_v60  ;;  %3525 = vmatprep.subr.bf16.mxu0 %v6029_v61  ;;  %v6083_v60 = vld [vmem:[%s9263_s2 + $0x380] ss:$8 sps:$4 sm:$0xff]  }
 0x1cd   :  { %3961 = vmatprep.subr.bf16.mxu1 %v6030_v62  ;;  %v6084_v61 = vld [vmem:[%s9263_s2 + $0xa40] ss:$8 sps:$4 sm:$0xff]   ;;  %v6085_v62 = vld [vmem:[%s9263_s2 + $0x394] ss:$8 sps:$4 sm:$0xff]  }
 0x1cf   :  { %3526 = vmatpush1.bf16.msra.mxu0 %v6031_v26  ;;  %v6086_v26 = vld [vmem:[%s9263_s2 + $0xa54] ss:$8 sps:$4 sm:$0xff]  }
 0x1d0   :  { %3962 = vmatpush1.bf16.msra.mxu1 %v6032_v63  ;;  %3527 = vmatprep.subr.bf16.mxu0 %v6033_v0  ;;  %v6087_v63 = vld [vmem:[%s9263_s2 + $0x390] ss:$8 sps:$4 sm:$0xff]  }
 0x1d1   :  { %3963 = vmatprep.subr.bf16.mxu1 %v6034_v2  ;;  %v6088_v0 = vld [vmem:[%s9263_s2 + $0xa50] ss:$8 sps:$4 sm:$0xff]   ;;  %v6089_v2 = vld [vmem:[%s9263_s2 + $0x3a4] ss:$8 sps:$4 sm:$0xff]  }
 0x1d3   :  { %3528 = vmatpush1.bf16.msra.mxu0 %v6035_v3  ;;  %v6090_v3 = vld [vmem:[%s9263_s2 + $0xa64] ss:$8 sps:$4 sm:$0xff]  }
 0x1d4   :  { %3964 = vmatpush1.bf16.msra.mxu1 %v6036_v4  ;;  %3529 = vmatprep.subr.bf16.mxu0 %v6037_v32  ;;  %v6091_v4 = vld [vmem:[%s9263_s2 + $0x3a0] ss:$8 sps:$4 sm:$0xff]  }
 0x1d5   :  { %3965 = vmatprep.subr.bf16.mxu1 %v6038_v6  ;;  %v6092_v32 = vld [vmem:[%s9263_s2 + $0xa60] ss:$8 sps:$4 sm:$0xff]   ;;  %v6093_v6 = vld [vmem:[%s9263_s2 + $0x3b4] ss:$8 sps:$4 sm:$0xff]  }
 0x1d7   :  { %3530 = vmatpush1.bf16.msra.mxu0 %v6039_v7  ;;  %v6094_v7 = vld [vmem:[%s9263_s2 + $0xa74] ss:$8 sps:$4 sm:$0xff]  }
 0x1d8   :  { %3966 = vmatpush1.bf16.msra.mxu1 %v6040_v8  ;;  %3531 = vmatprep.subr.bf16.mxu0 %v6041_v9  ;;  %v6095_v8 = vld [vmem:[%s9263_s2 + $0x3b0] ss:$8 sps:$4 sm:$0xff]  }
 0x1d9   :  { %3967 = vmatprep.subr.bf16.mxu1 %v6042_v33  ;;  %v6096_v9 = vld [vmem:[%s9263_s2 + $0xa70] ss:$8 sps:$4 sm:$0xff]   ;;  %v6097_v33 = vld [vmem:[%s9263_s2 + $0x3c4] ss:$8 sps:$4 sm:$0xff]  }
 0x1db   :  { %3532 = vmatpush1.bf16.msra.mxu0 %v6043_v11  ;;  %v6098_v11 = vld [vmem:[%s9263_s2 + $0xa84] ss:$8 sps:$4 sm:$0xff]  }
 0x1dc   :  { %3968 = vmatpush1.bf16.msra.mxu1 %v6044_v12  ;;  %3533 = vmatprep.subr.bf16.mxu0 %v6045_v13  ;;  %v6099_v12 = vld [vmem:[%s9263_s2 + $0x3c0] ss:$8 sps:$4 sm:$0xff]  }
 0x1dd   :  { %3969 = vmatprep.subr.bf16.mxu1 %v6046_v15  ;;  %v6100_v13 = vld [vmem:[%s9263_s2 + $0xa80] ss:$8 sps:$4 sm:$0xff]   ;;  %v6101_v15 = vld [vmem:[%s9263_s2 + $0x3d4] ss:$8 sps:$4 sm:$0xff]  }
 0x1df   :  { %3534 = vmatpush1.bf16.msra.mxu0 %v6047_v16  ;;  %v6102_v16 = vld [vmem:[%s9263_s2 + $0xa94] ss:$8 sps:$4 sm:$0xff]  }
 0x1e0   :  { %3970 = vmatpush1.bf16.msra.mxu1 %v6048_v17  ;;  %3535 = vmatprep.subr.bf16.mxu0 %v6049_v18  ;;  %v6103_v17 = vld [vmem:[%s9263_s2 + $0x3d0] ss:$8 sps:$4 sm:$0xff]  }
 0x1e1   :  { %3971 = vmatprep.subr.bf16.mxu1 %v6050_v19  ;;  %v6104_v18 = vld [vmem:[%s9263_s2 + $0xa90] ss:$8 sps:$4 sm:$0xff]   ;;  %v6105_v19 = vld [vmem:[%s9263_s2 + $0x3e4] ss:$8 sps:$4 sm:$0xff]  }
 0x1e3   :  { %3536 = vmatpush1.bf16.msra.mxu0 %v6051_v20  ;;  %v6106_v20 = vld [vmem:[%s9263_s2 + $0xaa4] ss:$8 sps:$4 sm:$0xff]  }
 0x1e4   :  { %3972 = vmatpush1.bf16.msra.mxu1 %v6052_v25  ;;  %3537 = vmatprep.subr.bf16.mxu0 %v6053_v27  ;;  %v6107_v25 = vld [vmem:[%s9263_s2 + $0x3e0] ss:$8 sps:$4 sm:$0xff]  }
 0x1e5   :  { %3973 = vmatprep.subr.bf16.mxu1 %v6054_v31  ;;  %v6108_v27 = vld [vmem:[%s9263_s2 + $0xaa0] ss:$8 sps:$4 sm:$0xff]   ;;  %v6109_v31 = vld [vmem:[%s9263_s2 + $0x3f4] ss:$8 sps:$4 sm:$0xff]  }
 0x1e7   :  { %3538 = vmatpush1.bf16.msra.mxu0 %v6055_v34  ;;  %v6110_v34 = vld [vmem:[%s9263_s2 + $0xab4] ss:$8 sps:$4 sm:$0xff]  }
 0x1e8   :  { %3974 = vmatpush1.bf16.msra.mxu1 %v6056_v35  ;;  %3539 = vmatprep.subr.bf16.mxu0 %v6057_v36  ;;  %v6111_v35 = vld [vmem:[%s9263_s2 + $0x3f0] ss:$8 sps:$4 sm:$0xff]  }
 0x1e9   :  { %3975 = vmatprep.subr.bf16.mxu1 %v6058_v37  ;;  %v6112_v36 = vld [vmem:[%s9263_s2 + $0xab0] ss:$8 sps:$4 sm:$0xff]   ;;  %v6113_v37 = vld [vmem:[%s9263_s2 + $0x404] ss:$8 sps:$4 sm:$0xff]  }
 0x1eb   :  { %3540 = vmatpush1.bf16.msra.mxu0 %v6059_v38  ;;  %v6114_v38 = vld [vmem:[%s9263_s2 + $0xac4] ss:$8 sps:$4 sm:$0xff]  }
 0x1ec   :  { %3976 = vmatpush1.bf16.msra.mxu1 %v6060_v39  ;;  %3541 = vmatprep.subr.bf16.mxu0 %v6061_v40  ;;  %v6115_v39 = vld [vmem:[%s9263_s2 + $0x400] ss:$8 sps:$4 sm:$0xff]  }
 0x1ed   :  { %3977 = vmatprep.subr.bf16.mxu1 %v6062_v41  ;;  %v6116_v40 = vld [vmem:[%s9263_s2 + $0xac0] ss:$8 sps:$4 sm:$0xff]   ;;  %v6117_v41 = vld [vmem:[%s9263_s2 + $0x414] ss:$8 sps:$4 sm:$0xff]  }
 0x1ef   :  { %3542 = vmatpush1.bf16.msra.mxu0 %v6063_v42  ;;  %v6118_v42 = vld [vmem:[%s9263_s2 + $0xad4] ss:$8 sps:$4 sm:$0xff]  }
 0x1f0   :  { %3978 = vmatpush1.bf16.msra.mxu1 %v6064_v57  ;;  %3554 = vmatprep.subr.bf16.mxu0 %v6065_v43  ;;  %v6119_v57 = vld [vmem:[%s9263_s2 + $0x410] ss:$8 sps:$4 sm:$0xff]  }
 0x1f1   :  { %3990 = vmatprep.subr.bf16.mxu1 %v6066_v44  ;;  %v6120_v43 = vld [vmem:[%s9263_s2 + $0xad0] ss:$8 sps:$4 sm:$0xff]   ;;  %v6121_v44 = vld [vmem:[%s9263_s2 + $0x424] ss:$8 sps:$4 sm:$0xff]  }
 0x1f2   :  { %3544 = vmatmul.mubr.bf16.vlgmr.msra.gmra.mrb[4].mxu0 %v7588_v1 }
 0x1f3   :  { %3980 = vmatmul.mubr.bf16.vlgmr.msra.gmra.mrb[4].mxu1 %v7588_v1  ;;  %3555 = vmatpush1.bf16.msra.mxu0 %v6067_v45  ;;  %v6071_v1 = vld [vmem:[%s9263_s2 + $0x350] ss:$8 sps:$4 sm:$0xff]   ;;  %v6122_v45 = vld [vmem:[%s9263_s2 + $0xae4] ss:$8 sps:$4 sm:$0xff]  }
 0x1f4   :  { %3991 = vmatpush1.bf16.msra.mxu1 %v6068_v46  ;;  %3556 = vmatprep.subr.bf16.mxu0 %v6069_v47  ;;  %v6123_v46 = vld [vmem:[%s9263_s2 + $0x420] ss:$8 sps:$4 sm:$0xff]  }
 0x1f5   :  { %3992 = vmatprep.subr.bf16.mxu1 %v6070_v48  ;;  %3586 = vmatprep.mubr.bf16.mxu0 %v7602_v5  ;;  %v6124_v47 = vld [vmem:[%s9263_s2 + $0xae0] ss:$8 sps:$4 sm:$0xff]   ;;  %v6125_v48 = vld [vmem:[%s9263_s2 + $0x434] ss:$8 sps:$4 sm:$0xff]  }
 0x1f6   :  { %4022 = vmatprep.mubr.bf16.mxu1 %v7602_v5  ;;  %v6075_v5 = vld [vmem:[%s9263_s2 + $0x360] ss:$8 sps:$4 sm:$0xff]  }
 0x1f7   :  { %3557 = vmatpush1.bf16.msra.mxu0 %v6071_v1  ;;  %v6126_v1 = vld [vmem:[%s9263_s2 + $0xaf4] ss:$8 sps:$4 sm:$0xff]  }
 0x1f8   :  { %3993 = vmatpush1.bf16.msra.mxu1 %v6072_v49  ;;  %3558 = vmatprep.subr.bf16.mxu0 %v6073_v50  ;;  %v6127_v49 = vld [vmem:[%s9263_s2 + $0x430] ss:$8 sps:$4 sm:$0xff]  }
 0x1f9   :  { %3994 = vmatprep.subr.bf16.mxu1 %v6074_v52  ;;  %v6128_v50 = vld [vmem:[%s9263_s2 + $0xaf0] ss:$8 sps:$4 sm:$0xff]   ;;  %v6129_v52 = vld [vmem:[%s9263_s2 + $0x444] ss:$8 sps:$4 sm:$0xff]  }
 0x1fb   :  { %3559 = vmatpush1.bf16.msra.mxu0 %v6075_v5  ;;  %v6130_v5 = vld [vmem:[%s9263_s2 + $0xb04] ss:$8 sps:$4 sm:$0xff]  }
 0x1fc   :  { %3995 = vmatpush1.bf16.msra.mxu1 %v6076_v53  ;;  %3560 = vmatprep.subr.bf16.mxu0 %v6077_v54  ;;  %v6131_v53 = vld [vmem:[%s9263_s2 + $0x440] ss:$8 sps:$4 sm:$0xff]  }
 0x1fd   :  { %3996 = vmatprep.subr.bf16.mxu1 %v6078_v55  ;;  %v6132_v54 = vld [vmem:[%s9263_s2 + $0xb00] ss:$8 sps:$4 sm:$0xff]   ;;  %v6133_v55 = vld [vmem:[%s9263_s2 + $0x454] ss:$8 sps:$4 sm:$0xff]  }
 0x1ff   :  { %3561 = vmatpush1.bf16.msra.mxu0 %v6079_v56  ;;  %v6134_v56 = vld [vmem:[%s9263_s2 + $0xb14] ss:$8 sps:$4 sm:$0xff]  }
 0x200   :  { %3997 = vmatpush1.bf16.msra.mxu1 %v6080_v28  ;;  %3562 = vmatprep.subr.bf16.mxu0 %v6081_v58  ;;  %v6136_v28 = vld [vmem:[%s9263_s2 + $0xb10] ss:$8 sps:$4 sm:$0xff]   ;;  %v6137_v58 = vld [vmem:[%s9263_s2 + $0x464] ss:$8 sps:$4 sm:$0xff]  }
 0x201   :  { %3998 = vmatprep.subr.bf16.mxu1 %v6082_v59  ;;  %v6138_v59 = vld [vmem:[%s9263_s2 + $0xb24] ss:$8 sps:$4 sm:$0xff]  }
 0x203   :  { %3563 = vmatpush1.bf16.msra.mxu0 %v6083_v60  ;;  %v6139_v60 = vld [vmem:[%s9263_s2 + $0x460] ss:$8 sps:$4 sm:$0xff]  }
 0x204   :  { %3999 = vmatpush1.bf16.msra.mxu1 %v6084_v61  ;;  %3564 = vmatprep.subr.bf16.mxu0 %v6085_v62  ;;  %v6140_v61 = vld [vmem:[%s9263_s2 + $0xb20] ss:$8 sps:$4 sm:$0xff]   ;;  %v6141_v62 = vld [vmem:[%s9263_s2 + $0x474] ss:$8 sps:$4 sm:$0xff]  }
 0x205   :  { %4000 = vmatprep.subr.bf16.mxu1 %v6086_v26  ;;  %v6142_v26 = vld [vmem:[%s9263_s2 + $0xb34] ss:$8 sps:$4 sm:$0xff]  }
 0x207   :  { %3565 = vmatpush1.bf16.msra.mxu0 %v6087_v63  ;;  %v6143_v63 = vld [vmem:[%s9263_s2 + $0x470] ss:$8 sps:$4 sm:$0xff]  }
 0x208   :  { %4001 = vmatpush1.bf16.msra.mxu1 %v6088_v0  ;;  %3566 = vmatprep.subr.bf16.mxu0 %v6089_v2  ;;  %v6144_v0 = vld [vmem:[%s9263_s2 + $0xb30] ss:$8 sps:$4 sm:$0xff]   ;;  %v6145_v2 = vld [vmem:[%s9263_s2 + $0x4] ss:$8 sps:$4 sm:$0xff]  }
 0x209   :  { %4002 = vmatprep.subr.bf16.mxu1 %v6090_v3  ;;  %v6146_v3 = vld [vmem:[%s9263_s2 + $0x6c4] ss:$8 sps:$4 sm:$0xff]  }
 0x20b   :  { %3567 = vmatpush1.bf16.msra.mxu0 %v6091_v4  ;;  %v6147_v4 = vld [vmem:[%s9263_s2] ss:$8 sps:$4 sm:$0xff]  }
 0x20c   :  { %4003 = vmatpush1.bf16.msra.mxu1 %v6092_v32  ;;  %3568 = vmatprep.subr.bf16.mxu0 %v6093_v6  ;;  %v6148_v32 = vld [vmem:[%s9263_s2 + $0x6c0] ss:$8 sps:$4 sm:$0xff]   ;;  %v6149_v6 = vld [vmem:[%s9263_s2 + $0x14] ss:$8 sps:$4 sm:$0xff]  }
 0x20d   :  { %4004 = vmatprep.subr.bf16.mxu1 %v6094_v7  ;;  %v6150_v7 = vld [vmem:[%s9263_s2 + $0x6d4] ss:$8 sps:$4 sm:$0xff]  }
 0x20f   :  { %3569 = vmatpush1.bf16.msra.mxu0 %v6095_v8  ;;  %v6152_v8 = vld [vmem:[%s9263_s2 + $0x10] ss:$8 sps:$4 sm:$0xff]  }
 0x210   :  { %4005 = vmatpush1.bf16.msra.mxu1 %v6096_v9  ;;  %3570 = vmatprep.subr.bf16.mxu0 %v6097_v33  ;;  %v6153_v9 = vld [vmem:[%s9263_s2 + $0x6d0] ss:$8 sps:$4 sm:$0xff]   ;;  %v6154_v33 = vld [vmem:[%s9263_s2 + $0x24] ss:$8 sps:$4 sm:$0xff]  }
 0x211   :  { %4006 = vmatprep.subr.bf16.mxu1 %v6098_v11  ;;  %v6155_v11 = vld [vmem:[%s9263_s2 + $0x6e4] ss:$8 sps:$4 sm:$0xff]  }
 0x213   :  { %3571 = vmatpush1.bf16.msra.mxu0 %v6099_v12  ;;  %v6156_v12 = vld [vmem:[%s9263_s2 + $0x20] ss:$8 sps:$4 sm:$0xff]  }
 0x214   :  { %4007 = vmatpush1.bf16.msra.mxu1 %v6100_v13  ;;  %3572 = vmatprep.subr.bf16.mxu0 %v6101_v15  ;;  %v6157_v13 = vld [vmem:[%s9263_s2 + $0x6e0] ss:$8 sps:$4 sm:$0xff]   ;;  %v6158_v15 = vld [vmem:[%s9263_s2 + $0x34] ss:$8 sps:$4 sm:$0xff]  }
 0x215   :  { %4008 = vmatprep.subr.bf16.mxu1 %v6102_v16  ;;  %v6159_v16 = vld [vmem:[%s9263_s2 + $0x6f4] ss:$8 sps:$4 sm:$0xff]  }
 0x217   :  { %3573 = vmatpush1.bf16.msra.mxu0 %v6103_v17  ;;  %v6160_v17 = vld [vmem:[%s9263_s2 + $0x30] ss:$8 sps:$4 sm:$0xff]  }
 0x218   :  { %4009 = vmatpush1.bf16.msra.mxu1 %v6104_v18  ;;  %3574 = vmatprep.subr.bf16.mxu0 %v6105_v19  ;;  %v6161_v18 = vld [vmem:[%s9263_s2 + $0x6f0] ss:$8 sps:$4 sm:$0xff]   ;;  %v6162_v19 = vld [vmem:[%s9263_s2 + $0x44] ss:$8 sps:$4 sm:$0xff]  }
 0x219   :  { %4010 = vmatprep.subr.bf16.mxu1 %v6106_v20  ;;  %v6163_v20 = vld [vmem:[%s9263_s2 + $0x704] ss:$8 sps:$4 sm:$0xff]  }
 0x21b   :  { %3575 = vmatpush1.bf16.msra.mxu0 %v6107_v25  ;;  %v6164_v25 = vld [vmem:[%s9263_s2 + $0x40] ss:$8 sps:$4 sm:$0xff]  }
 0x21c   :  { %4011 = vmatpush1.bf16.msra.mxu1 %v6108_v27  ;;  %3576 = vmatprep.subr.bf16.mxu0 %v6109_v31  ;;  %v6165_v27 = vld [vmem:[%s9263_s2 + $0x700] ss:$8 sps:$4 sm:$0xff]   ;;  %v6166_v31 = vld [vmem:[%s9263_s2 + $0x54] ss:$8 sps:$4 sm:$0xff]  }
 0x21d   :  { %4012 = vmatprep.subr.bf16.mxu1 %v6110_v34  ;;  %v6167_v34 = vld [vmem:[%s9263_s2 + $0x714] ss:$8 sps:$4 sm:$0xff]  }
 0x21f   :  { %3577 = vmatpush1.bf16.msra.mxu0 %v6111_v35  ;;  %v6168_v35 = vld [vmem:[%s9263_s2 + $0x50] ss:$8 sps:$4 sm:$0xff]  }
 0x220   :  { %4013 = vmatpush1.bf16.msra.mxu1 %v6112_v36  ;;  %3578 = vmatprep.subr.bf16.mxu0 %v6113_v37  ;;  %v6169_v36 = vld [vmem:[%s9263_s2 + $0x710] ss:$8 sps:$4 sm:$0xff]   ;;  %v6170_v37 = vld [vmem:[%s9263_s2 + $0x64] ss:$8 sps:$4 sm:$0xff]  }
 0x221   :  { %4014 = vmatprep.subr.bf16.mxu1 %v6114_v38  ;;  %v6171_v38 = vld [vmem:[%s9263_s2 + $0x724] ss:$8 sps:$4 sm:$0xff]  }
 0x223   :  { %3579 = vmatpush1.bf16.msra.mxu0 %v6115_v39  ;;  %v6172_v39 = vld [vmem:[%s9263_s2 + $0x60] ss:$8 sps:$4 sm:$0xff]  }
 0x224   :  { %4015 = vmatpush1.bf16.msra.mxu1 %v6116_v40  ;;  %3580 = vmatprep.subr.bf16.mxu0 %v6117_v41  ;;  %v6173_v40 = vld [vmem:[%s9263_s2 + $0x720] ss:$8 sps:$4 sm:$0xff]   ;;  %v6174_v41 = vld [vmem:[%s9263_s2 + $0x74] ss:$8 sps:$4 sm:$0xff]  }
 0x225   :  { %4016 = vmatprep.subr.bf16.mxu1 %v6118_v42  ;;  %v6175_v42 = vld [vmem:[%s9263_s2 + $0x734] ss:$8 sps:$4 sm:$0xff]  }
 0x227   :  { %3581 = vmatpush1.bf16.msra.mxu0 %v6119_v57  ;;  %v6176_v57 = vld [vmem:[%s9263_s2 + $0x70] ss:$8 sps:$4 sm:$0xff]  }
 0x228   :  { %4017 = vmatpush1.bf16.msra.mxu1 %v6120_v43  ;;  %3582 = vmatprep.subr.bf16.mxu0 %v6121_v44  ;;  %v6177_v43 = vld [vmem:[%s9263_s2 + $0x730] ss:$8 sps:$4 sm:$0xff]   ;;  %v6178_v44 = vld [vmem:[%s9263_s2 + $0x84] ss:$8 sps:$4 sm:$0xff]  }
 0x229   :  { %4018 = vmatprep.subr.bf16.mxu1 %v6122_v45  ;;  %v6179_v45 = vld [vmem:[%s9263_s2 + $0x744] ss:$8 sps:$4 sm:$0xff]  }
 0x22b   :  { %3583 = vmatpush1.bf16.msra.mxu0 %v6123_v46  ;;  %v6180_v46 = vld [vmem:[%s9263_s2 + $0x80] ss:$8 sps:$4 sm:$0xff]  }
 0x22c   :  { %4019 = vmatpush1.bf16.msra.mxu1 %v6124_v47  ;;  %3584 = vmatprep.subr.bf16.mxu0 %v6125_v48  ;;  %v6181_v47 = vld [vmem:[%s9263_s2 + $0x740] ss:$8 sps:$4 sm:$0xff]   ;;  %v6182_v48 = vld [vmem:[%s9263_s2 + $0x94] ss:$8 sps:$4 sm:$0xff]  }
 0x22d   :  { %4020 = vmatprep.subr.bf16.mxu1 %v6126_v1  ;;  %v6183_v1 = vld [vmem:[%s9263_s2 + $0x754] ss:$8 sps:$4 sm:$0xff]  }
 0x22f   :  { %3585 = vmatpush1.bf16.msra.mxu0 %v6127_v49  ;;  %v6184_v49 = vld [vmem:[%s9263_s2 + $0x90] ss:$8 sps:$4 sm:$0xff]  }
 0x230   :  { %4021 = vmatpush1.bf16.msra.mxu1 %v6128_v50  ;;  %3597 = vmatprep.subr.bf16.mxu0 %v6129_v52  ;;  %v6185_v50 = vld [vmem:[%s9263_s2 + $0x750] ss:$8 sps:$4 sm:$0xff]   ;;  %v6186_v52 = vld [vmem:[%s9263_s2 + $0xa4] ss:$8 sps:$4 sm:$0xff]  }
 0x231   :  { %4033 = vmatprep.subr.bf16.mxu1 %v6130_v5  ;;  %v6187_v5 = vld [vmem:[%s9263_s2 + $0x764] ss:$8 sps:$4 sm:$0xff]  }
 0x232   :  { %3587 = vmatmul.mubr.bf16.vlgmr.msra.gmra.mrb[4].mxu0 %v7790_v10 }
 0x233   :  { %4023 = vmatmul.mubr.bf16.vlgmr.msra.gmra.mrb[4].mxu1 %v7790_v10  ;;  %3598 = vmatpush1.bf16.msra.mxu0 %v6131_v53  ;;  %v6135_v10 = vld [vmem:[%s9263_s2 + $0x450] ss:$8 sps:$4 sm:$0xff]   ;;  %v6188_v53 = vld [vmem:[%s9263_s2 + $0xa0] ss:$8 sps:$4 sm:$0xff]  }
 0x234   :  { %4034 = vmatpush1.bf16.msra.mxu1 %v6132_v54  ;;  %3599 = vmatprep.subr.bf16.mxu0 %v6133_v55  ;;  %v6189_v54 = vld [vmem:[%s9263_s2 + $0x760] ss:$8 sps:$4 sm:$0xff]   ;;  %v6190_v55 = vld [vmem:[%s9263_s2 + $0xb4] ss:$8 sps:$4 sm:$0xff]  }
 0x235   :  { %4035 = vmatprep.subr.bf16.mxu1 %v6134_v56  ;;  %3629 = vmatprep.mubr.bf16.mxu0 %v6432_v14  ;;  %v6191_v56 = vld [vmem:[%s9263_s2 + $0x774] ss:$8 sps:$4 sm:$0xff]  }
 0x236   :  { %4065 = vmatprep.mubr.bf16.mxu1 %v6432_v14 }
 0x237   :  { %3600 = vmatpush1.bf16.msra.mxu0 %v6135_v10  ;;  %v6192_v10 = vld [vmem:[%s9263_s2 + $0xb0] ss:$8 sps:$4 sm:$0xff]  }
 0x238   :  { %4036 = vmatpush1.bf16.msra.mxu1 %v6136_v28  ;;  %3601 = vmatprep.subr.bf16.mxu0 %v6137_v58  ;;  %v6193_v28 = vld [vmem:[%s9263_s2 + $0x770] ss:$8 sps:$4 sm:$0xff]   ;;  %v6194_v58 = vld [vmem:[%s9263_s2 + $0xc4] ss:$8 sps:$4 sm:$0xff]  }
 0x239   :  { %4037 = vmatprep.subr.bf16.mxu1 %v6138_v59  ;;  %v6195_v59 = vld [vmem:[%s9263_s2 + $0x784] ss:$8 sps:$4 sm:$0xff]  }
 0x23b   :  { %3602 = vmatpush1.bf16.msra.mxu0 %v6139_v60  ;;  %v6196_v60 = vld [vmem:[%s9263_s2 + $0xc0] ss:$8 sps:$4 sm:$0xff]  }
 0x23c   :  { %4038 = vmatpush1.bf16.msra.mxu1 %v6140_v61  ;;  %3603 = vmatprep.subr.bf16.mxu0 %v6141_v62  ;;  %v6197_v61 = vld [vmem:[%s9263_s2 + $0x780] ss:$8 sps:$4 sm:$0xff]   ;;  %v6198_v62 = vld [vmem:[%s9263_s2 + $0xd4] ss:$8 sps:$4 sm:$0xff]  }
 0x23d   :  { %4039 = vmatprep.subr.bf16.mxu1 %v6142_v26  ;;  %v6199_v26 = vld [vmem:[%s9263_s2 + $0x794] ss:$8 sps:$4 sm:$0xff]  }
 0x23f   :  { %3604 = vmatpush1.bf16.msra.mxu0 %v6143_v63  ;;  %v6200_v63 = vld [vmem:[%s9263_s2 + $0xd0] ss:$8 sps:$4 sm:$0xff]  }
 0x240   :  { %4040 = vmatpush1.bf16.msra.mxu1 %v6144_v0  ;;  %3640 = vmatprep.subr.bf16.mxu0 %v6145_v2  ;;  %v6201_v0 = vld [vmem:[%s9263_s2 + $0x790] ss:$8 sps:$4 sm:$0xff]   ;;  %v6202_v2 = vld [vmem:[%s9263_s2 + $0xe4] ss:$8 sps:$4 sm:$0xff]  }
 0x241   :  { %4076 = vmatprep.subr.bf16.mxu1 %v6146_v3  ;;  %v6203_v3 = vld [vmem:[%s9263_s2 + $0x7a4] ss:$8 sps:$4 sm:$0xff]  }
 0x242   :  { %5200 = vmatmul.mubr.msk.bf16.vlgmr.msra.gmra.mrb[4].mxu0 %vm560_vm0, %v7856_v51 }
 0x243   :  { %5203 = vmatmul.mubr.msk.bf16.vlgmr.msra.gmra.mrb[4].mxu1 %vm560_vm0, %v7856_v51  ;;  %3641 = vmatpush1.bf16.msra.mxu0 %v6147_v4  ;;  %v8331_v51 = vld [vmem:[%s9264_s1 + $0x4] ss:$20 sps:$4 sm:$0x1f]   ;;  %v6204_v4 = vld [vmem:[%s9263_s2 + $0xe0] ss:$8 sps:$4 sm:$0xff]  }
 0x244   :  { %4077 = vmatpush1.bf16.msra.mxu1 %v6148_v32  ;;  %3642 = vmatprep.subr.bf16.mxu0 %v6149_v6  ;;  %v6205_v32 = vld [vmem:[%s9263_s2 + $0x7a0] ss:$8 sps:$4 sm:$0xff]   ;;  %v6206_v6 = vld [vmem:[%s9263_s2 + $0xf4] ss:$8 sps:$4 sm:$0xff]  }
 0x245   :  { %4078 = vmatprep.subr.bf16.mxu1 %v6150_v7  ;;  %3672 = vmatprep.mubr.bf16.mxu0 %v8331_v51  ;;  %v6207_v7 = vld [vmem:[%s9263_s2 + $0x7b4] ss:$8 sps:$4 sm:$0xff]  }
 0x246   :  { %4108 = vmatprep.mubr.bf16.mxu1 %v8331_v51 }
 0x247   :  { %3643 = vmatpush1.bf16.msra.mxu0 %v6152_v8  ;;  %v6208_v8 = vld [vmem:[%s9263_s2 + $0xf0] ss:$8 sps:$4 sm:$0xff]  }
 0x248   :  { %4079 = vmatpush1.bf16.msra.mxu1 %v6153_v9  ;;  %3644 = vmatprep.subr.bf16.mxu0 %v6154_v33  ;;  %v6209_v9 = vld [vmem:[%s9263_s2 + $0x7b0] ss:$8 sps:$4 sm:$0xff]   ;;  %v6210_v33 = vld [vmem:[%s9263_s2 + $0x104] ss:$8 sps:$4 sm:$0xff]  }
 0x249   :  { %4080 = vmatprep.subr.bf16.mxu1 %v6155_v11  ;;  %v6211_v11 = vld [vmem:[%s9263_s2 + $0x7c4] ss:$8 sps:$4 sm:$0xff]  }
 0x24b   :  { %3645 = vmatpush1.bf16.msra.mxu0 %v6156_v12  ;;  %v8518_v12 = vld [vmem:[%s9264_s1] ss:$20 sps:$4 sm:$0x1f]  }
 0x24c   :  { %4081 = vmatpush1.bf16.msra.mxu1 %v6157_v13  ;;  %3646 = vmatprep.subr.bf16.mxu0 %v6158_v15  ;;  %v6213_v13 = vld [vmem:[%s9263_s2 + $0x100] ss:$8 sps:$4 sm:$0xff]  }
 0x24d   :  { %4082 = vmatprep.subr.bf16.mxu1 %v6159_v16  ;;  %v6214_v15 = vld [vmem:[%s9263_s2 + $0x7c0] ss:$8 sps:$4 sm:$0xff]   ;;  %v6215_v16 = vld [vmem:[%s9263_s2 + $0x114] ss:$8 sps:$4 sm:$0xff]  }
 0x24f   :  { %3647 = vmatpush1.bf16.msra.mxu0 %v6160_v17  ;;  %v6216_v17 = vld [vmem:[%s9263_s2 + $0x7d4] ss:$8 sps:$4 sm:$0xff]  }
 0x250   :  { %4083 = vmatpush1.bf16.msra.mxu1 %v6161_v18  ;;  %3648 = vmatprep.subr.bf16.mxu0 %v6162_v19 }
 0x251   :  { %4084 = vmatprep.subr.bf16.mxu1 %v6163_v20  ;;  %v8541_v20 = vld [vmem:[%s9264_s1 + $0xc] ss:$20 sps:$4 sm:$0x1f]  }
 0x253   :  { %3649 = vmatpush1.bf16.msra.mxu0 %v6164_v25 }
 0x254   :  { %4085 = vmatpush1.bf16.msra.mxu1 %v6165_v27  ;;  %3650 = vmatprep.subr.bf16.mxu0 %v6166_v31 }
 0x255   :  { %4086 = vmatprep.subr.bf16.mxu1 %v6167_v34 }
 0x257   :  { %3651 = vmatpush1.bf16.msra.mxu0 %v6168_v35 }
 0x258   :  { %4087 = vmatpush1.bf16.msra.mxu1 %v6169_v36  ;;  %3652 = vmatprep.subr.bf16.mxu0 %v6170_v37  ;;  %v6218_v37 = vld [vmem:[%s9263_s2 + $0x110] ss:$8 sps:$4 sm:$0xff]  }
 0x259   :  { %4088 = vmatprep.subr.bf16.mxu1 %v6171_v38  ;;  %v6219_v38 = vld [vmem:[%s9263_s2 + $0x7d0] ss:$8 sps:$4 sm:$0xff]  }
 0x25b   :  { %3653 = vmatpush1.bf16.msra.mxu0 %v6172_v39 }
 0x25c   :  { %4089 = vmatpush1.bf16.msra.mxu1 %v6173_v40  ;;  %3654 = vmatprep.subr.bf16.mxu0 %v6174_v41 }
 0x25d   :  { %4090 = vmatprep.subr.bf16.mxu1 %v6175_v42  ;;  %v6220_v42 = vld [vmem:[%s9263_s2 + $0x124] ss:$8 sps:$4 sm:$0xff]  }
 0x25f   :  { %3655 = vmatpush1.bf16.msra.mxu0 %v6176_v57  ;;  %v6221_v57 = vld [vmem:[%s9263_s2 + $0x7e4] ss:$8 sps:$4 sm:$0xff]  }
 0x260   :  { %4091 = vmatpush1.bf16.msra.mxu1 %v6177_v43  ;;  %3656 = vmatprep.subr.bf16.mxu0 %v6178_v44  ;;  %v6222_v44 = vld [vmem:[%s9263_s2 + $0x120] ss:$8 sps:$4 sm:$0xff]  }
 0x261   :  { %4092 = vmatprep.subr.bf16.mxu1 %v6179_v45  ;;  %v6223_v45 = vld [vmem:[%s9263_s2 + $0x7e0] ss:$8 sps:$4 sm:$0xff]  }
 0x263   :  { %3657 = vmatpush1.bf16.msra.mxu0 %v6180_v46  ;;  %v6224_v46 = vld [vmem:[%s9263_s2 + $0x134] ss:$8 sps:$4 sm:$0xff]  }
 0x264   :  { %4093 = vmatpush1.bf16.msra.mxu1 %v6181_v47  ;;  %3658 = vmatprep.subr.bf16.mxu0 %v6182_v48  ;;  %v6225_v47 = vld [vmem:[%s9263_s2 + $0x7f4] ss:$8 sps:$4 sm:$0xff]   ;;  %v6226_v48 = vld [vmem:[%s9263_s2 + $0x130] ss:$8 sps:$4 sm:$0xff]  }
 0x265   :  { %4094 = vmatprep.subr.bf16.mxu1 %v6183_v1  ;;  %v6227_v1 = vld [vmem:[%s9263_s2 + $0x7f0] ss:$8 sps:$4 sm:$0xff]  }
 0x267   :  { %3659 = vmatpush1.bf16.msra.mxu0 %v6184_v49  ;;  %v6228_v49 = vld [vmem:[%s9263_s2 + $0x144] ss:$8 sps:$4 sm:$0xff]  }
 0x268   :  { %4095 = vmatpush1.bf16.msra.mxu1 %v6185_v50  ;;  %3660 = vmatprep.subr.bf16.mxu0 %v6186_v52  ;;  %v6229_v50 = vld [vmem:[%s9263_s2 + $0x804] ss:$8 sps:$4 sm:$0xff]   ;;  %v6230_v52 = vld [vmem:[%s9263_s2 + $0x140] ss:$8 sps:$4 sm:$0xff]  }
 0x269   :  { %4096 = vmatprep.subr.bf16.mxu1 %v6187_v5  ;;  %v6231_v5 = vld [vmem:[%s9263_s2 + $0x800] ss:$8 sps:$4 sm:$0xff]  }
 0x26b   :  { %3661 = vmatpush1.bf16.msra.mxu0 %v6188_v53  ;;  %v6232_v53 = vld [vmem:[%s9263_s2 + $0x154] ss:$8 sps:$4 sm:$0xff]  }
 0x26c   :  { %4097 = vmatpush1.bf16.msra.mxu1 %v6189_v54  ;;  %3662 = vmatprep.subr.bf16.mxu0 %v6190_v55  ;;  %v6233_v54 = vld [vmem:[%s9263_s2 + $0x814] ss:$8 sps:$4 sm:$0xff]   ;;  %v6234_v55 = vld [vmem:[%s9263_s2 + $0x150] ss:$8 sps:$4 sm:$0xff]  }
 0x26d   :  { %4098 = vmatprep.subr.bf16.mxu1 %v6191_v56  ;;  %v6235_v56 = vld [vmem:[%s9263_s2 + $0x810] ss:$8 sps:$4 sm:$0xff]  }
 0x26f   :  { %3663 = vmatpush1.bf16.msra.mxu0 %v6192_v10  ;;  %v6236_v10 = vld [vmem:[%s9263_s2 + $0x164] ss:$8 sps:$4 sm:$0xff]  }
 0x270   :  { %4099 = vmatpush1.bf16.msra.mxu1 %v6193_v28  ;;  %3664 = vmatprep.subr.bf16.mxu0 %v6194_v58  ;;  %v6237_v28 = vld [vmem:[%s9263_s2 + $0x824] ss:$8 sps:$4 sm:$0xff]   ;;  %v6238_v58 = vld [vmem:[%s9263_s2 + $0x160] ss:$8 sps:$4 sm:$0xff]  }
 0x271   :  { %4100 = vmatprep.subr.bf16.mxu1 %v6195_v59  ;;  %v6239_v59 = vld [vmem:[%s9263_s2 + $0x820] ss:$8 sps:$4 sm:$0xff]  }
 0x273   :  { %3665 = vmatpush1.bf16.msra.mxu0 %v6196_v60  ;;  %v6240_v60 = vld [vmem:[%s9263_s2 + $0x174] ss:$8 sps:$4 sm:$0xff]  }
 0x274   :  { %4101 = vmatpush1.bf16.msra.mxu1 %v6197_v61  ;;  %3666 = vmatprep.subr.bf16.mxu0 %v6198_v62  ;;  %v6241_v61 = vld [vmem:[%s9263_s2 + $0x834] ss:$8 sps:$4 sm:$0xff]   ;;  %v6242_v62 = vld [vmem:[%s9263_s2 + $0x170] ss:$8 sps:$4 sm:$0xff]  }
 0x275   :  { %4102 = vmatprep.subr.bf16.mxu1 %v6199_v26  ;;  %v6243_v26 = vld [vmem:[%s9263_s2 + $0x830] ss:$8 sps:$4 sm:$0xff]  }
 0x277   :  { %3667 = vmatpush1.bf16.msra.mxu0 %v6200_v63  ;;  %v6244_v63 = vld [vmem:[%s9263_s2 + $0x184] ss:$8 sps:$4 sm:$0xff]  }
 0x278   :  { %4103 = vmatpush1.bf16.msra.mxu1 %v6201_v0  ;;  %3668 = vmatprep.subr.bf16.mxu0 %v6202_v2  ;;  %v6245_v0 = vld [vmem:[%s9263_s2 + $0x844] ss:$8 sps:$4 sm:$0xff]   ;;  %v6246_v2 = vld [vmem:[%s9263_s2 + $0x180] ss:$8 sps:$4 sm:$0xff]  }
 0x279   :  { %4104 = vmatprep.subr.bf16.mxu1 %v6203_v3  ;;  %v6247_v3 = vld [vmem:[%s9263_s2 + $0x840] ss:$8 sps:$4 sm:$0xff]  }
 0x27b   :  { %3669 = vmatpush1.bf16.msra.mxu0 %v6204_v4  ;;  %v6248_v4 = vld [vmem:[%s9263_s2 + $0x194] ss:$8 sps:$4 sm:$0xff]  }
 0x27c   :  { %4105 = vmatpush1.bf16.msra.mxu1 %v6205_v32  ;;  %3670 = vmatprep.subr.bf16.mxu0 %v6206_v6  ;;  %v6249_v32 = vld [vmem:[%s9263_s2 + $0x854] ss:$8 sps:$4 sm:$0xff]   ;;  %v6250_v6 = vld [vmem:[%s9263_s2 + $0x190] ss:$8 sps:$4 sm:$0xff]  }
 0x27d   :  { %4106 = vmatprep.subr.bf16.mxu1 %v6207_v7  ;;  %v6251_v7 = vld [vmem:[%s9263_s2 + $0x850] ss:$8 sps:$4 sm:$0xff]  }
 0x27f   :  { %3671 = vmatpush1.bf16.msra.mxu0 %v6208_v8  ;;  %v6252_v8 = vld [vmem:[%s9263_s2 + $0x1a4] ss:$8 sps:$4 sm:$0xff]  }
 0x280   :  { %4107 = vmatpush1.bf16.msra.mxu1 %v6209_v9  ;;  %3683 = vmatprep.subr.bf16.mxu0 %v6210_v33  ;;  %v6253_v9 = vld [vmem:[%s9263_s2 + $0x864] ss:$8 sps:$4 sm:$0xff]   ;;  %v6254_v33 = vld [vmem:[%s9263_s2 + $0x1a0] ss:$8 sps:$4 sm:$0xff]  }
 0x281   :  { %4119 = vmatprep.subr.bf16.mxu1 %v6211_v11  ;;  %v6255_v11 = vld [vmem:[%s9263_s2 + $0x860] ss:$8 sps:$4 sm:$0xff]  }
 0x282   :  { %3673 = vmatmul.mubr.bf16.vlgmr.msra.gmra.mrb[4].mxu0 %v8518_v12 }
 0x283   :  { %4109 = vmatmul.mubr.bf16.vlgmr.msra.gmra.mrb[4].mxu1 %v8518_v12  ;;  %3684 = vmatpush1.bf16.msra.mxu0 %v6213_v13  ;;  %v6256_v13 = vld [vmem:[%s9263_s2 + $0x1b4] ss:$8 sps:$4 sm:$0xff]  }
 0x284   :  { %4120 = vmatpush1.bf16.msra.mxu1 %v6214_v15  ;;  %3685 = vmatprep.subr.bf16.mxu0 %v6215_v16  ;;  %v6257_v15 = vld [vmem:[%s9263_s2 + $0x874] ss:$8 sps:$4 sm:$0xff]   ;;  %v6258_v16 = vld [vmem:[%s9263_s2 + $0x1b0] ss:$8 sps:$4 sm:$0xff]  }
 0x285   :  { %4121 = vmatprep.subr.bf16.mxu1 %v6216_v17  ;;  %v8534_v18 = vpop.f32.mrb[0].mxu0  ;;  %3715 = vmatprep.mubr.bf16.mxu0 %v8541_v20  ;;  %v6259_v17 = vld [vmem:[%s9263_s2 + $0x870] ss:$8 sps:$4 sm:$0xff]  }
 0x286   :  { %v8536_v19 = vpop.f32.mrb[0].mxu1  ;;  %4151 = vmatprep.mubr.bf16.mxu1 %v8541_v20  ;;  %v8547_v27 = vpop.f32.mrb[1].mxu0 }
 0x287   :  { %v3507_v25 = vmax.f32 %v8534_v18, %v8536_v19  ;;  %v8549_v31 = vpop.f32.mrb[1].mxu1  ;;  %v8553_v35 = vpop.f32.mrb[2].mxu0  ;;  %3686 = vmatpush1.bf16.msra.mxu0 %v6218_v37  ;;  %v6260_v37 = vld [vmem:[%s9263_s2 + $0x1c4] ss:$8 sps:$4 sm:$0xff]  }
 0x288   :  { %v3508_v34 = vmax.f32 %v8547_v27, %v8549_v31  ;;  %v8555_v36 = vpop.f32.mrb[2].mxu1  ;;  %4122 = vmatpush1.bf16.msra.mxu1 %v6219_v38  ;;  %v8565_v40 = vpop.f32.mrb[3].mxu0  ;;  %3687 = vmatprep.subr.bf16.mxu0 %v6220_v42  ;;  %v6261_v38 = vld [vmem:[%s9263_s2 + $0x884] ss:$8 sps:$4 sm:$0xff]   ;;  %v6262_v42 = vld [vmem:[%s9263_s2 + $0x1c0] ss:$8 sps:$4 sm:$0xff]  }
 0x289   :  { %v3509_v39 = vmax.f32 %v8553_v35, %v8555_v36  ;;  %v8567_v41 = vpop.f32.mrb[3].mxu1  ;;  %4123 = vmatprep.subr.bf16.mxu1 %v6221_v57  ;;  %v6263_v57 = vld [vmem:[%s9263_s2 + $0x880] ss:$8 sps:$4 sm:$0xff]  }
 0x28a   :  { %v3510_v43 = vmax.f32 %v8565_v40, %v8567_v41 }
 0x28b   :  { %3688 = vmatpush1.bf16.msra.mxu0 %v6222_v44  ;;  %v6264_v44 = vld [vmem:[%s9263_s2 + $0x1d4] ss:$8 sps:$4 sm:$0xff]  }
 0x28c   :  { %4124 = vmatpush1.bf16.msra.mxu1 %v6223_v45  ;;  %3689 = vmatprep.subr.bf16.mxu0 %v6224_v46  ;;  %v6265_v45 = vld [vmem:[%s9263_s2 + $0x894] ss:$8 sps:$4 sm:$0xff]   ;;  %v6266_v46 = vld [vmem:[%s9263_s2 + $0x1d0] ss:$8 sps:$4 sm:$0xff]  }
 0x28d   :  { %4125 = vmatprep.subr.bf16.mxu1 %v6225_v47  ;;  %v6267_v47 = vld [vmem:[%s9263_s2 + $0x890] ss:$8 sps:$4 sm:$0xff]  }
 0x28f   :  { %3690 = vmatpush1.bf16.msra.mxu0 %v6226_v48  ;;  %v6268_v48 = vld [vmem:[%s9263_s2 + $0x1e4] ss:$8 sps:$4 sm:$0xff]  }
 0x290   :  { %4126 = vmatpush1.bf16.msra.mxu1 %v6227_v1  ;;  %3691 = vmatprep.subr.bf16.mxu0 %v6228_v49  ;;  %v6269_v1 = vld [vmem:[%s9263_s2 + $0x8a4] ss:$8 sps:$4 sm:$0xff]   ;;  %v6270_v49 = vld [vmem:[%s9263_s2 + $0x1e0] ss:$8 sps:$4 sm:$0xff]  }
 0x291   :  { %4127 = vmatprep.subr.bf16.mxu1 %v6229_v50  ;;  %v6271_v50 = vld [vmem:[%s9263_s2 + $0x8a0] ss:$8 sps:$4 sm:$0xff]  }
 0x293   :  { %3692 = vmatpush1.bf16.msra.mxu0 %v6230_v52  ;;  %v6272_v52 = vld [vmem:[%s9263_s2 + $0x1f4] ss:$8 sps:$4 sm:$0xff]  }
 0x294   :  { %4128 = vmatpush1.bf16.msra.mxu1 %v6231_v5  ;;  %3693 = vmatprep.subr.bf16.mxu0 %v6232_v53  ;;  %v6273_v5 = vld [vmem:[%s9263_s2 + $0x8b4] ss:$8 sps:$4 sm:$0xff]   ;;  %v6274_v53 = vld [vmem:[%s9263_s2 + $0x1f0] ss:$8 sps:$4 sm:$0xff]  }
 0x295   :  { %4129 = vmatprep.subr.bf16.mxu1 %v6233_v54  ;;  %v6275_v54 = vld [vmem:[%s9263_s2 + $0x8b0] ss:$8 sps:$4 sm:$0xff]  }
 0x297   :  { %3694 = vmatpush1.bf16.msra.mxu0 %v6234_v55  ;;  %v6276_v55 = vld [vmem:[%s9263_s2 + $0x204] ss:$8 sps:$4 sm:$0xff]  }
 0x298   :  { %4130 = vmatpush1.bf16.msra.mxu1 %v6235_v56  ;;  %3695 = vmatprep.subr.bf16.mxu0 %v6236_v10  ;;  %v6277_v56 = vld [vmem:[%s9263_s2 + $0x8c4] ss:$8 sps:$4 sm:$0xff]   ;;  %v8748_v10 = vld [vmem:[%s9264_s1 + $0x8] ss:$20 sps:$4 sm:$0x1f]  }
 0x299   :  { %4131 = vmatprep.subr.bf16.mxu1 %v6237_v28  ;;  %v6279_v28 = vld [vmem:[%s9263_s2 + $0x200] ss:$8 sps:$4 sm:$0xff]  }
 0x29b   :  { %3696 = vmatpush1.bf16.msra.mxu0 %v6238_v58  ;;  %v6280_v58 = vld [vmem:[%s9263_s2 + $0x8c0] ss:$8 sps:$4 sm:$0xff]  }
 0x29c   :  { %4132 = vmatpush1.bf16.msra.mxu1 %v6239_v59  ;;  %3697 = vmatprep.subr.bf16.mxu0 %v6240_v60  ;;  %v6281_v59 = vld [vmem:[%s9263_s2 + $0x214] ss:$8 sps:$4 sm:$0xff]  }
 0x29d   :  { %4133 = vmatprep.subr.bf16.mxu1 %v6241_v61  ;;  %v6282_v60 = vld [vmem:[%s9263_s2 + $0x8d4] ss:$8 sps:$4 sm:$0xff]   ;;  %v6283_v61 = vld [vmem:[%s9263_s2 + $0x210] ss:$8 sps:$4 sm:$0xff]  }
 0x29f   :  { %3698 = vmatpush1.bf16.msra.mxu0 %v6242_v62  ;;  %v6284_v62 = vld [vmem:[%s9263_s2 + $0x8d0] ss:$8 sps:$4 sm:$0xff]  }
 0x2a0   :  { %4134 = vmatpush1.bf16.msra.mxu1 %v6243_v26  ;;  %3699 = vmatprep.subr.bf16.mxu0 %v6244_v63  ;;  %v6285_v26 = vld [vmem:[%s9263_s2 + $0x224] ss:$8 sps:$4 sm:$0xff]  }
 0x2a1   :  { %4135 = vmatprep.subr.bf16.mxu1 %v6245_v0  ;;  %v6286_v63 = vld [vmem:[%s9263_s2 + $0x8e4] ss:$8 sps:$4 sm:$0xff]   ;;  %v3779_v0 = vshll.u32 %v8331_v51, 16 }
 0x2a3   :  { %3700 = vmatpush1.bf16.msra.mxu0 %v6246_v2  ;;  %v6287_v2 = vld [vmem:[%s9263_s2 + $0x220] ss:$8 sps:$4 sm:$0xff]  }
 0x2a4   :  { %4136 = vmatpush1.bf16.msra.mxu1 %v6247_v3  ;;  %3701 = vmatprep.subr.bf16.mxu0 %v6248_v4  ;;  %v6288_v3 = vld [vmem:[%s9263_s2 + $0x8e0] ss:$8 sps:$4 sm:$0xff]   ;;  %v6289_v4 = vld [vmem:[%s9263_s2 + $0x234] ss:$8 sps:$4 sm:$0xff]  }
 0x2a5   :  { %4137 = vmatprep.subr.bf16.mxu1 %v6249_v32  ;;  %v6290_v32 = vld [vmem:[%s9263_s2 + $0x8f4] ss:$8 sps:$4 sm:$0xff]  }
 0x2a7   :  { %3702 = vmatpush1.bf16.msra.mxu0 %v6250_v6  ;;  %v3777_v6 = vshrl.u32 %v8331_v51, 16  ;;  %v6294_v51 = vld [vmem:[%s9263_s2 + $0xb44] ss:$8 sps:$4 sm:$0xff]  }
 0x2a8   :  { %4138 = vmatpush1.bf16.msra.mxu1 %v6251_v7  ;;  %3703 = vmatprep.subr.bf16.mxu0 %v6252_v8  ;;  %v3781_v7 = vrot.slane %v3779_v0, 1  ;;  %v6291_v8 = vld [vmem:[%s9263_s2 + $0x230] ss:$8 sps:$4 sm:$0xff]  }
 0x2a9   :  { %4139 = vmatprep.subr.bf16.mxu1 %v6253_v9  ;;  %v6292_v9 = vld [vmem:[%s9263_s2 + $0x8f0] ss:$8 sps:$4 sm:$0xff]  }
 0x2aa   :  { %v6325_v0 = vld [vmem:[%s9263_s2 + $0xbb0] ss:$8 sps:$4 sm:$0xff]  }
 0x2ab   :  { %3704 = vmatpush1.bf16.msra.mxu0 %v6254_v33  ;;  %v6293_v33 = vld [vmem:[%s9263_s2 + $0x484] ss:$8 sps:$4 sm:$0xff]  }
 0x2ac   :  { %4140 = vmatpush1.bf16.msra.mxu1 %v6255_v11  ;;  %3705 = vmatprep.subr.bf16.mxu0 %v6256_v13  ;;  %v3782_v11 = vor.u32 %v3781_v7, %v3777_v6  ;;  %v8807_v13 = vld [vmem:[%s9264_s1 + $0x10] ss:$20 sps:$4 sm:$0x1f]   ;;  %v6330_v6 = vld [vmem:[%s9263_s2 + $0x514] ss:$8 sps:$4 sm:$0xff]  }
 0x2ad   :  { %4141 = vmatprep.subr.bf16.mxu1 %v6257_v15  ;;  %v6296_v15 = vld [vmem:[%s9263_s2 + $0x480] ss:$8 sps:$4 sm:$0xff]   ;;  %v6331_v7 = vld [vmem:[%s9263_s2 + $0xbd4] ss:$8 sps:$4 sm:$0xff]  }
 0x2af   :  { %3706 = vmatpush1.bf16.msra.mxu0 %v6258_v16  ;;  %v6297_v16 = vld [vmem:[%s9263_s2 + $0xb40] ss:$8 sps:$4 sm:$0xff]  }
 0x2b0   :  { %4142 = vmatpush1.bf16.msra.mxu1 %v6259_v17  ;;  %3707 = vmatprep.subr.bf16.mxu0 %v6260_v37  ;;  %v6298_v17 = vld [vmem:[%s9263_s2 + $0x494] ss:$8 sps:$4 sm:$0xff]  }
 0x2b1   :  { %4143 = vmatprep.subr.bf16.mxu1 %v6261_v38  ;;  %v6299_v37 = vld [vmem:[%s9263_s2 + $0xb54] ss:$8 sps:$4 sm:$0xff]   ;;  %v6300_v38 = vld [vmem:[%s9263_s2 + $0x490] ss:$8 sps:$4 sm:$0xff]  }
 0x2b3   :  { %3708 = vmatpush1.bf16.msra.mxu0 %v6262_v42  ;;  %v6301_v42 = vld [vmem:[%s9263_s2 + $0xb50] ss:$8 sps:$4 sm:$0xff]  }
 0x2b4   :  { %4144 = vmatpush1.bf16.msra.mxu1 %v6263_v57  ;;  %3709 = vmatprep.subr.bf16.mxu0 %v6264_v44  ;;  %v6302_v57 = vld [vmem:[%s9263_s2 + $0x4a4] ss:$8 sps:$4 sm:$0xff]  }
 0x2b5   :  { %4145 = vmatprep.subr.bf16.mxu1 %v6265_v45  ;;  %v6303_v44 = vld [vmem:[%s9263_s2 + $0xb64] ss:$8 sps:$4 sm:$0xff]   ;;  %v6304_v45 = vld [vmem:[%s9263_s2 + $0x4a0] ss:$8 sps:$4 sm:$0xff]  }
 0x2b7   :  { %3710 = vmatpush1.bf16.msra.mxu0 %v6266_v46  ;;  %v6305_v46 = vld [vmem:[%s9263_s2 + $0xb60] ss:$8 sps:$4 sm:$0xff]  }
 0x2b8   :  { %4146 = vmatpush1.bf16.msra.mxu1 %v6267_v47  ;;  %3711 = vmatprep.subr.bf16.mxu0 %v6268_v48  ;;  %v6306_v47 = vld [vmem:[%s9263_s2 + $0x4b4] ss:$8 sps:$4 sm:$0xff]  }
 0x2b9   :  { %4147 = vmatprep.subr.bf16.mxu1 %v6269_v1  ;;  %v6307_v48 = vld [vmem:[%s9263_s2 + $0xb74] ss:$8 sps:$4 sm:$0xff]   ;;  %v6308_v1 = vld [vmem:[%s9263_s2 + $0x4b0] ss:$8 sps:$4 sm:$0xff]  }
 0x2bb   :  { %3712 = vmatpush1.bf16.msra.mxu0 %v6270_v49  ;;  %v6309_v49 = vld [vmem:[%s9263_s2 + $0xb70] ss:$8 sps:$4 sm:$0xff]  }
 0x2bc   :  { %4148 = vmatpush1.bf16.msra.mxu1 %v6271_v50  ;;  %3713 = vmatprep.subr.bf16.mxu0 %v6272_v52  ;;  %v6310_v50 = vld [vmem:[%s9263_s2 + $0x4c4] ss:$8 sps:$4 sm:$0xff]  }
 0x2bd   :  { %4149 = vmatprep.subr.bf16.mxu1 %v6273_v5  ;;  %v6311_v52 = vld [vmem:[%s9263_s2 + $0xb84] ss:$8 sps:$4 sm:$0xff]   ;;  %v6312_v5 = vld [vmem:[%s9263_s2 + $0x4c0] ss:$8 sps:$4 sm:$0xff]  }
 0x2bf   :  { %3714 = vmatpush1.bf16.msra.mxu0 %v6274_v53  ;;  %v6313_v53 = vld [vmem:[%s9263_s2 + $0xb80] ss:$8 sps:$4 sm:$0xff]  }
 0x2c0   :  { %4150 = vmatpush1.bf16.msra.mxu1 %v6275_v54  ;;  %3726 = vmatprep.subr.bf16.mxu0 %v6276_v55  ;;  %v6314_v54 = vld [vmem:[%s9263_s2 + $0x4d4] ss:$8 sps:$4 sm:$0xff]  }
 0x2c1   :  { %4162 = vmatprep.subr.bf16.mxu1 %v6277_v56  ;;  %v6315_v55 = vld [vmem:[%s9263_s2 + $0xb94] ss:$8 sps:$4 sm:$0xff]   ;;  %v6316_v56 = vld [vmem:[%s9263_s2 + $0x4d0] ss:$8 sps:$4 sm:$0xff]  }
 0x2c2   :  { %3716 = vmatmul.mubr.bf16.vlgmr.msra.gmra.mrb[4].mxu0 %v8748_v10 }
 0x2c3   :  { %4152 = vmatmul.mubr.bf16.vlgmr.msra.gmra.mrb[4].mxu1 %v8748_v10  ;;  %3727 = vmatpush1.bf16.msra.mxu0 %v6279_v28  ;;  %v6317_v28 = vld [vmem:[%s9263_s2 + $0xb90] ss:$8 sps:$4 sm:$0xff]  }
 0x2c4   :  { %4163 = vmatpush1.bf16.msra.mxu1 %v6280_v58  ;;  %3728 = vmatprep.subr.bf16.mxu0 %v6281_v59  ;;  %v6318_v58 = vld [vmem:[%s9263_s2 + $0x4e4] ss:$8 sps:$4 sm:$0xff]  }
 0x2c5   :  { %4164 = vmatprep.subr.bf16.mxu1 %v6282_v60  ;;  %3758 = vmatprep.mubr.bf16.mxu0 %v6432_v14  ;;  %v6319_v59 = vld [vmem:[%s9263_s2 + $0xba4] ss:$8 sps:$4 sm:$0xff]   ;;  %v6320_v60 = vld [vmem:[%s9263_s2 + $0x4e0] ss:$8 sps:$4 sm:$0xff]  }
 0x2c6   :  { %4194 = vmatprep.mubr.bf16.mxu1 %v6432_v14 }
 0x2c7   :  { %3729 = vmatpush1.bf16.msra.mxu0 %v6283_v61  ;;  %v6321_v61 = vld [vmem:[%s9263_s2 + $0xba0] ss:$8 sps:$4 sm:$0xff]  }
 0x2c8   :  { %4165 = vmatpush1.bf16.msra.mxu1 %v6284_v62  ;;  %3730 = vmatprep.subr.bf16.mxu0 %v6285_v26  ;;  %v6322_v62 = vld [vmem:[%s9263_s2 + $0x4f4] ss:$8 sps:$4 sm:$0xff]  }
 0x2c9   :  { %4166 = vmatprep.subr.bf16.mxu1 %v6286_v63  ;;  %v6323_v26 = vld [vmem:[%s9263_s2 + $0xbb4] ss:$8 sps:$4 sm:$0xff]   ;;  %v6324_v63 = vld [vmem:[%s9263_s2 + $0x4f0] ss:$8 sps:$4 sm:$0xff]  }
 0x2cb   :  { %3731 = vmatpush1.bf16.msra.mxu0 %v6287_v2  ;;  %v6326_v2 = vld [vmem:[%s9263_s2 + $0x504] ss:$8 sps:$4 sm:$0xff]  }
 0x2cc   :  { %4167 = vmatpush1.bf16.msra.mxu1 %v6288_v3  ;;  %3732 = vmatprep.subr.bf16.mxu0 %v6289_v4  ;;  %v6327_v3 = vld [vmem:[%s9263_s2 + $0xbc4] ss:$8 sps:$4 sm:$0xff]   ;;  %v6328_v4 = vld [vmem:[%s9263_s2 + $0x500] ss:$8 sps:$4 sm:$0xff]  }
 0x2cd   :  { %4168 = vmatprep.subr.bf16.mxu1 %v6290_v32  ;;  %v6329_v32 = vld [vmem:[%s9263_s2 + $0xbc0] ss:$8 sps:$4 sm:$0xff]  }
 0x2cf   :  { %3733 = vmatpush1.bf16.msra.mxu0 %v6291_v8  ;;  %v6332_v8 = vld [vmem:[%s9263_s2 + $0x510] ss:$8 sps:$4 sm:$0xff]  }
 0x2d0   :  { %4169 = vmatpush1.bf16.msra.mxu1 %v6292_v9  ;;  %3810 = vmatprep.subr.bf16.mxu0 %v6293_v33  ;;  %v6333_v9 = vld [vmem:[%s9263_s2 + $0xbd0] ss:$8 sps:$4 sm:$0xff]   ;;  %v6334_v33 = vld [vmem:[%s9263_s2 + $0x524] ss:$8 sps:$4 sm:$0xff]  }
 0x2d1   :  { %4205 = vmatprep.subr.bf16.mxu1 %v6294_v51  ;;  %v6335_v51 = vld [vmem:[%s9263_s2 + $0xbe4] ss:$8 sps:$4 sm:$0xff]  }
 0x2d2   :  { %5201 = vmatmul.mubr.msk.bf16.vlgmr.msra.gmra.mrb[4].mxu0 %vm560_vm0, %v8807_v13 }
 0x2d3   :  { %5204 = vmatmul.mubr.msk.bf16.vlgmr.msra.gmra.mrb[4].mxu1 %vm560_vm0, %v8807_v13  ;;  %3811 = vmatpush1.bf16.msra.mxu0 %v6296_v15  ;;  %v6337_v15 = vld [vmem:[%s9263_s2 + $0xbe0] ss:$8 sps:$4 sm:$0xff]  }
 0x2d4   :  { %4206 = vmatpush1.bf16.msra.mxu1 %v6297_v16  ;;  %3812 = vmatprep.subr.bf16.mxu0 %v6298_v17  ;;  %v6338_v16 = vld [vmem:[%s9263_s2 + $0x534] ss:$8 sps:$4 sm:$0xff]  }
 0x2d5   :  { %4207 = vmatprep.subr.bf16.mxu1 %v6299_v37  ;;  %3842 = vmatprep.mubr.bf16.mxu0 %v3782_v11  ;;  %v6339_v17 = vld [vmem:[%s9263_s2 + $0xbf4] ss:$8 sps:$4 sm:$0xff]   ;;  %v6340_v37 = vld [vmem:[%s9263_s2 + $0x530] ss:$8 sps:$4 sm:$0xff]  }
 0x2d6   :  { %4237 = vmatprep.mubr.bf16.mxu1 %v3782_v11  ;;  %v6336_v11 = vld [vmem:[%s9263_s2 + $0x520] ss:$8 sps:$4 sm:$0xff]  }
 0x2d7   :  { %3813 = vmatpush1.bf16.msra.mxu0 %v6300_v38  ;;  %v6341_v38 = vld [vmem:[%s9263_s2 + $0xbf0] ss:$8 sps:$4 sm:$0xff]  }
 0x2d8   :  { %4208 = vmatpush1.bf16.msra.mxu1 %v6301_v42  ;;  %3814 = vmatprep.subr.bf16.mxu0 %v6302_v57  ;;  %v6342_v42 = vld [vmem:[%s9263_s2 + $0x544] ss:$8 sps:$4 sm:$0xff]  }
 0x2d9   :  { %4209 = vmatprep.subr.bf16.mxu1 %v6303_v44  ;;  %v6343_v57 = vld [vmem:[%s9263_s2 + $0xc04] ss:$8 sps:$4 sm:$0xff]   ;;  %v6344_v44 = vld [vmem:[%s9263_s2 + $0x540] ss:$8 sps:$4 sm:$0xff]  }
 0x2db   :  { %3815 = vmatpush1.bf16.msra.mxu0 %v6304_v45  ;;  %v6345_v45 = vld [vmem:[%s9263_s2 + $0xc00] ss:$8 sps:$4 sm:$0xff]  }
 0x2dc   :  { %4210 = vmatpush1.bf16.msra.mxu1 %v6305_v46  ;;  %3816 = vmatprep.subr.bf16.mxu0 %v6306_v47  ;;  %v6346_v46 = vld [vmem:[%s9263_s2 + $0x554] ss:$8 sps:$4 sm:$0xff]  }
 0x2dd   :  { %4211 = vmatprep.subr.bf16.mxu1 %v6307_v48  ;;  %v6347_v47 = vld [vmem:[%s9263_s2 + $0xc14] ss:$8 sps:$4 sm:$0xff]   ;;  %v3772_v48 = vshll.u32 %v8518_v12, 16 }
 0x2df   :  { %3817 = vmatpush1.bf16.msra.mxu0 %v6308_v1  ;;  %v6348_v1 = vld [vmem:[%s9263_s2 + $0x550] ss:$8 sps:$4 sm:$0xff]  }
 0x2e0   :  { %4212 = vmatpush1.bf16.msra.mxu1 %v6309_v49  ;;  %3818 = vmatprep.subr.bf16.mxu0 %v6310_v50  ;;  %v6349_v49 = vld [vmem:[%s9263_s2 + $0xc10] ss:$8 sps:$4 sm:$0xff]   ;;  %v6350_v50 = vld [vmem:[%s9263_s2 + $0x564] ss:$8 sps:$4 sm:$0xff]  }
 0x2e1   :  { %4213 = vmatprep.subr.bf16.mxu1 %v6311_v52  ;;  %v6351_v52 = vld [vmem:[%s9263_s2 + $0xc24] ss:$8 sps:$4 sm:$0xff]  }
 0x2e3   :  { %3819 = vmatpush1.bf16.msra.mxu0 %v6312_v5  ;;  %v3793_v5 = vshll.u32 %v8541_v20, 16 }
 0x2e4   :  { %4214 = vmatpush1.bf16.msra.mxu1 %v6313_v53  ;;  %3820 = vmatprep.subr.bf16.mxu0 %v6314_v54  ;;  %v3770_v53 = vshrl.u32 %v8518_v12, 16  ;;  %v3774_v54 = vrot.slane %v3772_v48, 1  ;;  %v6355_v12 = vld [vmem:[%s9263_s2 + $0xc34] ss:$8 sps:$4 sm:$0xff]   ;;  %v6383_v48 = vld [vmem:[%s9263_s2 + $0xca4] ss:$8 sps:$4 sm:$0xff]  }
 0x2e5   :  { %4215 = vmatprep.subr.bf16.mxu1 %v6315_v55  ;;  %v6352_v55 = vld [vmem:[%s9263_s2 + $0x560] ss:$8 sps:$4 sm:$0xff]  }
 0x2e7   :  { %3821 = vmatpush1.bf16.msra.mxu0 %v6316_v56  ;;  %v6353_v56 = vld [vmem:[%s9263_s2 + $0xc20] ss:$8 sps:$4 sm:$0xff]  }
 0x2e8   :  { %4216 = vmatpush1.bf16.msra.mxu1 %v6317_v28  ;;  %3822 = vmatprep.subr.bf16.mxu0 %v6318_v58  ;;  %v6354_v28 = vld [vmem:[%s9263_s2 + $0x574] ss:$8 sps:$4 sm:$0xff]   ;;  %v3791_v58 = vshrl.u32 %v8541_v20, 16  ;;  %v6359_v20 = vld [vmem:[%s9263_s2 + $0xc44] ss:$8 sps:$4 sm:$0xff]  }
 0x2e9   :  { %4217 = vmatprep.subr.bf16.mxu1 %v6319_v59  ;;  %v3795_v59 = vrot.slane %v3793_v5, 1  ;;  %v6388_v5 = vld [vmem:[%s9263_s2 + $0x5f0] ss:$8 sps:$4 sm:$0xff]  }
 0x2eb   :  { %3823 = vmatpush1.bf16.msra.mxu0 %v6320_v60  ;;  %v3775_v60 = vor.u32 %v3774_v54, %v3770_v53  ;;  %v6389_v53 = vld [vmem:[%s9263_s2 + $0xcb0] ss:$8 sps:$4 sm:$0xff]   ;;  %v6390_v54 = vld [vmem:[%s9263_s2 + $0x604] ss:$8 sps:$4 sm:$0xff]  }
 0x2ec   :  { %4218 = vmatpush1.bf16.msra.mxu1 %v6321_v61  ;;  %3824 = vmatprep.subr.bf16.mxu0 %v6322_v62  ;;  %v6356_v61 = vld [vmem:[%s9263_s2 + $0x570] ss:$8 sps:$4 sm:$0xff]  }
 0x2ed   :  { %4219 = vmatprep.subr.bf16.mxu1 %v6323_v26  ;;  %v6357_v62 = vld [vmem:[%s9263_s2 + $0xc30] ss:$8 sps:$4 sm:$0xff]   ;;  %v6358_v26 = vld [vmem:[%s9263_s2 + $0x584] ss:$8 sps:$4 sm:$0xff]  }
 0x2ef   :  { %3825 = vmatpush1.bf16.msra.mxu0 %v6324_v63  ;;  %v3796_v63 = vor.u32 %v3795_v59, %v3791_v58  ;;  %v6395_v58 = vld [vmem:[%s9263_s2 + $0xcd4] ss:$8 sps:$4 sm:$0xff]   ;;  %v6396_v59 = vld [vmem:[%s9263_s2 + $0x610] ss:$8 sps:$4 sm:$0xff]  }
 0x2f0   :  { %4220 = vmatpush1.bf16.msra.mxu1 %v6325_v0  ;;  %3826 = vmatprep.subr.bf16.mxu0 %v6326_v2  ;;  %v6360_v0 = vld [vmem:[%s9263_s2 + $0x580] ss:$8 sps:$4 sm:$0xff]  }
 0x2f1   :  { %4221 = vmatprep.subr.bf16.mxu1 %v6327_v3  ;;  %v6361_v2 = vld [vmem:[%s9263_s2 + $0xc40] ss:$8 sps:$4 sm:$0xff]   ;;  %v6362_v3 = vld [vmem:[%s9263_s2 + $0x594] ss:$8 sps:$4 sm:$0xff]  }
 0x2f3   :  { %3827 = vmatpush1.bf16.msra.mxu0 %v6328_v4  ;;  %v6363_v4 = vld [vmem:[%s9263_s2 + $0xc54] ss:$8 sps:$4 sm:$0xff]  }
 0x2f4   :  { %4222 = vmatpush1.bf16.msra.mxu1 %v6329_v32  ;;  %3828 = vmatprep.subr.bf16.mxu0 %v6330_v6  ;;  %v6364_v32 = vld [vmem:[%s9263_s2 + $0x590] ss:$8 sps:$4 sm:$0xff]  }
 0x2f5   :  { %4223 = vmatprep.subr.bf16.mxu1 %v6331_v7  ;;  %v6365_v6 = vld [vmem:[%s9263_s2 + $0xc50] ss:$8 sps:$4 sm:$0xff]   ;;  %v6366_v7 = vld [vmem:[%s9263_s2 + $0x5a4] ss:$8 sps:$4 sm:$0xff]  }
 0x2f7   :  { %3829 = vmatpush1.bf16.msra.mxu0 %v6332_v8  ;;  %v6367_v8 = vld [vmem:[%s9263_s2 + $0xc64] ss:$8 sps:$4 sm:$0xff]  }
 0x2f8   :  { %4224 = vmatpush1.bf16.msra.mxu1 %v6333_v9  ;;  %3830 = vmatprep.subr.bf16.mxu0 %v6334_v33  ;;  %v6368_v9 = vld [vmem:[%s9263_s2 + $0x5a0] ss:$8 sps:$4 sm:$0xff]  }
 0x2f9   :  { %4225 = vmatprep.subr.bf16.mxu1 %v6335_v51  ;;  %v6369_v33 = vld [vmem:[%s9263_s2 + $0xc60] ss:$8 sps:$4 sm:$0xff]   ;;  %v6370_v51 = vld [vmem:[%s9263_s2 + $0x5b4] ss:$8 sps:$4 sm:$0xff]  }
 0x2fb   :  { %3831 = vmatpush1.bf16.msra.mxu0 %v6336_v11  ;;  %v6371_v11 = vld [vmem:[%s9263_s2 + $0xc74] ss:$8 sps:$4 sm:$0xff]  }
 0x2fc   :  { %4226 = vmatpush1.bf16.msra.mxu1 %v6337_v15  ;;  %3832 = vmatprep.subr.bf16.mxu0 %v6338_v16  ;;  %v6372_v15 = vld [vmem:[%s9263_s2 + $0x5b0] ss:$8 sps:$4 sm:$0xff]  }
 0x2fd   :  { %4227 = vmatprep.subr.bf16.mxu1 %v6339_v17  ;;  %v6373_v16 = vld [vmem:[%s9263_s2 + $0xc70] ss:$8 sps:$4 sm:$0xff]   ;;  %v6374_v17 = vld [vmem:[%s9263_s2 + $0x5c4] ss:$8 sps:$4 sm:$0xff]  }
 0x2ff   :  { %3833 = vmatpush1.bf16.msra.mxu0 %v6340_v37  ;;  %v6375_v37 = vld [vmem:[%s9263_s2 + $0xc84] ss:$8 sps:$4 sm:$0xff]  }
 0x300   :  { %4228 = vmatpush1.bf16.msra.mxu1 %v6341_v38  ;;  %3834 = vmatprep.subr.bf16.mxu0 %v6342_v42  ;;  %v6376_v38 = vld [vmem:[%s9263_s2 + $0x5c0] ss:$8 sps:$4 sm:$0xff]  }
 0x301   :  { %4229 = vmatprep.subr.bf16.mxu1 %v6343_v57  ;;  %v6377_v42 = vld [vmem:[%s9263_s2 + $0xc80] ss:$8 sps:$4 sm:$0xff]   ;;  %v6378_v57 = vld [vmem:[%s9263_s2 + $0x5d4] ss:$8 sps:$4 sm:$0xff]  }
 0x303   :  { %3835 = vmatpush1.bf16.msra.mxu0 %v6344_v44  ;;  %v6379_v44 = vld [vmem:[%s9263_s2 + $0xc94] ss:$8 sps:$4 sm:$0xff]  }
 0x304   :  { %4230 = vmatpush1.bf16.msra.mxu1 %v6345_v45  ;;  %3836 = vmatprep.subr.bf16.mxu0 %v6346_v46  ;;  %v6380_v45 = vld [vmem:[%s9263_s2 + $0x5d0] ss:$8 sps:$4 sm:$0xff]  }
 0x305   :  { %4231 = vmatprep.subr.bf16.mxu1 %v6347_v47  ;;  %v6381_v46 = vld [vmem:[%s9263_s2 + $0xc90] ss:$8 sps:$4 sm:$0xff]   ;;  %v6382_v47 = vld [vmem:[%s9263_s2 + $0x5e4] ss:$8 sps:$4 sm:$0xff]  }
 0x307   :  { %3837 = vmatpush1.bf16.msra.mxu0 %v6348_v1  ;;  %v6384_v1 = vld [vmem:[%s9263_s2 + $0x5e0] ss:$8 sps:$4 sm:$0xff]  }
 0x308   :  { %4232 = vmatpush1.bf16.msra.mxu1 %v6349_v49  ;;  %3838 = vmatprep.subr.bf16.mxu0 %v6350_v50  ;;  %v6385_v49 = vld [vmem:[%s9263_s2 + $0xca0] ss:$8 sps:$4 sm:$0xff]   ;;  %v6386_v50 = vld [vmem:[%s9263_s2 + $0x5f4] ss:$8 sps:$4 sm:$0xff]  }
 0x309   :  { %4233 = vmatprep.subr.bf16.mxu1 %v6351_v52  ;;  %v6387_v52 = vld [vmem:[%s9263_s2 + $0xcb4] ss:$8 sps:$4 sm:$0xff]  }
 0x30b   :  { %3839 = vmatpush1.bf16.msra.mxu0 %v6352_v55  ;;  %v6391_v55 = vld [vmem:[%s9263_s2 + $0xcc4] ss:$8 sps:$4 sm:$0xff]  }
 0x30c   :  { %4234 = vmatpush1.bf16.msra.mxu1 %v6353_v56  ;;  %3840 = vmatprep.subr.bf16.mxu0 %v6354_v28  ;;  %v6392_v56 = vld [vmem:[%s9263_s2 + $0x600] ss:$8 sps:$4 sm:$0xff]  }
 0x30d   :  { %4235 = vmatprep.subr.bf16.mxu1 %v6355_v12  ;;  %v6393_v28 = vld [vmem:[%s9263_s2 + $0xcc0] ss:$8 sps:$4 sm:$0xff]   ;;  %v6394_v12 = vld [vmem:[%s9263_s2 + $0x614] ss:$8 sps:$4 sm:$0xff]  }
 0x30f   :  { %3841 = vmatpush1.bf16.msra.mxu0 %v6356_v61  ;;  %v6398_v61 = vld [vmem:[%s9263_s2 + $0x624] ss:$8 sps:$4 sm:$0xff]  }
 0x310   :  { %4236 = vmatpush1.bf16.msra.mxu1 %v6357_v62  ;;  %3853 = vmatprep.subr.bf16.mxu0 %v6358_v26  ;;  %v6399_v62 = vld [vmem:[%s9263_s2 + $0xce4] ss:$8 sps:$4 sm:$0xff]   ;;  %v6400_v26 = vld [vmem:[%s9263_s2 + $0x620] ss:$8 sps:$4 sm:$0xff]  }
 0x311   :  { %4248 = vmatprep.subr.bf16.mxu1 %v6359_v20  ;;  %v6401_v20 = vld [vmem:[%s9263_s2 + $0xce0] ss:$8 sps:$4 sm:$0xff]  }
 0x312   :  { %3843 = vmatmul.mubr.bf16.vlgmr.msra.gmra.mrb[4].mxu0 %v3775_v60 }
 0x313   :  { %4238 = vmatmul.mubr.bf16.vlgmr.msra.gmra.mrb[4].mxu1 %v3775_v60  ;;  %3854 = vmatpush1.bf16.msra.mxu0 %v6360_v0  ;;  %v6397_v60 = vld [vmem:[%s9263_s2 + $0xcd0] ss:$8 sps:$4 sm:$0xff]   ;;  %v6403_v0 = vld [vmem:[%s9263_s2 + $0xcf4] ss:$8 sps:$4 sm:$0xff]  }
 0x314   :  { %4249 = vmatpush1.bf16.msra.mxu1 %v6361_v2  ;;  %3855 = vmatprep.subr.bf16.mxu0 %v6362_v3  ;;  %v6404_v2 = vld [vmem:[%s9263_s2 + $0x630] ss:$8 sps:$4 sm:$0xff]  }
 0x315   :  { %4250 = vmatprep.subr.bf16.mxu1 %v6363_v4  ;;  %3885 = vmatprep.mubr.bf16.mxu0 %v3796_v63  ;;  %v6405_v3 = vld [vmem:[%s9263_s2 + $0xcf0] ss:$8 sps:$4 sm:$0xff]   ;;  %v6406_v4 = vld [vmem:[%s9263_s2 + $0x644] ss:$8 sps:$4 sm:$0xff]  }
 0x316   :  { %4280 = vmatprep.mubr.bf16.mxu1 %v3796_v63  ;;  %v6402_v63 = vld [vmem:[%s9263_s2 + $0x634] ss:$8 sps:$4 sm:$0xff]  }
 0x317   :  { %3856 = vmatpush1.bf16.msra.mxu0 %v6364_v32  ;;  %v6407_v32 = vld [vmem:[%s9263_s2 + $0xd04] ss:$8 sps:$4 sm:$0xff]  }
 0x318   :  { %4251 = vmatpush1.bf16.msra.mxu1 %v6365_v6  ;;  %3857 = vmatprep.subr.bf16.mxu0 %v6366_v7  ;;  %v6408_v6 = vld [vmem:[%s9263_s2 + $0x640] ss:$8 sps:$4 sm:$0xff]  }
 0x319   :  { %4252 = vmatprep.subr.bf16.mxu1 %v6367_v8  ;;  %v6409_v7 = vld [vmem:[%s9263_s2 + $0xd00] ss:$8 sps:$4 sm:$0xff]   ;;  %v6410_v8 = vld [vmem:[%s9263_s2 + $0x654] ss:$8 sps:$4 sm:$0xff]  }
 0x31b   :  { %3858 = vmatpush1.bf16.msra.mxu0 %v6368_v9  ;;  %v6411_v9 = vld [vmem:[%s9263_s2 + $0xd14] ss:$8 sps:$4 sm:$0xff]  }
 0x31c   :  { %4253 = vmatpush1.bf16.msra.mxu1 %v6369_v33  ;;  %3859 = vmatprep.subr.bf16.mxu0 %v6370_v51  ;;  %v3786_v33 = vshll.u32 %v8748_v10, 16  ;;  %v6412_v51 = vld [vmem:[%s9263_s2 + $0x650] ss:$8 sps:$4 sm:$0xff]  }
 0x31d   :  { %4254 = vmatprep.subr.bf16.mxu1 %v6371_v11  ;;  %v6413_v11 = vld [vmem:[%s9263_s2 + $0xd10] ss:$8 sps:$4 sm:$0xff]  }
 0x31f   :  { %3860 = vmatpush1.bf16.msra.mxu0 %v6372_v15  ;;  %v6414_v15 = vld [vmem:[%s9263_s2 + $0x664] ss:$8 sps:$4 sm:$0xff]  }
 0x320   :  { %4255 = vmatpush1.bf16.msra.mxu1 %v6373_v16  ;;  %3861 = vmatprep.subr.bf16.mxu0 %v6374_v17  ;;  %v6415_v16 = vld [vmem:[%s9263_s2 + $0xd24] ss:$8 sps:$4 sm:$0xff]   ;;  %v3784_v17 = vshrl.u32 %v8748_v10, 16  ;;  %v6419_v10 = vld [vmem:[%s9263_s2 + $0xd34] ss:$8 sps:$4 sm:$0xff]  }
 0x321   :  { %4256 = vmatprep.subr.bf16.mxu1 %v6375_v37  ;;  %v3788_v37 = vrot.slane %v3786_v33, 1 }
 0x323   :  { %3862 = vmatpush1.bf16.msra.mxu0 %v6376_v38  ;;  %v6416_v38 = vld [vmem:[%s9263_s2 + $0x660] ss:$8 sps:$4 sm:$0xff]  }
 0x324   :  { %4257 = vmatpush1.bf16.msra.mxu1 %v6377_v42  ;;  %3863 = vmatprep.subr.bf16.mxu0 %v6378_v57  ;;  %v6417_v42 = vld [vmem:[%s9263_s2 + $0xd20] ss:$8 sps:$4 sm:$0xff]   ;;  %v6418_v57 = vld [vmem:[%s9263_s2 + $0x674] ss:$8 sps:$4 sm:$0xff]  }
 0x325   :  { %4258 = vmatprep.subr.bf16.mxu1 %v6379_v44  ;;  %v3789_v44 = vor.u32 %v3788_v37, %v3784_v17 }
 0x327   :  { %3864 = vmatpush1.bf16.msra.mxu0 %v6380_v45  ;;  %v6420_v45 = vld [vmem:[%s9263_s2 + $0x670] ss:$8 sps:$4 sm:$0xff]  }
 0x328   :  { %4259 = vmatpush1.bf16.msra.mxu1 %v6381_v46  ;;  %3865 = vmatprep.subr.bf16.mxu0 %v6382_v47  ;;  %v6421_v46 = vld [vmem:[%s9263_s2 + $0xd30] ss:$8 sps:$4 sm:$0xff]   ;;  %v6422_v47 = vld [vmem:[%s9263_s2 + $0x684] ss:$8 sps:$4 sm:$0xff]  }
 0x329   :  { %4260 = vmatprep.subr.bf16.mxu1 %v6383_v48  ;;  %v6423_v48 = vld [vmem:[%s9263_s2 + $0xd44] ss:$8 sps:$4 sm:$0xff]  }
 0x32b   :  { %3866 = vmatpush1.bf16.msra.mxu0 %v6384_v1  ;;  %v6424_v1 = vld [vmem:[%s9263_s2 + $0x680] ss:$8 sps:$4 sm:$0xff]  }
 0x32c   :  { %4261 = vmatpush1.bf16.msra.mxu1 %v6385_v49  ;;  %3867 = vmatprep.subr.bf16.mxu0 %v6386_v50  ;;  %v6425_v49 = vld [vmem:[%s9263_s2 + $0xd40] ss:$8 sps:$4 sm:$0xff]   ;;  %v6426_v50 = vld [vmem:[%s9263_s2 + $0x694] ss:$8 sps:$4 sm:$0xff]  }
 0x32d   :  { %4262 = vmatprep.subr.bf16.mxu1 %v6387_v52  ;;  %v6427_v52 = vld [vmem:[%s9263_s2 + $0xd54] ss:$8 sps:$4 sm:$0xff]  }
 0x32f   :  { %3868 = vmatpush1.bf16.msra.mxu0 %v6388_v5  ;;  %v3799_v5 = vshll.u32 %v8807_v13, 16 }
 0x330   :  { %4263 = vmatpush1.bf16.msra.mxu1 %v6389_v53  ;;  %3869 = vmatprep.subr.bf16.mxu0 %v6390_v54  ;;  %v6428_v53 = vld [vmem:[%s9263_s2 + $0x690] ss:$8 sps:$4 sm:$0xff]  }
 0x331   :  { %4264 = vmatprep.subr.bf16.mxu1 %v6391_v55  ;;  %v6429_v54 = vld [vmem:[%s9263_s2 + $0xd50] ss:$8 sps:$4 sm:$0xff]   ;;  %v6430_v55 = vld [vmem:[%s9263_s2 + $0x6a4] ss:$8 sps:$4 sm:$0xff]  }
 0x333   :  { %3870 = vmatpush1.bf16.msra.mxu0 %v6392_v56  ;;  %v3797_v56 = vshrl.u32 %v8807_v13, 16 }
 0x334   :  { %4265 = vmatpush1.bf16.msra.mxu1 %v6393_v28  ;;  %3871 = vmatprep.subr.bf16.mxu0 %v6394_v12  ;;  %v3801_v28 = vrot.slane %v3799_v5, 1 }
 0x335   :  { %4266 = vmatprep.subr.bf16.mxu1 %v6395_v58  ;;  %v4344_v58 = vlaneseq }
 0x336   :  { %v3802_v12 = vor.u32 %v3801_v28, %v3797_v56 }
 0x337   :  { %3872 = vmatpush1.bf16.msra.mxu0 %v6396_v59  ;;  %v4345_v13 = vshrl.u32 %v4344_v58, 7 }
 0x338   :  { %4267 = vmatpush1.bf16.msra.mxu1 %v6397_v60  ;;  %3873 = vmatprep.subr.bf16.mxu0 %v6398_v61 }
 0x339   :  { %4268 = vmatprep.subr.bf16.mxu1 %v6399_v62  ;;  %v4346_v59 = vsub.s32 0, %v4345_v13 }
 0x33b   :  { %3874 = vmatpush1.bf16.msra.mxu0 %v6400_v26 }
 0x33c   :  { %4269 = vmatpush1.bf16.msra.mxu1 %v6401_v20  ;;  %3875 = vmatprep.subr.bf16.mxu0 %v6402_v63 }
 0x33d   :  { %4270 = vmatprep.subr.bf16.mxu1 %v6403_v0 }
 0x33f   :  { %3876 = vmatpush1.bf16.msra.mxu0 %v6404_v2 }
 0x340   :  { %4271 = vmatpush1.bf16.msra.mxu1 %v6405_v3  ;;  %3877 = vmatprep.subr.bf16.mxu0 %v6406_v4 }
 0x341   :  { %4272 = vmatprep.subr.bf16.mxu1 %v6407_v32 }
 0x343   :  { %3878 = vmatpush1.bf16.msra.mxu0 %v6408_v6 }
 0x344   :  { %4273 = vmatpush1.bf16.msra.mxu1 %v6409_v7  ;;  %3879 = vmatprep.subr.bf16.mxu0 %v6410_v8 }
 0x345   :  { %4274 = vmatprep.subr.bf16.mxu1 %v6411_v9 }
 0x347   :  { %3880 = vmatpush1.bf16.msra.mxu0 %v6412_v51 }
 0x348   :  { %4275 = vmatpush1.bf16.msra.mxu1 %v6413_v11  ;;  %3881 = vmatprep.subr.bf16.mxu0 %v6414_v15 }
 0x349   :  { %4276 = vmatprep.subr.bf16.mxu1 %v6415_v16 }
 0x34b   :  { %3882 = vmatpush1.bf16.msra.mxu0 %v6416_v38 }
 0x34c   :  { %4277 = vmatpush1.bf16.msra.mxu1 %v6417_v42  ;;  %3883 = vmatprep.subr.bf16.mxu0 %v6418_v57 }
 0x34d   :  { %4278 = vmatprep.subr.bf16.mxu1 %v6419_v10 }
 0x34f   :  { %3884 = vmatpush1.bf16.msra.mxu0 %v6420_v45 }
 0x350   :  { %4279 = vmatpush1.bf16.msra.mxu1 %v6421_v46  ;;  %3896 = vmatprep.subr.bf16.mxu0 %v6422_v47 }
 0x351   :  { %4291 = vmatprep.subr.bf16.mxu1 %v6423_v48 }
 0x352   :  { %3886 = vmatmul.mubr.bf16.vlgmr.msra.gmra.mrb[4].mxu0 %v3789_v44 }
 0x353   :  { %4281 = vmatmul.mubr.bf16.vlgmr.msra.gmra.mrb[4].mxu1 %v3789_v44  ;;  %3897 = vmatpush1.bf16.msra.mxu0 %v6424_v1 }
 0x354   :  { %4292 = vmatpush1.bf16.msra.mxu1 %v6425_v49  ;;  %3898 = vmatprep.subr.bf16.mxu0 %v6426_v50 }
 0x355   :  { %4293 = vmatprep.subr.bf16.mxu1 %v6427_v52  ;;  %3928 = vmatprep.mubr.bf16.mxu0 %v6432_v14 }
 0x356   :  { %4323 = vmatprep.mubr.bf16.mxu1 %v6432_v14  ;;  %v6431_v14 = vld [vmem:[%s9263_s2 + $0xd64] ss:$8 sps:$4 sm:$0xff]  }
 0x357   :  { %3899 = vmatpush1.bf16.msra.mxu0 %v6428_v53 }
 0x358   :  { %4294 = vmatpush1.bf16.msra.mxu1 %v6429_v54  ;;  %3900 = vmatprep.subr.bf16.mxu0 %v6430_v55 }
 0x359   :  { %4295 = vmatprep.subr.bf16.mxu1 %v6431_v14 }
 0x35b   :  { %3901 = vmatpush1.bf16.msra.mxu0 %v7824_v21  ;;  %v4342_v21 = vld [vmem:[%s9266_s3] sm:$0x3] }
 0x35c   :  { %4296 = vmatpush1.bf16.msra.mxu1 %v7829_v22  ;;  %3902 = vmatprep.subr.bf16.mxu0 %v7834_v23  ;;  %v4350_v22 = vsub.s32 1, %v4345_v13 }
 0x35d   :  { %4297 = vmatprep.subr.bf16.mxu1 %v7839_v24 }
 0x35e   :  { %v4351_v26 = vrot.slane %v4342_v21, %v4350_v22 }
 0x35f   :  { %3903 = vmatpush1.bf16.msra.mxu0 %v7847_v29  ;;  %v4347_v29 = vrot.slane %v4342_v21, %v4346_v59 }
 0x360   :  { %4298 = vmatpush1.bf16.msra.mxu1 %v7852_v30 }
 0x362   :  { %5202 = vmatmul.mubr.msk.bf16.vlgmr.msra.gmra.mrb[4].mxu0 %vm560_vm0, %v3802_v12 }
 0x363   :  { %5205 = vmatmul.mubr.msk.bf16.vlgmr.msra.gmra.mrb[4].mxu1 %vm560_vm0, %v3802_v12 }
 0x435   :  { %v3930_v23 = vpop.f32.mrb[4].mxu0 }
 0x436   :  { %v4325_v60 = vpop.f32.mrb[4].mxu1  ;;  %v3943_v24 = vmax.f32 %v3507_v25, %v3930_v23  ;;  %v3932_v30 = vpop.f32.mrb[5].mxu0 }
 0x437   :  { %v4327_v61 = vpop.f32.mrb[5].mxu1  ;;  %v3944_v62 = vmax.f32 %v3508_v34, %v3932_v30  ;;  %v3934_v20 = vpop.f32.mrb[6].mxu0 }
 0x438   :  { %v4329_v63 = vpop.f32.mrb[6].mxu1  ;;  %v4338_v0 = vmax.f32 %v3943_v24, %v4325_v60  ;;  %v3945_v2 = vmax.f32 %v3509_v39, %v3934_v20  ;;  %v3936_v3 = vpop.f32.mrb[7].mxu0 }
 0x439   :  { %v4331_v4 = vpop.f32.mrb[7].mxu1  ;;  %v4339_v32 = vmax.f32 %v3944_v62, %v4327_v61  ;;  %v3946_v18 = vmax.f32 %v3510_v43, %v3936_v3  ;;  %v4385_v43 = vld [vmem:[%s9267_s4 + $0x8] sm:$0x11] }
 0x43a   :  { %v4354_v19 = vadd.f32 %v4347_v29, %v4338_v0  ;;  %v4340_v25 = vmax.f32 %v3945_v2, %v4329_v63 }
 0x43b   :  { %v4355_v27 = vadd.f32 %v4351_v26, %v4339_v32  ;;  %v4341_v31 = vmax.f32 %v3946_v18, %v4331_v4 }
 0x43c   :  { %v4358_v34 = vmax.f32 %v4354_v19, 0.0  ;;  %v4356_v35 = vadd.f32 %v4347_v29, %v4340_v25 }
 0x43d   :  { %v4359_v36 = vmax.f32 %v4355_v27, 0.0  ;;  %v4357_v39 = vadd.f32 %v4351_v26, %v4341_v31 }
 0x43e   :  { %v4360_v6 = vmax.f32 %v4356_v35, 0.0 }
 0x43f   :  { %v5208_v40 = vpack.c.bf16 %v4359_v36, %v4358_v34  ;;  %v4361_v41 = vmax.f32 %v4357_v39, 0.0 }
 0x441   :  { %4377 = vst.msk [vmem:[%s9267_s4] sm:$0xff] %vm4376_vm9, %v5208_v40  ;;  %v5209_v7 = vpack.c.bf16 %v4361_v41, %v4360_v6 }
 0x443   :  { %v4386_v8 = vsel %vm4384_vm10, %v5209_v7, %v4385_v43 }
 0x444   :  { %4387 = vst [vmem:[%s9267_s4 + $0x8] sm:$0x11] %v4386_v8 }

</bundles_post_ra>
